<compile_context>
chip_gen: v5e
topology: v5e:2x2
jax: 0.10.0
libtpu: 0.0.40
codegen_flags: <defaults>
</compile_context>

<pallas_src>
import jax
import jax.numpy as jnp
import numpy as np
from jax.experimental import pallas as pl
from jax.experimental.pallas import tpu as pltpu

# ---- small, module-consistent hyper-parameters --------------------------------
VOCAB = 256
EMBED = 128
HEADS = 4
HEAD_DIM = EMBED // HEADS
FF = 256
LAYERS = 2          # ModuleList repeats the SAME layer object -> shared weights
BATCH = 8
SEQ = 8
EPS = 1e-5

ROWS = SEQ * BATCH  # flattened (time-major) rows handled by the single invocation


# ---- fused megakernel: LAYERS x (self-attn + LN + FFN + LN) + fc_out -----------
def megakernel(x_ref, wqkv_ref, wcat_ref, w2_ref, bias_ref, ln_ref, o_ref):
    # wqkv_ref: (E, 3E) bf16        = [wq | wk | wv]
    # wcat_ref: (E, E+FF+V) bf16    = [wo | w1 | fc_w]
    # w2_ref:   (FF, E) bf16
    # bias_ref: (1, 5E+FF+V) f32    = [bq|bk|bv | bo | b1 | b2 | fc_b]
    # ln_ref:   (4, E) f32          = [g1 ; be1 ; g3 ; be3]
    scale = jnp.float32(1.0 / np.sqrt(HEAD_DIM))

    # static bias slices (all offsets multiples of 128 lanes)
    bqkv = bias_ref[:, 0:3 * EMBED]
    bo = bias_ref[:, 3 * EMBED:4 * EMBED]
    b1 = bias_ref[:, 4 * EMBED:4 * EMBED + FF]
    b2 = bias_ref[:, 4 * EMBED + FF:5 * EMBED + FF]
    fcb = bias_ref[:, 5 * EMBED + FF:]

    g1 = ln_ref[0:1, :]
    be1 = ln_ref[1:2, :]
    g3 = ln_ref[2:3, :]
    be3 = ln_ref[3:4, :]

    def layernorm(xv, g, b):                      # f32 throughout
        mu = jnp.mean(xv, axis=-1, keepdims=True)
        xc = xv - mu
        var = jnp.mean(xc * xc, axis=-1, keepdims=True)
        return xc * jax.lax.rsqrt(var + EPS) * g + b

    x = x_ref[...]                                # (ROWS, E) f32, time-major rows

    for _ in range(LAYERS):                       # shared weights across layers
        xb = x.astype(jnp.bfloat16)

        # ---- fused QKV projection over all rows (bf16 MXU, f32 acc) ------------
        qkv = jnp.dot(xb, wqkv_ref[...], preferred_element_type=jnp.float32) + bqkv

        # ---- per-head attention over the B axis (torch "batch_size=S" quirk).
        # Each head's output is folded straight into the out-projection via the
        # matching 32-row slice of wo and accumulated in f32: no scratch buffer,
        # no concatenate, no lane-masked stores.
        attn_o = jnp.zeros((ROWS, EMBED), jnp.float32)
        for h in range(HEADS):                    # static unroll (H = 4)
            lo = h * HEAD_DIM
            qh = qkv[:, lo:lo + HEAD_DIM].reshape(SEQ, BATCH, HEAD_DIM).astype(jnp.bfloat16)
            kh = qkv[:, EMBED + lo:EMBED + lo + HEAD_DIM].reshape(SEQ, BATCH, HEAD_DIM).astype(jnp.bfloat16)
            vh = qkv[:, 2 * EMBED + lo:2 * EMBED + lo + HEAD_DIM].reshape(SEQ, BATCH, HEAD_DIM).astype(jnp.bfloat16)
            s = jnp.einsum("sbd,scd->sbc", qh, kh,
                           preferred_element_type=jnp.float32) * scale      # (S,B,B)
            s = s - jnp.max(s, axis=-1, keepdims=True)
            p = jnp.exp(s)
            p = p * pl.reciprocal(jnp.sum(p, axis=-1, keepdims=True), approx=True)
            oh = jnp.einsum("sbc,scd->sbd", p.astype(jnp.bfloat16), vh,
                            preferred_element_type=jnp.float32)             # (S,B,Dh)
            attn_o = attn_o + jnp.dot(
                oh.reshape(ROWS, HEAD_DIM).astype(jnp.bfloat16),
                wcat_ref[lo:lo + HEAD_DIM, 0:EMBED],                        # wo row-slice
                preferred_element_type=jnp.float32)
        attn_o = attn_o + bo

        x1 = layernorm(x + attn_o, g1, be1)       # norm1 (cross-attn / norm2 skipped)

        # ---- feed-forward -------------------------------------------------------
        h1 = jnp.maximum(
            jnp.dot(x1.astype(jnp.bfloat16), wcat_ref[:, EMBED:EMBED + FF],
                    preferred_element_type=jnp.float32) + b1, 0.0)
        ff = jnp.dot(h1.astype(jnp.bfloat16), w2_ref[...],
                     preferred_element_type=jnp.float32) + b2
        x = layernorm(x1 + ff, g3, be3)           # norm3

    # ---- fused fc_out: lane-dense (ROWS, VOCAB) output (fc_w slice read only here)
    o_ref[...] = jnp.dot(x.astype(jnp.bfloat16), wcat_ref[:, EMBED + FF:],
                         preferred_element_type=jnp.float32) + fcb


def decoder_pallas(x_flat, kp):
    """x_flat: (S*B, E) f32 time-major activations -> (S*B, VOCAB) f32 logits."""
    assert x_flat.shape == (ROWS, EMBED)
    vmem = pl.BlockSpec(memory_space=pltpu.MemorySpace.VMEM)
    return pl.pallas_call(
        megakernel,
        out_shape=jax.ShapeDtypeStruct((ROWS, VOCAB), jnp.float32),
        in_specs=[vmem] * 6,
        out_specs=vmem,
    )(x_flat, kp["wqkv"], kp["wcat"], kp["w2"], kp["bias"], kp["ln"])


# ---- full forward ---------------------------------------------------------------
def transformer_decoder_only(tokens, kernel_params):
    # TODO(synk): embedding gather + positional add stay in plain JAX glue
    # (a scalar-prefetch DMA-gather kernel is overkill at this size).
    emb = jnp.take(kernel_params["embedding"], tokens, axis=0)     # (B, S, E)
    x = emb + kernel_params["pos"][:, :tokens.shape[1], :]
    # dropout: identity at inference
    x = jnp.transpose(x, (1, 0, 2))                                # (S, B, E) time-major
    flat = decoder_pallas(x.reshape(ROWS, EMBED), kernel_params)   # (S*B, V)
    return flat.reshape(SEQ, BATCH, VOCAB).transpose(1, 0, 2)      # (B, S, V)


# ---- pure-JAX reference (mirrors the PyTorch forward exactly, f32) --------------
def _ref_mha(x, lp):
    bs = x.shape[0]                                                # = S (torch quirk)
    Q = x @ lp["wq"] + lp["bq"][0]
    K = x @ lp["wk"] + lp["bk"][0]
    V = x @ lp["wv"] + lp["bv"][0]
    def split(t):
        return t.reshape(bs, -1, HEADS, HEAD_DIM).transpose(0, 2, 1, 3)
    Q, K, V = split(Q), split(K), split(V)
    scores = jnp.einsum("shqd,shkd->shqk", Q, K) / jnp.sqrt(jnp.float32(HEAD_DIM))
    attn = jax.nn.softmax(scores, axis=-1)
    out = jnp.einsum("shqk,shkd->shqd", attn, V)
    out = out.transpose(0, 2, 1, 3).reshape(bs, -1, EMBED)
    return out @ lp["wo"] + lp["bo"][0]


def _ref_layer(x, lp):
    x = x + _ref_mha(x, lp)
    mu = x.mean(-1, keepdims=True); var = ((x - mu) ** 2).mean(-1, keepdims=True)
    x = (x - mu) * jax.lax.rsqrt(var + EPS) * lp["g1"][0] + lp["be1"][0]
    ff = jnp.maximum(x @ lp["w1"] + lp["b1"][0], 0.0) @ lp["w2"] + lp["b2"][0]
    x = x + ff
    mu = x.mean(-1, keepdims=True); var = ((x - mu) ** 2).mean(-1, keepdims=True)
    x = (x - mu) * jax.lax.rsqrt(var + EPS) * lp["g3"][0] + lp["be3"][0]
    return x


def ref_forward(tokens, params):
    emb = jnp.take(params["embedding"], tokens, axis=0)
    x = emb + params["pos"][:, :tokens.shape[1], :]
    x = jnp.transpose(x, (1, 0, 2))
    for _ in range(LAYERS):
        x = _ref_layer(x, params["layer"])
    x = jnp.transpose(x, (1, 0, 2))
    return x @ params["fc_w"] + params["fc_b"][0]


# ---- deterministic parameter init ----------------------------------------------
def init_params(key):
    ks = jax.random.split(key, 16)
    n = lambda k, shape, s=0.02: (s * jax.random.normal(k, shape)).astype(jnp.float32)
    layer = dict(
        wq=n(ks[0], (EMBED, EMBED)), bq=jnp.zeros((1, EMBED), jnp.float32),
        wk=n(ks[1], (EMBED, EMBED)), bk=jnp.zeros((1, EMBED), jnp.float32),
        wv=n(ks[2], (EMBED, EMBED)), bv=jnp.zeros((1, EMBED), jnp.float32),
        wo=n(ks[3], (EMBED, EMBED)), bo=jnp.zeros((1, EMBED), jnp.float32),
        w1=n(ks[4], (EMBED, FF)),    b1=jnp.zeros((1, FF), jnp.float32),
        w2=n(ks[5], (FF, EMBED)),    b2=jnp.zeros((1, EMBED), jnp.float32),
        g1=jnp.ones((1, EMBED), jnp.float32), be1=jnp.zeros((1, EMBED), jnp.float32),
        g3=jnp.ones((1, EMBED), jnp.float32), be3=jnp.zeros((1, EMBED), jnp.float32),
    )
    return dict(
        embedding=n(ks[6], (VOCAB, EMBED), 1.0),
        pos=n(ks[7], (1, 512, EMBED), 0.02),
        layer=layer,
        fc_w=n(ks[8], (EMBED, VOCAB)),
        fc_b=jnp.zeros((1, VOCAB), jnp.float32),
    )


def pack_for_kernel(params):
    """Pack the 16 per-layer tensors into a few slabs; matmul weights pre-cast to bf16."""
    lp = params["layer"]
    bf = lambda a: a.astype(jnp.bfloat16)
    return dict(
        embedding=params["embedding"],
        pos=params["pos"],
        # (E, 3E) bf16 : wq | wk | wv
        wqkv=bf(jnp.concatenate([lp["wq"], lp["wk"], lp["wv"]], axis=1)),
        # (E, E+FF+V) bf16 : wo | w1 | fc_w
        wcat=bf(jnp.concatenate([lp["wo"], lp["w1"], params["fc_w"]], axis=1)),
        # (FF, E) bf16
        w2=bf(lp["w2"]),
        # (1, 5E+FF+V) f32 : bq|bk|bv | bo | b1 | b2 | fc_b
        bias=jnp.concatenate([lp["bq"], lp["bk"], lp["bv"], lp["bo"],
                              lp["b1"], lp["b2"], params["fc_b"]], axis=1),
        # (4, E) f32 : g1 ; be1 ; g3 ; be3
        ln=jnp.concatenate([lp["g1"], lp["be1"], lp["g3"], lp["be3"]], axis=0),
    )


if __name__ == "__main__":
    key = jax.random.PRNGKey(0)
    pkey, tkey = jax.random.split(key)
    params = init_params(pkey)
    kparams = pack_for_kernel(params)
    tokens = jax.random.randint(tkey, (BATCH, SEQ), 0, VOCAB, dtype=jnp.int32)

    out = jax.jit(transformer_decoder_only)(tokens, kparams)
    out = jax.block_until_ready(out)

    ref = jax.block_until_ready(ref_forward(tokens, params))
    np.testing.assert_allclose(np.asarray(out), np.asarray(ref), rtol=5e-2, atol=5e-2)

    assert out.shape == (BATCH, SEQ, VOCAB)
    print("KERNEL_OK")
</pallas_src>

<mosaic_0001>
module attributes {stable_mosaic.version = 11 : i64} {
  func.func @megakernel(%arg0: memref<64x128xf32, #tpu.memory_space<vmem>>, %arg1: memref<128x384xbf16, #tpu.memory_space<vmem>>, %arg2: memref<128x640xbf16, #tpu.memory_space<vmem>>, %arg3: memref<256x128xbf16, #tpu.memory_space<vmem>>, %arg4: memref<1x1152xf32, #tpu.memory_space<vmem>>, %arg5: memref<4x128xf32, #tpu.memory_space<vmem>>, %arg6: memref<64x256xf32, #tpu.memory_space<vmem>>) attributes {dimension_semantics = [], scalar_prefetch = 0 : i64, scratch_operands = 0 : i64, tpu.core_type = #tpu.core_type<tc>} {
    %c0 = arith.constant 0 : index
    %c0_0 = arith.constant 0 : index
    %0 = vector.load %arg4[%c0, %c0_0] : memref<1x1152xf32, #tpu.memory_space<vmem>>, vector<1x384xf32>
    %c0_1 = arith.constant 0 : index
    %c384 = arith.constant 384 : index
    %1 = vector.load %arg4[%c0_1, %c384] : memref<1x1152xf32, #tpu.memory_space<vmem>>, vector<1x128xf32>
    %c0_2 = arith.constant 0 : index
    %c512 = arith.constant 512 : index
    %2 = vector.load %arg4[%c0_2, %c512] : memref<1x1152xf32, #tpu.memory_space<vmem>>, vector<1x256xf32>
    %c0_3 = arith.constant 0 : index
    %c768 = arith.constant 768 : index
    %3 = vector.load %arg4[%c0_3, %c768] : memref<1x1152xf32, #tpu.memory_space<vmem>>, vector<1x128xf32>
    %c0_4 = arith.constant 0 : index
    %c896 = arith.constant 896 : index
    %4 = vector.load %arg4[%c0_4, %c896] : memref<1x1152xf32, #tpu.memory_space<vmem>>, vector<1x256xf32>
    %c0_5 = arith.constant 0 : index
    %c0_6 = arith.constant 0 : index
    %5 = vector.load %arg5[%c0_5, %c0_6] : memref<4x128xf32, #tpu.memory_space<vmem>>, vector<1x128xf32>
    %c1 = arith.constant 1 : index
    %c0_7 = arith.constant 0 : index
    %6 = vector.load %arg5[%c1, %c0_7] : memref<4x128xf32, #tpu.memory_space<vmem>>, vector<1x128xf32>
    %c2 = arith.constant 2 : index
    %c0_8 = arith.constant 0 : index
    %7 = vector.load %arg5[%c2, %c0_8] : memref<4x128xf32, #tpu.memory_space<vmem>>, vector<1x128xf32>
    %c3 = arith.constant 3 : index
    %c0_9 = arith.constant 0 : index
    %8 = vector.load %arg5[%c3, %c0_9] : memref<4x128xf32, #tpu.memory_space<vmem>>, vector<1x128xf32>
    %c0_10 = arith.constant 0 : index
    %c0_11 = arith.constant 0 : index
    %9 = vector.load %arg0[%c0_10, %c0_11] : memref<64x128xf32, #tpu.memory_space<vmem>>, vector<64x128xf32>
    %10 = arith.truncf %9 : vector<64x128xf32> to vector<64x128xbf16>
    %c0_12 = arith.constant 0 : index
    %c0_13 = arith.constant 0 : index
    %11 = vector.load %arg1[%c0_12, %c0_13] : memref<128x384xbf16, #tpu.memory_space<vmem>>, vector<128x384xbf16>
    %cst = arith.constant dense<0.000000e+00> : vector<64x384xf32>
    %12 = tpu.matmul %10, %11, %cst {dimension_numbers = #tpu.dot_dimension_numbers<[1], [0], [0], [1], [0, 0, 1, 1], [], []>} : vector<64x128xbf16>, vector<128x384xbf16>, vector<64x384xf32> -> vector<64x384xf32>
    %13 = vector.broadcast %0 : vector<1x384xf32> to vector<64x384xf32>
    %14 = arith.addf %12, %13 : vector<64x384xf32>
    %cst_14 = arith.constant 0.000000e+00 : f32
    %15 = vector.broadcast %cst_14 : f32 to vector<64x128xf32>
    %16 = vector.extract_strided_slice %14 {offsets = [0, 0], sizes = [64, 32], strides = [1, 1]} : vector<64x384xf32> to vector<64x32xf32>
    %17 = vector.shape_cast %16 : vector<64x32xf32> to vector<8x8x32xf32>
    %18 = arith.truncf %17 : vector<8x8x32xf32> to vector<8x8x32xbf16>
    %19 = vector.extract_strided_slice %14 {offsets = [0, 128], sizes = [64, 32], strides = [1, 1]} : vector<64x384xf32> to vector<64x32xf32>
    %20 = vector.shape_cast %19 : vector<64x32xf32> to vector<8x8x32xf32>
    %21 = arith.truncf %20 : vector<8x8x32xf32> to vector<8x8x32xbf16>
    %22 = vector.extract_strided_slice %14 {offsets = [0, 256], sizes = [64, 32], strides = [1, 1]} : vector<64x384xf32> to vector<64x32xf32>
    %23 = vector.shape_cast %22 : vector<64x32xf32> to vector<8x8x32xf32>
    %24 = arith.truncf %23 : vector<8x8x32xf32> to vector<8x8x32xbf16>
    "tpu.trace_start"() <{level = 10 : i32, message = "sbd,scd->sbc"}> : () -> ()
    %cst_15 = arith.constant dense<0.000000e+00> : vector<8x8x8xf32>
    %25 = tpu.matmul %18, %21, %cst_15 {dimension_numbers = #tpu.dot_dimension_numbers<[2], [2], [1], [1], [0, 0, 0, 1, 1, 1], [0], [0]>} : vector<8x8x32xbf16>, vector<8x8x32xbf16>, vector<8x8x8xf32> -> vector<8x8x8xf32>
    "tpu.trace_stop"() : () -> ()
    %cst_16 = arith.constant 0.176776692 : f32
    %26 = vector.broadcast %cst_16 : f32 to vector<8x8x8xf32>
    %27 = arith.mulf %25, %26 : vector<8x8x8xf32>
    %cst_17 = arith.constant dense<0xFF800000> : vector<8x8xf32>
    %28 = vector.multi_reduction <maximumf>, %27, %cst_17 [2] : vector<8x8x8xf32> to vector<8x8xf32>
    %29 = vector.shape_cast %28 : vector<8x8xf32> to vector<8x8x1xf32>
    %30 = vector.broadcast %29 : vector<8x8x1xf32> to vector<8x8x8xf32>
    %31 = arith.subf %27, %30 : vector<8x8x8xf32>
    %32 = math.exp %31 : vector<8x8x8xf32>
    %cst_18 = arith.constant dense<0.000000e+00> : vector<8x8xf32>
    %33 = vector.multi_reduction <add>, %32, %cst_18 [2] : vector<8x8x8xf32> to vector<8x8xf32>
    %34 = vector.shape_cast %33 : vector<8x8xf32> to vector<8x8x1xf32>
    %35 = tpu.reciprocal %34 {approx = true} : vector<8x8x1xf32> -> vector<8x8x1xf32>
    %36 = vector.broadcast %35 : vector<8x8x1xf32> to vector<8x8x8xf32>
    %37 = arith.mulf %32, %36 : vector<8x8x8xf32>
    %38 = arith.truncf %37 : vector<8x8x8xf32> to vector<8x8x8xbf16>
    "tpu.trace_start"() <{level = 10 : i32, message = "sbc,scd->sbd"}> : () -> ()
    %cst_19 = arith.constant dense<0.000000e+00> : vector<8x8x32xf32>
    %39 = tpu.matmul %38, %24, %cst_19 {dimension_numbers = #tpu.dot_dimension_numbers<[2], [1], [1], [2], [0, 0, 0, 1, 1, 2], [0], [0]>} : vector<8x8x8xbf16>, vector<8x8x32xbf16>, vector<8x8x32xf32> -> vector<8x8x32xf32>
    "tpu.trace_stop"() : () -> ()
    %40 = vector.shape_cast %39 : vector<8x8x32xf32> to vector<64x32xf32>
    %41 = arith.truncf %40 : vector<64x32xf32> to vector<64x32xbf16>
    %c0_20 = arith.constant 0 : index
    %c0_21 = arith.constant 0 : index
    %42 = vector.load %arg2[%c0_20, %c0_21] : memref<128x640xbf16, #tpu.memory_space<vmem>>, vector<32x128xbf16>
    %cst_22 = arith.constant dense<0.000000e+00> : vector<64x128xf32>
    %43 = tpu.matmul %41, %42, %cst_22 {dimension_numbers = #tpu.dot_dimension_numbers<[1], [0], [0], [1], [0, 0, 1, 1], [], []>} : vector<64x32xbf16>, vector<32x128xbf16>, vector<64x128xf32> -> vector<64x128xf32>
    %44 = arith.addf %15, %43 : vector<64x128xf32>
    %45 = vector.extract_strided_slice %14 {offsets = [0, 32], sizes = [64, 32], strides = [1, 1]} : vector<64x384xf32> to vector<64x32xf32>
    %46 = vector.shape_cast %45 : vector<64x32xf32> to vector<8x8x32xf32>
    %47 = arith.truncf %46 : vector<8x8x32xf32> to vector<8x8x32xbf16>
    %48 = vector.extract_strided_slice %14 {offsets = [0, 160], sizes = [64, 32], strides = [1, 1]} : vector<64x384xf32> to vector<64x32xf32>
    %49 = vector.shape_cast %48 : vector<64x32xf32> to vector<8x8x32xf32>
    %50 = arith.truncf %49 : vector<8x8x32xf32> to vector<8x8x32xbf16>
    %51 = vector.extract_strided_slice %14 {offsets = [0, 288], sizes = [64, 32], strides = [1, 1]} : vector<64x384xf32> to vector<64x32xf32>
    %52 = vector.shape_cast %51 : vector<64x32xf32> to vector<8x8x32xf32>
    %53 = arith.truncf %52 : vector<8x8x32xf32> to vector<8x8x32xbf16>
    "tpu.trace_start"() <{level = 10 : i32, message = "sbd,scd->sbc"}> : () -> ()
    %cst_23 = arith.constant dense<0.000000e+00> : vector<8x8x8xf32>
    %54 = tpu.matmul %47, %50, %cst_23 {dimension_numbers = #tpu.dot_dimension_numbers<[2], [2], [1], [1], [0, 0, 0, 1, 1, 1], [0], [0]>} : vector<8x8x32xbf16>, vector<8x8x32xbf16>, vector<8x8x8xf32> -> vector<8x8x8xf32>
    "tpu.trace_stop"() : () -> ()
    %cst_24 = arith.constant 0.176776692 : f32
    %55 = vector.broadcast %cst_24 : f32 to vector<8x8x8xf32>
    %56 = arith.mulf %54, %55 : vector<8x8x8xf32>
    %cst_25 = arith.constant dense<0xFF800000> : vector<8x8xf32>
    %57 = vector.multi_reduction <maximumf>, %56, %cst_25 [2] : vector<8x8x8xf32> to vector<8x8xf32>
    %58 = vector.shape_cast %57 : vector<8x8xf32> to vector<8x8x1xf32>
    %59 = vector.broadcast %58 : vector<8x8x1xf32> to vector<8x8x8xf32>
    %60 = arith.subf %56, %59 : vector<8x8x8xf32>
    %61 = math.exp %60 : vector<8x8x8xf32>
    %cst_26 = arith.constant dense<0.000000e+00> : vector<8x8xf32>
    %62 = vector.multi_reduction <add>, %61, %cst_26 [2] : vector<8x8x8xf32> to vector<8x8xf32>
    %63 = vector.shape_cast %62 : vector<8x8xf32> to vector<8x8x1xf32>
    %64 = tpu.reciprocal %63 {approx = true} : vector<8x8x1xf32> -> vector<8x8x1xf32>
    %65 = vector.broadcast %64 : vector<8x8x1xf32> to vector<8x8x8xf32>
    %66 = arith.mulf %61, %65 : vector<8x8x8xf32>
    %67 = arith.truncf %66 : vector<8x8x8xf32> to vector<8x8x8xbf16>
    "tpu.trace_start"() <{level = 10 : i32, message = "sbc,scd->sbd"}> : () -> ()
    %cst_27 = arith.constant dense<0.000000e+00> : vector<8x8x32xf32>
    %68 = tpu.matmul %67, %53, %cst_27 {dimension_numbers = #tpu.dot_dimension_numbers<[2], [1], [1], [2], [0, 0, 0, 1, 1, 2], [0], [0]>} : vector<8x8x8xbf16>, vector<8x8x32xbf16>, vector<8x8x32xf32> -> vector<8x8x32xf32>
    "tpu.trace_stop"() : () -> ()
    %69 = vector.shape_cast %68 : vector<8x8x32xf32> to vector<64x32xf32>
    %70 = arith.truncf %69 : vector<64x32xf32> to vector<64x32xbf16>
    %c32 = arith.constant 32 : index
    %c0_28 = arith.constant 0 : index
    %71 = vector.load %arg2[%c32, %c0_28] : memref<128x640xbf16, #tpu.memory_space<vmem>>, vector<32x128xbf16>
    %cst_29 = arith.constant dense<0.000000e+00> : vector<64x128xf32>
    %72 = tpu.matmul %70, %71, %cst_29 {dimension_numbers = #tpu.dot_dimension_numbers<[1], [0], [0], [1], [0, 0, 1, 1], [], []>} : vector<64x32xbf16>, vector<32x128xbf16>, vector<64x128xf32> -> vector<64x128xf32>
    %73 = arith.addf %44, %72 : vector<64x128xf32>
    %74 = vector.extract_strided_slice %14 {offsets = [0, 64], sizes = [64, 32], strides = [1, 1]} : vector<64x384xf32> to vector<64x32xf32>
    %75 = vector.shape_cast %74 : vector<64x32xf32> to vector<8x8x32xf32>
    %76 = arith.truncf %75 : vector<8x8x32xf32> to vector<8x8x32xbf16>
    %77 = vector.extract_strided_slice %14 {offsets = [0, 192], sizes = [64, 32], strides = [1, 1]} : vector<64x384xf32> to vector<64x32xf32>
    %78 = vector.shape_cast %77 : vector<64x32xf32> to vector<8x8x32xf32>
    %79 = arith.truncf %78 : vector<8x8x32xf32> to vector<8x8x32xbf16>
    %80 = vector.extract_strided_slice %14 {offsets = [0, 320], sizes = [64, 32], strides = [1, 1]} : vector<64x384xf32> to vector<64x32xf32>
    %81 = vector.shape_cast %80 : vector<64x32xf32> to vector<8x8x32xf32>
    %82 = arith.truncf %81 : vector<8x8x32xf32> to vector<8x8x32xbf16>
    "tpu.trace_start"() <{level = 10 : i32, message = "sbd,scd->sbc"}> : () -> ()
    %cst_30 = arith.constant dense<0.000000e+00> : vector<8x8x8xf32>
    %83 = tpu.matmul %76, %79, %cst_30 {dimension_numbers = #tpu.dot_dimension_numbers<[2], [2], [1], [1], [0, 0, 0, 1, 1, 1], [0], [0]>} : vector<8x8x32xbf16>, vector<8x8x32xbf16>, vector<8x8x8xf32> -> vector<8x8x8xf32>
    "tpu.trace_stop"() : () -> ()
    %cst_31 = arith.constant 0.176776692 : f32
    %84 = vector.broadcast %cst_31 : f32 to vector<8x8x8xf32>
    %85 = arith.mulf %83, %84 : vector<8x8x8xf32>
    %cst_32 = arith.constant dense<0xFF800000> : vector<8x8xf32>
    %86 = vector.multi_reduction <maximumf>, %85, %cst_32 [2] : vector<8x8x8xf32> to vector<8x8xf32>
    %87 = vector.shape_cast %86 : vector<8x8xf32> to vector<8x8x1xf32>
    %88 = vector.broadcast %87 : vector<8x8x1xf32> to vector<8x8x8xf32>
    %89 = arith.subf %85, %88 : vector<8x8x8xf32>
    %90 = math.exp %89 : vector<8x8x8xf32>
    %cst_33 = arith.constant dense<0.000000e+00> : vector<8x8xf32>
    %91 = vector.multi_reduction <add>, %90, %cst_33 [2] : vector<8x8x8xf32> to vector<8x8xf32>
    %92 = vector.shape_cast %91 : vector<8x8xf32> to vector<8x8x1xf32>
    %93 = tpu.reciprocal %92 {approx = true} : vector<8x8x1xf32> -> vector<8x8x1xf32>
    %94 = vector.broadcast %93 : vector<8x8x1xf32> to vector<8x8x8xf32>
    %95 = arith.mulf %90, %94 : vector<8x8x8xf32>
    %96 = arith.truncf %95 : vector<8x8x8xf32> to vector<8x8x8xbf16>
    "tpu.trace_start"() <{level = 10 : i32, message = "sbc,scd->sbd"}> : () -> ()
    %cst_34 = arith.constant dense<0.000000e+00> : vector<8x8x32xf32>
    %97 = tpu.matmul %96, %82, %cst_34 {dimension_numbers = #tpu.dot_dimension_numbers<[2], [1], [1], [2], [0, 0, 0, 1, 1, 2], [0], [0]>} : vector<8x8x8xbf16>, vector<8x8x32xbf16>, vector<8x8x32xf32> -> vector<8x8x32xf32>
    "tpu.trace_stop"() : () -> ()
    %98 = vector.shape_cast %97 : vector<8x8x32xf32> to vector<64x32xf32>
    %99 = arith.truncf %98 : vector<64x32xf32> to vector<64x32xbf16>
    %c64 = arith.constant 64 : index
    %c0_35 = arith.constant 0 : index
    %100 = vector.load %arg2[%c64, %c0_35] : memref<128x640xbf16, #tpu.memory_space<vmem>>, vector<32x128xbf16>
    %cst_36 = arith.constant dense<0.000000e+00> : vector<64x128xf32>
    %101 = tpu.matmul %99, %100, %cst_36 {dimension_numbers = #tpu.dot_dimension_numbers<[1], [0], [0], [1], [0, 0, 1, 1], [], []>} : vector<64x32xbf16>, vector<32x128xbf16>, vector<64x128xf32> -> vector<64x128xf32>
    %102 = arith.addf %73, %101 : vector<64x128xf32>
    %103 = vector.extract_strided_slice %14 {offsets = [0, 96], sizes = [64, 32], strides = [1, 1]} : vector<64x384xf32> to vector<64x32xf32>
    %104 = vector.shape_cast %103 : vector<64x32xf32> to vector<8x8x32xf32>
    %105 = arith.truncf %104 : vector<8x8x32xf32> to vector<8x8x32xbf16>
    %106 = vector.extract_strided_slice %14 {offsets = [0, 224], sizes = [64, 32], strides = [1, 1]} : vector<64x384xf32> to vector<64x32xf32>
    %107 = vector.shape_cast %106 : vector<64x32xf32> to vector<8x8x32xf32>
    %108 = arith.truncf %107 : vector<8x8x32xf32> to vector<8x8x32xbf16>
    %109 = vector.extract_strided_slice %14 {offsets = [0, 352], sizes = [64, 32], strides = [1, 1]} : vector<64x384xf32> to vector<64x32xf32>
    %110 = vector.shape_cast %109 : vector<64x32xf32> to vector<8x8x32xf32>
    %111 = arith.truncf %110 : vector<8x8x32xf32> to vector<8x8x32xbf16>
    "tpu.trace_start"() <{level = 10 : i32, message = "sbd,scd->sbc"}> : () -> ()
    %cst_37 = arith.constant dense<0.000000e+00> : vector<8x8x8xf32>
    %112 = tpu.matmul %105, %108, %cst_37 {dimension_numbers = #tpu.dot_dimension_numbers<[2], [2], [1], [1], [0, 0, 0, 1, 1, 1], [0], [0]>} : vector<8x8x32xbf16>, vector<8x8x32xbf16>, vector<8x8x8xf32> -> vector<8x8x8xf32>
    "tpu.trace_stop"() : () -> ()
    %cst_38 = arith.constant 0.176776692 : f32
    %113 = vector.broadcast %cst_38 : f32 to vector<8x8x8xf32>
    %114 = arith.mulf %112, %113 : vector<8x8x8xf32>
    %cst_39 = arith.constant dense<0xFF800000> : vector<8x8xf32>
    %115 = vector.multi_reduction <maximumf>, %114, %cst_39 [2] : vector<8x8x8xf32> to vector<8x8xf32>
    %116 = vector.shape_cast %115 : vector<8x8xf32> to vector<8x8x1xf32>
    %117 = vector.broadcast %116 : vector<8x8x1xf32> to vector<8x8x8xf32>
    %118 = arith.subf %114, %117 : vector<8x8x8xf32>
    %119 = math.exp %118 : vector<8x8x8xf32>
    %cst_40 = arith.constant dense<0.000000e+00> : vector<8x8xf32>
    %120 = vector.multi_reduction <add>, %119, %cst_40 [2] : vector<8x8x8xf32> to vector<8x8xf32>
    %121 = vector.shape_cast %120 : vector<8x8xf32> to vector<8x8x1xf32>
    %122 = tpu.reciprocal %121 {approx = true} : vector<8x8x1xf32> -> vector<8x8x1xf32>
    %123 = vector.broadcast %122 : vector<8x8x1xf32> to vector<8x8x8xf32>
    %124 = arith.mulf %119, %123 : vector<8x8x8xf32>
    %125 = arith.truncf %124 : vector<8x8x8xf32> to vector<8x8x8xbf16>
    "tpu.trace_start"() <{level = 10 : i32, message = "sbc,scd->sbd"}> : () -> ()
    %cst_41 = arith.constant dense<0.000000e+00> : vector<8x8x32xf32>
    %126 = tpu.matmul %125, %111, %cst_41 {dimension_numbers = #tpu.dot_dimension_numbers<[2], [1], [1], [2], [0, 0, 0, 1, 1, 2], [0], [0]>} : vector<8x8x8xbf16>, vector<8x8x32xbf16>, vector<8x8x32xf32> -> vector<8x8x32xf32>
    "tpu.trace_stop"() : () -> ()
    %127 = vector.shape_cast %126 : vector<8x8x32xf32> to vector<64x32xf32>
    %128 = arith.truncf %127 : vector<64x32xf32> to vector<64x32xbf16>
    %c96 = arith.constant 96 : index
    %c0_42 = arith.constant 0 : index
    %129 = vector.load %arg2[%c96, %c0_42] : memref<128x640xbf16, #tpu.memory_space<vmem>>, vector<32x128xbf16>
    %cst_43 = arith.constant dense<0.000000e+00> : vector<64x128xf32>
    %130 = tpu.matmul %128, %129, %cst_43 {dimension_numbers = #tpu.dot_dimension_numbers<[1], [0], [0], [1], [0, 0, 1, 1], [], []>} : vector<64x32xbf16>, vector<32x128xbf16>, vector<64x128xf32> -> vector<64x128xf32>
    %131 = arith.addf %102, %130 : vector<64x128xf32>
    %132 = vector.broadcast %1 : vector<1x128xf32> to vector<64x128xf32>
    %133 = arith.addf %131, %132 : vector<64x128xf32>
    %134 = arith.addf %9, %133 : vector<64x128xf32>
    %cst_44 = arith.constant dense<0.000000e+00> : vector<64xf32>
    %135 = vector.multi_reduction <add>, %134, %cst_44 [1] : vector<64x128xf32> to vector<64xf32>
    %136 = vector.shape_cast %135 : vector<64xf32> to vector<64x1xf32>
    %cst_45 = arith.constant 1.280000e+02 : f32
    %137 = vector.broadcast %cst_45 : f32 to vector<64x1xf32>
    %138 = arith.divf %136, %137 : vector<64x1xf32>
    %139 = vector.broadcast %138 : vector<64x1xf32> to vector<64x128xf32>
    %140 = arith.subf %134, %139 : vector<64x128xf32>
    %141 = arith.mulf %140, %140 : vector<64x128xf32>
    %cst_46 = arith.constant dense<0.000000e+00> : vector<64xf32>
    %142 = vector.multi_reduction <add>, %141, %cst_46 [1] : vector<64x128xf32> to vector<64xf32>
    %143 = vector.shape_cast %142 : vector<64xf32> to vector<64x1xf32>
    %cst_47 = arith.constant 1.280000e+02 : f32
    %144 = vector.broadcast %cst_47 : f32 to vector<64x1xf32>
    %145 = arith.divf %143, %144 : vector<64x1xf32>
    %cst_48 = arith.constant 9.99999974E-6 : f32
    %146 = vector.broadcast %cst_48 : f32 to vector<64x1xf32>
    %147 = arith.addf %145, %146 : vector<64x1xf32>
    %148 = math.rsqrt %147 : vector<64x1xf32>
    %149 = vector.broadcast %148 : vector<64x1xf32> to vector<64x128xf32>
    %150 = arith.mulf %140, %149 : vector<64x128xf32>
    %151 = vector.broadcast %5 : vector<1x128xf32> to vector<64x128xf32>
    %152 = arith.mulf %150, %151 : vector<64x128xf32>
    %153 = vector.broadcast %6 : vector<1x128xf32> to vector<64x128xf32>
    %154 = arith.addf %152, %153 : vector<64x128xf32>
    %155 = arith.truncf %154 : vector<64x128xf32> to vector<64x128xbf16>
    %c0_49 = arith.constant 0 : index
    %c128 = arith.constant 128 : index
    %156 = vector.load %arg2[%c0_49, %c128] : memref<128x640xbf16, #tpu.memory_space<vmem>>, vector<128x256xbf16>
    %cst_50 = arith.constant dense<0.000000e+00> : vector<64x256xf32>
    %157 = tpu.matmul %155, %156, %cst_50 {dimension_numbers = #tpu.dot_dimension_numbers<[1], [0], [0], [1], [0, 0, 1, 1], [], []>} : vector<64x128xbf16>, vector<128x256xbf16>, vector<64x256xf32> -> vector<64x256xf32>
    %158 = vector.broadcast %2 : vector<1x256xf32> to vector<64x256xf32>
    %159 = arith.addf %157, %158 : vector<64x256xf32>
    %cst_51 = arith.constant 0.000000e+00 : f32
    %160 = vector.broadcast %cst_51 : f32 to vector<64x256xf32>
    %161 = arith.maximumf %159, %160 : vector<64x256xf32>
    %162 = arith.truncf %161 : vector<64x256xf32> to vector<64x256xbf16>
    %c0_52 = arith.constant 0 : index
    %c0_53 = arith.constant 0 : index
    %163 = vector.load %arg3[%c0_52, %c0_53] : memref<256x128xbf16, #tpu.memory_space<vmem>>, vector<256x128xbf16>
    %cst_54 = arith.constant dense<0.000000e+00> : vector<64x128xf32>
    %164 = tpu.matmul %162, %163, %cst_54 {dimension_numbers = #tpu.dot_dimension_numbers<[1], [0], [0], [1], [0, 0, 1, 1], [], []>} : vector<64x256xbf16>, vector<256x128xbf16>, vector<64x128xf32> -> vector<64x128xf32>
    %165 = vector.broadcast %3 : vector<1x128xf32> to vector<64x128xf32>
    %166 = arith.addf %164, %165 : vector<64x128xf32>
    %167 = arith.addf %154, %166 : vector<64x128xf32>
    %cst_55 = arith.constant dense<0.000000e+00> : vector<64xf32>
    %168 = vector.multi_reduction <add>, %167, %cst_55 [1] : vector<64x128xf32> to vector<64xf32>
    %169 = vector.shape_cast %168 : vector<64xf32> to vector<64x1xf32>
    %cst_56 = arith.constant 1.280000e+02 : f32
    %170 = vector.broadcast %cst_56 : f32 to vector<64x1xf32>
    %171 = arith.divf %169, %170 : vector<64x1xf32>
    %172 = vector.broadcast %171 : vector<64x1xf32> to vector<64x128xf32>
    %173 = arith.subf %167, %172 : vector<64x128xf32>
    %174 = arith.mulf %173, %173 : vector<64x128xf32>
    %cst_57 = arith.constant dense<0.000000e+00> : vector<64xf32>
    %175 = vector.multi_reduction <add>, %174, %cst_57 [1] : vector<64x128xf32> to vector<64xf32>
    %176 = vector.shape_cast %175 : vector<64xf32> to vector<64x1xf32>
    %cst_58 = arith.constant 1.280000e+02 : f32
    %177 = vector.broadcast %cst_58 : f32 to vector<64x1xf32>
    %178 = arith.divf %176, %177 : vector<64x1xf32>
    %cst_59 = arith.constant 9.99999974E-6 : f32
    %179 = vector.broadcast %cst_59 : f32 to vector<64x1xf32>
    %180 = arith.addf %178, %179 : vector<64x1xf32>
    %181 = math.rsqrt %180 : vector<64x1xf32>
    %182 = vector.broadcast %181 : vector<64x1xf32> to vector<64x128xf32>
    %183 = arith.mulf %173, %182 : vector<64x128xf32>
    %184 = vector.broadcast %7 : vector<1x128xf32> to vector<64x128xf32>
    %185 = arith.mulf %183, %184 : vector<64x128xf32>
    %186 = vector.broadcast %8 : vector<1x128xf32> to vector<64x128xf32>
    %187 = arith.addf %185, %186 : vector<64x128xf32>
    %188 = arith.truncf %187 : vector<64x128xf32> to vector<64x128xbf16>
    %c0_60 = arith.constant 0 : index
    %c0_61 = arith.constant 0 : index
    %189 = vector.load %arg1[%c0_60, %c0_61] : memref<128x384xbf16, #tpu.memory_space<vmem>>, vector<128x384xbf16>
    %cst_62 = arith.constant dense<0.000000e+00> : vector<64x384xf32>
    %190 = tpu.matmul %188, %189, %cst_62 {dimension_numbers = #tpu.dot_dimension_numbers<[1], [0], [0], [1], [0, 0, 1, 1], [], []>} : vector<64x128xbf16>, vector<128x384xbf16>, vector<64x384xf32> -> vector<64x384xf32>
    %191 = vector.broadcast %0 : vector<1x384xf32> to vector<64x384xf32>
    %192 = arith.addf %190, %191 : vector<64x384xf32>
    %cst_63 = arith.constant 0.000000e+00 : f32
    %193 = vector.broadcast %cst_63 : f32 to vector<64x128xf32>
    %194 = vector.extract_strided_slice %192 {offsets = [0, 0], sizes = [64, 32], strides = [1, 1]} : vector<64x384xf32> to vector<64x32xf32>
    %195 = vector.shape_cast %194 : vector<64x32xf32> to vector<8x8x32xf32>
    %196 = arith.truncf %195 : vector<8x8x32xf32> to vector<8x8x32xbf16>
    %197 = vector.extract_strided_slice %192 {offsets = [0, 128], sizes = [64, 32], strides = [1, 1]} : vector<64x384xf32> to vector<64x32xf32>
    %198 = vector.shape_cast %197 : vector<64x32xf32> to vector<8x8x32xf32>
    %199 = arith.truncf %198 : vector<8x8x32xf32> to vector<8x8x32xbf16>
    %200 = vector.extract_strided_slice %192 {offsets = [0, 256], sizes = [64, 32], strides = [1, 1]} : vector<64x384xf32> to vector<64x32xf32>
    %201 = vector.shape_cast %200 : vector<64x32xf32> to vector<8x8x32xf32>
    %202 = arith.truncf %201 : vector<8x8x32xf32> to vector<8x8x32xbf16>
    "tpu.trace_start"() <{level = 10 : i32, message = "sbd,scd->sbc"}> : () -> ()
    %cst_64 = arith.constant dense<0.000000e+00> : vector<8x8x8xf32>
    %203 = tpu.matmul %196, %199, %cst_64 {dimension_numbers = #tpu.dot_dimension_numbers<[2], [2], [1], [1], [0, 0, 0, 1, 1, 1], [0], [0]>} : vector<8x8x32xbf16>, vector<8x8x32xbf16>, vector<8x8x8xf32> -> vector<8x8x8xf32>
    "tpu.trace_stop"() : () -> ()
    %cst_65 = arith.constant 0.176776692 : f32
    %204 = vector.broadcast %cst_65 : f32 to vector<8x8x8xf32>
    %205 = arith.mulf %203, %204 : vector<8x8x8xf32>
    %cst_66 = arith.constant dense<0xFF800000> : vector<8x8xf32>
    %206 = vector.multi_reduction <maximumf>, %205, %cst_66 [2] : vector<8x8x8xf32> to vector<8x8xf32>
    %207 = vector.shape_cast %206 : vector<8x8xf32> to vector<8x8x1xf32>
    %208 = vector.broadcast %207 : vector<8x8x1xf32> to vector<8x8x8xf32>
    %209 = arith.subf %205, %208 : vector<8x8x8xf32>
    %210 = math.exp %209 : vector<8x8x8xf32>
    %cst_67 = arith.constant dense<0.000000e+00> : vector<8x8xf32>
    %211 = vector.multi_reduction <add>, %210, %cst_67 [2] : vector<8x8x8xf32> to vector<8x8xf32>
    %212 = vector.shape_cast %211 : vector<8x8xf32> to vector<8x8x1xf32>
    %213 = tpu.reciprocal %212 {approx = true} : vector<8x8x1xf32> -> vector<8x8x1xf32>
    %214 = vector.broadcast %213 : vector<8x8x1xf32> to vector<8x8x8xf32>
    %215 = arith.mulf %210, %214 : vector<8x8x8xf32>
    %216 = arith.truncf %215 : vector<8x8x8xf32> to vector<8x8x8xbf16>
    "tpu.trace_start"() <{level = 10 : i32, message = "sbc,scd->sbd"}> : () -> ()
    %cst_68 = arith.constant dense<0.000000e+00> : vector<8x8x32xf32>
    %217 = tpu.matmul %216, %202, %cst_68 {dimension_numbers = #tpu.dot_dimension_numbers<[2], [1], [1], [2], [0, 0, 0, 1, 1, 2], [0], [0]>} : vector<8x8x8xbf16>, vector<8x8x32xbf16>, vector<8x8x32xf32> -> vector<8x8x32xf32>
    "tpu.trace_stop"() : () -> ()
    %218 = vector.shape_cast %217 : vector<8x8x32xf32> to vector<64x32xf32>
    %219 = arith.truncf %218 : vector<64x32xf32> to vector<64x32xbf16>
    %c0_69 = arith.constant 0 : index
    %c0_70 = arith.constant 0 : index
    %220 = vector.load %arg2[%c0_69, %c0_70] : memref<128x640xbf16, #tpu.memory_space<vmem>>, vector<32x128xbf16>
    %cst_71 = arith.constant dense<0.000000e+00> : vector<64x128xf32>
    %221 = tpu.matmul %219, %220, %cst_71 {dimension_numbers = #tpu.dot_dimension_numbers<[1], [0], [0], [1], [0, 0, 1, 1], [], []>} : vector<64x32xbf16>, vector<32x128xbf16>, vector<64x128xf32> -> vector<64x128xf32>
    %222 = arith.addf %193, %221 : vector<64x128xf32>
    %223 = vector.extract_strided_slice %192 {offsets = [0, 32], sizes = [64, 32], strides = [1, 1]} : vector<64x384xf32> to vector<64x32xf32>
    %224 = vector.shape_cast %223 : vector<64x32xf32> to vector<8x8x32xf32>
    %225 = arith.truncf %224 : vector<8x8x32xf32> to vector<8x8x32xbf16>
    %226 = vector.extract_strided_slice %192 {offsets = [0, 160], sizes = [64, 32], strides = [1, 1]} : vector<64x384xf32> to vector<64x32xf32>
    %227 = vector.shape_cast %226 : vector<64x32xf32> to vector<8x8x32xf32>
    %228 = arith.truncf %227 : vector<8x8x32xf32> to vector<8x8x32xbf16>
    %229 = vector.extract_strided_slice %192 {offsets = [0, 288], sizes = [64, 32], strides = [1, 1]} : vector<64x384xf32> to vector<64x32xf32>
    %230 = vector.shape_cast %229 : vector<64x32xf32> to vector<8x8x32xf32>
    %231 = arith.truncf %230 : vector<8x8x32xf32> to vector<8x8x32xbf16>
    "tpu.trace_start"() <{level = 10 : i32, message = "sbd,scd->sbc"}> : () -> ()
    %cst_72 = arith.constant dense<0.000000e+00> : vector<8x8x8xf32>
    %232 = tpu.matmul %225, %228, %cst_72 {dimension_numbers = #tpu.dot_dimension_numbers<[2], [2], [1], [1], [0, 0, 0, 1, 1, 1], [0], [0]>} : vector<8x8x32xbf16>, vector<8x8x32xbf16>, vector<8x8x8xf32> -> vector<8x8x8xf32>
    "tpu.trace_stop"() : () -> ()
    %cst_73 = arith.constant 0.176776692 : f32
    %233 = vector.broadcast %cst_73 : f32 to vector<8x8x8xf32>
    %234 = arith.mulf %232, %233 : vector<8x8x8xf32>
    %cst_74 = arith.constant dense<0xFF800000> : vector<8x8xf32>
    %235 = vector.multi_reduction <maximumf>, %234, %cst_74 [2] : vector<8x8x8xf32> to vector<8x8xf32>
    %236 = vector.shape_cast %235 : vector<8x8xf32> to vector<8x8x1xf32>
    %237 = vector.broadcast %236 : vector<8x8x1xf32> to vector<8x8x8xf32>
    %238 = arith.subf %234, %237 : vector<8x8x8xf32>
    %239 = math.exp %238 : vector<8x8x8xf32>
    %cst_75 = arith.constant dense<0.000000e+00> : vector<8x8xf32>
    %240 = vector.multi_reduction <add>, %239, %cst_75 [2] : vector<8x8x8xf32> to vector<8x8xf32>
    %241 = vector.shape_cast %240 : vector<8x8xf32> to vector<8x8x1xf32>
    %242 = tpu.reciprocal %241 {approx = true} : vector<8x8x1xf32> -> vector<8x8x1xf32>
    %243 = vector.broadcast %242 : vector<8x8x1xf32> to vector<8x8x8xf32>
    %244 = arith.mulf %239, %243 : vector<8x8x8xf32>
    %245 = arith.truncf %244 : vector<8x8x8xf32> to vector<8x8x8xbf16>
    "tpu.trace_start"() <{level = 10 : i32, message = "sbc,scd->sbd"}> : () -> ()
    %cst_76 = arith.constant dense<0.000000e+00> : vector<8x8x32xf32>
    %246 = tpu.matmul %245, %231, %cst_76 {dimension_numbers = #tpu.dot_dimension_numbers<[2], [1], [1], [2], [0, 0, 0, 1, 1, 2], [0], [0]>} : vector<8x8x8xbf16>, vector<8x8x32xbf16>, vector<8x8x32xf32> -> vector<8x8x32xf32>
    "tpu.trace_stop"() : () -> ()
    %247 = vector.shape_cast %246 : vector<8x8x32xf32> to vector<64x32xf32>
    %248 = arith.truncf %247 : vector<64x32xf32> to vector<64x32xbf16>
    %c32_77 = arith.constant 32 : index
    %c0_78 = arith.constant 0 : index
    %249 = vector.load %arg2[%c32_77, %c0_78] : memref<128x640xbf16, #tpu.memory_space<vmem>>, vector<32x128xbf16>
    %cst_79 = arith.constant dense<0.000000e+00> : vector<64x128xf32>
    %250 = tpu.matmul %248, %249, %cst_79 {dimension_numbers = #tpu.dot_dimension_numbers<[1], [0], [0], [1], [0, 0, 1, 1], [], []>} : vector<64x32xbf16>, vector<32x128xbf16>, vector<64x128xf32> -> vector<64x128xf32>
    %251 = arith.addf %222, %250 : vector<64x128xf32>
    %252 = vector.extract_strided_slice %192 {offsets = [0, 64], sizes = [64, 32], strides = [1, 1]} : vector<64x384xf32> to vector<64x32xf32>
    %253 = vector.shape_cast %252 : vector<64x32xf32> to vector<8x8x32xf32>
    %254 = arith.truncf %253 : vector<8x8x32xf32> to vector<8x8x32xbf16>
    %255 = vector.extract_strided_slice %192 {offsets = [0, 192], sizes = [64, 32], strides = [1, 1]} : vector<64x384xf32> to vector<64x32xf32>
    %256 = vector.shape_cast %255 : vector<64x32xf32> to vector<8x8x32xf32>
    %257 = arith.truncf %256 : vector<8x8x32xf32> to vector<8x8x32xbf16>
    %258 = vector.extract_strided_slice %192 {offsets = [0, 320], sizes = [64, 32], strides = [1, 1]} : vector<64x384xf32> to vector<64x32xf32>
    %259 = vector.shape_cast %258 : vector<64x32xf32> to vector<8x8x32xf32>
    %260 = arith.truncf %259 : vector<8x8x32xf32> to vector<8x8x32xbf16>
    "tpu.trace_start"() <{level = 10 : i32, message = "sbd,scd->sbc"}> : () -> ()
    %cst_80 = arith.constant dense<0.000000e+00> : vector<8x8x8xf32>
    %261 = tpu.matmul %254, %257, %cst_80 {dimension_numbers = #tpu.dot_dimension_numbers<[2], [2], [1], [1], [0, 0, 0, 1, 1, 1], [0], [0]>} : vector<8x8x32xbf16>, vector<8x8x32xbf16>, vector<8x8x8xf32> -> vector<8x8x8xf32>
    "tpu.trace_stop"() : () -> ()
    %cst_81 = arith.constant 0.176776692 : f32
    %262 = vector.broadcast %cst_81 : f32 to vector<8x8x8xf32>
    %263 = arith.mulf %261, %262 : vector<8x8x8xf32>
    %cst_82 = arith.constant dense<0xFF800000> : vector<8x8xf32>
    %264 = vector.multi_reduction <maximumf>, %263, %cst_82 [2] : vector<8x8x8xf32> to vector<8x8xf32>
    %265 = vector.shape_cast %264 : vector<8x8xf32> to vector<8x8x1xf32>
    %266 = vector.broadcast %265 : vector<8x8x1xf32> to vector<8x8x8xf32>
    %267 = arith.subf %263, %266 : vector<8x8x8xf32>
    %268 = math.exp %267 : vector<8x8x8xf32>
    %cst_83 = arith.constant dense<0.000000e+00> : vector<8x8xf32>
    %269 = vector.multi_reduction <add>, %268, %cst_83 [2] : vector<8x8x8xf32> to vector<8x8xf32>
    %270 = vector.shape_cast %269 : vector<8x8xf32> to vector<8x8x1xf32>
    %271 = tpu.reciprocal %270 {approx = true} : vector<8x8x1xf32> -> vector<8x8x1xf32>
    %272 = vector.broadcast %271 : vector<8x8x1xf32> to vector<8x8x8xf32>
    %273 = arith.mulf %268, %272 : vector<8x8x8xf32>
    %274 = arith.truncf %273 : vector<8x8x8xf32> to vector<8x8x8xbf16>
    "tpu.trace_start"() <{level = 10 : i32, message = "sbc,scd->sbd"}> : () -> ()
    %cst_84 = arith.constant dense<0.000000e+00> : vector<8x8x32xf32>
    %275 = tpu.matmul %274, %260, %cst_84 {dimension_numbers = #tpu.dot_dimension_numbers<[2], [1], [1], [2], [0, 0, 0, 1, 1, 2], [0], [0]>} : vector<8x8x8xbf16>, vector<8x8x32xbf16>, vector<8x8x32xf32> -> vector<8x8x32xf32>
    "tpu.trace_stop"() : () -> ()
    %276 = vector.shape_cast %275 : vector<8x8x32xf32> to vector<64x32xf32>
    %277 = arith.truncf %276 : vector<64x32xf32> to vector<64x32xbf16>
    %c64_85 = arith.constant 64 : index
    %c0_86 = arith.constant 0 : index
    %278 = vector.load %arg2[%c64_85, %c0_86] : memref<128x640xbf16, #tpu.memory_space<vmem>>, vector<32x128xbf16>
    %cst_87 = arith.constant dense<0.000000e+00> : vector<64x128xf32>
    %279 = tpu.matmul %277, %278, %cst_87 {dimension_numbers = #tpu.dot_dimension_numbers<[1], [0], [0], [1], [0, 0, 1, 1], [], []>} : vector<64x32xbf16>, vector<32x128xbf16>, vector<64x128xf32> -> vector<64x128xf32>
    %280 = arith.addf %251, %279 : vector<64x128xf32>
    %281 = vector.extract_strided_slice %192 {offsets = [0, 96], sizes = [64, 32], strides = [1, 1]} : vector<64x384xf32> to vector<64x32xf32>
    %282 = vector.shape_cast %281 : vector<64x32xf32> to vector<8x8x32xf32>
    %283 = arith.truncf %282 : vector<8x8x32xf32> to vector<8x8x32xbf16>
    %284 = vector.extract_strided_slice %192 {offsets = [0, 224], sizes = [64, 32], strides = [1, 1]} : vector<64x384xf32> to vector<64x32xf32>
    %285 = vector.shape_cast %284 : vector<64x32xf32> to vector<8x8x32xf32>
    %286 = arith.truncf %285 : vector<8x8x32xf32> to vector<8x8x32xbf16>
    %287 = vector.extract_strided_slice %192 {offsets = [0, 352], sizes = [64, 32], strides = [1, 1]} : vector<64x384xf32> to vector<64x32xf32>
    %288 = vector.shape_cast %287 : vector<64x32xf32> to vector<8x8x32xf32>
    %289 = arith.truncf %288 : vector<8x8x32xf32> to vector<8x8x32xbf16>
    "tpu.trace_start"() <{level = 10 : i32, message = "sbd,scd->sbc"}> : () -> ()
    %cst_88 = arith.constant dense<0.000000e+00> : vector<8x8x8xf32>
    %290 = tpu.matmul %283, %286, %cst_88 {dimension_numbers = #tpu.dot_dimension_numbers<[2], [2], [1], [1], [0, 0, 0, 1, 1, 1], [0], [0]>} : vector<8x8x32xbf16>, vector<8x8x32xbf16>, vector<8x8x8xf32> -> vector<8x8x8xf32>
    "tpu.trace_stop"() : () -> ()
    %cst_89 = arith.constant 0.176776692 : f32
    %291 = vector.broadcast %cst_89 : f32 to vector<8x8x8xf32>
    %292 = arith.mulf %290, %291 : vector<8x8x8xf32>
    %cst_90 = arith.constant dense<0xFF800000> : vector<8x8xf32>
    %293 = vector.multi_reduction <maximumf>, %292, %cst_90 [2] : vector<8x8x8xf32> to vector<8x8xf32>
    %294 = vector.shape_cast %293 : vector<8x8xf32> to vector<8x8x1xf32>
    %295 = vector.broadcast %294 : vector<8x8x1xf32> to vector<8x8x8xf32>
    %296 = arith.subf %292, %295 : vector<8x8x8xf32>
    %297 = math.exp %296 : vector<8x8x8xf32>
    %cst_91 = arith.constant dense<0.000000e+00> : vector<8x8xf32>
    %298 = vector.multi_reduction <add>, %297, %cst_91 [2] : vector<8x8x8xf32> to vector<8x8xf32>
    %299 = vector.shape_cast %298 : vector<8x8xf32> to vector<8x8x1xf32>
    %300 = tpu.reciprocal %299 {approx = true} : vector<8x8x1xf32> -> vector<8x8x1xf32>
    %301 = vector.broadcast %300 : vector<8x8x1xf32> to vector<8x8x8xf32>
    %302 = arith.mulf %297, %301 : vector<8x8x8xf32>
    %303 = arith.truncf %302 : vector<8x8x8xf32> to vector<8x8x8xbf16>
    "tpu.trace_start"() <{level = 10 : i32, message = "sbc,scd->sbd"}> : () -> ()
    %cst_92 = arith.constant dense<0.000000e+00> : vector<8x8x32xf32>
    %304 = tpu.matmul %303, %289, %cst_92 {dimension_numbers = #tpu.dot_dimension_numbers<[2], [1], [1], [2], [0, 0, 0, 1, 1, 2], [0], [0]>} : vector<8x8x8xbf16>, vector<8x8x32xbf16>, vector<8x8x32xf32> -> vector<8x8x32xf32>
    "tpu.trace_stop"() : () -> ()
    %305 = vector.shape_cast %304 : vector<8x8x32xf32> to vector<64x32xf32>
    %306 = arith.truncf %305 : vector<64x32xf32> to vector<64x32xbf16>
    %c96_93 = arith.constant 96 : index
    %c0_94 = arith.constant 0 : index
    %307 = vector.load %arg2[%c96_93, %c0_94] : memref<128x640xbf16, #tpu.memory_space<vmem>>, vector<32x128xbf16>
    %cst_95 = arith.constant dense<0.000000e+00> : vector<64x128xf32>
    %308 = tpu.matmul %306, %307, %cst_95 {dimension_numbers = #tpu.dot_dimension_numbers<[1], [0], [0], [1], [0, 0, 1, 1], [], []>} : vector<64x32xbf16>, vector<32x128xbf16>, vector<64x128xf32> -> vector<64x128xf32>
    %309 = arith.addf %280, %308 : vector<64x128xf32>
    %310 = vector.broadcast %1 : vector<1x128xf32> to vector<64x128xf32>
    %311 = arith.addf %309, %310 : vector<64x128xf32>
    %312 = arith.addf %187, %311 : vector<64x128xf32>
    %cst_96 = arith.constant dense<0.000000e+00> : vector<64xf32>
    %313 = vector.multi_reduction <add>, %312, %cst_96 [1] : vector<64x128xf32> to vector<64xf32>
    %314 = vector.shape_cast %313 : vector<64xf32> to vector<64x1xf32>
    %cst_97 = arith.constant 1.280000e+02 : f32
    %315 = vector.broadcast %cst_97 : f32 to vector<64x1xf32>
    %316 = arith.divf %314, %315 : vector<64x1xf32>
    %317 = vector.broadcast %316 : vector<64x1xf32> to vector<64x128xf32>
    %318 = arith.subf %312, %317 : vector<64x128xf32>
    %319 = arith.mulf %318, %318 : vector<64x128xf32>
    %cst_98 = arith.constant dense<0.000000e+00> : vector<64xf32>
    %320 = vector.multi_reduction <add>, %319, %cst_98 [1] : vector<64x128xf32> to vector<64xf32>
    %321 = vector.shape_cast %320 : vector<64xf32> to vector<64x1xf32>
    %cst_99 = arith.constant 1.280000e+02 : f32
    %322 = vector.broadcast %cst_99 : f32 to vector<64x1xf32>
    %323 = arith.divf %321, %322 : vector<64x1xf32>
    %cst_100 = arith.constant 9.99999974E-6 : f32
    %324 = vector.broadcast %cst_100 : f32 to vector<64x1xf32>
    %325 = arith.addf %323, %324 : vector<64x1xf32>
    %326 = math.rsqrt %325 : vector<64x1xf32>
    %327 = vector.broadcast %326 : vector<64x1xf32> to vector<64x128xf32>
    %328 = arith.mulf %318, %327 : vector<64x128xf32>
    %329 = vector.broadcast %5 : vector<1x128xf32> to vector<64x128xf32>
    %330 = arith.mulf %328, %329 : vector<64x128xf32>
    %331 = vector.broadcast %6 : vector<1x128xf32> to vector<64x128xf32>
    %332 = arith.addf %330, %331 : vector<64x128xf32>
    %333 = arith.truncf %332 : vector<64x128xf32> to vector<64x128xbf16>
    %c0_101 = arith.constant 0 : index
    %c128_102 = arith.constant 128 : index
    %334 = vector.load %arg2[%c0_101, %c128_102] : memref<128x640xbf16, #tpu.memory_space<vmem>>, vector<128x256xbf16>
    %cst_103 = arith.constant dense<0.000000e+00> : vector<64x256xf32>
    %335 = tpu.matmul %333, %334, %cst_103 {dimension_numbers = #tpu.dot_dimension_numbers<[1], [0], [0], [1], [0, 0, 1, 1], [], []>} : vector<64x128xbf16>, vector<128x256xbf16>, vector<64x256xf32> -> vector<64x256xf32>
    %336 = vector.broadcast %2 : vector<1x256xf32> to vector<64x256xf32>
    %337 = arith.addf %335, %336 : vector<64x256xf32>
    %cst_104 = arith.constant 0.000000e+00 : f32
    %338 = vector.broadcast %cst_104 : f32 to vector<64x256xf32>
    %339 = arith.maximumf %337, %338 : vector<64x256xf32>
    %340 = arith.truncf %339 : vector<64x256xf32> to vector<64x256xbf16>
    %c0_105 = arith.constant 0 : index
    %c0_106 = arith.constant 0 : index
    %341 = vector.load %arg3[%c0_105, %c0_106] : memref<256x128xbf16, #tpu.memory_space<vmem>>, vector<256x128xbf16>
    %cst_107 = arith.constant dense<0.000000e+00> : vector<64x128xf32>
    %342 = tpu.matmul %340, %341, %cst_107 {dimension_numbers = #tpu.dot_dimension_numbers<[1], [0], [0], [1], [0, 0, 1, 1], [], []>} : vector<64x256xbf16>, vector<256x128xbf16>, vector<64x128xf32> -> vector<64x128xf32>
    %343 = vector.broadcast %3 : vector<1x128xf32> to vector<64x128xf32>
    %344 = arith.addf %342, %343 : vector<64x128xf32>
    %345 = arith.addf %332, %344 : vector<64x128xf32>
    %cst_108 = arith.constant dense<0.000000e+00> : vector<64xf32>
    %346 = vector.multi_reduction <add>, %345, %cst_108 [1] : vector<64x128xf32> to vector<64xf32>
    %347 = vector.shape_cast %346 : vector<64xf32> to vector<64x1xf32>
    %cst_109 = arith.constant 1.280000e+02 : f32
    %348 = vector.broadcast %cst_109 : f32 to vector<64x1xf32>
    %349 = arith.divf %347, %348 : vector<64x1xf32>
    %350 = vector.broadcast %349 : vector<64x1xf32> to vector<64x128xf32>
    %351 = arith.subf %345, %350 : vector<64x128xf32>
    %352 = arith.mulf %351, %351 : vector<64x128xf32>
    %cst_110 = arith.constant dense<0.000000e+00> : vector<64xf32>
    %353 = vector.multi_reduction <add>, %352, %cst_110 [1] : vector<64x128xf32> to vector<64xf32>
    %354 = vector.shape_cast %353 : vector<64xf32> to vector<64x1xf32>
    %cst_111 = arith.constant 1.280000e+02 : f32
    %355 = vector.broadcast %cst_111 : f32 to vector<64x1xf32>
    %356 = arith.divf %354, %355 : vector<64x1xf32>
    %cst_112 = arith.constant 9.99999974E-6 : f32
    %357 = vector.broadcast %cst_112 : f32 to vector<64x1xf32>
    %358 = arith.addf %356, %357 : vector<64x1xf32>
    %359 = math.rsqrt %358 : vector<64x1xf32>
    %360 = vector.broadcast %359 : vector<64x1xf32> to vector<64x128xf32>
    %361 = arith.mulf %351, %360 : vector<64x128xf32>
    %362 = vector.broadcast %7 : vector<1x128xf32> to vector<64x128xf32>
    %363 = arith.mulf %361, %362 : vector<64x128xf32>
    %364 = vector.broadcast %8 : vector<1x128xf32> to vector<64x128xf32>
    %365 = arith.addf %363, %364 : vector<64x128xf32>
    %366 = arith.truncf %365 : vector<64x128xf32> to vector<64x128xbf16>
    %c0_113 = arith.constant 0 : index
    %c384_114 = arith.constant 384 : index
    %367 = vector.load %arg2[%c0_113, %c384_114] : memref<128x640xbf16, #tpu.memory_space<vmem>>, vector<128x256xbf16>
    %cst_115 = arith.constant dense<0.000000e+00> : vector<64x256xf32>
    %368 = tpu.matmul %366, %367, %cst_115 {dimension_numbers = #tpu.dot_dimension_numbers<[1], [0], [0], [1], [0, 0, 1, 1], [], []>} : vector<64x128xbf16>, vector<128x256xbf16>, vector<64x256xf32> -> vector<64x256xf32>
    %369 = vector.broadcast %4 : vector<1x256xf32> to vector<64x256xf32>
    %370 = arith.addf %368, %369 : vector<64x256xf32>
    %c0_116 = arith.constant 0 : index
    %c0_117 = arith.constant 0 : index
    %371 = vector.load %arg6[%c0_116, %c0_117] : memref<64x256xf32, #tpu.memory_space<vmem>>, vector<64x256xf32>
    tpu.vector_store %arg6[%c0_116, %c0_117], %370 {strides = array<i32>} : memref<64x256xf32, #tpu.memory_space<vmem>>, vector<64x256xf32>,
    return
  }
}

</mosaic_0001>

<bundles_post_ra>
// kernel: transformer_decoder_only.1
= control target key start
LH: loop header
LB: loop body
LE: loop exit
PB: predicated region body
PF: predicated region fallthrough
CT: control target
= control target key end

     0   :  { %vm323_vm0 = vcmask 261120   ;;  %vm484_vm1 = vcmask 64512   ;;  %s7744_s15 = smov 96   ;;  %vm584_vm2 = vcmask 1043456   ;;  %s7745_s16 = smov 64   ;;  %s11048_s1 = inlined_call_operand.vmem [shape: bf16[128,384], index: 1, kind: input, shape index: {}]   ;;  %s11049_s4 = inlined_call_operand.vmem [shape: f32[1,1152], index: 4, kind: input, shape index: {}]   ;;  %s11050_s0 = inlined_call_operand.vmem [shape: f32[64,128], index: 0, kind: input, shape index: {}]   ;;  %s11051_s2 = inlined_call_operand.vmem [shape: bf16[128,640], index: 2, kind: input, shape index: {}]   ;;  %s11052_s5 = inlined_call_operand.vmem [shape: f32[4,128], index: 5, kind: input, shape index: {}]   ;;  %s11053_s3 = inlined_call_operand.vmem [shape: bf16[256,128], index: 3, kind: input, shape index: {}]   ;;  %s11054_s6 = inlined_call_operand.vmem [shape: f32[64,256], index: 6, kind: output, shape index: {}]  }
   0x1   :  { %v7267_v0 = vld [vmem:[%s11048_s1 + $0xac] sm:$0xf]  ;;  %v6598_v1 = vld [vmem:[%s11048_s1 + $0xb4] sm:$0xf0]  ;;  %v7264_v2 = vld [vmem:[%s11048_s1 + $0x94] sm:$0xf] }
   0x2   :  { %v6601_v3 = vor.u32 %v7267_v0, %v6598_v1  ;;  %v6586_v4 = vld [vmem:[%s11048_s1 + $0x9c] sm:$0xf0]  ;;  %v6596_v5 = vld [vmem:[%s11048_s1 + $0xa8] sm:$0xf]  ;;  %v7268_v6 = vld [vmem:[%s11048_s1 + $0xb0] sm:$0xf0] }
   0x3   :  { %v6597_v7 = vor.u32 %v7268_v6, %v6596_v5  ;;  %v6584_v8 = vld [vmem:[%s11048_s1 + $0x90] sm:$0xf]  ;;  %v6589_v9 = vor.u32 %v7264_v2, %v6586_v4  ;;  %v7265_v10 = vld [vmem:[%s11048_s1 + $0x98] sm:$0xf0]  ;;  %v6574_v12 = vld [vmem:[%s11048_s1 + $0x84] sm:$0xf0] }
   0x4   :  { %241 = vmatpush.bf16.msra.mxu1 %v6601_v3  ;;  %v7261_v11 = vld [vmem:[%s11048_s1 + $0x7c] sm:$0xf]  ;;  %v6585_v13 = vor.u32 %v7265_v10, %v6584_v8  ;;  %v6572_v14 = vld [vmem:[%s11048_s1 + $0x78] sm:$0xf]  ;;  %v7262_v15 = vld [vmem:[%s11048_s1 + $0x80] sm:$0xf0] }
   0x5   :  { %212 = vmatpush.bf16.msra.mxu0 %v6597_v7  ;;  %v6577_v16 = vor.u32 %v7261_v11, %v6574_v12  ;;  %v7258_v17 = vld [vmem:[%s11048_s1 + $0x64] sm:$0xf]  ;;  %v6562_v18 = vld [vmem:[%s11048_s1 + $0x6c] sm:$0xf0]  ;;  %v6573_v19 = vor.u32 %v7262_v15, %v6572_v14  ;;  %v6560_v20 = vld [vmem:[%s11048_s1 + $0x60] sm:$0xf] }
   0x6   :  { %v7259_v21 = vld [vmem:[%s11048_s1 + $0x68] sm:$0xf0]  ;;  %v6565_v22 = vor.u32 %v7258_v17, %v6562_v18  ;;  %v6550_v24 = vld [vmem:[%s11048_s1 + $0x54] sm:$0xf0]  ;;  %v6548_v26 = vld [vmem:[%s11048_s1 + $0x48] sm:$0xf] }
   0x7   :  { %v7255_v23 = vld [vmem:[%s11048_s1 + $0x4c] sm:$0xf]  ;;  %v6561_v25 = vor.u32 %v7259_v21, %v6560_v20  ;;  %v7256_v27 = vld [vmem:[%s11048_s1 + $0x50] sm:$0xf0]  ;;  %v6538_v30 = vld [vmem:[%s11048_s1 + $0x3c] sm:$0xf0] }
   0x8   :  { %242 = vmatpush.bf16.msra.mxu1 %v6589_v9  ;;  %v6553_v28 = vor.u32 %v7255_v23, %v6550_v24  ;;  %v7252_v29 = vld [vmem:[%s11048_s1 + $0x34] sm:$0xf]  ;;  %v6549_v31 = vor.u32 %v7256_v27, %v6548_v26  ;;  %v6536_v32 = vld [vmem:[%s11048_s1 + $0x30] sm:$0xf]  ;;  %v7253_v33 = vld [vmem:[%s11048_s1 + $0x38] sm:$0xf0] }
   0x9   :  { %213 = vmatpush.bf16.msra.mxu0 %v6585_v13  ;;  %v6541_v34 = vor.u32 %v7252_v29, %v6538_v30  ;;  %v7249_v35 = vld [vmem:[%s11048_s1 + $0x1c] sm:$0xf]  ;;  %v6526_v36 = vld [vmem:[%s11048_s1 + $0x24] sm:$0xf0]  ;;  %v6537_v37 = vor.u32 %v7253_v33, %v6536_v32  ;;  %v6524_v38 = vld [vmem:[%s11048_s1 + $0x18] sm:$0xf] }
   0xa   :  { %v7250_v39 = vld [vmem:[%s11048_s1 + $0x20] sm:$0xf0]  ;;  %v6529_v40 = vor.u32 %v7249_v35, %v6526_v36  ;;  %v6514_v42 = vld [vmem:[%s11048_s1 + $0xc] sm:$0xf0]  ;;  %v6512_v44 = vld [vmem:[%s11048_s1] sm:$0xf] }
   0xb   :  { %v7246_v41 = vld [vmem:[%s11048_s1 + $0x4] sm:$0xf]  ;;  %v6525_v43 = vor.u32 %v7250_v39, %v6524_v38  ;;  %v7247_v45 = vld [vmem:[%s11048_s1 + $0x8] sm:$0xf0]  ;;  %v35_v51 = vld [vmem:[%s11050_s0 + $0x10] sm:$0xff]  ;;  %s7746_s9 = smov 32  }
   0xc   :  { %243 = vmatpush.bf16.msra.mxu1 %v6577_v16  ;;  %v6517_v46 = vor.u32 %v7246_v41, %v6514_v42  ;;  %v33_v47 = vld [vmem:[%s11050_s0] sm:$0xff]  ;;  %v34_v48 = vld [vmem:[%s11050_s0 + $0x8] sm:$0xff]  ;;  %v6513_v49 = vor.u32 %v7247_v45, %v6512_v44  ;;  %v36_v52 = vld [vmem:[%s11050_s0 + $0x18] sm:$0xff] }
   0xd   :  { %214 = vmatpush.bf16.msra.mxu0 %v6573_v19  ;;  %v7885_v50 = vpack.c.bf16 %v34_v48, %v33_v47  ;;  %v7895_v53 = vpack.c.bf16 %v36_v52, %v35_v51  ;;  %v37_v54 = vld [vmem:[%s11050_s0 + $0x20] sm:$0xff]  ;;  %v38_v55 = vld [vmem:[%s11050_s0 + $0x28] sm:$0xff]  ;;  %v39_v57 = vld [vmem:[%s11050_s0 + $0x30] sm:$0xff] }
   0xe   :  { %v7905_v56 = vpack.c.bf16 %v38_v55, %v37_v54  ;;  %v40_v58 = vld [vmem:[%s11050_s0 + $0x38] sm:$0xff]  ;;  %v7922_v60 = vld [vmem:[%s11049_s4] sm:$0x7] }
   0xf   :  { %v7915_v59 = vpack.c.bf16 %v40_v58, %v39_v57  ;;  %v7925_v61 = vperm.slane %v7922_v60, 1  ;;  %v7929_v0 = vperm.slane %v7922_v60, 0 }
  0x10   :  { %244 = vmatpush.bf16.msra.mxu1 %v6565_v22 }
  0x11   :  { %215 = vmatpush.bf16.msra.mxu0 %v6561_v25 }
  0x14   :  { %245 = vmatpush.bf16.msra.mxu1 %v6553_v28 }
  0x15   :  { %216 = vmatpush.bf16.msra.mxu0 %v6549_v31 }
  0x18   :  { %246 = vmatpush.bf16.msra.mxu1 %v6541_v34 }
  0x19   :  { %217 = vmatpush.bf16.msra.mxu0 %v6537_v37 }
  0x1c   :  { %247 = vmatpush.bf16.msra.mxu1 %v6529_v40 }
  0x1d   :  { %218 = vmatpush.bf16.msra.mxu0 %v6525_v43 }
  0x20   :  { %248 = vmatpush.bf16.msra.mxu1 %v6517_v46 }
  0x21   :  { %219 = vmatpush.bf16.msra.mxu0 %v6513_v49 }
  0x23   :  { %249 = vmatmul.bf16.vlgmr.msra.gmra.mxu1 %v7885_v50 }
  0x24   :  { %220 = vmatmul.bf16.vlgmr.msra.gmra.mxu0 %v7885_v50 }
  0x33   :  { %254 = vmatmul.bf16.gmra.mxu1 %v7895_v53 }
  0x34   :  { %225 = vmatmul.bf16.gmra.mxu0 %v7895_v53 }
  0x43   :  { %259 = vmatmul.bf16.gmra.mxu1 %v7905_v56 }
  0x44   :  { %230 = vmatmul.bf16.gmra.mxu0 %v7905_v56 }
  0x53   :  { %264 = vmatmul.bf16.gmra.mxu1 %v7915_v59 }
  0x54   :  { %235 = vmatmul.bf16.gmra.mxu0 %v7915_v59 }
  0xa0   :  { %v250_v62 = vpop.f32.mrf.mxu1 }
  0xa1   :  { %v251_v63 = vadd.f32 %v250_v62, %v7925_v61  ;;  %v221_v1 = vpop.f32.mrf.mxu0 }
  0xa2   :  { %v222_v4 = vadd.f32 %v221_v1, %v7929_v0 }
  0xa3   :  { %v7931_v2 = vpack.c.bf16 %v251_v63, %v251_v63 }
  0xa4   :  { %v7936_v6 = vpack.c.bf16 %v222_v4, %v222_v4 }
  0xa5   :  { %v328_v3 = vsel %vm323_vm0, %v7931_v2, 0 }
  0xa6   :  { %337 = vmatpush.bf16.xpose.msra.mxu3 %v328_v3 }
  0xa8   :  { %v252_v5 = vpop.f32.mrf.mxu1 }
  0xa9   :  { %v253_v7 = vadd.f32 %v252_v5, %v7925_v61  ;;  %v223_v8 = vpop.f32.mrf.mxu0 }
  0xaa   :  { %v224_v16 = vadd.f32 %v223_v8, %v7929_v0  ;;  %v6604_v8 = vld [vmem:[%s11048_s1 + $0xb0] sm:$0xf] }
  0xab   :  { %v7939_v9 = vpack.c.bf16 %v253_v7, %v253_v7 }
  0xac   :  { %v7952_v20 = vpack.c.bf16 %v224_v16, %v224_v16 }
  0xad   :  { %6606 = vmatmul.msk.bf16.vlgmr.msra.gmra.mxu3 %vm323_vm0, %v7936_v6  ;;  %v347_v10 = vsel %vm323_vm0, %v7939_v9, 0 }
  0xae   :  { %356 = vmatpush.bf16.xpose.msrb.mxu3 %v347_v10  ;;  %v7269_v10 = vld [vmem:[%s11048_s1 + $0xb8] sm:$0xf0] }
  0xb0   :  { %v255_v11 = vpop.f32.mrf.mxu1 }
  0xb1   :  { %v256_v12 = vadd.f32 %v255_v11, %v7925_v61  ;;  %v226_v13 = vpop.f32.mrf.mxu0  ;;  %v6592_v11 = vld [vmem:[%s11048_s1 + $0x98] sm:$0xf] }
  0xb2   :  { %v227_v26 = vadd.f32 %v226_v13, %v7929_v0  ;;  %v7266_v13 = vld [vmem:[%s11048_s1 + $0xa0] sm:$0xf0] }
  0xb3   :  { %v7946_v14 = vpack.c.bf16 %v256_v12, %v256_v12  ;;  %v6605_v12 = vor.u32 %v7269_v10, %v6604_v8 }
  0xb4   :  { %v7964_v29 = vpack.c.bf16 %v227_v26, %v227_v26  ;;  %v6568_v26 = vld [vmem:[%s11048_s1 + $0x68] sm:$0xf] }
  0xb5   :  { %v366_v15 = vsel %vm323_vm0, %v7946_v14, 0  ;;  %270 = vmatpush.bf16.msra.mxu2 %v6605_v12 }
  0xb6   :  { %375 = vmatpush.bf16.xpose.msra.mxu3 %v366_v15 }
  0xb8   :  { %v257_v17 = vpop.f32.mrf.mxu1 }
  0xb9   :  { %v258_v18 = vadd.f32 %v257_v17, %v7925_v61  ;;  %v228_v19 = vpop.f32.mrf.mxu0  ;;  %v6593_v17 = vor.u32 %v7266_v13, %v6592_v11 }
  0xba   :  { %v229_v39 = vadd.f32 %v228_v19, %v7929_v0 }
  0xbb   :  { %v7954_v21 = vpack.c.bf16 %v258_v18, %v258_v18  ;;  %271 = vmatpush.bf16.msra.mxu2 %v6593_v17 }
  0xbc   :  { %v7983_v45 = vpack.c.bf16 %v229_v39, %v229_v39  ;;  %v7257_v39 = vld [vmem:[%s11048_s1 + $0x58] sm:$0xf0] }
  0xbd   :  { %6607 = vmatmul.msk.bf16.vlgmr.msrb.gmra.mxu3 %vm323_vm0, %v7952_v20  ;;  %v385_v22 = vsel %vm323_vm0, %v7954_v21, 0  ;;  %v835_v11 = vunpack.c.l.b16 %v7954_v21 }
  0xbe   :  { %394 = vmatpush.bf16.xpose.msrb.mxu3 %v385_v22  ;;  %v6580_v22 = vld [vmem:[%s11048_s1 + $0x80] sm:$0xf] }
  0xbf   :  { %v8084_v12 = vpack.c.b16 %v835_v11, %v835_v11 }
  0xc0   :  { %v260_v23 = vpop.f32.mrf.mxu1 }
  0xc1   :  { %v231_v24 = vpop.f32.mrf.mxu0  ;;  %v261_v25 = vadd.f32 %v260_v23, %v7925_v61  ;;  %v7263_v23 = vld [vmem:[%s11048_s1 + $0x88] sm:$0xf0] }
  0xc2   :  { %v232_v52 = vadd.f32 %v231_v24, %v7929_v0 }
  0xc3   :  { %v7962_v27 = vpack.c.bf16 %v261_v25, %v261_v25  ;;  %v6581_v25 = vor.u32 %v7263_v23, %v6580_v22 }
  0xc4   :  { %v8001_v54 = vpack.c.bf16 %v232_v52, %v232_v52  ;;  %v7251_v52 = vld [vmem:[%s11048_s1 + $0x28] sm:$0xf0] }
  0xc5   :  { %v404_v31 = vsel %vm323_vm0, %v7962_v27, 0  ;;  %272 = vmatpush.bf16.msra.mxu2 %v6581_v25 }
  0xc8   :  { %v262_v28 = vpop.f32.mrf.mxu1 }
  0xc9   :  { %v233_v30 = vpop.f32.mrf.mxu0  ;;  %v263_v36 = vadd.f32 %v262_v28, %v7925_v61  ;;  %v7260_v28 = vld [vmem:[%s11048_s1 + $0x70] sm:$0xf0] }
  0xca   :  { %v234_v55 = vadd.f32 %v233_v30, %v7929_v0 }
  0xcb   :  { %v7978_v41 = vpack.c.bf16 %v263_v36, %v263_v36 }
  0xcc   :  { %v8006_v57 = vpack.c.bf16 %v234_v55, %v234_v55 }
  0xcd   :  { %6608 = vmatmul.msk.bf16.vlgmr.msra.gmra.mxu3 %vm323_vm0, %v7964_v29  ;;  %v423_v47 = vsel %vm323_vm0, %v7978_v41, 0 }
  0xce   :  { %413 = vmatpush.bf16.xpose.msra.mxu3 %v404_v31 }
  0xd0   :  { %v265_v32 = vpop.f32.mrf.mxu1 }
  0xd1   :  { %v266_v33 = vadd.f32 %v265_v32, %v7925_v61  ;;  %v236_v34 = vpop.f32.mrf.mxu0 }
  0xd2   :  { %v237_v38 = vadd.f32 %v236_v34, %v7929_v0  ;;  %v6569_v34 = vor.u32 %v7260_v28, %v6568_v26  ;;  %v806_v28 = vunpack.c.l.b16 %v7946_v14  ;;  %v8122_v14 = vperm.slane %v7922_v60, 2 }
  0xd3   :  { %v7971_v35 = vpack.c.bf16 %v266_v33, %v266_v33 }
  0xd4   :  { %v7980_v42 = vpack.c.bf16 %v237_v38, %v237_v38  ;;  %273 = vmatpush.bf16.msra.mxu2 %v6569_v34  ;;  %v6556_v38 = vld [vmem:[%s11048_s1 + $0x50] sm:$0xf] }
  0xd5   :  { %v442_v37 = vsel %vm323_vm0, %v7971_v35, 0  ;;  %v922_v11 = vunpack.c.l.b16 %v7971_v35 }
  0xd6   :  { %451 = vmatpush.bf16.xpose.msrb.mxu0 %v442_v37  ;;  %v917_v35 = vunpack.c.l.b16 %v7980_v42 }
  0xd8   :  { %v267_v40 = vpop.f32.mrf.mxu1 }
  0xd9   :  { %v268_v43 = vadd.f32 %v267_v40, %v7925_v61  ;;  %v238_v44 = vpop.f32.mrf.mxu0  ;;  %v6544_v40 = vld [vmem:[%s11048_s1 + $0x38] sm:$0xf] }
  0xda   :  { %v239_v49 = vadd.f32 %v238_v44, %v7929_v0  ;;  %v7254_v44 = vld [vmem:[%s11048_s1 + $0x40] sm:$0xf0] }
  0xdb   :  { %v7985_v46 = vpack.c.bf16 %v268_v43, %v268_v43  ;;  %v6557_v43 = vor.u32 %v7257_v39, %v6556_v38 }
  0xdc   :  { %v7996_v51 = vpack.c.bf16 %v239_v49, %v239_v49  ;;  %v6532_v49 = vld [vmem:[%s11048_s1 + $0x20] sm:$0xf] }
  0xdd   :  { %6609 = vmatmul.msk.bf16.vlgmr.msrb.gmra.mxu3 %vm323_vm0, %v7983_v45  ;;  %6612 = vmatmul.msk.bf16.vlgmr.msrb.gmra.mxu0 %vm323_vm0, %v7980_v42  ;;  %v461_v48 = vsel %vm323_vm0, %v7985_v46, 0  ;;  %v6533_v55 = vor.u32 %v7251_v52, %v6532_v49 }
  0xde   :  { %432 = vmatpush.bf16.xpose.msrb.mxu3 %v423_v47  ;;  %470 = vmatpush.bf16.xpose.msrb.mxu1 %v461_v48  ;;  %v6545_v48 = vor.u32 %v7254_v44, %v6544_v40 }
  0xdf   :  { %274 = vmatpush.bf16.msra.mxu2 %v6557_v43 }
  0xe3   :  { %275 = vmatpush.bf16.msra.mxu2 %v6545_v48 }
  0xe5   :  { %6613 = vmatmul.msk.bf16.vlgmr.msrb.gmra.mxu1 %vm323_vm0, %v7996_v51 }
  0xe7   :  { %276 = vmatpush.bf16.msra.mxu2 %v6533_v55 }
  0xed   :  { %6610 = vmatmul.msk.bf16.vlgmr.msra.gmra.mxu3 %vm323_vm0, %v8001_v54 }
  0xfd   :  { %6611 = vmatmul.msk.bf16.vlgmr.msrb.gmra.mxu3 %vm323_vm0, %v8006_v57 }
 0x130   :  { %v8010_v58 = vpop.f32.mrf.mxu3 }
 0x138   :  { %v341_v62 = vpop.f32.mrf.mxu3 }
 0x140   :  { %v8012_v63 = vpop.f32.mrf.mxu3 }
 0x148   :  { %v360_v1 = vpop.f32.mrf.mxu3 }
 0x149   :  { %v6520_v1 = vld [vmem:[%s11048_s1 + $0x8] sm:$0xf] }
 0x150   :  { %v377_v3 = vpop.f32.mrf.mxu3 }
 0x151   :  { %v8014_v4 = vmul.f32 0.17677669, %v377_v3  ;;  %v7248_v3 = vld [vmem:[%s11048_s1 + $0x10] sm:$0xf0] }
 0x153   :  { %v491_v5 = vsel %vm484_vm1, %v8014_v4, -inf }
 0x154   :  { %492 = vmax.xlane.f32.xlu0 %v491_v5  ;;  %v801_v5 = vunpack.c.l.b16 %v7964_v29 }
 0x156   :  { %v8078_v8 = vpack.c.b16 %v801_v5, %v801_v5 }
 0x158   :  { %v379_v7 = vpop.f32.mrf.mxu3 }
 0x159   :  { %v6521_v7 = vor.u32 %v7248_v3, %v6520_v1 }
 0x15a   :  { %v453_v15 = vpop.f32.mrf.mxu0 }
 0x15b   :  { %v8030_v16 = vmul.f32 0.17677669, %v453_v15  ;;  %277 = vmatpush.bf16.msra.mxu2 %v6521_v7  ;;  %v8148_v7 = vmul.f32 0.17677669, %v8012_v63 }
 0x15d   :  { %v503_v18 = vsel %vm484_vm1, %v8030_v16, -inf }
 0x15e   :  { %504 = vmax.xlane.f32.xlu1 %v503_v18  ;;  %278 = vmatmul.bf16.vlgmr.msra.gmra.mxu2 %v7885_v50 }
 0x160   :  { %v396_v19 = vpop.f32.mrf.mxu3 }
 0x161   :  { %v8040_v24 = vmul.f32 0.17677669, %v396_v19 }
 0x162   :  { %v472_v30 = vpop.f32.mrf.mxu1  ;;  %v455_v31 = vpop.f32.mrf.mxu0 }
 0x163   :  { %v483_v32 = vmul.f32 0.17677669, %v472_v30  ;;  %v494_v33 = vsel %vm484_vm1, %v8040_v24, -inf  ;;  %v8106_v30 = vpack.c.b16 %v806_v28, %v806_v28  ;;  %v830_v31 = vunpack.c.l.b16 %v7983_v45 }
 0x164   :  { %495 = vmax.xlane.f32.xlu0 %v494_v33  ;;  %v946_v33 = vunpack.c.l.b16 %v7996_v51 }
 0x165   :  { %v506_v36 = vsel %vm484_vm1, %v483_v32, -inf }
 0x166   :  { %507 = vmax.xlane.f32.xlu1 %v506_v36  ;;  %v8116_v34 = vpack.c.b16 %v946_v33, %v946_v33  ;;  %v951_v36 = vunpack.c.l.b16 %v7985_v46 }
 0x168   :  { %v398_v37 = vpop.f32.mrf.mxu3  ;;  %v8124_v45 = vpack.c.b16 %v951_v36, %v951_v36  ;;  %v888_v36 = vunpack.c.l.b16 %v8006_v57  ;;  %v476_v57 = vmul.f32 0.17677669, %v8010_v58 }
 0x16a   :  { %v474_v47 = vpop.f32.mrf.mxu1 }
 0x16e   :  { %283 = vmatmul.bf16.gmra.mxu2 %v7895_v53 }
 0x170   :  { %v8069_v62 = vpop.f32.mrf.mxu3 }
 0x178   :  { %803 = vrot.lane.b32.xlu0 %v8078_v8, %s7744_s15  ;;  %v417_v10 = vpop.f32.mrf.mxu3 }
 0x17e   :  { %288 = vmatmul.bf16.gmra.mxu2 %v7905_v56 }
 0x17f   :  { %837 = vrot.lane.b32.xlu1 %v8084_v12, %s7744_s15 }
 0x180   :  { %v434_v29 = vpop.f32.mrf.mxu3 }
 0x181   :  { %v8143_v3 = vmul.f32 0.17677669, %v434_v29  ;;  %v8159_v29 = vmul.f32 0.17677669, %v8069_v62 }
 0x183   :  { %v500_v5 = vsel %vm484_vm1, %v8143_v3, -inf }
 0x188   :  { %v436_v13 = vpop.f32.mrf.mxu3 }
 0x189   :  { %v488_v13 = vsel %vm484_vm1, %v8148_v7, -inf }
 0x18e   :  { %293 = vmatmul.bf16.gmra.mxu2 %v7915_v59 }
 0x1c7   :  { %v493_v15 = vpop.xlane.xlu0 %492 }
 0x1c8   :  { %v511_v17 = vsub.f32 %v8014_v4, %v493_v15 }
 0x1ca   :  { %v521_v18 = vmul.f32 1.442695, %v511_v17  ;;  %v8156_v17 = vpack.c.b16 %v922_v11, %v922_v11 }
 0x1cc   :  { %7408 = vpow2.f32 %v521_v18 }
 0x1d1   :  { %v505_v21 = vpop.xlane.xlu1 %504 }
 0x1d2   :  { %v8092_v50 = vpop.eup %7408  ;;  %v515_v19 = vsub.f32 %v8030_v16, %v505_v21 }
 0x1d3   :  { %v539_v22 = vsel %vm484_vm1, %v8092_v50, 0.0 }
 0x1d4   :  { %v529_v23 = vmul.f32 1.442695, %v515_v19  ;;  %540 = vadd.xlane.f32.xlu2 %v539_v22  ;;  %v497_v19 = vsel %vm484_vm1, %v8159_v29, -inf }
 0x1d6   :  { %7410 = vpow2.f32 %v529_v23 }
 0x1d7   :  { %v496_v51 = vpop.xlane.xlu0 %495 }
 0x1d8   :  { %v512_v40 = vsub.f32 %v8040_v24, %v496_v51 }
 0x1d9   :  { %v508_v53 = vpop.xlane.xlu1 %507 }
 0x1da   :  { %v516_v56 = vsub.f32 %v483_v32, %v508_v53  ;;  %v8111_v32 = vpack.c.b16 %v830_v31, %v830_v31  ;;  %v523_v43 = vmul.f32 1.442695, %v512_v40  ;;  %v8175_v53 = vpack.c.b16 %v917_v35, %v917_v35 }
 0x1db   :  { %v8194_v40 = vpack.c.b16 %v888_v36, %v888_v36 }
 0x1dc   :  { %v8097_v25 = vpop.eup %7410  ;;  %v531_v59 = vmul.f32 1.442695, %v516_v56 }
 0x1dd   :  { %v551_v4 = vsel %vm484_vm1, %v8097_v25, 0.0 }
 0x1de   :  { %7412 = vpow2.f32 %v531_v59  ;;  %552 = vadd.xlane.f32.xlu0 %v551_v4  ;;  %v777_v4 = vunpack.c.l.b16 %v7939_v9 }
 0x1df   :  { %7414 = vpow2.f32 %v523_v43 }
 0x1e0   :  { %v8185_v28 = vpack.c.b16 %v777_v4, %v777_v4 }
 0x1e1   :  { %v279_v37 = vpop.f32.mrf.mxu2 }
 0x1e2   :  { %v280_v38 = vadd.f32 %v279_v37, %v8122_v14 }
 0x1e4   :  { %v8101_v26 = vpop.eup %7412  ;;  %v8129_v39 = vpack.c.bf16 %v280_v38, %v280_v38 }
 0x1e5   :  { %v554_v16 = vsel %vm484_vm1, %v8101_v26, 0.0  ;;  %v8137_v49 = vpop.eup %7414 }
 0x1e6   :  { %555 = vadd.xlane.f32.xlu1 %v554_v16  ;;  %v586_v46 = vsel %vm584_vm2, %v8129_v39, 0  ;;  %v542_v55 = vsel %vm484_vm1, %v8137_v49, 0.0 }
 0x1e7   :  { %595 = vmatpush.bf16.msra.mxu3 %v586_v46 }
 0x1e9   :  { %v281_v60 = vpop.f32.mrf.mxu2 }
 0x1ea   :  { %v282_v15 = vadd.f32 %v281_v60, %v8122_v14  ;;  %v804_v31 = vpop.permute.xlu0 %803 }
 0x1ec   :  { %808 = vrot.lane.b32.xlu2 %v8106_v30, %s7744_s15  ;;  %v8161_v18 = vpack.c.bf16 %v282_v15, %v282_v15 }
 0x1ee   :  { %v605_v62 = vsel %vm584_vm2, %v8161_v18, 0 }
 0x1ef   :  { %614 = vmatpush.bf16.msrb.mxu3 %v605_v62 }
 0x1f1   :  { %v284_v44 = vpop.f32.mrf.mxu2  ;;  %v838_v58 = vpop.permute.xlu1 %837 }
 0x1f2   :  { %832 = vrot.lane.b32.xlu0 %v8111_v32, %s7744_s15  ;;  %v285_v47 = vadd.f32 %v284_v44, %v8122_v14  ;;  %v843_v62 = vsel %vm323_vm0, %v838_v58, 0 }
 0x1f4   :  { %v8135_v48 = vpack.c.bf16 %v285_v47, %v285_v47 }
 0x1f6   :  { %v624_v52 = vsel %vm584_vm2, %v8135_v48, 0 }
 0x1f7   :  { %633 = vmatpush.bf16.msra.mxu0 %v624_v52 }
 0x1f9   :  { %v286_v24 = vpop.f32.mrf.mxu2 }
 0x1fa   :  { %948 = vrot.lane.b32.xlu0 %v8116_v34, %s7744_s15  ;;  %v287_v42 = vadd.f32 %v286_v24, %v8122_v14 }
 0x1fc   :  { %v8180_v56 = vpack.c.bf16 %v287_v42, %v287_v42 }
 0x1fe   :  { %v643_v59 = vsel %vm584_vm2, %v8180_v56, 0 }
 0x1ff   :  { %953 = vrot.lane.b32.xlu1 %v8124_v45, %s7744_s15  ;;  %652 = vmatpush.bf16.msra.mxu1 %v643_v59 }
 0x201   :  { %v289_v1 = vpop.f32.mrf.mxu2 }
 0x202   :  { %v290_v33 = vadd.f32 %v289_v1, %v8122_v14 }
 0x204   :  { %v8191_v37 = vpack.c.bf16 %v290_v33, %v290_v33 }
 0x206   :  { %v662_v43 = vsel %vm584_vm2, %v8191_v37, 0 }
 0x207   :  { %671 = vmatpush.bf16.msrb.mxu2 %v662_v43 }
 0x209   :  { %v8150_v10 = vpop.f32.mrf.mxu2 }
 0x211   :  { %v294_v63 = vpop.f32.mrf.mxu2 }
 0x212   :  { %v295_v21 = vadd.f32 %v294_v63, %v8122_v14 }
 0x214   :  { %v8169_v22 = vpack.c.bf16 %v295_v21, %v295_v21 }
 0x215   :  { %543 = vadd.xlane.f32.xlu2 %v542_v55  ;;  %v485_v55 = vsel %vm484_vm1, %v476_v57, -inf }
 0x216   :  { %v700_v23 = vsel %vm584_vm2, %v8169_v22, 0 }
 0x217   :  { %709 = vmatpush.bf16.msrb.mxu0 %v700_v23 }
 0x219   :  { %v296_v47 = vpop.f32.mrf.mxu2 }
 0x21a   :  { %v297_v24 = vadd.f32 %v296_v47, %v8122_v14 }
 0x21c   :  { %v8206_v1 = vpack.c.bf16 %v297_v24, %v297_v24 }
 0x21e   :  { %v719_v11 = vsel %vm584_vm2, %v8206_v1, 0 }
 0x21f   :  { %728 = vmatpush.bf16.msrb.mxu1 %v719_v11 }
 0x224   :  { %501 = vmax.xlane.f32.xlu0 %v500_v5 }
 0x229   :  { %489 = vmax.xlane.f32.xlu1 %v488_v13 }
 0x22d   :  { %924 = vrot.lane.b32.xlu2 %v8156_v17, %s7744_s15 }
 0x231   :  { %498 = vmax.xlane.f32.xlu1 %v497_v19 }
 0x235   :  { %919 = vrot.lane.b32.xlu2 %v8175_v53, %s7744_s15 }
 0x247   :  { %v541_v16 = vpop.xlane.xlu2 %540 }
 0x248   :  { %7416 = vrcp.f32 %v541_v16 }
 0x24a   :  { %779 = vrot.lane.b32.xlu1 %v8185_v28, %s7744_s15 }
 0x24e   :  { %v7417_v38 = vpop.eup %7416 }
 0x24f   :  { %v567_v51 = vmul.f32 %v7417_v38, %v8092_v50  ;;  %v809_v46 = vpop.permute.xlu2 %808 }
 0x250   :  { %v814_v44 = vsel %vm323_vm0, %v809_v46, 0 }
 0x251   :  { %v575_v9 = vpack.c.bf16 %v567_v51, %v567_v51  ;;  %v553_v60 = vpop.xlane.xlu0 %552 }
 0x252   :  { %890 = vrot.lane.b32.xlu1 %v8194_v40, %s7744_s15  ;;  %7418 = vrcp.f32 %v553_v60 }
 0x253   :  { %6616 = vmatmul.msk.bf16.vlgmr.msra.gmra.mxu0 %vm484_vm1, %v575_v9 }
 0x254   :  { %823 = vmatpush.bf16.xpose.msra.mxu0 %v814_v44 }
 0x258   :  { %v7419_v50 = vpop.eup %7418 }
 0x259   :  { %v571_v52 = vmul.f32 %v7419_v50, %v8097_v25  ;;  %v556_v25 = vpop.xlane.xlu1 %555 }
 0x25b   :  { %v579_v5 = vpack.c.bf16 %v571_v52, %v571_v52 }
 0x25e   :  { %486 = vmax.xlane.f32.xlu2 %v485_v55 }
 0x263   :  { %6620 = vmatmul.msk.bf16.vlgmr.msrb.gmra.mxu0 %vm484_vm1, %v579_v5 }
 0x264   :  { %v833_v46 = vpop.permute.xlu0 %832 }
 0x26c   :  { %v949_v9 = vpop.permute.xlu0 %948 }
 0x271   :  { %v954_v23 = vpop.permute.xlu1 %953 }
 0x272   :  { %v959_v36 = vsel %vm323_vm0, %v954_v23, 0 }
 0x273   :  { %6624 = vmatmul.msk.bf16.vlgmr.msra.gmra.mxu0 %vm323_vm0, %v804_v31 }
 0x288   :  { %v544_v13 = vpop.xlane.xlu2 %543 }
 0x289   :  { %7420 = vrcp.f32 %v544_v13 }
 0x28a   :  { %7422 = vrcp.f32 %v556_v25 }
 0x28f   :  { %v7421_v15 = vpop.eup %7420 }
 0x290   :  { %v568_v63 = vmul.f32 %v7421_v15, %v8137_v49  ;;  %v925_v21 = vpop.permute.xlu2 %924  ;;  %v7423_v59 = vpop.eup %7422 }
 0x291   :  { %v930_v35 = vsel %vm323_vm0, %v925_v21, 0  ;;  %v572_v49 = vmul.f32 %v7423_v59, %v8101_v26 }
 0x292   :  { %v576_v19 = vpack.c.bf16 %v568_v63, %v568_v63  ;;  %939 = vmatpush.bf16.xpose.msrb.mxu0 %v930_v35  ;;  %v1127_v35 = vunpack.c.l.b16 %v8135_v48 }
 0x293   :  { %v580_v33 = vpack.c.bf16 %v572_v49, %v572_v49 }
 0x294   :  { %6617 = vmatmul.msk.bf16.vlgmr.msra.gmra.mxu1 %vm484_vm1, %v576_v19  ;;  %v748_v19 = vunpack.c.l.b16 %v7931_v2  ;;  %v8256_v23 = vpack.c.b16 %v1127_v35, %v1127_v35 }
 0x295   :  { %852 = vmatpush.bf16.xpose.msra.mxu1 %v843_v62 }
 0x297   :  { %v502_v2 = vpop.xlane.xlu0 %501 }
 0x298   :  { %v920_v42 = vpop.permute.xlu2 %919 }
 0x299   :  { %6628 = vmatmul.msk.bf16.vlgmr.msrb.gmra.mxu0 %vm323_vm0, %v920_v42  ;;  %v743_v42 = vunpack.c.l.b16 %v7936_v6 }
 0x29b   :  { %v8265_v59 = vpack.c.b16 %v743_v42, %v743_v42 }
 0x29c   :  { %v490_v4 = vpop.xlane.xlu1 %489 }
 0x29d   :  { %v510_v16 = vsub.f32 %v8148_v7, %v490_v4  ;;  %v893_v7 = vunpack.c.l.b16 %v7978_v41 }
 0x29f   :  { %v519_v31 = vmul.f32 1.442695, %v510_v16  ;;  %v8227_v26 = vpack.c.b16 %v893_v7, %v893_v7  ;;  %v514_v16 = vsub.f32 %v8143_v3, %v502_v2 }
 0x2a1   :  { %7424 = vpow2.f32 %v519_v31  ;;  %v527_v31 = vmul.f32 1.442695, %v514_v16 }
 0x2a4   :  { %6621 = vmatmul.msk.bf16.vlgmr.msrb.gmra.mxu1 %vm484_vm1, %v580_v33  ;;  %v499_v44 = vpop.xlane.xlu1 %498 }
 0x2a5   :  { %968 = vmatpush.bf16.xpose.msrb.mxu1 %v959_v36  ;;  %v513_v52 = vsub.f32 %v8159_v29, %v499_v44  ;;  %v772_v29 = vunpack.c.l.b16 %v7952_v20  ;;  %v8260_v20 = vpack.c.b16 %v748_v19, %v748_v19  ;;  %v1223_v19 = vunpack.c.l.b16 %v8169_v22 }
 0x2a7   :  { %v8221_v38 = vpop.eup %7424  ;;  %v525_v24 = vmul.f32 1.442695, %v513_v52  ;;  %v8250_v21 = vpack.c.b16 %v772_v29, %v772_v29  ;;  %v8302_v42 = vpack.c.b16 %v1223_v19, %v1223_v19 }
 0x2a8   :  { %v536_v51 = vsel %vm484_vm1, %v8221_v38, 0.0 }
 0x2a9   :  { %537 = vadd.xlane.f32.xlu0 %v536_v51 }
 0x2b4   :  { %6625 = vmatmul.msk.bf16.vlgmr.msra.gmra.mxu1 %vm323_vm0, %v833_v46 }
 0x2bd   :  { %895 = vrot.lane.b32.xlu0 %v8227_v26, %s7744_s15 }
 0x2c4   :  { %6629 = vmatmul.msk.bf16.vlgmr.msrb.gmra.mxu1 %vm323_vm0, %v949_v9 }
 0x2d0   :  { %v8232_v60 = vpop.f32.mrf.mxu0 }
 0x2d1   :  { %v487_v43 = vpop.xlane.xlu2 %486 }
 0x2d2   :  { %v509_v50 = vsub.f32 %v476_v57, %v487_v43 }
 0x2d4   :  { %v517_v47 = vmul.f32 1.442695, %v509_v50 }
 0x2d6   :  { %7426 = vpow2.f32 %v517_v47 }
 0x2d7   :  { %7428 = vpow2.f32 %v525_v24 }
 0x2d8   :  { %v637_v55 = vpop.f32.mrf.mxu0  ;;  %7430 = vpow2.f32 %v527_v31 }
 0x2d9   :  { %v864_v55 = vunpack.c.l.b16 %v7962_v27  ;;  %v292_v27 = vadd.f32 %v8150_v10, %v8122_v14 }
 0x2db   :  { %v8304_v16 = vpack.c.bf16 %v292_v27, %v292_v27 }
 0x2dc   :  { %v8235_v41 = vpop.eup %7426 }
 0x2dd   :  { %v533_v5 = vsel %vm484_vm1, %v8235_v41, 0.0  ;;  %v8241_v58 = vpop.eup %7428  ;;  %v681_v10 = vsel %vm584_vm2, %v8304_v16, 0 }
 0x2de   :  { %534 = vadd.xlane.f32.xlu2 %v533_v5  ;;  %v545_v57 = vsel %vm484_vm1, %v8241_v58, 0.0  ;;  %v8278_v46 = vpop.eup %7430 }
 0x2df   :  { %v548_v7 = vsel %vm484_vm1, %v8278_v46, 0.0 }
 0x2e0   :  { %v8239_v11 = vpop.f32.mrf.mxu0 }
 0x2e7   :  { %546 = vadd.xlane.f32.xlu0 %v545_v57 }
 0x2e8   :  { %v713_v13 = vpop.f32.mrf.mxu0 }
 0x2e9   :  { %v8295_v13 = vpack.c.b16 %v864_v55, %v864_v55 }
 0x2f0   :  { %v825_v25 = vpop.f32.mrf.mxu0 }
 0x2f1   :  { %v8246_v15 = vmul.f32 0.17677669, %v825_v25 }
 0x2f3   :  { %v988_v63 = vsel %vm484_vm1, %v8246_v15, -inf }
 0x2f4   :  { %989 = vmax.xlane.f32.xlu1 %v988_v63 }
 0x2f6   :  { %774 = vrot.lane.b32.xlu2 %v8250_v21, %s7744_s15 }
 0x2f8   :  { %v827_v62 = vpop.f32.mrf.mxu0 }
 0x2f9   :  { %v780_v62 = vpop.permute.xlu1 %779 }
 0x2fb   :  { %1129 = vrot.lane.b32.xlu0 %v8256_v23, %s7744_s15 }
 0x2fe   :  { %750 = vrot.lane.b32.xlu2 %v8260_v20, %s7744_s15 }
 0x301   :  { %v8314_v22 = vpop.permute.xlu1 %890 }
 0x30d   :  { %745 = vrot.lane.b32.xlu1 %v8265_v59, %s7744_s15 }
 0x311   :  { %v8269_v48 = vpop.f32.mrf.mxu1 }
 0x316   :  { %v941_v49 = vpop.f32.mrf.mxu0 }
 0x317   :  { %v8282_v43 = vmul.f32 0.17677669, %v941_v49 }
 0x319   :  { %v656_v33 = vpop.f32.mrf.mxu1  ;;  %v1000_v3 = vsel %vm484_vm1, %v8282_v43, -inf }
 0x31c   :  { %v538_v25 = vpop.xlane.xlu0 %537 }
 0x31e   :  { %v943_v36 = vpop.f32.mrf.mxu0 }
 0x321   :  { %v8274_v51 = vpop.f32.mrf.mxu1 }
 0x327   :  { %549 = vadd.xlane.f32.xlu2 %v548_v7 }
 0x329   :  { %v732_v9 = vpop.f32.mrf.mxu1 }
 0x32f   :  { %1001 = vmax.xlane.f32.xlu2 %v1000_v3  ;;  %v896_v35 = vpop.permute.xlu0 %895 }
 0x331   :  { %v854_v44 = vpop.f32.mrf.mxu1 }
 0x332   :  { %v8286_v50 = vmul.f32 0.17677669, %v854_v44 }
 0x334   :  { %v991_v47 = vsel %vm484_vm1, %v8286_v50, -inf }
 0x335   :  { %992 = vmax.xlane.f32.xlu0 %v991_v47 }
 0x339   :  { %v856_v52 = vpop.f32.mrf.mxu1 }
 0x341   :  { %v970_v24 = vpop.f32.mrf.mxu1 }
 0x342   :  { %v8291_v5 = vmul.f32 0.17677669, %v970_v24 }
 0x344   :  { %v1003_v57 = vsel %vm484_vm1, %v8291_v5, -inf }
 0x345   :  { %1004 = vmax.xlane.f32.xlu0 %v1003_v57 }
 0x347   :  { %866 = vrot.lane.b32.xlu2 %v8295_v13, %s7744_s15 }
 0x349   :  { %v972_v29 = vpop.f32.mrf.mxu1 }
 0x351   :  { %v535_v63 = vpop.xlane.xlu2 %534 }
 0x352   :  { %7432 = vrcp.f32 %v535_v63 }
 0x358   :  { %v7433_v2 = vpop.eup %7432 }
 0x359   :  { %v565_v49 = vmul.f32 %v7433_v2, %v8235_v41  ;;  %v8307_v31 = vpop.permute.xlu2 %774  ;;  %1225 = vrot.lane.b32.xlu0 %v8302_v42, %s7744_s15 }
 0x35a   :  { %v547_v33 = vpop.xlane.xlu0 %546 }
 0x35b   :  { %v573_v36 = vpack.c.bf16 %v565_v49, %v565_v49  ;;  %7434 = vrcp.f32 %v547_v33 }
 0x35c   :  { %7436 = vrcp.f32 %v538_v25  ;;  %v785_v25 = vsel %vm323_vm0, %v780_v62, 0  ;;  %v1247_v62 = vunpack.c.l.b16 %v8206_v1 }
 0x35d   :  { %6614 = vmatmul.msk.bf16.vlgmr.msra.gmra.mxu3 %vm484_vm1, %v573_v36 }
 0x35e   :  { %690 = vmatpush.bf16.msra.mxu3 %v681_v10  ;;  %v8335_v49 = vpack.c.b16 %v1247_v62, %v1247_v62 }
 0x361   :  { %v7435_v7 = vpop.eup %7434  ;;  %v751_v9 = vpop.permute.xlu2 %750 }
 0x362   :  { %v756_v41 = vsel %vm323_vm0, %v751_v9, 0  ;;  %v569_v3 = vmul.f32 %v7435_v7, %v8241_v58  ;;  %v7437_v44 = vpop.eup %7436 }
 0x363   :  { %765 = vmatpush.bf16.xpose.msra.mxu2 %v756_v41  ;;  %v566_v52 = vmul.f32 %v7437_v44, %v8221_v38  ;;  %v901_v41 = vsel %vm323_vm0, %v896_v35, 0 }
 0x364   :  { %v577_v47 = vpack.c.bf16 %v569_v3, %v569_v3 }
 0x365   :  { %v574_v29 = vpack.c.bf16 %v566_v52, %v566_v52 }
 0x366   :  { %6618 = vmatmul.msk.bf16.vlgmr.msrb.gmra.mxu2 %vm484_vm1, %v577_v47 }
 0x367   :  { %v990_v55 = vpop.xlane.xlu1 %989 }
 0x368   :  { %v1008_v24 = vsub.f32 %v8246_v15, %v990_v55  ;;  %v859_v15 = vunpack.c.l.b16 %v8001_v54 }
 0x36a   :  { %v1018_v57 = vmul.f32 1.442695, %v1008_v24  ;;  %v8330_v2 = vpack.c.b16 %v859_v15, %v859_v15 }
 0x36c   :  { %7438 = vpow2.f32 %v1018_v57  ;;  %v1151_v57 = vunpack.c.l.b16 %v8180_v56 }
 0x36d   :  { %6615 = vmatmul.msk.bf16.vlgmr.msrb.gmra.mxu3 %vm484_vm1, %v574_v29  ;;  %v1130_v63 = vpop.permute.xlu0 %1129 }
 0x36e   :  { %794 = vmatpush.bf16.xpose.msrb.mxu3 %v785_v25  ;;  %v1135_v58 = vsel %vm584_vm2, %v1130_v63, 0  ;;  %v8374_v25 = vpack.c.b16 %v1151_v57, %v1151_v57 }
 0x36f   :  { %1144 = vmatpush.bf16.msra.mxu0 %v1135_v58 }
 0x372   :  { %v8324_v19 = vpop.eup %7438 }
 0x373   :  { %v1036_v38 = vsel %vm484_vm1, %v8324_v19, 0.0 }
 0x374   :  { %1037 = vadd.xlane.f32.xlu2 %v1036_v38 }
 0x37f   :  { %v746_v27 = vpop.permute.xlu1 %745 }
 0x380   :  { %6622 = vmatmul.msk.bf16.vlgmr.msra.gmra.mxu2 %vm323_vm0, %v746_v27 }
 0x38c   :  { %861 = vrot.lane.b32.xlu2 %v8330_v2, %s7744_s15 }
 0x394   :  { %1249 = vrot.lane.b32.xlu2 %v8335_v49, %s7744_s15 }
 0x39a   :  { %v550_v33 = vpop.xlane.xlu2 %549 }
 0x39b   :  { %7440 = vrcp.f32 %v550_v33 }
 0x39c   :  { %1409 = vrot.lane.b32.xlu2 %v8185_v28, %s7745_s16 }
 0x3a1   :  { %v7441_v36 = vpop.eup %7440 }
 0x3a2   :  { %v570_v54 = vmul.f32 %v7441_v36, %v8278_v46  ;;  %v1002_v10 = vpop.xlane.xlu2 %1001 }
 0x3a3   :  { %v1012_v7 = vsub.f32 %v8282_v43, %v1002_v10 }
 0x3a4   :  { %v578_v9 = vpack.c.bf16 %v570_v54, %v570_v54  ;;  %1407 = vrot.lane.b32.xlu2 %v8250_v21, %s7745_s16 }
 0x3a5   :  { %v1026_v1 = vmul.f32 1.442695, %v1012_v7 }
 0x3a6   :  { %6619 = vmatmul.msk.bf16.vlgmr.msra.gmra.mxu3 %vm484_vm1, %v578_v9 }
 0x3a7   :  { %7442 = vpow2.f32 %v1026_v1  ;;  %910 = vmatpush.bf16.xpose.msra.mxu3 %v901_v41 }
 0x3a8   :  { %v993_v3 = vpop.xlane.xlu0 %992 }
 0x3a9   :  { %v1009_v44 = vsub.f32 %v8286_v50, %v993_v3 }
 0x3aa   :  { %v867_v47 = vpop.permute.xlu2 %866 }
 0x3ab   :  { %v1020_v52 = vmul.f32 1.442695, %v1009_v44  ;;  %v872_v46 = vsel %vm323_vm0, %v867_v47, 0 }
 0x3ac   :  { %1455 = vrot.lane.b32.xlu2 %v8084_v12, %s7745_s16  ;;  %881 = vmatpush.bf16.xpose.msrb.mxu2 %v872_v46 }
 0x3ad   :  { %v7443_v43 = vpop.eup %7442  ;;  %7444 = vpow2.f32 %v1020_v52 }
 0x3ae   :  { %v1048_v55 = vsel %vm484_vm1, %v7443_v43, 0.0 }
 0x3af   :  { %1049 = vadd.xlane.f32.xlu0 %v1048_v55 }
 0x3b3   :  { %v8352_v35 = vpop.eup %7444 }
 0x3b4   :  { %1453 = vrot.lane.b32.xlu2 %v8111_v32, %s7745_s16  ;;  %v1039_v50 = vsel %vm484_vm1, %v8352_v35, 0.0 }
 0x3b5   :  { %1040 = vadd.xlane.f32.xlu1 %v1039_v50 }
 0x3b6   :  { %6623 = vmatmul.msk.bf16.vlgmr.msrb.gmra.mxu3 %vm323_vm0, %v8307_v31 }
 0x3b8   :  { %v1005_v24 = vpop.xlane.xlu0 %1004 }
 0x3bc   :  { %1524 = vrot.lane.b32.xlu2 %v8156_v17, %s7745_s16 }
 0x3c3   :  { %1386 = vrot.lane.b32.xlu0 %v8260_v20, %s7745_s16 }
 0x3c4   :  { %1522 = vrot.lane.b32.xlu2 %v8175_v53, %s7745_s16 }
 0x3c6   :  { %6627 = vmatmul.msk.bf16.vlgmr.msra.gmra.mxu3 %vm323_vm0, %v8314_v22  ;;  %v1013_v22 = vsub.f32 %v8291_v5, %v1005_v24 }
 0x3c8   :  { %v1028_v27 = vmul.f32 1.442695, %v1013_v22 }
 0x3cb   :  { %1384 = vrot.lane.b32.xlu0 %v8265_v59, %s7745_s16  ;;  %v1226_v29 = vpop.permute.xlu0 %1225 }
 0x3cc   :  { %v1231_v31 = vsel %vm584_vm2, %v1226_v29, 0  ;;  %1545 = vrot.lane.b32.xlu2 %v8116_v34, %s7745_s16 }
 0x3cd   :  { %1240 = vmatpush.bf16.msrb.mxu0 %v1231_v31 }
 0x3ce   :  { %1153 = vrot.lane.b32.xlu1 %v8374_v25, %s7744_s15 }
 0x3d3   :  { %1432 = vrot.lane.b32.xlu0 %v8106_v30, %s7745_s16 }
 0x3db   :  { %1430 = vrot.lane.b32.xlu0 %v8078_v8, %s7745_s16 }
 0x3e0   :  { %v8382_v56 = vpop.f32.mrf.mxu3 }
 0x3e3   :  { %1478 = vrot.lane.b32.xlu0 %v8295_v13, %s7745_s16 }
 0x3e7   :  { %v1038_v63 = vpop.xlane.xlu2 %1037 }
 0x3e8   :  { %7446 = vrcp.f32 %v1038_v63  ;;  %v599_v58 = vpop.f32.mrf.mxu3 }
 0x3e9   :  { %v8387_v38 = vpop.f32.mrf.mxu2  ;;  %7448 = vpow2.f32 %v1028_v27 }
 0x3eb   :  { %1476 = vrot.lane.b32.xlu0 %v8330_v2, %s7745_s16 }
 0x3ee   :  { %v7447_v15 = vpop.eup %7446 }
 0x3ef   :  { %v1064_v62 = vmul.f32 %v7447_v15, %v8324_v19  ;;  %v862_v33 = vpop.permute.xlu2 %861  ;;  %v8400_v7 = vpop.eup %7448 }
 0x3f0   :  { %v8392_v36 = vpop.f32.mrf.mxu3  ;;  %6626 = vmatmul.msk.bf16.vlgmr.msrb.gmra.mxu2 %vm323_vm0, %v862_v33  ;;  %v1051_v19 = vsel %vm484_vm1, %v8400_v7, 0.0 }
 0x3f1   :  { %v1072_v54 = vpack.c.bf16 %v1064_v62, %v1064_v62  ;;  %v675_v10 = vpop.f32.mrf.mxu2 }
 0x3f3   :  { %1499 = vrot.lane.b32.xlu0 %v8194_v40, %s7745_s16  ;;  %6632 = vmatmul.msk.bf16.vlgmr.msra.gmra.mxu0 %vm484_vm1, %v1072_v54 }
 0x3f7   :  { %v1250_v47 = vpop.permute.xlu2 %1249 }
 0x3f8   :  { %1052 = vadd.xlane.f32.xlu1 %v1051_v19  ;;  %v618_v9 = vpop.f32.mrf.mxu3 }
 0x3fb   :  { %1547 = vrot.lane.b32.xlu0 %v8124_v45, %s7745_s16 }
 0x3ff   :  { %v1410_v57 = vpop.permute.xlu2 %1409 }
 0x403   :  { %v767_v1 = vpop.f32.mrf.mxu2 }
 0x404   :  { %v8406_v41 = vmul.f32 0.17677669, %v767_v1 }
 0x406   :  { %v982_v3 = vsel %vm484_vm1, %v8406_v41, -inf }
 0x407   :  { %983 = vmax.xlane.f32.xlu2 %v982_v3  ;;  %v8417_v58 = vpop.permute.xlu2 %1407 }
 0x40b   :  { %v769_v44 = vpop.f32.mrf.mxu2 }
 0x40c   :  { %v1255_v44 = vsel %vm584_vm2, %v1250_v47, 0 }
 0x40f   :  { %v1456_v19 = vpop.permute.xlu2 %1455 }
 0x411   :  { %1501 = vrot.lane.b32.xlu1 %v8227_v26, %s7745_s16 }
 0x422   :  { %v1050_v52 = vpop.xlane.xlu0 %1049 }
 0x423   :  { %7450 = vrcp.f32 %v1050_v52 }
 0x428   :  { %v1041_v22 = vpop.xlane.xlu1 %1040 }
 0x429   :  { %v7451_v46 = vpop.eup %7450  ;;  %v8412_v55 = vpop.f32.mrf.mxu3  ;;  %7452 = vrcp.f32 %v1041_v22 }
 0x42a   :  { %v1068_v50 = vmul.f32 %v7451_v46, %v7443_v43  ;;  %v1415_v46 = vsel %vm323_vm0, %v1410_v57, 0 }
 0x42c   :  { %v1076_v29 = vpack.c.bf16 %v1068_v50, %v1068_v50 }
 0x42e   :  { %6636 = vmatmul.msk.bf16.vlgmr.msrb.gmra.mxu0 %vm484_vm1, %v1076_v29 }
 0x42f   :  { %v7453_v43 = vpop.eup %7452 }
 0x430   :  { %v1065_v10 = vmul.f32 %v7453_v43, %v8352_v35 }
 0x431   :  { %v694_v31 = vpop.f32.mrf.mxu3 }
 0x432   :  { %v1073_v52 = vpack.c.bf16 %v1065_v10, %v1065_v10  ;;  %v1454_v31 = vpop.permute.xlu2 %1453  ;;  %v1103_v10 = vunpack.c.l.b16 %v8161_v18 }
 0x435   :  { %v1387_v63 = vpop.permute.xlu0 %1386 }
 0x436   :  { %v1392_v27 = vsel %vm323_vm0, %v1387_v63, 0 }
 0x437   :  { %1401 = vmatpush.bf16.xpose.msra.mxu0 %v1392_v27 }
 0x439   :  { %v796_v15 = vpop.f32.mrf.mxu3 }
 0x43a   :  { %v8420_v62 = vmul.f32 0.17677669, %v796_v15  ;;  %v1525_v57 = vpop.permute.xlu2 %1524 }
 0x43c   :  { %v985_v33 = vsel %vm484_vm1, %v8420_v62, -inf }
 0x43d   :  { %v1385_v54 = vpop.permute.xlu0 %1384  ;;  %986 = vmax.xlane.f32.xlu0 %v985_v33  ;;  %v1530_v33 = vsel %vm323_vm0, %v1525_v57, 0 }
 0x43e   :  { %6662 = vmatmul.msk.bf16.vlgmr.msra.gmra.mxu0 %vm323_vm0, %v1385_v54 }
 0x440   :  { %v1154_v9 = vpop.permute.xlu1 %1153 }
 0x441   :  { %v1159_v1 = vsel %vm584_vm2, %v1154_v9, 0  ;;  %v798_v3 = vpop.f32.mrf.mxu3  ;;  %v8440_v9 = vpack.c.b16 %v1103_v10, %v1103_v10 }
 0x442   :  { %1168 = vmatpush.bf16.msra.mxu1 %v1159_v1  ;;  %v1175_v1 = vunpack.c.l.b16 %v8191_v37  ;;  %v1523_v3 = vpop.permute.xlu2 %1522 }
 0x445   :  { %6633 = vmatmul.msk.bf16.vlgmr.msra.gmra.mxu1 %vm484_vm1, %v1073_v52  ;;  %v1433_v50 = vpop.permute.xlu0 %1432  ;;  %v8445_v52 = vpack.c.b16 %v1175_v1, %v1175_v1 }
 0x446   :  { %1264 = vmatpush.bf16.msrb.mxu1 %v1255_v44  ;;  %v1438_v29 = vsel %vm323_vm0, %v1433_v50, 0 }
 0x447   :  { %1447 = vmatpush.bf16.xpose.msrb.mxu0 %v1438_v29 }
 0x449   :  { %v912_v35 = vpop.f32.mrf.mxu3 }
 0x44a   :  { %1424 = vmatpush.bf16.xpose.msra.mxu1 %v1415_v46  ;;  %v8431_v22 = vmul.f32 0.17677669, %v912_v35  ;;  %v1199_v46 = vunpack.c.l.b16 %v8304_v16  ;;  %v1546_v29 = vpop.permute.xlu2 %1545 }
 0x44c   :  { %v997_v63 = vsel %vm484_vm1, %v8431_v22, -inf }
 0x44d   :  { %v1431_v47 = vpop.permute.xlu0 %1430  ;;  %998 = vmax.xlane.f32.xlu1 %v997_v63 }
 0x44e   :  { %6664 = vmatmul.msk.bf16.vlgmr.msrb.gmra.mxu0 %vm323_vm0, %v1431_v47  ;;  %v8454_v47 = vpack.c.b16 %v1199_v46, %v1199_v46  ;;  %v1079_v46 = vunpack.c.l.b16 %v8129_v39 }
 0x451   :  { %v914_v27 = vpop.f32.mrf.mxu3 }
 0x455   :  { %v1479_v15 = vpop.permute.xlu0 %1478 }
 0x456   :  { %v1484_v43 = vsel %vm323_vm0, %v1479_v15, 0  ;;  %v1461_v15 = vsel %vm323_vm0, %v1456_v19, 0 }
 0x457   :  { %1493 = vmatpush.bf16.xpose.msra.mxu0 %v1484_v43 }
 0x45d   :  { %v1477_v54 = vpop.permute.xlu0 %1476 }
 0x45e   :  { %6666 = vmatmul.msk.bf16.vlgmr.msra.gmra.mxu0 %vm323_vm0, %v1477_v54 }
 0x45f   :  { %1539 = vmatpush.bf16.xpose.msrb.mxu0 %v1530_v33 }
 0x465   :  { %v1500_v19 = vpop.permute.xlu0 %1499 }
 0x466   :  { %1105 = vrot.lane.b32.xlu1 %v8440_v9, %s7744_s15 }
 0x46b   :  { %v1053_v44 = vpop.xlane.xlu1 %1052 }
 0x46c   :  { %7454 = vrcp.f32 %v1053_v44 }
 0x46e   :  { %6668 = vmatmul.msk.bf16.vlgmr.msrb.gmra.mxu0 %vm323_vm0, %v1523_v3  ;;  %1177 = vrot.lane.b32.xlu1 %v8445_v52, %s7744_s15 }
 0x470   :  { %v8451_v18 = vpop.f32.mrf.mxu0 }
 0x472   :  { %v7455_v50 = vpop.eup %7454 }
 0x473   :  { %v1069_v35 = vmul.f32 %v7455_v50, %v8400_v7  ;;  %v883_v63 = vpop.f32.mrf.mxu2 }
 0x474   :  { %v978_v37 = vmul.f32 0.17677669, %v883_v63 }
 0x475   :  { %v1077_v27 = vpack.c.bf16 %v1069_v35, %v1069_v35  ;;  %v8476_v35 = vpack.c.b16 %v1079_v46, %v1079_v46 }
 0x476   :  { %1777 = vrot.lane.b32.xlu1 %v8454_v47, %s7745_s16  ;;  %v994_v57 = vsel %vm484_vm1, %v978_v37, -inf }
 0x477   :  { %995 = vmax.xlane.f32.xlu2 %v994_v57  ;;  %6637 = vmatmul.msk.bf16.vlgmr.msrb.gmra.mxu1 %vm484_vm1, %v1077_v27 }
 0x478   :  { %1470 = vmatpush.bf16.xpose.msrb.mxu1 %v1461_v15  ;;  %v1148_v16 = vpop.f32.mrf.mxu0 }
 0x47a   :  { %v984_v43 = vpop.xlane.xlu2 %983 }
 0x47b   :  { %v1006_v7 = vsub.f32 %v8406_v41, %v984_v43  ;;  %v885_v33 = vpop.f32.mrf.mxu2  ;;  %v1548_v41 = vpop.permute.xlu0 %1547 }
 0x47c   :  { %v1553_v50 = vsel %vm323_vm0, %v1548_v41, 0 }
 0x47d   :  { %v1014_v54 = vmul.f32 1.442695, %v1006_v7 }
 0x47f   :  { %7456 = vpow2.f32 %v1014_v54 }
 0x483   :  { %v1502_v10 = vpop.permute.xlu1 %1501 }
 0x484   :  { %v1507_v44 = vsel %vm323_vm0, %v1502_v10, 0 }
 0x485   :  { %v8462_v1 = vpop.eup %7456 }
 0x486   :  { %v1030_v3 = vsel %vm484_vm1, %v8462_v1, 0.0 }
 0x487   :  { %6663 = vmatmul.msk.bf16.vlgmr.msra.gmra.mxu1 %vm323_vm0, %v8417_v58  ;;  %1031 = vadd.xlane.f32.xlu0 %v1030_v3 }
 0x488   :  { %1516 = vmatpush.bf16.xpose.msra.mxu1 %v1507_v44 }
 0x48f   :  { %1201 = vrot.lane.b32.xlu2 %v8454_v47, %s7744_s15 }
 0x497   :  { %1693 = vrot.lane.b32.xlu2 %v8440_v9, %s7745_s16  ;;  %6665 = vmatmul.msk.bf16.vlgmr.msrb.gmra.mxu1 %vm323_vm0, %v1454_v31 }
 0x498   :  { %1562 = vmatpush.bf16.xpose.msrb.mxu1 %v1553_v50 }
 0x49b   :  { %1081 = vrot.lane.b32.xlu0 %v8476_v35, %s7744_s15 }
 0x4a7   :  { %6667 = vmatmul.msk.bf16.vlgmr.msra.gmra.mxu1 %vm323_vm0, %v1500_v19 }
 0x4ab   :  { %v8481_v58 = vpop.f32.mrf.mxu0 }
 0x4b0   :  { %v987_v63 = vpop.xlane.xlu0 %986 }
 0x4b1   :  { %v1007_v39 = vsub.f32 %v8420_v62, %v987_v63 }
 0x4b3   :  { %v1244_v27 = vpop.f32.mrf.mxu0  ;;  %v1016_v57 = vmul.f32 1.442695, %v1007_v39 }
 0x4b5   :  { %7458 = vpow2.f32 %v1016_v57 }
 0x4b7   :  { %6669 = vmatmul.msk.bf16.vlgmr.msrb.gmra.mxu1 %vm323_vm0, %v1546_v29 }
 0x4bb   :  { %v8485_v15 = vpop.f32.mrf.mxu0  ;;  %v8487_v31 = vpop.eup %7458 }
 0x4bc   :  { %v1033_v7 = vsel %vm484_vm1, %v8487_v31, 0.0 }
 0x4c0   :  { %v999_v29 = vpop.xlane.xlu1 %998 }
 0x4c1   :  { %v1011_v27 = vsub.f32 %v8431_v22, %v999_v29 }
 0x4c2   :  { %v8489_v16 = vpop.f32.mrf.mxu1 }
 0x4c3   :  { %v1405_v43 = vpop.f32.mrf.mxu0 }
 0x4c4   :  { %v1024_v43 = vmul.f32 1.442695, %v1011_v27 }
 0x4c5   :  { %1034 = vadd.xlane.f32.xlu0 %v1033_v7 }
 0x4ca   :  { %v1172_v33 = vpop.f32.mrf.mxu1 }
 0x4cb   :  { %v1449_v54 = vpop.f32.mrf.mxu0 }
 0x4cc   :  { %v8493_v10 = vmul.f32 0.17677669, %v1449_v54 }
 0x4ce   :  { %v1582_v62 = vsel %vm484_vm1, %v8493_v10, -inf }
 0x4cf   :  { %1583 = vmax.xlane.f32.xlu2 %v1582_v62 }
 0x4d3   :  { %v1451_v3 = vpop.f32.mrf.mxu0 }
 0x4d8   :  { %v1106_v44 = vpop.permute.xlu1 %1105 }
 0x4d9   :  { %v1111_v19 = vsel %vm584_vm2, %v1106_v44, 0 }
 0x4da   :  { %1120 = vmatpush.bf16.msrb.mxu3 %v1111_v19 }
 0x4db   :  { %v8498_v41 = vpop.f32.mrf.mxu0 }
 0x4e3   :  { %v1497_v46 = vpop.f32.mrf.mxu0 }
 0x4ea   :  { %v996_v50 = vpop.xlane.xlu2 %995 }
 0x4eb   :  { %v1010_v63 = vsub.f32 %v978_v37, %v996_v50  ;;  %v1541_v39 = vpop.f32.mrf.mxu0 }
 0x4ed   :  { %v1022_v57 = vmul.f32 1.442695, %v1010_v63 }
 0x4ef   :  { %7460 = vpow2.f32 %v1022_v57  ;;  %v1178_v57 = vpop.permute.xlu1 %1177 }
 0x4f0   :  { %7462 = vpow2.f32 %v1024_v43 }
 0x4f2   :  { %v1202_v7 = vpop.permute.xlu2 %1201 }
 0x4f3   :  { %v1207_v33 = vsel %vm584_vm2, %v1202_v7, 0  ;;  %v1543_v54 = vpop.f32.mrf.mxu0 }
 0x4f4   :  { %1216 = vmatpush.bf16.msra.mxu3 %v1207_v33  ;;  %v8502_v62 = vpop.f32.mrf.mxu1 }
 0x4f5   :  { %v8504_v3 = vpop.eup %7460 }
 0x4f6   :  { %v1042_v44 = vsel %vm484_vm1, %v8504_v3, 0.0  ;;  %v8508_v37 = vpop.eup %7462 }
 0x4f7   :  { %1043 = vadd.xlane.f32.xlu0 %v1042_v44  ;;  %v1045_v29 = vsel %vm484_vm1, %v8508_v37, 0.0  ;;  %v1183_v44 = vsel %vm584_vm2, %v1178_v57, 0 }
 0x4fa   :  { %v1032_v19 = vpop.xlane.xlu0 %1031 }
 0x4fb   :  { %7464 = vrcp.f32 %v1032_v19 }
 0x4fc   :  { %v1268_v22 = vpop.f32.mrf.mxu1 }
 0x4ff   :  { %1046 = vadd.xlane.f32.xlu0 %v1045_v29 }
 0x501   :  { %v7465_v27 = vpop.eup %7464 }
 0x502   :  { %v1062_v43 = vmul.f32 %v7465_v27, %v8462_v1 }
 0x504   :  { %v1426_v46 = vpop.f32.mrf.mxu1  ;;  %v1070_v22 = vpack.c.bf16 %v1062_v43, %v1062_v43 }
 0x505   :  { %v8512_v50 = vmul.f32 0.17677669, %v1426_v46  ;;  %v8526_v46 = vmul.f32 0.17677669, %v1541_v39 }
 0x507   :  { %v1579_v63 = vsel %vm484_vm1, %v8512_v50, -inf  ;;  %v1594_v27 = vsel %vm484_vm1, %v8526_v46, -inf }
 0x508   :  { %1580 = vmax.xlane.f32.xlu1 %v1579_v63 }
 0x50c   :  { %v1428_v7 = vpop.f32.mrf.mxu1 }
 0x50d   :  { %v1082_v33 = vpop.permute.xlu0 %1081 }
 0x50e   :  { %v1087_v54 = vsel %vm584_vm2, %v1082_v33, 0 }
 0x50f   :  { %1096 = vmatpush.bf16.msra.mxu2 %v1087_v54 }
 0x512   :  { %6630 = vmatmul.msk.bf16.vlgmr.msra.gmra.mxu2 %vm484_vm1, %v1070_v22  ;;  %v1694_v22 = vpop.permute.xlu2 %1693 }
 0x513   :  { %1192 = vmatpush.bf16.msrb.mxu2 %v1183_v44  ;;  %1714 = vrot.lane.b32.xlu0 %v8256_v23, %s7745_s16 }
 0x514   :  { %v1472_v29 = vpop.f32.mrf.mxu1 }
 0x515   :  { %v8522_v19 = vmul.f32 0.17677669, %v1472_v29 }
 0x517   :  { %v1585_v1 = vsel %vm484_vm1, %v8522_v19, -inf }
 0x518   :  { %1586 = vmax.xlane.f32.xlu2 %v1585_v1 }
 0x51c   :  { %v1474_v63 = vpop.f32.mrf.mxu1 }
 0x520   :  { %1595 = vmax.xlane.f32.xlu2 %v1594_v27 }
 0x524   :  { %v1518_v57 = vpop.f32.mrf.mxu1 }
 0x525   :  { %v8530_v43 = vmul.f32 0.17677669, %v1518_v57 }
 0x527   :  { %v1591_v7 = vsel %vm484_vm1, %v8530_v43, -inf }
 0x528   :  { %1592 = vmax.xlane.f32.xlu1 %v1591_v7 }
 0x52c   :  { %v1520_v33 = vpop.f32.mrf.mxu1 }
 0x534   :  { %v1564_v54 = vpop.f32.mrf.mxu1 }
 0x535   :  { %v8534_v44 = vmul.f32 0.17677669, %v1564_v54 }
 0x537   :  { %v1597_v1 = vsel %vm484_vm1, %v8534_v44, -inf }
 0x538   :  { %1798 = vrot.lane.b32.xlu2 %v8302_v42, %s7745_s16  ;;  %v1035_v39 = vpop.xlane.xlu0 %1034 }
 0x539   :  { %7466 = vrcp.f32 %v1035_v39 }
 0x53c   :  { %v1566_v29 = vpop.f32.mrf.mxu1 }
 0x53d   :  { %1598 = vmax.xlane.f32.xlu0 %v1597_v1  ;;  %v6656_v29 = vld [vmem:[%s11051_s2 + $0x28] sm:$0xf] }
 0x53f   :  { %v7467_v63 = vpop.eup %7466 }
 0x540   :  { %v1063_v27 = vmul.f32 %v7467_v63, %v8487_v31  ;;  %v7271_v31 = vld [vmem:[%s11051_s2 + $0x38] sm:$0xf0]  ;;  %v7270_v63 = vld [vmem:[%s11051_s2 + $0x10] sm:$0xf0] }
 0x541   :  { %v6657_v1 = vor.u32 %v7271_v31, %v6656_v29 }
 0x542   :  { %v1071_v57 = vpack.c.bf16 %v1063_v27, %v1063_v27  ;;  %v1584_v7 = vpop.xlane.xlu2 %1583 }
 0x543   :  { %v1602_v33 = vsub.f32 %v8493_v10, %v1584_v7  ;;  %v6652_v10 = vld [vmem:[%s11051_s2] sm:$0xf] }
 0x544   :  { %6631 = vmatmul.msk.bf16.vlgmr.msrb.gmra.mxu3 %vm484_vm1, %v1071_v57  ;;  %v6653_v27 = vor.u32 %v7270_v63, %v6652_v10  ;;  %v1699_v10 = vsel %vm584_vm2, %v1694_v22, 0 }
 0x545   :  { %v1612_v54 = vmul.f32 1.442695, %v1602_v33  ;;  %1361 = vmatpush.bf16.msrb.mxu3 %v6657_v1 }
 0x547   :  { %7468 = vpow2.f32 %v1612_v54 }
 0x549   :  { %1362 = vmatpush.bf16.msrb.mxu3 %v6653_v27 }
 0x54d   :  { %v8543_v6 = vpop.eup %7468 }
 0x54e   :  { %v1630_v39 = vsel %vm484_vm1, %v8543_v6, 0.0 }
 0x54f   :  { %1631 = vadd.xlane.f32.xlu0 %v1630_v39  ;;  %v1778_v39 = vpop.permute.xlu1 %1777 }
 0x56a   :  { %v1044_v57 = vpop.xlane.xlu0 %1043 }
 0x56b   :  { %7470 = vrcp.f32 %v1044_v57 }
 0x571   :  { %v7471_v7 = vpop.eup %7470 }
 0x572   :  { %v1066_v33 = vmul.f32 %v7471_v7, %v8504_v3  ;;  %v1047_v54 = vpop.xlane.xlu0 %1046 }
 0x573   :  { %7472 = vrcp.f32 %v1047_v54 }
 0x574   :  { %v1074_v29 = vpack.c.bf16 %v1066_v33, %v1066_v33 }
 0x576   :  { %6634 = vmatmul.msk.bf16.vlgmr.msrb.gmra.mxu2 %vm484_vm1, %v1074_v29 }
 0x579   :  { %v7473_v31 = vpop.eup %7472 }
 0x57a   :  { %v1067_v1 = vmul.f32 %v7473_v31, %v8508_v37 }
 0x57b   :  { %v1581_v24 = vpop.xlane.xlu1 %1580 }
 0x57c   :  { %v1075_v4 = vpack.c.bf16 %v1067_v1, %v1067_v1  ;;  %v1601_v5 = vsub.f32 %v8512_v50, %v1581_v24  ;;  %v1783_v50 = vsel %vm584_vm2, %v1778_v39, 0 }
 0x57e   :  { %v1610_v63 = vmul.f32 1.442695, %v1601_v5  ;;  %6635 = vmatmul.msk.bf16.vlgmr.msra.gmra.mxu3 %vm484_vm1, %v1075_v4  ;;  %v11057_v4 = vpack.c.bf16 %v8392_v36, %v8382_v56 }
 0x57f   :  { %1708 = vmatpush.bf16.msra.mxu3 %v1699_v10 }
 0x580   :  { %7474 = vpow2.f32 %v1610_v63 }
 0x585   :  { %v1715_v3 = vpop.permute.xlu0 %1714 }
 0x586   :  { %v8565_v27 = vpop.eup %7474  ;;  %v1720_v57 = vsel %vm584_vm2, %v1715_v3, 0  ;;  %v11058_v3 = vpack.c.bf16 %v8269_v48, %v8232_v60  ;;  %v6640_v60 = vld [vmem:[%s11051_s2 + $0x50] sm:$0xf]  ;;  %v7272_v48 = vld [vmem:[%s11051_s2 + $0x60] sm:$0xf0] }
 0x587   :  { %1729 = vmatpush.bf16.msra.mxu0 %v1720_v57  ;;  %v1627_v37 = vsel %vm484_vm1, %v8565_v27, 0.0 }
 0x588   :  { %1628 = vadd.xlane.f32.xlu2 %v1627_v37  ;;  %v6644_v37 = vld [vmem:[%s11051_s2 + $0x78] sm:$0xf] }
 0x58b   :  { %v1587_v7 = vpop.xlane.xlu2 %1586 }
 0x58c   :  { %v1603_v24 = vsub.f32 %v8522_v19, %v1587_v7 }
 0x58e   :  { %v1614_v5 = vmul.f32 1.442695, %v1603_v24  ;;  %6658 = vmatmul.msk.bf16.vlgmr.msrb.gmra.mxu3 %vm323_vm0, %v11057_v4  ;;  %v11059_v4 = vpack.c.bf16 %v8412_v55, %v8387_v38 }
 0x58f   :  { %1792 = vmatpush.bf16.msrb.mxu3 %v1783_v50  ;;  %v6641_v50 = vor.u32 %v7272_v48, %v6640_v60 }
 0x590   :  { %7476 = vpow2.f32 %v1614_v5 }
 0x593   :  { %v1596_v22 = vpop.xlane.xlu2 %1595 }
 0x594   :  { %v1606_v33 = vsub.f32 %v8526_v46, %v1596_v22 }
 0x595   :  { %v1098_v54 = vpop.f32.mrf.mxu2 }
 0x596   :  { %v8577_v29 = vpop.eup %7476  ;;  %v1620_v31 = vmul.f32 1.442695, %v1606_v33  ;;  %v11060_v33 = vpack.c.bf16 %v8274_v51, %v8239_v11 }
 0x597   :  { %v1633_v19 = vsel %vm484_vm1, %v8577_v29, 0.0 }
 0x598   :  { %7478 = vpow2.f32 %v1620_v31  ;;  %1634 = vadd.xlane.f32.xlu2 %v1633_v19 }
 0x59b   :  { %v1799_v39 = vpop.permute.xlu2 %1798  ;;  %v1593_v1 = vpop.xlane.xlu1 %1592 }
 0x59c   :  { %v1804_v56 = vsel %vm584_vm2, %v1799_v39, 0  ;;  %v1605_v36 = vsub.f32 %v8530_v43, %v1593_v1  ;;  %v7273_v43 = vld [vmem:[%s11051_s2 + $0x88] sm:$0xf0] }
 0x59d   :  { %v1100_v10 = vpop.f32.mrf.mxu2  ;;  %1813 = vmatpush.bf16.msrb.mxu0 %v1804_v56  ;;  %v6645_v7 = vor.u32 %v7273_v43, %v6644_v37 }
 0x59e   :  { %v8583_v63 = vpop.eup %7478  ;;  %v1618_v46 = vmul.f32 1.442695, %v1605_v36  ;;  %6659 = vmatmul.msk.bf16.gmra.mxu3 %vm323_vm0, %v11058_v3  ;;  %v8678_v10 = vmul.f32 0.17677669, %v8498_v41 }
 0x59f   :  { %v1642_v57 = vsel %vm484_vm1, %v8583_v63, 0.0  ;;  %1308 = vmatpush.bf16.msra.mxu2 %v6645_v7 }
 0x5a0   :  { %7480 = vpow2.f32 %v1618_v46  ;;  %1643 = vadd.xlane.f32.xlu0 %v1642_v57  ;;  %v1588_v37 = vsel %vm484_vm1, %v8678_v10, -inf }
 0x5a3   :  { %1309 = vmatpush.bf16.msra.mxu2 %v6641_v50 }
 0x5a6   :  { %v8603_v24 = vpop.eup %7480 }
 0x5a7   :  { %v1639_v5 = vsel %vm484_vm1, %v8603_v24, 0.0 }
 0x5a8   :  { %1640 = vadd.xlane.f32.xlu1 %v1639_v5 }
 0x5ae   :  { %6660 = vmatmul.msk.bf16.gmra.mxu3 %vm323_vm0, %v11059_v4 }
 0x5b0   :  { %1932 = vrot.lane.b32.xlu2 %v8250_v21, %s7746_s9  ;;  %v1599_v22 = vpop.xlane.xlu0 %1598 }
 0x5b1   :  { %v1607_v11 = vsub.f32 %v8534_v44, %v1599_v22 }
 0x5b3   :  { %v1622_v19 = vmul.f32 1.442695, %v1607_v11 }
 0x5b4   :  { %1735 = vrot.lane.b32.xlu0 %v8374_v25, %s7745_s16 }
 0x5b8   :  { %1980 = vrot.lane.b32.xlu2 %v8084_v12, %s7746_s9 }
 0x5be   :  { %6661 = vmatmul.msk.bf16.gmra.mxu3 %vm323_vm0, %v11060_v33 }
 0x5c0   :  { %1978 = vrot.lane.b32.xlu2 %v8111_v32, %s7746_s9 }
 0x5c1   :  { %1911 = vrot.lane.b32.xlu1 %v8260_v20, %s7746_s9  ;;  %v1271_v20 = vpack.c.bf16 %v8489_v16, %v8451_v18 }
 0x5c2   :  { %v1632_v38 = vpop.xlane.xlu0 %1631 }
 0x5c3   :  { %7482 = vrcp.f32 %v1632_v38 }
 0x5c4   :  { %7484 = vpow2.f32 %v1622_v19 }
 0x5c7   :  { %v1122_v21 = vpop.f32.mrf.mxu3 }
 0x5c8   :  { %v1270_v55 = vpack.c.bf16 %v1122_v21, %v1098_v54 }
 0x5c9   :  { %v7483_v31 = vpop.eup %7482  ;;  %1934 = vrot.lane.b32.xlu1 %v8185_v28, %s7746_s9 }
 0x5ca   :  { %v1658_v12 = vmul.f32 %v7483_v31, %v8543_v6  ;;  %6646 = vmatmul.msk.bf16.vlgmr.msra.gmra.mxu2 %vm323_vm0, %v1270_v55  ;;  %v8637_v28 = vpop.eup %7484 }
 0x5cb   :  { %v1645_v6 = vsel %vm484_vm1, %v8637_v28, 0.0 }
 0x5cc   :  { %v1666_v51 = vpack.c.bf16 %v1658_v12, %v1658_v12 }
 0x5ce   :  { %6672 = vmatmul.msk.bf16.vlgmr.msra.gmra.mxu0 %vm484_vm1, %v1666_v51 }
 0x5cf   :  { %v1124_v32 = vpop.f32.mrf.mxu3 }
 0x5d1   :  { %1909 = vrot.lane.b32.xlu1 %v8265_v59, %s7746_s9  ;;  %v8645_v59 = vmul.f32 0.17677669, %v8485_v15 }
 0x5d3   :  { %v1576_v18 = vsel %vm484_vm1, %v8645_v59, -inf }
 0x5d9   :  { %1819 = vrot.lane.b32.xlu1 %v8335_v49, %s7745_s16 }
 0x5da   :  { %6647 = vmatmul.msk.bf16.gmra.mxu2 %vm323_vm0, %v1271_v20 }
 0x5de   :  { %1646 = vadd.xlane.f32.xlu0 %v1645_v6 }
 0x5e1   :  { %1957 = vrot.lane.b32.xlu1 %v8106_v30, %s7746_s9 }
 0x5e9   :  { %1577 = vmax.xlane.f32.xlu2 %v1576_v18  ;;  %1955 = vrot.lane.b32.xlu1 %v8078_v8, %s7746_s9 }
 0x5f1   :  { %2003 = vrot.lane.b32.xlu1 %v8295_v13, %s7746_s9 }
 0x5f2   :  { %2001 = vrot.lane.b32.xlu0 %v8330_v2, %s7746_s9 }
 0x5f9   :  { %v1194_v16 = vpop.f32.mrf.mxu2  ;;  %2026 = vrot.lane.b32.xlu1 %v8227_v26, %s7746_s9 }
 0x5fa   :  { %2049 = vrot.lane.b32.xlu0 %v8156_v17, %s7746_s9 }
 0x5fb   :  { %v1629_v30 = vpop.xlane.xlu2 %1628 }
 0x5fc   :  { %7486 = vrcp.f32 %v1629_v30 }
 0x601   :  { %v1196_v15 = vpop.f32.mrf.mxu2  ;;  %2072 = vrot.lane.b32.xlu2 %v8124_v45, %s7746_s9  ;;  %2024 = vrot.lane.b32.xlu1 %v8194_v40, %s7746_s9  ;;  %v1218_v8 = vpop.f32.mrf.mxu3  ;;  %v1273_v40 = vpack.c.bf16 %v8502_v62, %v8481_v58 }
 0x602   :  { %v7487_v13 = vpop.eup %7486  ;;  %v1272_v44 = vpack.c.bf16 %v1218_v8, %v1194_v16  ;;  %2047 = vrot.lane.b32.xlu0 %v8175_v53, %s7746_s9 }
 0x603   :  { %v1657_v26 = vmul.f32 %v7487_v13, %v8565_v27 }
 0x604   :  { %6648 = vmatmul.msk.bf16.gmra.mxu2 %vm323_vm0, %v1272_v44 }
 0x605   :  { %v1665_v17 = vpack.c.bf16 %v1657_v26, %v1657_v26 }
 0x607   :  { %6671 = vmatmul.msk.bf16.vlgmr.msra.gmra.mxu3 %vm484_vm1, %v1665_v17 }
 0x609   :  { %2070 = vrot.lane.b32.xlu2 %v8116_v34, %s7746_s9  ;;  %v1220_v45 = vpop.f32.mrf.mxu3 }
 0x60b   :  { %v1635_v54 = vpop.xlane.xlu2 %1634 }
 0x611   :  { %v1364_v60 = vpop.f32.mrf.mxu3 }
 0x613   :  { %v1644_v2 = vpop.xlane.xlu0 %1643 }
 0x614   :  { %7488 = vrcp.f32 %v1644_v2  ;;  %6649 = vmatmul.msk.bf16.gmra.mxu2 %vm323_vm0, %v1273_v40 }
 0x615   :  { %7490 = vrcp.f32 %v1635_v54 }
 0x619   :  { %v8691_v5 = vpop.f32.mrf.mxu3 }
 0x61a   :  { %v7489_v53 = vpop.eup %7488 }
 0x61b   :  { %v1662_v27 = vmul.f32 %v7489_v53, %v8583_v63  ;;  %v1641_v39 = vpop.xlane.xlu1 %1640  ;;  %v7491_v56 = vpop.eup %7490 }
 0x61c   :  { %7492 = vrcp.f32 %v1641_v39  ;;  %v1659_v58 = vmul.f32 %v7491_v56, %v8577_v29  ;;  %v1933_v63 = vpop.permute.xlu2 %1932 }
 0x61d   :  { %v1670_v1 = vpack.c.bf16 %v1662_v27, %v1662_v27 }
 0x61e   :  { %v1667_v57 = vpack.c.bf16 %v1659_v58, %v1659_v58 }
 0x61f   :  { %6676 = vmatmul.msk.bf16.vlgmr.msrb.gmra.mxu0 %vm484_vm1, %v1670_v1 }
 0x621   :  { %v1369_v55 = vpop.f32.mrf.mxu3 }
 0x622   :  { %v7493_v34 = vpop.eup %7492 }
 0x623   :  { %v1661_v36 = vmul.f32 %v7493_v34, %v8603_v24 }
 0x624   :  { %v1981_v43 = vpop.permute.xlu2 %1980 }
 0x625   :  { %v1669_v62 = vpack.c.bf16 %v1661_v36, %v1661_v36  ;;  %v1986_v41 = vsel %vm323_vm0, %v1981_v43, 0 }
 0x626   :  { %v1736_v46 = vpop.permute.xlu0 %1735 }
 0x627   :  { %v1741_v3 = vsel %vm584_vm2, %v1736_v46, 0  ;;  %6675 = vmatmul.msk.bf16.vlgmr.msrb.gmra.mxu3 %vm484_vm1, %v1669_v62 }
 0x628   :  { %1750 = vmatpush.bf16.msra.mxu1 %v1741_v3 }
 0x629   :  { %v8703_v6 = vpop.f32.mrf.mxu3 }
 0x62b   :  { %6673 = vmatmul.msk.bf16.vlgmr.msra.gmra.mxu1 %vm484_vm1, %v1667_v57  ;;  %1589 = vmax.xlane.f32.xlu1 %v1588_v37 }
 0x62c   :  { %v1979_v12 = vpop.permute.xlu2 %1978 }
 0x631   :  { %v8710_v17 = vpop.f32.mrf.mxu3 }
 0x633   :  { %v1912_v29 = vpop.permute.xlu1 %1911 }
 0x634   :  { %v1917_v7 = vsel %vm323_vm0, %v1912_v29, 0 }
 0x635   :  { %1926 = vmatpush.bf16.xpose.msra.mxu3 %v1917_v7 }
 0x639   :  { %v8719_v34 = vpop.f32.mrf.mxu3 }
 0x63b   :  { %v1935_v48 = vpop.permute.xlu1 %1934 }
 0x63c   :  { %v1940_v24 = vsel %vm323_vm0, %v1935_v48, 0 }
 0x63d   :  { %1995 = vmatpush.bf16.xpose.msrb.mxu3 %v1986_v41  ;;  %1949 = vmatpush.bf16.xpose.msra.mxu0 %v1940_v24 }
 0x641   :  { %v8722_v58 = vpop.f32.mrf.mxu3 }
 0x643   :  { %v1910_v50 = vpop.permute.xlu1 %1909 }
 0x644   :  { %1672 = vrot.lane.b32.xlu1 %v8476_v35, %s7745_s16  ;;  %6690 = vmatmul.msk.bf16.vlgmr.msra.gmra.mxu3 %vm323_vm0, %v1910_v50 }
 0x645   :  { %6691 = vmatmul.msk.bf16.vlgmr.msra.gmra.mxu0 %vm323_vm0, %v1933_v63 }
 0x649   :  { %v8728_v3 = vpop.f32.mrf.mxu3 }
 0x64b   :  { %v8694_v4 = vpop.f32.mrf.mxu0  ;;  %v1820_v22 = vpop.permute.xlu1 %1819 }
 0x64c   :  { %v1825_v33 = vsel %vm584_vm2, %v1820_v22, 0 }
 0x64d   :  { %v1311_v38 = vpop.f32.mrf.mxu2  ;;  %1834 = vmatpush.bf16.msrb.mxu1 %v1825_v33 }
 0x64e   :  { %v8697_v21 = vadd.f32 %v1364_v60, %v1311_v38 }
 0x651   :  { %v1647_v31 = vpop.xlane.xlu0 %1646 }
 0x652   :  { %7494 = vrcp.f32 %v1647_v31 }
 0x653   :  { %v1733_v11 = vpop.f32.mrf.mxu0  ;;  %v1958_v51 = vpop.permute.xlu1 %1957 }
 0x654   :  { %v1963_v32 = vsel %vm323_vm0, %v1958_v51, 0  ;;  %6693 = vmatmul.msk.bf16.vlgmr.msrb.gmra.mxu3 %vm323_vm0, %v1979_v12 }
 0x655   :  { %v8701_v19 = vpop.f32.mrf.mxu2  ;;  %1972 = vmatpush.bf16.xpose.msra.mxu1 %v1963_v32 }
 0x658   :  { %v7495_v20 = vpop.eup %7494 }
 0x659   :  { %v1663_v18 = vmul.f32 %v7495_v20, %v8637_v28 }
 0x65b   :  { %v1671_v16 = vpack.c.bf16 %v1663_v18, %v1663_v18  ;;  %v1956_v30 = vpop.permute.xlu1 %1955 }
 0x65c   :  { %v1578_v15 = vpop.xlane.xlu2 %1577 }
 0x65d   :  { %v1600_v8 = vsub.f32 %v8645_v59, %v1578_v15  ;;  %v1316_v13 = vpop.f32.mrf.mxu2  ;;  %6677 = vmatmul.msk.bf16.vlgmr.msrb.gmra.mxu1 %vm484_vm1, %v1671_v16 }
 0x65e   :  { %v8708_v44 = vadd.f32 %v1369_v55, %v1316_v13 }
 0x65f   :  { %v1608_v26 = vmul.f32 1.442695, %v1600_v8 }
 0x661   :  { %7496 = vpow2.f32 %v1608_v26 }
 0x663   :  { %v2004_v45 = vpop.permute.xlu1 %2003 }
 0x664   :  { %v2009_v40 = vsel %vm323_vm0, %v2004_v45, 0  ;;  %v2002_v2 = vpop.permute.xlu0 %2001  ;;  %v2073_v54 = vpop.permute.xlu2 %2072 }
 0x665   :  { %v2078_v28 = vsel %vm323_vm0, %v2073_v54, 0  ;;  %2018 = vmatpush.bf16.xpose.msrb.mxu0 %v2009_v40 }
 0x667   :  { %v7497_v53 = vpop.eup %7496 }
 0x668   :  { %v1624_v59 = vsel %vm484_vm1, %v7497_v53, 0.0 }
 0x669   :  { %1625 = vadd.xlane.f32.xlu0 %v1624_v59 }
 0x66b   :  { %v2027_v27 = vpop.permute.xlu1 %2026 }
 0x66c   :  { %v2032_v39 = vsel %vm323_vm0, %v2027_v27, 0  ;;  %v2050_v1 = vpop.permute.xlu0 %2049  ;;  %6694 = vmatmul.msk.bf16.vlgmr.msrb.gmra.mxu0 %vm323_vm0, %v2002_v2  ;;  %v2071_v62 = vpop.permute.xlu2 %2070 }
 0x66d   :  { %2087 = vmatpush.bf16.xpose.msra.mxu0 %v2078_v28  ;;  %v2055_v56 = vsel %vm323_vm0, %v2050_v1, 0  ;;  %6692 = vmatmul.msk.bf16.vlgmr.msra.gmra.mxu1 %vm323_vm0, %v1956_v30 }
 0x66e   :  { %2041 = vmatpush.bf16.xpose.msrb.mxu1 %v2032_v39  ;;  %2064 = vmatpush.bf16.xpose.msra.mxu3 %v2055_v56 }
 0x673   :  { %v2025_v46 = vpop.permute.xlu1 %2024 }
 0x674   :  { %v2048_v36 = vpop.permute.xlu0 %2047 }
 0x675   :  { %6696 = vmatmul.msk.bf16.vlgmr.msra.gmra.mxu3 %vm323_vm0, %v2048_v36 }
 0x67c   :  { %6697 = vmatmul.msk.bf16.vlgmr.msra.gmra.mxu0 %vm323_vm0, %v2071_v62 }
 0x67d   :  { %1756 = vrot.lane.b32.xlu0 %v8445_v52, %s7745_s16  ;;  %6695 = vmatmul.msk.bf16.vlgmr.msrb.gmra.mxu1 %vm323_vm0, %v2025_v46 }
 0x68a   :  { %v8730_v63 = vpop.f32.mrf.mxu3 }
 0x692   :  { %v1712_v57 = vpop.f32.mrf.mxu3 }
 0x69c   :  { %v8732_v37 = vpop.f32.mrf.mxu0 }
 0x69e   :  { %v1590_v43 = vpop.xlane.xlu1 %1589 }
 0x69f   :  { %v1604_v29 = vsub.f32 %v8678_v10, %v1590_v43 }
 0x6a1   :  { %v1616_v7 = vmul.f32 1.442695, %v1604_v29 }
 0x6a3   :  { %7498 = vpow2.f32 %v1616_v7 }
 0x6a4   :  { %v1817_v41 = vpop.f32.mrf.mxu0 }
 0x6a8   :  { %v8735_v60 = vpop.f32.mrf.mxu1 }
 0x6a9   :  { %v8737_v48 = vpop.eup %7498 }
 0x6aa   :  { %v8739_v24 = vpop.f32.mrf.mxu3  ;;  %v1636_v50 = vsel %vm484_vm1, %v8737_v48, 0.0 }
 0x6ab   :  { %1637 = vadd.xlane.f32.xlu2 %v1636_v50 }
 0x6b0   :  { %v1754_v22 = vpop.f32.mrf.mxu1 }
 0x6b2   :  { %v1796_v33 = vpop.f32.mrf.mxu3 }
 0x6b6   :  { %v1673_v38 = vpop.permute.xlu1 %1672 }
 0x6b7   :  { %v1678_v55 = vsel %vm584_vm2, %v1673_v38, 0 }
 0x6b8   :  { %1687 = vmatpush.bf16.msrb.mxu2 %v1678_v55 }
 0x6c2   :  { %v1951_v10 = vpop.f32.mrf.mxu0 }
 0x6c3   :  { %v2094_v31 = vmul.f32 0.17677669, %v1951_v10 }
 0x6c5   :  { %v2104_v12 = vsel %vm484_vm1, %v2094_v31, -inf }
 0x6c6   :  { %2105 = vmax.xlane.f32.xlu1 %v2104_v12 }
 0x6c7   :  { %v1928_v11 = vpop.f32.mrf.mxu3 }
 0x6c8   :  { %v2093_v51 = vmul.f32 0.17677669, %v1928_v11 }
 0x6ca   :  { %v1953_v32 = vpop.f32.mrf.mxu0  ;;  %v2101_v20 = vsel %vm484_vm1, %v2093_v51, -inf }
 0x6cb   :  { %2102 = vmax.xlane.f32.xlu0 %v2101_v20 }
 0x6cf   :  { %v1930_v18 = vpop.f32.mrf.mxu3 }
 0x6d0   :  { %v8786_v18 = vpop.f32.mrf.mxu2 }
 0x6d7   :  { %v1997_v16 = vpop.f32.mrf.mxu3 }
 0x6d8   :  { %v8766_v36 = vmul.f32 0.17677669, %v1997_v16 }
 0x6da   :  { %v8746_v30 = vpop.f32.mrf.mxu1  ;;  %v2110_v57 = vsel %vm484_vm1, %v8766_v36, -inf }
 0x6db   :  { %v1843_v15 = vpack.c.bf16 %v8746_v30, %v8732_v37 }
 0x6dc   :  { %v1626_v8 = vpop.xlane.xlu0 %1625 }
 0x6dd   :  { %7500 = vrcp.f32 %v1626_v8 }
 0x6df   :  { %2218 = vrot.lane.b32.xlu1 %v8440_v9, %s7746_s9  ;;  %2197 = vrot.lane.b32.xlu0 %v8476_v35, %s7746_s9  ;;  %v1999_v13 = vpop.f32.mrf.mxu3 }
 0x6e2   :  { %v1838_v26 = vpop.f32.mrf.mxu1 }
 0x6e3   :  { %v7501_v45 = vpop.eup %7500 }
 0x6e4   :  { %v1656_v40 = vmul.f32 %v7501_v45, %v7497_v53 }
 0x6e6   :  { %v1664_v2 = vpack.c.bf16 %v1656_v40, %v1656_v40  ;;  %v7274_v40 = vld [vmem:[%s11051_s2 + $0xb0] sm:$0xf0] }
 0x6e7   :  { %2260 = vrot.lane.b32.xlu0 %v8374_v25, %s7746_s9 }
 0x6e8   :  { %6670 = vmatmul.msk.bf16.vlgmr.msrb.gmra.mxu2 %vm484_vm1, %v1664_v2 }
 0x6e9   :  { %v2020_v54 = vpop.f32.mrf.mxu0 }
 0x6ea   :  { %v1974_v28 = vpop.f32.mrf.mxu1  ;;  %v8762_v39 = vmul.f32 0.17677669, %v2020_v54 }
 0x6eb   :  { %v8757_v59 = vmul.f32 0.17677669, %v1974_v28 }
 0x6ec   :  { %v2113_v25 = vsel %vm484_vm1, %v8762_v39, -inf }
 0x6ed   :  { %v2107_v9 = vsel %vm484_vm1, %v8757_v59, -inf }
 0x6ee   :  { %2108 = vmax.xlane.f32.xlu2 %v2107_v9 }
 0x6ef   :  { %v1757_v27 = vpop.permute.xlu0 %1756 }
 0x6f0   :  { %v1762_v35 = vsel %vm584_vm2, %v1757_v27, 0 }
 0x6f1   :  { %1771 = vmatpush.bf16.msra.mxu2 %v1762_v35  ;;  %v2022_v53 = vpop.f32.mrf.mxu0 }
 0x6f2   :  { %v1976_v1 = vpop.f32.mrf.mxu1 }
 0x6f6   :  { %2114 = vmax.xlane.f32.xlu2 %v2113_v25 }
 0x6f8   :  { %v2066_v56 = vpop.f32.mrf.mxu3 }
 0x6f9   :  { %v8768_v62 = vpop.f32.mrf.mxu0  ;;  %v8776_v22 = vmul.f32 0.17677669, %v2066_v56 }
 0x6fa   :  { %v2043_v46 = vpop.f32.mrf.mxu1 }
 0x6fb   :  { %v8772_v29 = vmul.f32 0.17677669, %v2043_v46  ;;  %v2119_v33 = vsel %vm484_vm1, %v8776_v22, -inf }
 0x6fd   :  { %v2116_v50 = vsel %vm484_vm1, %v8772_v29, -inf }
 0x6fe   :  { %2111 = vmax.xlane.f32.xlu2 %v2110_v57 }
 0x700   :  { %v2068_v43 = vpop.f32.mrf.mxu3 }
 0x701   :  { %v2091_v7 = vpop.f32.mrf.mxu0 }
 0x702   :  { %v2045_v41 = vpop.f32.mrf.mxu1 }
 0x706   :  { %2117 = vmax.xlane.f32.xlu2 %v2116_v50 }
 0x711   :  { %2120 = vmax.xlane.f32.xlu0 %v2119_v33 }
 0x71e   :  { %v1638_v38 = vpop.xlane.xlu2 %1637 }
 0x71f   :  { %7502 = vrcp.f32 %v1638_v38 }
 0x725   :  { %v7503_v55 = vpop.eup %7502  ;;  %2302 = vrot.lane.b32.xlu0 %v8454_v47, %s7746_s9  ;;  %v8790_v47 = vpop.f32.mrf.mxu2 }
 0x726   :  { %v1660_v10 = vmul.f32 %v7503_v55, %v8737_v48 }
 0x728   :  { %v1668_v12 = vpack.c.bf16 %v1660_v10, %v1660_v10 }
 0x72a   :  { %6674 = vmatmul.msk.bf16.vlgmr.msra.gmra.mxu2 %vm484_vm1, %v1668_v12 }
 0x72d   :  { %2323 = vrot.lane.b32.xlu0 %v8302_v42, %s7746_s9  ;;  %v6684_v42 = vld [vmem:[%s11051_s2 + $0xc8] sm:$0xf]  ;;  %v8810_v9 = vpop.f32.mrf.mxu2 }
 0x735   :  { %v8814_v25 = vpop.f32.mrf.mxu2 }
 0x739   :  { %v2106_v11 = vpop.xlane.xlu1 %2105 }
 0x73a   :  { %v2126_v32 = vsub.f32 %v2094_v31, %v2106_v11  ;;  %v7275_v31 = vld [vmem:[%s11051_s2 + $0xd8] sm:$0xf0] }
 0x73b   :  { %v6685_v45 = vor.u32 %v7275_v31, %v6684_v42 }
 0x73c   :  { %v2135_v20 = vmul.f32 1.442695, %v2126_v32 }
 0x73d   :  { %1878 = vmatpush.bf16.msrb.mxu2 %v6685_v45  ;;  %v8818_v7 = vpop.f32.mrf.mxu2 }
 0x73e   :  { %7504 = vpow2.f32 %v2135_v20  ;;  %v2103_v16 = vpop.xlane.xlu0 %2102 }
 0x73f   :  { %v2125_v8 = vsub.f32 %v2093_v51, %v2103_v16  ;;  %v6680_v51 = vld [vmem:[%s11051_s2 + $0xa0] sm:$0xf] }
 0x740   :  { %v6681_v54 = vor.u32 %v7274_v40, %v6680_v51 }
 0x741   :  { %v2133_v13 = vmul.f32 1.442695, %v2125_v8 }
 0x742   :  { %1879 = vmatpush.bf16.msrb.mxu2 %v6681_v54 }
 0x743   :  { %7506 = vpow2.f32 %v2133_v13  ;;  %v1841_v13 = vpack.c.bf16 %v8735_v60, %v8694_v4  ;;  %v8846_v60 = vmul.f32 0.17677669, %v8768_v62 }
 0x744   :  { %v8788_v26 = vpop.eup %7504 }
 0x745   :  { %v2152_v48 = vsel %vm484_vm1, %v8788_v26, 0.0 }
 0x746   :  { %2153 = vadd.xlane.f32.xlu2 %v2152_v48 }
 0x749   :  { %v8806_v2 = vpop.eup %7506 }
 0x74a   :  { %v2149_v28 = vsel %vm484_vm1, %v8806_v2, 0.0 }
 0x74e   :  { %2150 = vadd.xlane.f32.xlu2 %v2149_v28 }
 0x751   :  { %v2219_v27 = vpop.permute.xlu1 %2218  ;;  %v2198_v35 = vpop.permute.xlu0 %2197 }
 0x752   :  { %v2224_v53 = vsel %vm584_vm2, %v2219_v27, 0  ;;  %v2203_v1 = vsel %vm584_vm2, %v2198_v35, 0 }
 0x753   :  { %2233 = vmatpush.bf16.msrb.mxu3 %v2224_v53  ;;  %2212 = vmatpush.bf16.msra.mxu1 %v2203_v1 }
 0x759   :  { %v2261_v56 = vpop.permute.xlu0 %2260 }
 0x75a   :  { %v2266_v46 = vsel %vm584_vm2, %v2261_v56, 0 }
 0x75b   :  { %2275 = vmatpush.bf16.msrb.mxu1 %v2266_v46 }
 0x761   :  { %v2109_v57 = vpop.xlane.xlu2 %2108 }
 0x762   :  { %v2127_v43 = vsub.f32 %v8757_v59, %v2109_v57 }
 0x764   :  { %v2137_v41 = vmul.f32 1.442695, %v2127_v43 }
 0x766   :  { %7508 = vpow2.f32 %v2137_v41 }
 0x769   :  { %v2115_v50 = vpop.xlane.xlu2 %2114 }
 0x76a   :  { %v2129_v33 = vsub.f32 %v8762_v39, %v2115_v50 }
 0x76b   :  { %v1689_v38 = vpop.f32.mrf.mxu2 }
 0x76c   :  { %v8821_v55 = vpop.eup %7508  ;;  %v2141_v10 = vmul.f32 1.442695, %v2129_v33  ;;  %v1840_v12 = vpack.c.bf16 %v8730_v63, %v1689_v38 }
 0x76d   :  { %v2155_v11 = vsel %vm484_vm1, %v8821_v55, 0.0 }
 0x76e   :  { %7510 = vpow2.f32 %v2141_v10  ;;  %6686 = vmatmul.msk.bf16.vlgmr.msrb.gmra.mxu2 %vm323_vm0, %v1840_v12  ;;  %2156 = vadd.xlane.f32.xlu2 %v2155_v11 }
 0x771   :  { %v2112_v59 = vpop.xlane.xlu2 %2111 }
 0x772   :  { %v2128_v32 = vsub.f32 %v8766_v36, %v2112_v59 }
 0x773   :  { %v1691_v20 = vpop.f32.mrf.mxu2 }
 0x774   :  { %v8828_v16 = vpop.eup %7510  ;;  %v2139_v39 = vmul.f32 1.442695, %v2128_v32 }
 0x775   :  { %v2161_v8 = vsel %vm484_vm1, %v8828_v16, 0.0 }
 0x776   :  { %7512 = vpow2.f32 %v2139_v39  ;;  %2162 = vadd.xlane.f32.xlu1 %v2161_v8 }
 0x779   :  { %v2118_v51 = vpop.xlane.xlu2 %2117 }
 0x77c   :  { %v8832_v63 = vpop.eup %7512 }
 0x77d   :  { %v2158_v48 = vsel %vm484_vm1, %v8832_v63, 0.0 }
 0x77e   :  { %6687 = vmatmul.msk.bf16.gmra.mxu2 %vm323_vm0, %v1841_v13  ;;  %2159 = vadd.xlane.f32.xlu1 %v2158_v48 }
 0x784   :  { %v2121_v36 = vpop.xlane.xlu0 %2120 }
 0x785   :  { %v2131_v45 = vsub.f32 %v8776_v22, %v2121_v36 }
 0x786   :  { %2239 = vrot.lane.b32.xlu2 %v8256_v23, %s7746_s9  ;;  %v2122_v23 = vsel %vm484_vm1, %v8846_v60, -inf }
 0x787   :  { %v2145_v4 = vmul.f32 1.442695, %v2131_v45  ;;  %v6712_v45 = vld [vmem:[%s11051_s2 + $0x118] sm:$0xf] }
 0x789   :  { %7514 = vpow2.f32 %v2145_v4 }
 0x78f   :  { %v8853_v28 = vpop.eup %7514 }
 0x790   :  { %v2167_v62 = vsel %vm484_vm1, %v8853_v28, 0.0 }
 0x797   :  { %2281 = vrot.lane.b32.xlu1 %v8445_v52, %s7746_s9  ;;  %v2303_v42 = vpop.permute.xlu0 %2302  ;;  %v2130_v52 = vsub.f32 %v8772_v29, %v2118_v51  ;;  %v6708_v51 = vld [vmem:[%s11051_s2 + $0xf0] sm:$0xf] }
 0x798   :  { %v2308_v31 = vsel %vm584_vm2, %v2303_v42, 0 }
 0x799   :  { %2317 = vmatpush.bf16.msra.mxu3 %v2308_v31  ;;  %v2143_v22 = vmul.f32 1.442695, %v2130_v52 }
 0x79b   :  { %7516 = vpow2.f32 %v2143_v22 }
 0x7ad   :  { %v1773_v40 = vpop.f32.mrf.mxu2 }
 0x7ae   :  { %v1842_v54 = vpack.c.bf16 %v8739_v24, %v1773_v40  ;;  %v8857_v24 = vpop.eup %7516 }
 0x7af   :  { %2123 = vmax.xlane.f32.xlu2 %v2122_v23  ;;  %v2164_v29 = vsel %vm484_vm1, %v8857_v24, 0.0 }
 0x7b0   :  { %6688 = vmatmul.msk.bf16.gmra.mxu2 %vm323_vm0, %v1842_v54 }
 0x7b5   :  { %v1775_v27 = vpop.f32.mrf.mxu2 }
 0x7b7   :  { %2168 = vadd.xlane.f32.xlu2 %v2167_v62  ;;  %v1375_v62 = vadd.f32 %v8710_v17, %v8790_v47  ;;  %v1380_v17 = vadd.f32 %v8722_v58, %v8814_v25 }
 0x7b9   :  { %v2154_v35 = vpop.xlane.xlu2 %2153 }
 0x7ba   :  { %7518 = vrcp.f32 %v2154_v35 }
 0x7c0   :  { %v7519_v53 = vpop.eup %7518  ;;  %6689 = vmatmul.msk.bf16.gmra.mxu2 %vm323_vm0, %v1843_v15  ;;  %v2324_v15 = vpop.permute.xlu0 %2323 }
 0x7c1   :  { %v2182_v1 = vmul.f32 %v7519_v53, %v8788_v26  ;;  %v2151_v56 = vpop.xlane.xlu2 %2150  ;;  %2165 = vadd.xlane.f32.xlu1 %v2164_v29  ;;  %v2329_v10 = vsel %vm584_vm2, %v2324_v15, 0 }
 0x7c2   :  { %7520 = vrcp.f32 %v2151_v56 }
 0x7c3   :  { %v2190_v46 = vpack.c.bf16 %v2182_v1, %v2182_v1 }
 0x7c5   :  { %6699 = vmatmul.msk.bf16.vlgmr.msrb.gmra.mxu3 %vm484_vm1, %v2190_v46 }
 0x7c8   :  { %v7521_v57 = vpop.eup %7520 }
 0x7c9   :  { %v2181_v43 = vmul.f32 %v7521_v57, %v8806_v2 }
 0x7cb   :  { %v2189_v41 = vpack.c.bf16 %v2181_v43, %v2181_v43 }
 0x7cd   :  { %6698 = vmatmul.msk.bf16.vlgmr.msra.gmra.mxu1 %vm484_vm1, %v2189_v41 }
 0x7da   :  { %2344 = vrot.lane.b32.xlu1 %v8335_v49, %s7746_s9 }
 0x7e1   :  { %v2157_v37 = vpop.xlane.xlu2 %2156 }
 0x7e2   :  { %7522 = vrcp.f32 %v2157_v37 }
 0x7e8   :  { %v7523_v30 = vpop.eup %7522 }
 0x7e9   :  { %v2183_v26 = vmul.f32 %v7523_v30, %v8821_v55  ;;  %v2163_v50 = vpop.xlane.xlu1 %2162  ;;  %v2240_v33 = vpop.permute.xlu2 %2239 }
 0x7ea   :  { %v2245_v38 = vsel %vm584_vm2, %v2240_v33, 0 }
 0x7eb   :  { %v2191_v12 = vpack.c.bf16 %v2183_v26, %v2183_v26  ;;  %2254 = vmatpush.bf16.msrb.mxu0 %v2245_v38 }
 0x7ee   :  { %6700 = vmatmul.msk.bf16.vlgmr.msrb.gmra.mxu0 %vm484_vm1, %v2191_v12 }
 0x7ef   :  { %2338 = vmatpush.bf16.msra.mxu0 %v2329_v10 }
 0x7f1   :  { %v1881_v2 = vpop.f32.mrf.mxu2  ;;  %v2160_v11 = vpop.xlane.xlu1 %2159 }
 0x7f2   :  { %v8876_v49 = vadd.f32 %v1881_v2, %v8697_v21  ;;  %7524 = vrcp.f32 %v2160_v11 }
 0x7f3   :  { %7526 = vrcp.f32 %v2163_v50 }
 0x7f8   :  { %v7525_v59 = vpop.eup %7524 }
 0x7f9   :  { %v2184_v55 = vmul.f32 %v7525_v59, %v8832_v63  ;;  %v8879_v32 = vpop.f32.mrf.mxu2  ;;  %v7527_v13 = vpop.eup %7526 }
 0x7fa   :  { %v2185_v48 = vmul.f32 %v7527_v13, %v8828_v16 }
 0x7fb   :  { %v2192_v20 = vpack.c.bf16 %v2184_v55, %v2184_v55 }
 0x7fc   :  { %v2193_v42 = vpack.c.bf16 %v2185_v48, %v2185_v48 }
 0x7fd   :  { %6701 = vmatmul.msk.bf16.vlgmr.msrb.gmra.mxu1 %vm484_vm1, %v2192_v20 }
 0x801   :  { %v1886_v39 = vpop.f32.mrf.mxu2 }
 0x802   :  { %v8883_v8 = vadd.f32 %v1886_v39, %v8708_v44  ;;  %v7277_v44 = vld [vmem:[%s11051_s2 + $0x128] sm:$0xf0] }
 0x803   :  { %v6713_v4 = vor.u32 %v7277_v44, %v6712_v45 }
 0x809   :  { %v2282_v36 = vpop.permute.xlu1 %2281  ;;  %v8901_v23 = vpop.f32.mrf.mxu2 }
 0x80a   :  { %v2287_v21 = vsel %vm584_vm2, %v2282_v36, 0 }
 0x80b   :  { %2296 = vmatpush.bf16.msra.mxu2 %v2287_v21 }
 0x80e   :  { %6702 = vmatmul.msk.bf16.vlgmr.msra.gmra.mxu2 %vm484_vm1, %v2193_v42 }
 0x80f   :  { %2403 = vmatpush.bf16.msrb.mxu2 %v6713_v4 }
 0x822   :  { %v2124_v63 = vpop.xlane.xlu2 %2123 }
 0x823   :  { %v2132_v31 = vsub.f32 %v8846_v60, %v2124_v63  ;;  %v7276_v60 = vld [vmem:[%s11051_s2 + $0x100] sm:$0xf0] }
 0x824   :  { %v6709_v40 = vor.u32 %v7276_v60, %v6708_v51  ;;  %v7730_v51 = vld [vmem:[%s11050_s0] sm:$0xff] }
 0x825   :  { %v2147_v16 = vmul.f32 1.442695, %v2132_v31  ;;  %v8928_v31 = vld [vmem:[%s11049_s4 + $0x3] ss:$0 sm:$0xff] }
 0x826   :  { %2404 = vmatpush.bf16.msrb.mxu2 %v6709_v40 }
 0x827   :  { %7528 = vpow2.f32 %v2147_v16  ;;  %v1367_v16 = vadd.f32 %v8691_v5, %v8701_v19 }
 0x829   :  { %v1902_v40 = vadd.f32 %v8879_v32, %v1367_v16  ;;  %v7732_v32 = vld [vmem:[%s11050_s0 + $0x10] sm:$0xff] }
 0x82a   :  { %v2169_v54 = vpop.xlane.xlu2 %2168 }
 0x82b   :  { %7530 = vrcp.f32 %v2169_v54 }
 0x82d   :  { %v7529_v52 = vpop.eup %7528 }
 0x82e   :  { %v2170_v22 = vsel %vm484_vm1, %v7529_v52, 0.0 }
 0x82f   :  { %2171 = vadd.xlane.f32.xlu2 %v2170_v22 }
 0x831   :  { %v7531_v27 = vpop.eup %7530 }
 0x832   :  { %v2187_v35 = vmul.f32 %v7531_v27, %v8853_v28 }
 0x833   :  { %v1891_v53 = vpop.f32.mrf.mxu2 }
 0x834   :  { %v2195_v29 = vpack.c.bf16 %v2187_v35, %v2187_v35  ;;  %v8907_v1 = vadd.f32 %v1891_v53, %v1375_v62  ;;  %v2166_v56 = vpop.xlane.xlu1 %2165  ;;  %v1372_v35 = vadd.f32 %v8703_v6, %v8786_v18  ;;  %v7747_v18 = vmov 128.0  }
 0x835   :  { %7532 = vrcp.f32 %v2166_v56 }
 0x836   :  { %6704 = vmatmul.msk.bf16.vlgmr.msra.gmra.mxu0 %vm484_vm1, %v2195_v29  ;;  %v1904_v29 = vadd.f32 %v8901_v23, %v1372_v35 }
 0x83b   :  { %v7533_v46 = vpop.eup %7532  ;;  %v8910_v57 = vpop.f32.mrf.mxu2 }
 0x83c   :  { %v2186_v43 = vmul.f32 %v7533_v46, %v8857_v24 }
 0x83e   :  { %v2194_v41 = vpack.c.bf16 %v2186_v43, %v2186_v43 }
 0x840   :  { %6703 = vmatmul.msk.bf16.vlgmr.msra.gmra.mxu3 %vm484_vm1, %v2194_v41 }
 0x843   :  { %v1896_v47 = vpop.f32.mrf.mxu2 }
 0x844   :  { %v8916_v28 = vadd.f32 %v1896_v47, %v1380_v17 }
 0x848   :  { %v2235_v37 = vpop.f32.mrf.mxu3 }
 0x84a   :  { %v2214_v30 = vpop.f32.mrf.mxu1 }
 0x84b   :  { %v2365_v15 = vpack.c.bf16 %v2235_v37, %v2214_v30  ;;  %v8921_v25 = vpop.f32.mrf.mxu2 }
 0x84c   :  { %v2345_v26 = vpop.permute.xlu1 %2344 }
 0x84d   :  { %v2350_v50 = vsel %vm584_vm2, %v2345_v26, 0  ;;  %6714 = vmatmul.msk.bf16.vlgmr.msrb.gmra.mxu2 %vm323_vm0, %v2365_v15 }
 0x84e   :  { %2359 = vmatpush.bf16.msra.mxu1 %v2350_v50 }
 0x850   :  { %v2237_v33 = vpop.f32.mrf.mxu3 }
 0x852   :  { %v2216_v24 = vpop.f32.mrf.mxu1 }
 0x86b   :  { %v2256_v38 = vpop.f32.mrf.mxu0 }
 0x873   :  { %v2258_v10 = vpop.f32.mrf.mxu0 }
 0x87a   :  { %v2277_v12 = vpop.f32.mrf.mxu1 }
 0x87b   :  { %v2366_v2 = vpack.c.bf16 %v2277_v12, %v2256_v38 }
 0x87d   :  { %6715 = vmatmul.msk.bf16.gmra.mxu2 %vm323_vm0, %v2366_v2 }
 0x882   :  { %v2279_v58 = vpop.f32.mrf.mxu1 }
 0x891   :  { %v2298_v11 = vpop.f32.mrf.mxu2 }
 0x899   :  { %v2300_v59 = vpop.f32.mrf.mxu2 }
 0x8a2   :  { %v2172_v55 = vpop.xlane.xlu2 %2171 }
 0x8a3   :  { %7534 = vrcp.f32 %v2172_v55 }
 0x8a4   :  { %7536 = vrcp.f32 %v7747_v18 }
 0x8a9   :  { %v7535_v20 = vpop.eup %7534 }
 0x8aa   :  { %v2188_v39 = vmul.f32 %v7535_v20, %v7529_v52  ;;  %v7537_v37 = vpop.eup %7536  ;;  %v1377_v20 = vadd.f32 %v8719_v34, %v8810_v9  ;;  %v7735_v34 = vld [vmem:[%s11050_s0 + $0x28] sm:$0xff] }
 0x8ab   :  { %v2470_v23 = vmul.f32 128.0, %v7537_v37  ;;  %vm2474_vm3 = vweird.f32 %v7537_v37 }
 0x8ac   :  { %v2196_v13 = vpack.c.bf16 %v2188_v39, %v2188_v39 }
 0x8ad   :  { %v2471_v30 = vsub.f32 1.0, %v2470_v23  ;;  %v7737_v23 = vld [vmem:[%s11050_s0 + $0x38] sm:$0xff] }
 0x8ae   :  { %6705 = vmatmul.msk.bf16.vlgmr.msra.gmra.mxu1 %vm484_vm1, %v2196_v13 }
 0x8af   :  { %v2472_v15 = vmul.f32 %v7537_v37, %v2471_v30 }
 0x8b1   :  { %v2473_v26 = vadd.f32 %v7537_v37, %v2472_v15 }
 0x8b3   :  { %v2340_v48 = vpop.f32.mrf.mxu0  ;;  %v8955_v50 = vsel %vm2474_vm3, %v7537_v37, %v2473_v26  ;;  %v7283_v37 = vld [vmem:[%s11051_s2 + $0x64] sm:$0xf0]  ;;  %v7281_v26 = vld [vmem:[%s11051_s2 + $0x3c] sm:$0xf0] }
 0x8bb   :  { %v2342_v36 = vpop.f32.mrf.mxu0 }
 0x8c3   :  { %v2319_v21 = vpop.f32.mrf.mxu3 }
 0x8c4   :  { %v2367_v42 = vpack.c.bf16 %v2319_v21, %v2298_v11  ;;  %v7734_v21 = vld [vmem:[%s11050_s0 + $0x20] sm:$0xff] }
 0x8c6   :  { %6716 = vmatmul.msk.bf16.gmra.mxu2 %vm323_vm0, %v2367_v42 }
 0x8cb   :  { %v2321_v63 = vpop.f32.mrf.mxu3 }
 0x8d0   :  { %v2406_v45 = vpop.f32.mrf.mxu2 }
 0x8d1   :  { %v2426_v44 = vadd.f32 %v2406_v45, %v8876_v49  ;;  %v7731_v49 = vld [vmem:[%s11050_s0 + $0x8] sm:$0xff] }
 0x8d3   :  { %v2437_v4 = vadd.f32 %v8928_v31, %v2426_v44 }
 0x8d5   :  { %v2445_v60 = vadd.f32 %v7730_v51, %v2437_v4 }
 0x8d7   :  { %2453 = vadd.xlane.f32.xlu2 %v2445_v60 }
 0x8d8   :  { %v2408_v54 = vpop.f32.mrf.mxu2 }
 0x8d9   :  { %v2427_v52 = vadd.f32 %v2408_v54, %v1902_v40  ;;  %v6776_v40 = vld [vmem:[%s11051_s2 + $0x11c] sm:$0xf]  ;;  %v7293_v54 = vld [vmem:[%s11051_s2 + $0x12c] sm:$0xf0] }
 0x8db   :  { %v2438_v22 = vadd.f32 %v8928_v31, %v2427_v52  ;;  %v6777_v52 = vor.u32 %v7293_v54, %v6776_v40 }
 0x8dd   :  { %v2446_v27 = vadd.f32 %v7731_v49, %v2438_v22  ;;  %2743 = vmatpush.bf16.msrb.mxu0 %v6777_v52  ;;  %7390 = vmatpush.bf16.msrb.mxu3 %v6777_v52  ;;  %v6768_v22 = vld [vmem:[%s11051_s2 + $0xf4] sm:$0xf]  ;;  %v7291_v49 = vld [vmem:[%s11051_s2 + $0x104] sm:$0xf0] }
 0x8df   :  { %2455 = vadd.xlane.f32.xlu0 %v2446_v27 }
 0x900   :  { %v2411_v62 = vpop.f32.mrf.mxu2 }
 0x901   :  { %v2428_v5 = vadd.f32 %v2411_v62, %v8883_v8  ;;  %v7733_v8 = vld [vmem:[%s11050_s0 + $0x18] sm:$0xff] }
 0x903   :  { %v2439_v19 = vadd.f32 %v8928_v31, %v2428_v5  ;;  %v6760_v5 = vld [vmem:[%s11051_s2 + $0xcc] sm:$0xf] }
 0x905   :  { %v2447_v53 = vadd.f32 %v7732_v32, %v2439_v19  ;;  %v7289_v19 = vld [vmem:[%s11051_s2 + $0xdc] sm:$0xf0] }
 0x906   :  { %v6761_v32 = vor.u32 %v7289_v19, %v6760_v5 }
 0x907   :  { %2457 = vadd.xlane.f32.xlu1 %v2447_v53 }
 0x908   :  { %v2413_v56 = vpop.f32.mrf.mxu2 }
 0x909   :  { %v2429_v46 = vadd.f32 %v2413_v56, %v1904_v29  ;;  %v6752_v29 = vld [vmem:[%s11051_s2 + $0xa4] sm:$0xf]  ;;  %v7287_v56 = vld [vmem:[%s11051_s2 + $0xb4] sm:$0xf0] }
 0x90b   :  { %v2440_v43 = vadd.f32 %v8928_v31, %v2429_v46  ;;  %v1382_v46 = vadd.f32 %v8728_v3, %v8818_v7  ;;  %v7285_v3 = vld [vmem:[%s11051_s2 + $0x8c] sm:$0xf0] }
 0x90d   :  { %v2448_v41 = vadd.f32 %v7733_v8, %v2440_v43  ;;  %v6753_v8 = vor.u32 %v7287_v56, %v6752_v29  ;;  %v9086_v56 = vld [vmem:[%s11052_s5 + $0x1] ss:$0 sm:$0xff] }
 0x90f   :  { %2459 = vadd.xlane.f32.xlu2 %v2448_v41 }
 0x92b   :  { %v2361_v17 = vpop.f32.mrf.mxu1 }
 0x92c   :  { %v2368_v6 = vpack.c.bf16 %v2361_v17, %v2340_v48  ;;  %v1906_v48 = vadd.f32 %v8910_v57, %v1377_v20 }
 0x92e   :  { %6717 = vmatmul.msk.bf16.gmra.mxu2 %vm323_vm0, %v2368_v6  ;;  %v6744_v6 = vld [vmem:[%s11051_s2 + $0x7c] sm:$0xf] }
 0x92f   :  { %v6745_v18 = vor.u32 %v7285_v3, %v6744_v6  ;;  %v6770_v6 = vld [vmem:[%s11051_s2 + $0x108] sm:$0xf0] }
 0x933   :  { %v2363_v47 = vpop.f32.mrf.mxu1 }
 0x949   :  { %v2416_v12 = vpop.f32.mrf.mxu2 }
 0x94a   :  { %v2454_v33 = vpop.xlane.xlu2 %2453  ;;  %v2430_v59 = vadd.f32 %v2416_v12, %v8907_v1  ;;  %v6720_v12 = vld [vmem:[%s11051_s2 + $0x4] sm:$0xf] }
 0x94b   :  { %v2476_v24 = vmul.f32 %v8955_v50, %v2454_v33 }
 0x94c   :  { %v2441_v39 = vadd.f32 %v8928_v31, %v2430_v59 }
 0x94d   :  { %v8958_v38 = vsub.f32 %v2445_v60, %v2476_v24 }
 0x94e   :  { %v8975_v42 = vadd.f32 %v7734_v21, %v2441_v39 }
 0x94f   :  { %v2492_v10 = vmul.f32 %v8958_v38, %v8958_v38 }
 0x951   :  { %2500 = vadd.xlane.f32.xlu2 %v2492_v10  ;;  %v2418_v13 = vpop.f32.mrf.mxu2 }
 0x952   :  { %v2456_v2 = vpop.xlane.xlu0 %2455  ;;  %v2431_v36 = vadd.f32 %v2418_v13, %v1906_v48 }
 0x953   :  { %v2477_v58 = vmul.f32 %v8955_v50, %v2456_v2  ;;  %v7279_v2 = vld [vmem:[%s11051_s2 + $0x14] sm:$0xf0] }
 0x954   :  { %v2442_v1 = vadd.f32 %v8928_v31, %v2431_v36 }
 0x955   :  { %v8963_v11 = vsub.f32 %v2446_v27, %v2477_v58  ;;  %v6769_v27 = vor.u32 %v7291_v49, %v6768_v22  ;;  %v6721_v58 = vor.u32 %v7279_v2, %v6720_v12  ;;  %v7282_v12 = vld [vmem:[%s11051_s2 + $0x58] sm:$0xf]  ;;  %v6738_v2 = vld [vmem:[%s11051_s2 + $0x68] sm:$0xf0] }
 0x956   :  { %v8982_v9 = vadd.f32 %v7735_v34, %v2442_v1 }
 0x957   :  { %v2493_v55 = vmul.f32 %v8963_v11, %v8963_v11  ;;  %2744 = vmatpush.bf16.msrb.mxu0 %v6769_v27  ;;  %7391 = vmatpush.bf16.msrb.mxu3 %v6769_v27 }
 0x959   :  { %2502 = vadd.xlane.f32.xlu2 %v2493_v55 }
 0x95b   :  { %2745 = vmatpush.bf16.msrb.mxu0 %v6761_v32  ;;  %7392 = vmatpush.bf16.msrb.mxu3 %v6761_v32 }
 0x95f   :  { %2746 = vmatpush.bf16.msrb.mxu0 %v6753_v8  ;;  %7393 = vmatpush.bf16.msrb.mxu3 %v6753_v8  ;;  %v6778_v8 = vld [vmem:[%s11051_s2 + $0x130] sm:$0xf0] }
 0x961   :  { %2461 = vadd.xlane.f32.xlu2 %v8975_v42 }
 0x963   :  { %2747 = vmatpush.bf16.msrb.mxu0 %v6745_v18  ;;  %7394 = vmatpush.bf16.msrb.mxu3 %v6745_v18  ;;  %v6762_v18 = vld [vmem:[%s11051_s2 + $0xe0] sm:$0xf0] }
 0x969   :  { %2463 = vadd.xlane.f32.xlu2 %v8982_v9 }
 0x97a   :  { %v2458_v57 = vpop.xlane.xlu1 %2457 }
 0x97b   :  { %v2478_v63 = vmul.f32 %v8955_v50, %v2458_v57 }
 0x97d   :  { %v8986_v45 = vsub.f32 %v2447_v53, %v2478_v63 }
 0x97f   :  { %v2494_v44 = vmul.f32 %v8986_v45, %v8986_v45 }
 0x981   :  { %2504 = vadd.xlane.f32.xlu0 %v2494_v44 }
 0x982   :  { %v2460_v4 = vpop.xlane.xlu2 %2459 }
 0x983   :  { %v2479_v16 = vmul.f32 %v8955_v50, %v2460_v4 }
 0x985   :  { %v8991_v51 = vsub.f32 %v2448_v41, %v2479_v16  ;;  %v1908_v41 = vadd.f32 %v8921_v25, %v1382_v46  ;;  %v6736_v25 = vld [vmem:[%s11051_s2 + $0x54] sm:$0xf] }
 0x986   :  { %v6737_v15 = vor.u32 %v7283_v37, %v6736_v25  ;;  %v6754_v37 = vld [vmem:[%s11051_s2 + $0xb8] sm:$0xf0] }
 0x987   :  { %v2495_v60 = vmul.f32 %v8991_v51, %v8991_v51 }
 0x988   :  { %2748 = vmatpush.bf16.msrb.mxu0 %v6737_v15  ;;  %7395 = vmatpush.bf16.msrb.mxu3 %v6737_v15 }
 0x989   :  { %2506 = vadd.xlane.f32.xlu1 %v2495_v60 }
 0x9b1   :  { %v2421_v62 = vpop.f32.mrf.mxu2 }
 0x9b2   :  { %v2432_v35 = vadd.f32 %v2421_v62, %v8916_v28  ;;  %v7736_v28 = vld [vmem:[%s11050_s0 + $0x30] sm:$0xff] }
 0x9b4   :  { %v2443_v53 = vadd.f32 %v8928_v31, %v2432_v35 }
 0x9b6   :  { %v9026_v43 = vadd.f32 %v7736_v28, %v2443_v53 }
 0x9b8   :  { %2465 = vadd.xlane.f32.xlu2 %v9026_v43 }
 0x9b9   :  { %v2423_v17 = vpop.f32.mrf.mxu2 }
 0x9ba   :  { %v2433_v7 = vadd.f32 %v2423_v17, %v1908_v41  ;;  %v7290_v17 = vld [vmem:[%s11051_s2 + $0xf8] sm:$0xf] }
 0x9bb   :  { %v6773_v3 = vor.u32 %v7290_v17, %v6770_v6 }
 0x9bc   :  { %v2444_v47 = vadd.f32 %v8928_v31, %v2433_v7  ;;  %v6728_v31 = vld [vmem:[%s11051_s2 + $0x2c] sm:$0xf]  ;;  %v7288_v7 = vld [vmem:[%s11051_s2 + $0xd0] sm:$0xf] }
 0x9bd   :  { %v6729_v33 = vor.u32 %v7281_v26, %v6728_v31  ;;  %v6765_v25 = vor.u32 %v7288_v7, %v6762_v18 }
 0x9be   :  { %v9046_v30 = vadd.f32 %v7737_v23, %v2444_v47  ;;  %v7286_v47 = vld [vmem:[%s11051_s2 + $0xa8] sm:$0xf] }
 0x9bf   :  { %2749 = vmatpush.bf16.msrb.mxu0 %v6729_v33  ;;  %7396 = vmatpush.bf16.msrb.mxu3 %v6729_v33  ;;  %v6757_v31 = vor.u32 %v7286_v47, %v6754_v37  ;;  %v7284_v33 = vld [vmem:[%s11051_s2 + $0x80] sm:$0xf]  ;;  %v7296_v37 = vld [vmem:[%s11053_s3 + $0x10] sm:$0xff] }
 0x9c0   :  { %2467 = vadd.xlane.f32.xlu0 %v9046_v30  ;;  %v7298_v47 = vld [vmem:[%s11053_s3 + $0x20] sm:$0xff] }
 0x9c3   :  { %2750 = vmatpush.bf16.msrb.mxu0 %v6721_v58  ;;  %7397 = vmatpush.bf16.msrb.mxu3 %v6721_v58 }
 0x9c4   :  { %v2501_v24 = vpop.xlane.xlu2 %2500 }
 0x9c5   :  { %v2516_v10 = vmul.f32 %v2501_v24, %v8955_v50  ;;  %v6746_v24 = vld [vmem:[%s11051_s2 + $0x90] sm:$0xf0] }
 0x9c7   :  { %v2524_v59 = vadd.f32 1e-05, %v2516_v10  ;;  %v6749_v10 = vor.u32 %v7284_v33, %v6746_v24  ;;  %v7294_v33 = vld [vmem:[%s11053_s3] sm:$0xff] }
 0x9c9   :  { %7538 = vrsqrt.f32 %v2524_v59  ;;  %vm2538_vm5 = vweird.f32 %v2524_v59 }
 0x9cc   :  { %v2503_v55 = vpop.xlane.xlu2 %2502 }
 0x9cd   :  { %v2517_v20 = vmul.f32 %v2503_v55, %v8955_v50  ;;  %v6741_v55 = vor.u32 %v7282_v12, %v6738_v2 }
 0x9cf   :  { %v7539_v39 = vpop.eup %7538  ;;  %v2525_v13 = vadd.f32 1e-05, %v2517_v20  ;;  %v7280_v20 = vld [vmem:[%s11051_s2 + $0x30] sm:$0xf] }
 0x9d0   :  { %v2533_v48 = vmul.f32 %v7539_v39, %v2524_v59  ;;  %vm2539_vm4 = vweird.f32 %v7539_v39 }
 0x9d1   :  { %7540 = vrsqrt.f32 %v2525_v13  ;;  %vm2540_vm6 = vmor %vm2538_vm5, %vm2539_vm4  ;;  %vm2548_vm8 = vweird.f32 %v2525_v13 }
 0x9d2   :  { %v2534_v36 = vmul.f32 %v7539_v39, %v2533_v48 }
 0x9d4   :  { %v2535_v21 = vmul.f32 0.5, %v2534_v36  ;;  %v2462_v1 = vpop.xlane.xlu2 %2461 }
 0x9d5   :  { %v2480_v34 = vmul.f32 %v8955_v50, %v2462_v1 }
 0x9d6   :  { %v2536_v57 = vsub.f32 1.5, %v2535_v21 }
 0x9d7   :  { %v7541_v63 = vpop.eup %7540  ;;  %v9065_v44 = vsub.f32 %v8975_v42, %v2480_v34  ;;  %v9073_v42 = vld [vmem:[%s11052_s5] ss:$0 sm:$0xff]  ;;  %v7278_v34 = vld [vmem:[%s11051_s2 + $0x8] sm:$0xf] }
 0x9d8   :  { %v2537_v4 = vmul.f32 %v7539_v39, %v2536_v57  ;;  %v2543_v16 = vmul.f32 %v7541_v63, %v2525_v13  ;;  %vm2549_vm7 = vweird.f32 %v7541_v63  ;;  %v6722_v57 = vld [vmem:[%s11051_s2 + $0x18] sm:$0xf0] }
 0x9d9   :  { %v2496_v60 = vmul.f32 %v9065_v44, %v9065_v44  ;;  %vm2550_vm9 = vmor %vm2548_vm8, %vm2549_vm7 }
 0x9da   :  { %v2544_v40 = vmul.f32 %v7541_v63, %v2543_v16  ;;  %v2541_v54 = vsel %vm2540_vm6, %v7539_v39, %v2537_v4  ;;  %v6730_v39 = vld [vmem:[%s11051_s2 + $0x40] sm:$0xf0]  ;;  %v6725_v4 = vor.u32 %v7278_v34, %v6722_v57 }
 0x9db   :  { %2508 = vadd.xlane.f32.xlu1 %v2496_v60  ;;  %v2612_v62 = vmul.f32 %v2541_v54, %v8958_v38  ;;  %v6733_v21 = vor.u32 %v7280_v20, %v6730_v39  ;;  %v26_v57 = vld [vmem:[%s11049_s4 + $0x4] sm:$0x3] }
 0x9dc   :  { %v2545_v52 = vmul.f32 0.5, %v2544_v40  ;;  %v2464_v22 = vpop.xlane.xlu2 %2463 }
 0x9dd   :  { %v2481_v49 = vmul.f32 %v8955_v50, %v2464_v22  ;;  %v2621_v53 = vmul.f32 %v9073_v42, %v2612_v62 }
 0x9de   :  { %v2546_v27 = vsub.f32 1.5, %v2545_v52 }
 0x9df   :  { %v9077_v5 = vsub.f32 %v8982_v9, %v2481_v49  ;;  %v9090_v9 = vadd.f32 %v9086_v56, %v2621_v53 }
 0x9e0   :  { %v2547_v19 = vmul.f32 %v7541_v63, %v2546_v27 }
 0x9e1   :  { %v2497_v35 = vmul.f32 %v9077_v5, %v9077_v5 }
 0x9e2   :  { %v2551_v32 = vsel %vm2550_vm9, %v7541_v63, %v2547_v19 }
 0x9e3   :  { %v2613_v29 = vmul.f32 %v2551_v32, %v8963_v11  ;;  %2510 = vadd.xlane.f32.xlu2 %v2497_v35  ;;  %v7292_v11 = vld [vmem:[%s11051_s2 + $0x120] sm:$0xf] }
 0x9e4   :  { %v6781_v41 = vor.u32 %v7292_v11, %v6778_v8 }
 0x9e5   :  { %v2622_v38 = vmul.f32 %v9073_v42, %v2613_v29 }
 0x9e6   :  { %2772 = vmatpush.bf16.msra.mxu0 %v6781_v41 }
 0x9e7   :  { %v9093_v46 = vadd.f32 %v9086_v56, %v2622_v38 }
 0x9e9   :  { %v9097_v28 = vpack.c.bf16 %v9093_v46, %v9090_v9 }
 0x9ea   :  { %2773 = vmatpush.bf16.msra.mxu0 %v6773_v3 }
 0x9eb   :  { %2751 = vmatmul.bf16.vlgmr.msrb.gmra.mxu0 %v9097_v28 }
 0x9ee   :  { %2774 = vmatpush.bf16.msra.mxu0 %v6765_v25  ;;  %v7297_v25 = vld [vmem:[%s11053_s3 + $0x18] sm:$0xff] }
 0x9f2   :  { %2775 = vmatpush.bf16.msra.mxu0 %v6757_v31 }
 0x9f4   :  { %v2505_v23 = vpop.xlane.xlu0 %2504 }
 0x9f5   :  { %v2518_v15 = vmul.f32 %v2505_v23, %v8955_v50 }
 0x9f6   :  { %2776 = vmatpush.bf16.msra.mxu0 %v6749_v10 }
 0x9f7   :  { %v2526_v26 = vadd.f32 1e-05, %v2518_v15  ;;  %v7295_v15 = vld [vmem:[%s11053_s3 + $0x8] sm:$0xff] }
 0x9f9   :  { %7542 = vrsqrt.f32 %v2526_v26  ;;  %vm2558_vm11 = vweird.f32 %v2526_v26 }
 0x9fa   :  { %2777 = vmatpush.bf16.msra.mxu0 %v6741_v55 }
 0x9fc   :  { %v2507_v58 = vpop.xlane.xlu1 %2506 }
 0x9fd   :  { %v2519_v59 = vmul.f32 %v2507_v58, %v8955_v50 }
 0x9fe   :  { %2778 = vmatpush.bf16.msra.mxu0 %v6733_v21 }
 0x9ff   :  { %v7543_v13 = vpop.eup %7542  ;;  %v2527_v48 = vadd.f32 1e-05, %v2519_v59 }
 0xa00   :  { %v2553_v36 = vmul.f32 %v7543_v13, %v2526_v26  ;;  %vm2559_vm10 = vweird.f32 %v7543_v13 }
 0xa01   :  { %7544 = vrsqrt.f32 %v2527_v48  ;;  %vm2560_vm12 = vmor %vm2558_vm11, %vm2559_vm10  ;;  %vm2568_vm14 = vweird.f32 %v2527_v48 }
 0xa02   :  { %v2554_v1 = vmul.f32 %v7543_v13, %v2553_v36  ;;  %2779 = vmatpush.bf16.msra.mxu0 %v6725_v4 }
 0xa04   :  { %v2555_v63 = vmul.f32 0.5, %v2554_v1 }
 0xa06   :  { %v2556_v16 = vsub.f32 1.5, %v2555_v63 }
 0xa07   :  { %v7545_v60 = vpop.eup %7544 }
 0xa08   :  { %v2557_v40 = vmul.f32 %v7543_v13, %v2556_v16  ;;  %v2563_v54 = vmul.f32 %v7545_v60, %v2527_v48  ;;  %vm2569_vm13 = vweird.f32 %v7545_v60 }
 0xa09   :  { %vm2570_vm15 = vmor %vm2568_vm14, %vm2569_vm13 }
 0xa0a   :  { %v2564_v52 = vmul.f32 %v7545_v60, %v2563_v54  ;;  %v2561_v22 = vsel %vm2560_vm12, %v7543_v13, %v2557_v40 }
 0xa0b   :  { %v2614_v62 = vmul.f32 %v2561_v22, %v8986_v45 }
 0xa0c   :  { %v2565_v49 = vmul.f32 0.5, %v2564_v52 }
 0xa0d   :  { %v2623_v53 = vmul.f32 %v9073_v42, %v2614_v62 }
 0xa0e   :  { %v2566_v27 = vsub.f32 1.5, %v2565_v49 }
 0xa0f   :  { %v9155_v38 = vadd.f32 %v9086_v56, %v2623_v53 }
 0xa10   :  { %v2567_v19 = vmul.f32 %v7545_v60, %v2566_v27 }
 0xa12   :  { %v2571_v35 = vsel %vm2570_vm15, %v7545_v60, %v2567_v19  ;;  %v9205_v60 = vperm.slane %v26_v57, 0 }
 0xa13   :  { %v2615_v32 = vmul.f32 %v2571_v35, %v8991_v51 }
 0xa15   :  { %v2624_v29 = vmul.f32 %v9073_v42, %v2615_v32 }
 0xa17   :  { %v9158_v11 = vadd.f32 %v9086_v56, %v2624_v29 }
 0xa19   :  { %v2639_v8 = vpack.c.bf16 %v9158_v11, %v9155_v38 }
 0xa1b   :  { %2756 = vmatmul.bf16.gmra.mxu0 %v2639_v8 }
 0xa2b   :  { %2780 = vmatmul.bf16.vlgmr.msra.gmra.mxu0 %v9097_v28  ;;  %v2466_v45 = vpop.xlane.xlu2 %2465  ;;  %v7301_v28 = vld [vmem:[%s11053_s3 + $0x38] sm:$0xff] }
 0xa2c   :  { %v2482_v41 = vmul.f32 %v8955_v50, %v2466_v45  ;;  %2956 = vmatpush.bf16.msrb.mxu1 %v7301_v28  ;;  %v7307_v45 = vld [vmem:[%s11053_s3 + $0x68] sm:$0xff]  ;;  %v7302_v28 = vld [vmem:[%s11053_s3 + $0x40] sm:$0xff] }
 0xa2e   :  { %v9165_v51 = vsub.f32 %v9026_v43, %v2482_v41  ;;  %v7300_v43 = vld [vmem:[%s11053_s3 + $0x30] sm:$0xff]  ;;  %v7306_v41 = vld [vmem:[%s11053_s3 + $0x60] sm:$0xff] }
 0xa30   :  { %v2498_v17 = vmul.f32 %v9165_v51, %v9165_v51  ;;  %2957 = vmatpush.bf16.msrb.mxu1 %v7300_v43 }
 0xa32   :  { %2512 = vadd.xlane.f32.xlu0 %v2498_v17  ;;  %v7305_v17 = vld [vmem:[%s11053_s3 + $0x58] sm:$0xff] }
 0xa33   :  { %v2468_v6 = vpop.xlane.xlu0 %2467 }
 0xa34   :  { %v2483_v3 = vmul.f32 %v8955_v50, %v2468_v6  ;;  %v7304_v6 = vld [vmem:[%s11053_s3 + $0x50] sm:$0xff] }
 0xa36   :  { %v9171_v7 = vsub.f32 %v9046_v30, %v2483_v3  ;;  %v7299_v30 = vld [vmem:[%s11053_s3 + $0x28] sm:$0xff] }
 0xa37   :  { %2958 = vmatpush.bf16.msrb.mxu1 %v7299_v30  ;;  %v7303_v3 = vld [vmem:[%s11053_s3 + $0x48] sm:$0xff] }
 0xa38   :  { %v2499_v18 = vmul.f32 %v9171_v7, %v9171_v7 }
 0xa3a   :  { %2514 = vadd.xlane.f32.xlu1 %v2499_v18 }
 0xa3b   :  { %2785 = vmatmul.bf16.gmra.mxu0 %v2639_v8  ;;  %2959 = vmatpush.bf16.msrb.mxu1 %v7298_v47  ;;  %v7308_v8 = vld [vmem:[%s11053_s3 + $0x70] sm:$0xff] }
 0xa3f   :  { %2960 = vmatpush.bf16.msrb.mxu1 %v7297_v25 }
 0xa43   :  { %2961 = vmatpush.bf16.msrb.mxu1 %v7296_v37 }
 0xa47   :  { %2962 = vmatpush.bf16.msrb.mxu1 %v7295_v15 }
 0xa4b   :  { %2963 = vmatpush.bf16.msrb.mxu1 %v7294_v33 }
 0xa4e   :  { %v2509_v23 = vpop.xlane.xlu1 %2508 }
 0xa4f   :  { %v2520_v31 = vmul.f32 %v2509_v23, %v8955_v50 }
 0xa51   :  { %v2528_v26 = vadd.f32 1e-05, %v2520_v31 }
 0xa53   :  { %7546 = vrsqrt.f32 %v2528_v26  ;;  %vm2578_vm4 = vweird.f32 %v2528_v26 }
 0xa56   :  { %v2511_v24 = vpop.xlane.xlu2 %2510 }
 0xa57   :  { %v2521_v10 = vmul.f32 %v2511_v24, %v8955_v50  ;;  %v9247_v24 = vperm.slane %v26_v57, 1 }
 0xa59   :  { %v7547_v12 = vpop.eup %7546  ;;  %v2529_v2 = vadd.f32 1e-05, %v2521_v10  ;;  %11061 = vst [vmem:[#allocation2_spill] sm:$0xff] %v9247_v24 }
 0xa5a   :  { %v2573_v58 = vmul.f32 %v7547_v12, %v2528_v26  ;;  %vm2579_vm3 = vweird.f32 %v7547_v12 }
 0xa5b   :  { %7548 = vrsqrt.f32 %v2529_v2  ;;  %vm2580_vm5 = vmor %vm2578_vm4, %vm2579_vm3  ;;  %vm2588_vm7 = vweird.f32 %v2529_v2 }
 0xa5c   :  { %v2574_v59 = vmul.f32 %v7547_v12, %v2573_v58 }
 0xa5e   :  { %v2575_v55 = vmul.f32 0.5, %v2574_v59 }
 0xa60   :  { %v2576_v20 = vsub.f32 1.5, %v2575_v55 }
 0xa61   :  { %v7549_v39 = vpop.eup %7548 }
 0xa62   :  { %v2577_v13 = vmul.f32 %v7547_v12, %v2576_v20  ;;  %v2583_v48 = vmul.f32 %v7549_v39, %v2529_v2  ;;  %vm2589_vm6 = vweird.f32 %v7549_v39 }
 0xa63   :  { %vm2590_vm8 = vmor %vm2588_vm7, %vm2589_vm6 }
 0xa64   :  { %v2584_v36 = vmul.f32 %v7549_v39, %v2583_v48  ;;  %v2581_v21 = vsel %vm2580_vm5, %v7547_v12, %v2577_v13 }
 0xa65   :  { %v2616_v4 = vmul.f32 %v2581_v21, %v9065_v44 }
 0xa66   :  { %v2585_v1 = vmul.f32 0.5, %v2584_v36 }
 0xa67   :  { %v2625_v54 = vmul.f32 %v9073_v42, %v2616_v4 }
 0xa68   :  { %v2586_v34 = vsub.f32 1.5, %v2585_v1  ;;  %v2752_v63 = vpop.f32.mrf.mxu0 }
 0xa69   :  { %v2753_v49 = vadd.f32 %v2752_v63, %v9205_v60  ;;  %v9213_v19 = vadd.f32 %v9086_v56, %v2625_v54 }
 0xa6a   :  { %v2587_v16 = vmul.f32 %v7549_v39, %v2586_v34 }
 0xa6b   :  { %v2801_v35 = vmax.f32 %v2753_v49, 0.0 }
 0xa6c   :  { %v2591_v40 = vsel %vm2590_vm8, %v7549_v39, %v2587_v16 }
 0xa6d   :  { %v2617_v52 = vmul.f32 %v2591_v40, %v9077_v5  ;;  %v7309_v5 = vld [vmem:[%s11053_s3 + $0x78] sm:$0xff] }
 0xa6e   :  { %2985 = vmatpush.bf16.msra.mxu2 %v7309_v5 }
 0xa6f   :  { %v2626_v22 = vmul.f32 %v9073_v42, %v2617_v52 }
 0xa70   :  { %v2754_v27 = vpop.f32.mrf.mxu0 }
 0xa71   :  { %v2755_v62 = vadd.f32 %v2754_v27, %v9205_v60  ;;  %v9216_v44 = vadd.f32 %v9086_v56, %v2626_v22 }
 0xa72   :  { %2986 = vmatpush.bf16.msra.mxu2 %v7308_v8 }
 0xa73   :  { %v2803_v32 = vmax.f32 %v2755_v62, 0.0  ;;  %v2640_v53 = vpack.c.bf16 %v9216_v44, %v9213_v19 }
 0xa75   :  { %v2817_v29 = vpack.c.bf16 %v2803_v32, %v2801_v35  ;;  %2761 = vmatmul.bf16.vlgmr.msrb.gmra.mxu3 %v2640_v53  ;;  %2790 = vmatmul.bf16.gmra.mxu0 %v2640_v53 }
 0xa76   :  { %2987 = vmatpush.bf16.msra.mxu2 %v7307_v45 }
 0xa77   :  { %2964 = vmatmul.bf16.vlgmr.msrb.gmra.mxu1 %v2817_v29 }
 0xa7a   :  { %2988 = vmatpush.bf16.msra.mxu2 %v7306_v41 }
 0xa7e   :  { %2989 = vmatpush.bf16.msra.mxu2 %v7305_v17 }
 0xa82   :  { %2990 = vmatpush.bf16.msra.mxu2 %v7304_v6 }
 0xa86   :  { %2991 = vmatpush.bf16.msra.mxu2 %v7303_v3 }
 0xa8a   :  { %2992 = vmatpush.bf16.msra.mxu2 %v7302_v28 }
 0xa98   :  { %v2757_v18 = vpop.f32.mrf.mxu0 }
 0xa99   :  { %v2758_v43 = vadd.f32 %v2757_v18, %v9205_v60 }
 0xa9b   :  { %v2805_v25 = vmax.f32 %v2758_v43, 0.0 }
 0xaa0   :  { %v2759_v30 = vpop.f32.mrf.mxu0 }
 0xaa1   :  { %v2760_v47 = vadd.f32 %v2759_v30, %v9205_v60 }
 0xaa3   :  { %v2807_v37 = vmax.f32 %v2760_v47, 0.0 }
 0xaa5   :  { %v2513_v23 = vpop.xlane.xlu0 %2512  ;;  %v2819_v15 = vpack.c.bf16 %v2807_v37, %v2805_v25 }
 0xaa6   :  { %v2522_v31 = vmul.f32 %v2513_v23, %v8955_v50 }
 0xaa7   :  { %2969 = vmatmul.bf16.gmra.mxu1 %v2819_v15 }
 0xaa8   :  { %v2530_v26 = vadd.f32 1e-05, %v2522_v31  ;;  %v2781_v33 = vpop.f32.mrf.mxu0 }
 0xaa9   :  { %v2782_v2 = vadd.f32 %v2781_v33, %v9247_v24 }
 0xaaa   :  { %7550 = vrsqrt.f32 %v2530_v26  ;;  %vm2598_vm10 = vweird.f32 %v2530_v26 }
 0xaab   :  { %v2802_v48 = vmax.f32 %v2782_v2, 0.0 }
 0xaad   :  { %v2515_v10 = vpop.xlane.xlu1 %2514 }
 0xaae   :  { %v2523_v12 = vmul.f32 %v2515_v10, %v8955_v50  ;;  %v9273_v10 = vld [vmem:[%s11049_s4 + $0x6] ss:$0 sm:$0xff] }
 0xab0   :  { %v7551_v58 = vpop.eup %7550  ;;  %v2531_v59 = vadd.f32 1e-05, %v2523_v12  ;;  %v2783_v55 = vpop.f32.mrf.mxu0 }
 0xab1   :  { %v2593_v20 = vmul.f32 %v7551_v58, %v2530_v26  ;;  %v2784_v39 = vadd.f32 %v2783_v55, %v9247_v24  ;;  %vm2599_vm9 = vweird.f32 %v7551_v58 }
 0xab2   :  { %7552 = vrsqrt.f32 %v2531_v59  ;;  %vm2600_vm11 = vmor %vm2598_vm10, %vm2599_vm9  ;;  %vm2608_vm13 = vweird.f32 %v2531_v59 }
 0xab3   :  { %v2594_v13 = vmul.f32 %v7551_v58, %v2593_v20  ;;  %v2804_v36 = vmax.f32 %v2784_v39, 0.0 }
 0xab5   :  { %v2595_v21 = vmul.f32 0.5, %v2594_v13  ;;  %v2818_v1 = vpack.c.bf16 %v2804_v36, %v2802_v48 }
 0xab7   :  { %v2596_v34 = vsub.f32 1.5, %v2595_v21  ;;  %2993 = vmatmul.bf16.vlgmr.msra.gmra.mxu2 %v2818_v1 }
 0xab8   :  { %v7553_v57 = vpop.eup %7552  ;;  %v2786_v63 = vpop.f32.mrf.mxu0 }
 0xab9   :  { %v2597_v4 = vmul.f32 %v7551_v58, %v2596_v34  ;;  %v2603_v16 = vmul.f32 %v7553_v57, %v2531_v59  ;;  %vm2609_vm12 = vweird.f32 %v7553_v57  ;;  %v2787_v49 = vadd.f32 %v2786_v63, %v9247_v24 }
 0xaba   :  { %vm2610_vm14 = vmor %vm2608_vm13, %vm2609_vm12 }
 0xabb   :  { %v2604_v40 = vmul.f32 %v7553_v57, %v2603_v16  ;;  %v2601_v54 = vsel %vm2600_vm11, %v7551_v58, %v2597_v4  ;;  %v2806_v29 = vmax.f32 %v2787_v49, 0.0 }
 0xabc   :  { %v2618_v62 = vmul.f32 %v2601_v54, %v9165_v51 }
 0xabd   :  { %v2605_v52 = vmul.f32 0.5, %v2604_v40 }
 0xabe   :  { %v2627_v45 = vmul.f32 %v9073_v42, %v2618_v62 }
 0xabf   :  { %v2606_v22 = vsub.f32 1.5, %v2605_v52 }
 0xac0   :  { %v2788_v27 = vpop.f32.mrf.mxu0  ;;  %v9259_v6 = vadd.f32 %v9086_v56, %v2627_v45 }
 0xac1   :  { %v2607_v35 = vmul.f32 %v7553_v57, %v2606_v22  ;;  %v2789_v32 = vadd.f32 %v2788_v27, %v9247_v24 }
 0xac3   :  { %v2611_v53 = vsel %vm2610_vm14, %v7553_v57, %v2607_v35  ;;  %v2808_v5 = vmax.f32 %v2789_v32, 0.0 }
 0xac4   :  { %v2619_v8 = vmul.f32 %v2611_v53, %v9171_v7 }
 0xac5   :  { %v2820_v41 = vpack.c.bf16 %v2808_v5, %v2806_v29 }
 0xac6   :  { %v2628_v17 = vmul.f32 %v9073_v42, %v2619_v8 }
 0xac7   :  { %2998 = vmatmul.bf16.gmra.mxu2 %v2820_v41 }
 0xac8   :  { %v9262_v51 = vadd.f32 %v9086_v56, %v2628_v17 }
 0xaca   :  { %v2641_v3 = vpack.c.bf16 %v9262_v51, %v9259_v6 }
 0xacc   :  { %2766 = vmatmul.bf16.gmra.mxu3 %v2641_v3  ;;  %2795 = vmatmul.bf16.gmra.mxu0 %v2641_v3 }
 0xaf2   :  { %v2791_v28 = vpop.f32.mrf.mxu0 }
 0xaf3   :  { %v2792_v7 = vadd.f32 %v2791_v28, %v9247_v24 }
 0xaf4   :  { %v2965_v33 = vpop.f32.mrf.mxu1 }
 0xaf5   :  { %v2810_v42 = vmax.f32 %v2792_v7, 0.0  ;;  %v2966_v12 = vadd.f32 %v9273_v10, %v2965_v33 }
 0xaf8   :  { %v2762_v18 = vpop.f32.mrf.mxu3 }
 0xaf9   :  { %v2763_v25 = vadd.f32 %v2762_v18, %v9205_v60 }
 0xafa   :  { %v2793_v43 = vpop.f32.mrf.mxu0 }
 0xafb   :  { %v2794_v30 = vadd.f32 %v2793_v43, %v9247_v24  ;;  %v2809_v15 = vmax.f32 %v2763_v25, 0.0 }
 0xafc   :  { %v2967_v59 = vpop.f32.mrf.mxu1 }
 0xafd   :  { %v2812_v47 = vmax.f32 %v2794_v30, 0.0  ;;  %v2968_v20 = vadd.f32 %v9273_v10, %v2967_v59 }
 0xaff   :  { %v2822_v37 = vpack.c.bf16 %v2812_v47, %v2810_v42 }
 0xb00   :  { %v2764_v23 = vpop.f32.mrf.mxu3 }
 0xb01   :  { %v2765_v56 = vadd.f32 %v2764_v23, %v9205_v60  ;;  %3003 = vmatmul.bf16.gmra.mxu2 %v2822_v37 }
 0xb03   :  { %v2811_v31 = vmax.f32 %v2765_v56, 0.0 }
 0xb05   :  { %v2821_v26 = vpack.c.bf16 %v2811_v31, %v2809_v15 }
 0xb07   :  { %2974 = vmatmul.bf16.gmra.mxu1 %v2821_v26 }
 0xb24   :  { %v2970_v48 = vpop.f32.mrf.mxu1 }
 0xb25   :  { %v2971_v21 = vadd.f32 %v9273_v10, %v2970_v48 }
 0xb2c   :  { %v2972_v4 = vpop.f32.mrf.mxu1 }
 0xb2d   :  { %v2973_v40 = vadd.f32 %v9273_v10, %v2972_v4 }
 0xb3a   :  { %v2994_v2 = vpop.f32.mrf.mxu2 }
 0xb3b   :  { %v2995_v58 = vadd.f32 %v2994_v2, %v2966_v12 }
 0xb3d   :  { %v3014_v55 = vadd.f32 %v2995_v58, %v9090_v9 }
 0xb3f   :  { %3022 = vadd.xlane.f32.xlu2 %v3014_v55 }
 0xb42   :  { %v2996_v39 = vpop.f32.mrf.mxu2 }
 0xb43   :  { %v2997_v13 = vadd.f32 %v2996_v39, %v2968_v20 }
 0xb45   :  { %v3015_v36 = vadd.f32 %v2997_v13, %v9093_v46 }
 0xb47   :  { %3024 = vadd.xlane.f32.xlu0 %v3015_v36 }
 0xb49   :  { %v2796_v1 = vpop.f32.mrf.mxu0 }
 0xb4a   :  { %v2999_v34 = vpop.f32.mrf.mxu2  ;;  %v2797_v9 = vadd.f32 %v2796_v1, %v9247_v24 }
 0xb4b   :  { %v3000_v57 = vadd.f32 %v2999_v34, %v2971_v21 }
 0xb4c   :  { %v2814_v49 = vmax.f32 %v2797_v9, 0.0 }
 0xb4d   :  { %v3016_v63 = vadd.f32 %v3000_v57, %v9155_v38 }
 0xb4f   :  { %3026 = vadd.xlane.f32.xlu1 %v3016_v63  ;;  %v2767_v16 = vpop.f32.mrf.mxu3 }
 0xb50   :  { %v2768_v35 = vadd.f32 %v2767_v16, %v9205_v60 }
 0xb51   :  { %v2798_v54 = vpop.f32.mrf.mxu0 }
 0xb52   :  { %v2799_v52 = vadd.f32 %v2798_v54, %v9247_v24  ;;  %v3001_v22 = vpop.f32.mrf.mxu2  ;;  %v2813_v29 = vmax.f32 %v2768_v35, 0.0  ;;  %v6932_v54 = vld [vmem:[%s11048_s1 + $0xa8] sm:$0xf] }
 0xb53   :  { %v3002_v46 = vadd.f32 %v3001_v22, %v2973_v40  ;;  %v7331_v22 = vld [vmem:[%s11048_s1 + $0xac] sm:$0xf] }
 0xb54   :  { %v2816_v27 = vmax.f32 %v2799_v52, 0.0  ;;  %v7332_v52 = vld [vmem:[%s11048_s1 + $0xb0] sm:$0xf0] }
 0xb55   :  { %v3017_v62 = vadd.f32 %v3002_v46, %v9158_v11  ;;  %v6933_v46 = vor.u32 %v7332_v52, %v6932_v54  ;;  %v6880_v54 = vld [vmem:[%s11048_s1 + $0x38] sm:$0xf]  ;;  %v7318_v52 = vld [vmem:[%s11048_s1 + $0x40] sm:$0xf0] }
 0xb56   :  { %v2824_v32 = vpack.c.bf16 %v2816_v27, %v2814_v49  ;;  %v6934_v49 = vld [vmem:[%s11048_s1 + $0xb4] sm:$0xf0]  ;;  %v6940_v27 = vld [vmem:[%s11048_s1 + $0xb0] sm:$0xf] }
 0xb57   :  { %3028 = vadd.xlane.f32.xlu2 %v3017_v62  ;;  %v2769_v38 = vpop.f32.mrf.mxu3  ;;  %v6937_v35 = vor.u32 %v7331_v22, %v6934_v49  ;;  %3364 = vmatpush.bf16.msra.mxu3 %v6933_v46  ;;  %v6881_v46 = vor.u32 %v7318_v52, %v6880_v54  ;;  %v6860_v49 = vld [vmem:[%s11048_s1 + $0x18] sm:$0xf] }
 0xb58   :  { %v2770_v53 = vadd.f32 %v2769_v38, %v9205_v60  ;;  %3008 = vmatmul.bf16.gmra.mxu2 %v2824_v32  ;;  %v6920_v38 = vld [vmem:[%s11048_s1 + $0x90] sm:$0xf] }
 0xb59   :  { %3393 = vmatpush.bf16.msrb.mxu0 %v6937_v35 }
 0xb5a   :  { %v2815_v5 = vmax.f32 %v2770_v53, 0.0  ;;  %v7329_v53 = vld [vmem:[%s11048_s1 + $0x98] sm:$0xf0] }
 0xb5c   :  { %v2823_v8 = vpack.c.bf16 %v2815_v5, %v2813_v29  ;;  %v7328_v29 = vld [vmem:[%s11048_s1 + $0x94] sm:$0xf]  ;;  %v6921_v5 = vor.u32 %v7329_v53, %v6920_v38  ;;  %v6868_v38 = vld [vmem:[%s11048_s1 + $0x20] sm:$0xf]  ;;  %v7315_v53 = vld [vmem:[%s11048_s1 + $0x28] sm:$0xf0] }
 0xb5e   :  { %2979 = vmatmul.bf16.gmra.mxu1 %v2823_v8  ;;  %v6922_v8 = vld [vmem:[%s11048_s1 + $0x9c] sm:$0xf0]  ;;  %3365 = vmatpush.bf16.msra.mxu3 %v6921_v5 }
 0xb84   :  { %v2975_v45 = vpop.f32.mrf.mxu1  ;;  %v3004_v41 = vpop.f32.mrf.mxu2 }
 0xb85   :  { %v2976_v17 = vadd.f32 %v9273_v10, %v2975_v45  ;;  %v6928_v45 = vld [vmem:[%s11048_s1 + $0x98] sm:$0xf] }
 0xb87   :  { %v3005_v3 = vadd.f32 %v3004_v41, %v2976_v17  ;;  %v7330_v41 = vld [vmem:[%s11048_s1 + $0xa0] sm:$0xf0]  ;;  %v6925_v17 = vor.u32 %v7328_v29, %v6922_v8  ;;  %v6869_v8 = vor.u32 %v7315_v53, %v6868_v38 }
 0xb89   :  { %v3018_v28 = vadd.f32 %v3005_v3, %v9213_v19  ;;  %v6929_v3 = vor.u32 %v7330_v41, %v6928_v45  ;;  %3394 = vmatpush.bf16.msrb.mxu0 %v6925_v17  ;;  %v6848_v41 = vld [vmem:[%s11048_s1] sm:$0xf]  ;;  %v7311_v17 = vld [vmem:[%s11048_s1 + $0x8] sm:$0xf0] }
 0xb8b   :  { %3030 = vadd.xlane.f32.xlu0 %v3018_v28 }
 0xb8c   :  { %v2977_v11 = vpop.f32.mrf.mxu1  ;;  %v3006_v7 = vpop.f32.mrf.mxu2 }
 0xb8d   :  { %v2978_v18 = vadd.f32 %v9273_v10, %v2977_v11  ;;  %v7326_v11 = vld [vmem:[%s11048_s1 + $0x80] sm:$0xf0] }
 0xb8f   :  { %v3007_v43 = vadd.f32 %v3006_v7, %v2978_v18  ;;  %v7325_v18 = vld [vmem:[%s11048_s1 + $0x7c] sm:$0xf] }
 0xb91   :  { %v3019_v30 = vadd.f32 %v3007_v43, %v9216_v44  ;;  %v6910_v43 = vld [vmem:[%s11048_s1 + $0x84] sm:$0xf0] }
 0xb93   :  { %3032 = vadd.xlane.f32.xlu1 %v3019_v30 }
 0xbb2   :  { %v3023_v42 = vpop.xlane.xlu2 %3022 }
 0xbb3   :  { %v3038_v47 = vmul.f32 %v3023_v42, %v8955_v50  ;;  %v7327_v42 = vld [vmem:[%s11048_s1 + $0x88] sm:$0xf0] }
 0xbb5   :  { %v9292_v25 = vsub.f32 %v3014_v55, %v3038_v47  ;;  %v6913_v47 = vor.u32 %v7325_v18, %v6910_v43  ;;  %v6850_v18 = vld [vmem:[%s11048_s1 + $0xc] sm:$0xf0] }
 0xbb7   :  { %v3054_v37 = vmul.f32 %v9292_v25, %v9292_v25  ;;  %3395 = vmatpush.bf16.msrb.mxu0 %v6913_v47 }
 0xbb9   :  { %3062 = vadd.xlane.f32.xlu2 %v3054_v37 }
 0xbba   :  { %v3025_v23 = vpop.xlane.xlu0 %3024 }
 0xbbb   :  { %v3039_v19 = vmul.f32 %v3025_v23, %v8955_v50  ;;  %v6896_v23 = vld [vmem:[%s11048_s1 + $0x60] sm:$0xf] }
 0xbbd   :  { %v9297_v56 = vsub.f32 %v3015_v36, %v3039_v19  ;;  %v7323_v19 = vld [vmem:[%s11048_s1 + $0x68] sm:$0xf0] }
 0xbbf   :  { %v3055_v15 = vmul.f32 %v9297_v56, %v9297_v56 }
 0xbc1   :  { %3064 = vadd.xlane.f32.xlu0 %v3055_v15  ;;  %v7322_v15 = vld [vmem:[%s11048_s1 + $0x64] sm:$0xf] }
 0xbc2   :  { %v3027_v44 = vpop.xlane.xlu1 %3026 }
 0xbc3   :  { %v3040_v31 = vmul.f32 %v3027_v44, %v8955_v50  ;;  %v6897_v44 = vor.u32 %v7323_v19, %v6896_v23 }
 0xbc5   :  { %v9302_v26 = vsub.f32 %v3016_v63, %v3040_v31  ;;  %v6898_v31 = vld [vmem:[%s11048_s1 + $0x6c] sm:$0xf0] }
 0xbc7   :  { %v3056_v33 = vmul.f32 %v9302_v26, %v9302_v26 }
 0xbc9   :  { %3066 = vadd.xlane.f32.xlu0 %v3056_v33  ;;  %v6904_v33 = vld [vmem:[%s11048_s1 + $0x68] sm:$0xf] }
 0xbca   :  { %v3029_v59 = vpop.xlane.xlu2 %3028 }
 0xbcb   :  { %v3041_v20 = vmul.f32 %v3029_v59, %v8955_v50  ;;  %v6884_v59 = vld [vmem:[%s11048_s1 + $0x48] sm:$0xf] }
 0xbcd   :  { %v9313_v36 = vsub.f32 %v3017_v62, %v3041_v20  ;;  %v7333_v62 = vld [vmem:[%s11048_s1 + $0xb8] sm:$0xf0]  ;;  %v7319_v20 = vld [vmem:[%s11048_s1 + $0x4c] sm:$0xf] }
 0xbce   :  { %v6941_v32 = vor.u32 %v7333_v62, %v6940_v27  ;;  %v7314_v27 = vld [vmem:[%s11048_s1 + $0x20] sm:$0xf0]  ;;  %v7313_v62 = vld [vmem:[%s11048_s1 + $0x1c] sm:$0xf] }
 0xbcf   :  { %v3057_v57 = vmul.f32 %v9313_v36, %v9313_v36  ;;  %v6861_v35 = vor.u32 %v7314_v27, %v6860_v49 }
 0xbd0   :  { %3422 = vmatpush.bf16.msra.mxu1 %v6941_v32  ;;  %v6862_v32 = vld [vmem:[%s11048_s1 + $0x24] sm:$0xf0] }
 0xbd1   :  { %v6865_v5 = vor.u32 %v7313_v62, %v6862_v32 }
 0xbd4   :  { %3423 = vmatpush.bf16.msra.mxu1 %v6929_v3  ;;  %v7310_v3 = vld [vmem:[%s11048_s1 + $0x4] sm:$0xf] }
 0xbd5   :  { %v6853_v43 = vor.u32 %v7310_v3, %v6850_v18 }
 0xbdb   :  { %v2980_v12 = vpop.f32.mrf.mxu1  ;;  %v3009_v2 = vpop.f32.mrf.mxu2 }
 0xbdc   :  { %v2981_v58 = vadd.f32 %v9273_v10, %v2980_v12  ;;  %v7324_v12 = vld [vmem:[%s11048_s1 + $0x70] sm:$0xf0] }
 0xbde   :  { %v3010_v55 = vadd.f32 %v3009_v2, %v2981_v58  ;;  %v6901_v2 = vor.u32 %v7322_v15, %v6898_v31  ;;  %v6905_v58 = vor.u32 %v7324_v12, %v6904_v33 }
 0xbe0   :  { %v9309_v39 = vadd.f32 %v3010_v55, %v9259_v6  ;;  %3396 = vmatpush.bf16.msrb.mxu0 %v6901_v2  ;;  %v7320_v55 = vld [vmem:[%s11048_s1 + $0x50] sm:$0xf0] }
 0xbe2   :  { %3034 = vadd.xlane.f32.xlu1 %v9309_v39 }
 0xbe3   :  { %v2982_v13 = vpop.f32.mrf.mxu1  ;;  %v3011_v21 = vpop.f32.mrf.mxu2 }
 0xbe4   :  { %v2983_v48 = vadd.f32 %v9273_v10, %v2982_v13  ;;  %v6885_v13 = vor.u32 %v7320_v55, %v6884_v59 }
 0xbe6   :  { %v3012_v1 = vadd.f32 %v3011_v21, %v2983_v48  ;;  %v6886_v48 = vld [vmem:[%s11048_s1 + $0x54] sm:$0xf0]  ;;  %v6892_v21 = vld [vmem:[%s11048_s1 + $0x50] sm:$0xf] }
 0xbe8   :  { %v9316_v34 = vadd.f32 %v3012_v1, %v9262_v51  ;;  %v7321_v1 = vld [vmem:[%s11048_s1 + $0x58] sm:$0xf0] }
 0xbea   :  { %3036 = vadd.xlane.f32.xlu2 %v9316_v34  ;;  %3068 = vadd.xlane.f32.xlu1 %v3057_v57  ;;  %v6889_v57 = vor.u32 %v7319_v20, %v6886_v48 }
 0xbec   :  { %3397 = vmatpush.bf16.msrb.mxu0 %v6889_v57 }
 0xbfe   :  { %v3031_v6 = vpop.xlane.xlu0 %3030 }
 0xbff   :  { %v3042_v63 = vmul.f32 %v3031_v6, %v8955_v50  ;;  %v6893_v6 = vor.u32 %v7321_v1, %v6892_v21  ;;  %v9480_v21 = vld [vmem:[%s11052_s5 + $0x2] ss:$0 sm:$0xff] }
 0xc01   :  { %v9322_v4 = vsub.f32 %v3018_v28, %v3042_v63  ;;  %v6908_v28 = vld [vmem:[%s11048_s1 + $0x78] sm:$0xf]  ;;  %v6872_v63 = vld [vmem:[%s11048_s1 + $0x30] sm:$0xf] }
 0xc02   :  { %v6909_v7 = vor.u32 %v7326_v11, %v6908_v28  ;;  %v6849_v11 = vor.u32 %v7311_v17, %v6848_v41 }
 0xc03   :  { %v3058_v10 = vmul.f32 %v9322_v4, %v9322_v4 }
 0xc04   :  { %3366 = vmatpush.bf16.msra.mxu3 %v6909_v7  ;;  %v6856_v7 = vld [vmem:[%s11048_s1 + $0x8] sm:$0xf] }
 0xc05   :  { %3070 = vadd.xlane.f32.xlu2 %v3058_v10  ;;  %v7317_v10 = vld [vmem:[%s11048_s1 + $0x38] sm:$0xf0] }
 0xc06   :  { %v3033_v16 = vpop.xlane.xlu1 %3032 }
 0xc07   :  { %v3043_v9 = vmul.f32 %v3033_v16, %v8955_v50  ;;  %v7316_v16 = vld [vmem:[%s11048_s1 + $0x34] sm:$0xf] }
 0xc08   :  { %3367 = vmatpush.bf16.msra.mxu3 %v6897_v44 }
 0xc09   :  { %v9327_v51 = vsub.f32 %v3019_v30, %v3043_v9  ;;  %v6916_v30 = vld [vmem:[%s11048_s1 + $0x80] sm:$0xf]  ;;  %v6873_v9 = vor.u32 %v7317_v10, %v6872_v63 }
 0xc0a   :  { %v6917_v37 = vor.u32 %v7327_v42, %v6916_v30  ;;  %v7312_v30 = vld [vmem:[%s11048_s1 + $0x10] sm:$0xf0] }
 0xc0b   :  { %v3059_v40 = vmul.f32 %v9327_v51, %v9327_v51  ;;  %v6857_v42 = vor.u32 %v7312_v30, %v6856_v7 }
 0xc0c   :  { %3424 = vmatpush.bf16.msra.mxu1 %v6917_v37  ;;  %3368 = vmatpush.bf16.msra.mxu3 %v6885_v13 }
 0xc0d   :  { %3072 = vadd.xlane.f32.xlu0 %v3059_v40  ;;  %v6874_v40 = vld [vmem:[%s11048_s1 + $0x3c] sm:$0xf0] }
 0xc0e   :  { %v6877_v22 = vor.u32 %v7316_v16, %v6874_v40 }
 0xc10   :  { %3425 = vmatpush.bf16.msra.mxu1 %v6905_v58  ;;  %3369 = vmatpush.bf16.msra.mxu3 %v6873_v9  ;;  %v9489_v9 = vld [vmem:[%s11052_s5 + $0x3] ss:$0 sm:$0xff] }
 0xc11   :  { %3398 = vmatpush.bf16.msrb.mxu0 %v6877_v22 }
 0xc14   :  { %3426 = vmatpush.bf16.msra.mxu1 %v6893_v6  ;;  %3370 = vmatpush.bf16.msra.mxu3 %v6861_v35 }
 0xc15   :  { %3399 = vmatpush.bf16.msrb.mxu0 %v6865_v5 }
 0xc18   :  { %3427 = vmatpush.bf16.msra.mxu1 %v6881_v46  ;;  %3371 = vmatpush.bf16.msra.mxu3 %v6849_v11 }
 0xc19   :  { %3400 = vmatpush.bf16.msrb.mxu0 %v6853_v43 }
 0xc1c   :  { %3428 = vmatpush.bf16.msra.mxu1 %v6869_v8 }
 0xc20   :  { %3429 = vmatpush.bf16.msra.mxu1 %v6857_v42 }
 0xc2c   :  { %v3063_v29 = vpop.xlane.xlu2 %3062 }
 0xc2d   :  { %v3078_v45 = vmul.f32 %v3063_v29, %v8955_v50 }
 0xc2f   :  { %v3086_v28 = vadd.f32 1e-05, %v3078_v45 }
 0xc31   :  { %7554 = vrsqrt.f32 %v3086_v28  ;;  %vm3100_vm3 = vweird.f32 %v3086_v28 }
 0xc34   :  { %v3065_v47 = vpop.xlane.xlu0 %3064 }
 0xc35   :  { %v3079_v37 = vmul.f32 %v3065_v47, %v8955_v50 }
 0xc37   :  { %v7555_v23 = vpop.eup %7554  ;;  %v3087_v19 = vadd.f32 1e-05, %v3079_v37 }
 0xc38   :  { %v3095_v15 = vmul.f32 %v7555_v23, %v3086_v28  ;;  %vm3101_vm15 = vweird.f32 %v7555_v23 }
 0xc39   :  { %7556 = vrsqrt.f32 %v3087_v19  ;;  %vm3102_vm4 = vmor %vm3100_vm3, %vm3101_vm15  ;;  %vm3110_vm6 = vweird.f32 %v3087_v19 }
 0xc3a   :  { %v3096_v44 = vmul.f32 %v7555_v23, %v3095_v15 }
 0xc3c   :  { %v3097_v31 = vmul.f32 0.5, %v3096_v44  ;;  %v3067_v13 = vpop.xlane.xlu0 %3066 }
 0xc3d   :  { %v3080_v6 = vmul.f32 %v3067_v13, %v8955_v50 }
 0xc3e   :  { %v3098_v33 = vsub.f32 1.5, %v3097_v31 }
 0xc3f   :  { %v7557_v12 = vpop.eup %7556  ;;  %v3088_v40 = vadd.f32 1e-05, %v3080_v6 }
 0xc40   :  { %v3099_v2 = vmul.f32 %v7555_v23, %v3098_v33  ;;  %v3105_v58 = vmul.f32 %v7557_v12, %v3087_v19  ;;  %vm3111_vm5 = vweird.f32 %v7557_v12 }
 0xc41   :  { %vm3112_vm7 = vmor %vm3110_vm6, %vm3111_vm5  ;;  %7558 = vrsqrt.f32 %v3088_v40  ;;  %vm3120_vm9 = vweird.f32 %v3088_v40 }
 0xc42   :  { %v3106_v59 = vmul.f32 %v7557_v12, %v3105_v58  ;;  %v3103_v55 = vsel %vm3102_vm4, %v7555_v23, %v3099_v2 }
 0xc43   :  { %v3174_v1 = vmul.f32 %v3103_v55, %v9292_v25 }
 0xc44   :  { %v3107_v20 = vmul.f32 0.5, %v3106_v59 }
 0xc45   :  { %v3183_v10 = vmul.f32 %v9480_v21, %v3174_v1 }
 0xc46   :  { %v3108_v48 = vsub.f32 1.5, %v3107_v20 }
 0xc47   :  { %v9493_v25 = vadd.f32 %v9489_v9, %v3183_v10  ;;  %v7559_v46 = vpop.eup %7558 }
 0xc48   :  { %v3109_v57 = vmul.f32 %v7557_v12, %v3108_v48  ;;  %v3115_v62 = vmul.f32 %v7559_v46, %v3088_v40  ;;  %vm3121_vm8 = vweird.f32 %v7559_v46 }
 0xc49   :  { %vm3122_vm10 = vmor %vm3120_vm9, %vm3121_vm8 }
 0xc4a   :  { %v3113_v63 = vsel %vm3112_vm7, %v7557_v12, %v3109_v57  ;;  %v3116_v32 = vmul.f32 %v7559_v46, %v3115_v62 }
 0xc4b   :  { %v3175_v16 = vmul.f32 %v3113_v63, %v9297_v56 }
 0xc4c   :  { %v3117_v41 = vmul.f32 0.5, %v3116_v32 }
 0xc4d   :  { %v3184_v54 = vmul.f32 %v9480_v21, %v3175_v16 }
 0xc4e   :  { %v3118_v17 = vsub.f32 1.5, %v3117_v41 }
 0xc4f   :  { %v9496_v52 = vadd.f32 %v9489_v9, %v3184_v54 }
 0xc50   :  { %v3119_v28 = vmul.f32 %v7559_v46, %v3118_v17 }
 0xc51   :  { %v3200_v22 = vpack.c.bf16 %v9496_v52, %v9493_v25 }
 0xc52   :  { %v3123_v7 = vsel %vm3122_vm10, %v7559_v46, %v3119_v28 }
 0xc53   :  { %3372 = vmatmul.bf16.vlgmr.msra.gmra.mxu3 %v3200_v22  ;;  %3401 = vmatmul.bf16.vlgmr.msrb.gmra.mxu0 %v3200_v22 }
 0xc54   :  { %3430 = vmatmul.bf16.vlgmr.msra.gmra.mxu1 %v3200_v22 }
 0xc55   :  { %v3035_v56 = vpop.xlane.xlu1 %3034 }
 0xc56   :  { %v3044_v49 = vmul.f32 %v3035_v56, %v8955_v50 }
 0xc58   :  { %v9502_v27 = vsub.f32 %v9309_v39, %v3044_v49 }
 0xc5a   :  { %v3060_v35 = vmul.f32 %v9502_v27, %v9502_v27 }
 0xc5c   :  { %3074 = vadd.xlane.f32.xlu1 %v3060_v35 }
 0xc5d   :  { %v3069_v38 = vpop.xlane.xlu1 %3068  ;;  %v3037_v53 = vpop.xlane.xlu2 %3036 }
 0xc5e   :  { %v3081_v29 = vmul.f32 %v3069_v38, %v8955_v50  ;;  %v3045_v5 = vmul.f32 %v3037_v53, %v8955_v50 }
 0xc60   :  { %v3089_v8 = vadd.f32 1e-05, %v3081_v29  ;;  %v9509_v45 = vsub.f32 %v9316_v34, %v3045_v5  ;;  %v3176_v34 = vmul.f32 %v3123_v7, %v9302_v26 }
 0xc62   :  { %7560 = vrsqrt.f32 %v3089_v8  ;;  %v3061_v39 = vmul.f32 %v9509_v45, %v9509_v45  ;;  %vm3130_vm12 = vweird.f32 %v3089_v8  ;;  %v3185_v23 = vmul.f32 %v9480_v21, %v3176_v34 }
 0xc64   :  { %3076 = vadd.xlane.f32.xlu2 %v3061_v39  ;;  %v9518_v44 = vadd.f32 %v9489_v9, %v3185_v23 }
 0xc68   :  { %v7561_v3 = vpop.eup %7560 }
 0xc69   :  { %v3125_v11 = vmul.f32 %v7561_v3, %v3089_v8  ;;  %vm3131_vm11 = vweird.f32 %v7561_v3 }
 0xc6a   :  { %vm3132_vm13 = vmor %vm3130_vm12, %vm3131_vm11 }
 0xc6b   :  { %v3126_v18 = vmul.f32 %v7561_v3, %v3125_v11 }
 0xc6d   :  { %v3127_v43 = vmul.f32 0.5, %v3126_v18 }
 0xc6f   :  { %v3128_v30 = vsub.f32 1.5, %v3127_v43 }
 0xc71   :  { %v3129_v42 = vmul.f32 %v7561_v3, %v3128_v30 }
 0xc73   :  { %v3133_v47 = vsel %vm3132_vm13, %v7561_v3, %v3129_v42 }
 0xc74   :  { %v3177_v37 = vmul.f32 %v3133_v47, %v9313_v36 }
 0xc76   :  { %v3186_v19 = vmul.f32 %v9480_v21, %v3177_v37 }
 0xc78   :  { %v3071_v15 = vpop.xlane.xlu2 %3070  ;;  %v9521_v31 = vadd.f32 %v9489_v9, %v3186_v19 }
 0xc79   :  { %v3082_v33 = vmul.f32 %v3071_v15, %v8955_v50 }
 0xc7a   :  { %v3201_v26 = vpack.c.bf16 %v9521_v31, %v9518_v44 }
 0xc7b   :  { %v3090_v12 = vadd.f32 1e-05, %v3082_v33 }
 0xc7c   :  { %3377 = vmatmul.bf16.gmra.mxu3 %v3201_v26  ;;  %3406 = vmatmul.bf16.gmra.mxu0 %v3201_v26 }
 0xc7d   :  { %7562 = vrsqrt.f32 %v3090_v12  ;;  %3435 = vmatmul.bf16.gmra.mxu1 %v3201_v26  ;;  %vm3140_vm15 = vweird.f32 %v3090_v12 }
 0xc80   :  { %v3073_v36 = vpop.xlane.xlu0 %3072 }
 0xc81   :  { %v3083_v2 = vmul.f32 %v3073_v36, %v8955_v50 }
 0xc83   :  { %v7563_v58 = vpop.eup %7562  ;;  %v3091_v59 = vadd.f32 1e-05, %v3083_v2 }
 0xc84   :  { %v3135_v55 = vmul.f32 %v7563_v58, %v3090_v12  ;;  %vm3141_vm14 = vweird.f32 %v7563_v58 }
 0xc85   :  { %7564 = vrsqrt.f32 %v3091_v59  ;;  %vm3142_vm3 = vmor %vm3140_vm15, %vm3141_vm14  ;;  %vm3150_vm5 = vweird.f32 %v3091_v59 }
 0xc86   :  { %v3136_v20 = vmul.f32 %v7563_v58, %v3135_v55 }
 0xc88   :  { %v3137_v13 = vmul.f32 0.5, %v3136_v20 }
 0xc8a   :  { %v3138_v48 = vsub.f32 1.5, %v3137_v13 }
 0xc8b   :  { %v7565_v1 = vpop.eup %7564 }
 0xc8c   :  { %v3139_v57 = vmul.f32 %v7563_v58, %v3138_v48  ;;  %v3145_v6 = vmul.f32 %v7565_v1, %v3091_v59  ;;  %vm3151_vm4 = vweird.f32 %v7565_v1 }
 0xc8d   :  { %vm3152_vm6 = vmor %vm3150_vm5, %vm3151_vm4 }
 0xc8e   :  { %v3146_v63 = vmul.f32 %v7565_v1, %v3145_v6  ;;  %v3143_v10 = vsel %vm3142_vm3, %v7563_v58, %v3139_v57 }
 0xc8f   :  { %v3178_v54 = vmul.f32 %v3143_v10, %v9322_v4 }
 0xc90   :  { %v3147_v16 = vmul.f32 0.5, %v3146_v63 }
 0xc91   :  { %v3187_v49 = vmul.f32 %v9480_v21, %v3178_v54 }
 0xc92   :  { %v3148_v40 = vsub.f32 1.5, %v3147_v16 }
 0xc93   :  { %v9532_v35 = vadd.f32 %v9489_v9, %v3187_v49 }
 0xc94   :  { %v3149_v22 = vmul.f32 %v7565_v1, %v3148_v40 }
 0xc96   :  { %v3153_v56 = vsel %vm3152_vm6, %v7565_v1, %v3149_v22 }
 0xc97   :  { %v3179_v46 = vmul.f32 %v3153_v56, %v9327_v51 }
 0xc99   :  { %v3188_v62 = vmul.f32 %v9480_v21, %v3179_v46 }
 0xc9b   :  { %v9535_v32 = vadd.f32 %v9489_v9, %v3188_v62 }
 0xc9d   :  { %v3202_v38 = vpack.c.bf16 %v9535_v32, %v9532_v35 }
 0xc9f   :  { %3382 = vmatmul.bf16.gmra.mxu3 %v3202_v38  ;;  %3411 = vmatmul.bf16.gmra.mxu0 %v3202_v38 }
 0xca0   :  { %3440 = vmatmul.bf16.gmra.mxu1 %v3202_v38 }
 0xccf   :  { %v3075_v4 = vpop.xlane.xlu1 %3074 }
 0xcd0   :  { %v3084_v53 = vmul.f32 %v3075_v4, %v8955_v50  ;;  %v3402_v51 = vpop.f32.mrf.mxu0 }
 0xcd1   :  { %v3403_v29 = vadd.f32 %v3402_v51, %v7925_v61  ;;  %v3431_v40 = vpop.f32.mrf.mxu1 }
 0xcd2   :  { %v3092_v5 = vadd.f32 1e-05, %v3084_v53 }
 0xcd3   :  { %v9541_v8 = vpack.c.bf16 %v3403_v29, %v3403_v29 }
 0xcd4   :  { %7566 = vrsqrt.f32 %v3092_v5  ;;  %vm3160_vm8 = vweird.f32 %v3092_v5 }
 0xcd5   :  { %v3479_v41 = vsel %vm323_vm0, %v9541_v8, 0 }
 0xcd6   :  { %v3373_v39 = vpop.f32.mrf.mxu3  ;;  %3488 = vmatpush.bf16.xpose.msrb.mxu2 %v3479_v41 }
 0xcd7   :  { %v3374_v17 = vadd.f32 %v3373_v39, %v7929_v0  ;;  %v3077_v3 = vpop.xlane.xlu2 %3076 }
 0xcd8   :  { %v3085_v28 = vmul.f32 %v3077_v3, %v8955_v50  ;;  %v3404_v11 = vpop.f32.mrf.mxu0 }
 0xcd9   :  { %v3405_v18 = vadd.f32 %v3404_v11, %v7925_v61  ;;  %v9548_v34 = vpack.c.bf16 %v3374_v17, %v3374_v17  ;;  %v3433_v62 = vpop.f32.mrf.mxu1  ;;  %v3432_v17 = vadd.f32 %v3431_v40, %v8122_v14 }
 0xcda   :  { %v7567_v7 = vpop.eup %7566  ;;  %v3093_v43 = vadd.f32 1e-05, %v3085_v28 }
 0xcdb   :  { %v3155_v30 = vmul.f32 %v7567_v7, %v3092_v5  ;;  %v9550_v42 = vpack.c.bf16 %v3405_v18, %v3405_v18  ;;  %vm3161_vm7 = vweird.f32 %v7567_v7  ;;  %v9595_v18 = vpack.c.bf16 %v3432_v17, %v3432_v17 }
 0xcdc   :  { %7568 = vrsqrt.f32 %v3093_v43  ;;  %vm3162_vm9 = vmor %vm3160_vm8, %vm3161_vm7  ;;  %vm3170_vm11 = vweird.f32 %v3093_v43 }
 0xcdd   :  { %v3156_v47 = vmul.f32 %v7567_v7, %v3155_v30  ;;  %6942 = vmatmul.msk.bf16.vlgmr.msrb.gmra.mxu2 %vm323_vm0, %v9548_v34  ;;  %v3498_v37 = vsel %vm323_vm0, %v9550_v42, 0 }
 0xcde   :  { %3507 = vmatpush.bf16.xpose.msra.mxu2 %v3498_v37  ;;  %v3375_v12 = vpop.f32.mrf.mxu3  ;;  %v3434_v37 = vadd.f32 %v3433_v62, %v8122_v14 }
 0xcdf   :  { %v3157_v23 = vmul.f32 0.5, %v3156_v47  ;;  %v3376_v59 = vadd.f32 %v3375_v12, %v7929_v0  ;;  %v3735_v47 = vsel %vm584_vm2, %v9595_v18, 0 }
 0xce0   :  { %v9609_v12 = vpack.c.bf16 %v3434_v37, %v3434_v37 }
 0xce1   :  { %v3158_v19 = vsub.f32 1.5, %v3157_v23  ;;  %v9558_v48 = vpack.c.bf16 %v3376_v59, %v3376_v59 }
 0xce2   :  { %v7569_v15 = vpop.eup %7568 }
 0xce3   :  { %v3159_v33 = vmul.f32 %v7567_v7, %v3158_v19  ;;  %v3165_v26 = vmul.f32 %v7569_v15, %v3093_v43  ;;  %vm3171_vm10 = vweird.f32 %v7569_v15 }
 0xce4   :  { %vm3172_vm12 = vmor %vm3170_vm11, %vm3171_vm10 }
 0xce5   :  { %v3166_v36 = vmul.f32 %v7569_v15, %v3165_v26  ;;  %v3163_v2 = vsel %vm3162_vm9, %v7567_v7, %v3159_v33 }
 0xce6   :  { %v3180_v20 = vmul.f32 %v3163_v2, %v9502_v27 }
 0xce7   :  { %v3167_v58 = vmul.f32 0.5, %v3166_v36 }
 0xce8   :  { %v3189_v6 = vmul.f32 %v9480_v21, %v3180_v20 }
 0xce9   :  { %v3168_v55 = vsub.f32 1.5, %v3167_v58 }
 0xcea   :  { %v9566_v10 = vadd.f32 %v9489_v9, %v3189_v6 }
 0xceb   :  { %v3169_v13 = vmul.f32 %v7569_v15, %v3168_v55 }
 0xced   :  { %v3173_v1 = vsel %vm3172_vm12, %v7569_v15, %v3169_v13  ;;  %6943 = vmatmul.msk.bf16.vlgmr.msra.gmra.mxu2 %vm323_vm0, %v9558_v48 }
 0xcee   :  { %v3181_v57 = vmul.f32 %v3173_v1, %v9509_v45  ;;  %v3754_v1 = vsel %vm584_vm2, %v9609_v12, 0 }
 0xcf0   :  { %v3190_v63 = vmul.f32 %v9480_v21, %v3181_v57 }
 0xcf2   :  { %v9569_v27 = vadd.f32 %v9489_v9, %v3190_v63 }
 0xcf4   :  { %v3203_v16 = vpack.c.bf16 %v9569_v27, %v9566_v10 }
 0xcf6   :  { %3387 = vmatmul.bf16.gmra.mxu3 %v3203_v16  ;;  %3416 = vmatmul.bf16.gmra.mxu0 %v3203_v16 }
 0xcf7   :  { %3445 = vmatmul.bf16.gmra.mxu1 %v3203_v16 }
 0xcf9   :  { %v3407_v54 = vpop.f32.mrf.mxu0 }
 0xcfa   :  { %v3408_v45 = vadd.f32 %v3407_v54, %v7925_v61  ;;  %v3436_v5 = vpop.f32.mrf.mxu1 }
 0xcfc   :  { %v9574_v22 = vpack.c.bf16 %v3408_v45, %v3408_v45 }
 0xcfe   :  { %v3517_v21 = vsel %vm323_vm0, %v9574_v22, 0 }
 0xcff   :  { %v3378_v56 = vpop.f32.mrf.mxu3  ;;  %3526 = vmatpush.bf16.xpose.msrb.mxu3 %v3517_v21  ;;  %v3437_v21 = vadd.f32 %v3436_v5, %v8122_v14 }
 0xd00   :  { %v3379_v9 = vadd.f32 %v3378_v56, %v7929_v0 }
 0xd01   :  { %v3409_v46 = vpop.f32.mrf.mxu0 }
 0xd02   :  { %v3410_v49 = vadd.f32 %v3409_v46, %v7925_v61  ;;  %v9580_v38 = vpack.c.bf16 %v3379_v9, %v3379_v9  ;;  %v3438_v39 = vpop.f32.mrf.mxu1 }
 0xd04   :  { %v9582_v4 = vpack.c.bf16 %v3410_v49, %v3410_v49  ;;  %v9639_v49 = vpack.c.bf16 %v3437_v21, %v3437_v21 }
 0xd06   :  { %6944 = vmatmul.msk.bf16.vlgmr.msrb.gmra.mxu3 %vm323_vm0, %v9580_v38  ;;  %v3536_v53 = vsel %vm323_vm0, %v9582_v4, 0  ;;  %v3773_v17 = vsel %vm584_vm2, %v9639_v49, 0 }
 0xd07   :  { %v3380_v51 = vpop.f32.mrf.mxu3  ;;  %3545 = vmatpush.bf16.xpose.msra.mxu0 %v3536_v53 }
 0xd08   :  { %v3381_v29 = vadd.f32 %v3380_v51, %v7929_v0 }
 0xd0a   :  { %v9589_v41 = vpack.c.bf16 %v3381_v29, %v3381_v29 }
 0xd0e   :  { %6945 = vmatmul.msk.bf16.vlgmr.msra.gmra.mxu0 %vm323_vm0, %v9589_v41 }
 0xd1c   :  { %v3412_v3 = vpop.f32.mrf.mxu0 }
 0xd1d   :  { %v3413_v28 = vadd.f32 %v3412_v3, %v7925_v61  ;;  %v3441_v11 = vpop.f32.mrf.mxu1  ;;  %v3439_v3 = vadd.f32 %v3438_v39, %v8122_v14 }
 0xd1e   :  { %v3442_v30 = vadd.f32 %v3441_v11, %v8122_v14 }
 0xd1f   :  { %v9597_v7 = vpack.c.bf16 %v3413_v28, %v3413_v28 }
 0xd20   :  { %v9606_v33 = vpack.c.bf16 %v3442_v30, %v3442_v30 }
 0xd21   :  { %v3555_v43 = vsel %vm323_vm0, %v9597_v7, 0 }
 0xd22   :  { %v3383_v23 = vpop.f32.mrf.mxu3  ;;  %3564 = vmatpush.bf16.xpose.msrb.mxu1 %v3555_v43  ;;  %v3811_v59 = vsel %vm584_vm2, %v9606_v33, 0 }
 0xd23   :  { %v3384_v19 = vadd.f32 %v3383_v23, %v7929_v0 }
 0xd24   :  { %v3414_v15 = vpop.f32.mrf.mxu0 }
 0xd25   :  { %v3415_v26 = vadd.f32 %v3414_v15, %v7925_v61  ;;  %v3443_v36 = vpop.f32.mrf.mxu1  ;;  %v9611_v2 = vpack.c.bf16 %v3384_v19, %v3384_v19 }
 0xd26   :  { %v3444_v55 = vadd.f32 %v3443_v36, %v8122_v14 }
 0xd27   :  { %v9613_v58 = vpack.c.bf16 %v3415_v26, %v3415_v26 }
 0xd28   :  { %v9625_v6 = vpack.c.bf16 %v3444_v55, %v3444_v55 }
 0xd29   :  { %6946 = vmatmul.msk.bf16.vlgmr.msrb.gmra.mxu1 %vm323_vm0, %v9611_v2  ;;  %v3574_v20 = vsel %vm323_vm0, %v9613_v58, 0 }
 0xd2a   :  { %3744 = vmatpush.bf16.msra.mxu1 %v3735_v47  ;;  %v3385_v13 = vpop.f32.mrf.mxu3  ;;  %3583 = vmatpush.bf16.xpose.msrb.mxu2 %v3574_v20  ;;  %v3830_v16 = vsel %vm584_vm2, %v9625_v6, 0  ;;  %v9653_v47 = vpack.c.bf16 %v3439_v3, %v3439_v3 }
 0xd2b   :  { %v3386_v57 = vadd.f32 %v3385_v13, %v7929_v0 }
 0xd2d   :  { %v9627_v63 = vpack.c.bf16 %v3386_v57, %v3386_v57 }
 0xd2e   :  { %3820 = vmatpush.bf16.msrb.mxu1 %v3811_v59 }
 0xd31   :  { %6947 = vmatmul.msk.bf16.vlgmr.msrb.gmra.mxu2 %vm323_vm0, %v9627_v63 }
 0xd32   :  { %3763 = vmatpush.bf16.msra.mxu2 %v3754_v1 }
 0xd36   :  { %3839 = vmatpush.bf16.msrb.mxu2 %v3830_v16 }
 0xd60   :  { %v9633_v40 = vpop.f32.mrf.mxu2 }
 0xd68   :  { %v3492_v54 = vpop.f32.mrf.mxu2 }
 0xd70   :  { %v9635_v45 = vpop.f32.mrf.mxu2 }
 0xd73   :  { %v3417_v56 = vpop.f32.mrf.mxu0 }
 0xd74   :  { %v3418_v9 = vadd.f32 %v3417_v56, %v7925_v61  ;;  %v3446_v46 = vpop.f32.mrf.mxu1 }
 0xd75   :  { %v3447_v51 = vadd.f32 %v3446_v46, %v8122_v14 }
 0xd76   :  { %v9641_v62 = vpack.c.bf16 %v3418_v9, %v3418_v9 }
 0xd77   :  { %v9650_v43 = vpack.c.bf16 %v3447_v51, %v3447_v51 }
 0xd78   :  { %v3593_v53 = vsel %vm323_vm0, %v9641_v62, 0  ;;  %v3511_v29 = vpop.f32.mrf.mxu2 }
 0xd79   :  { %v3388_v5 = vpop.f32.mrf.mxu3  ;;  %3602 = vmatpush.bf16.xpose.msra.mxu3 %v3593_v53  ;;  %v3849_v15 = vsel %vm584_vm2, %v9650_v43, 0 }
 0xd7a   :  { %v3389_v28 = vadd.f32 %v3388_v5, %v7929_v0 }
 0xd7b   :  { %v3419_v11 = vpop.f32.mrf.mxu0 }
 0xd7c   :  { %v3420_v30 = vadd.f32 %v3419_v11, %v7925_v61  ;;  %v3448_v37 = vpop.f32.mrf.mxu1  ;;  %v9655_v23 = vpack.c.bf16 %v3389_v28, %v3389_v28  ;;  %v3792_v61 = vsel %vm584_vm2, %v9653_v47, 0 }
 0xd7d   :  { %v3449_v39 = vadd.f32 %v3448_v37, %v8122_v14 }
 0xd7e   :  { %v3466_v19 = vpack.c.bf16 %v3420_v30, %v3420_v30 }
 0xd7f   :  { %v9666_v55 = vpack.c.bf16 %v3449_v39, %v3449_v39 }
 0xd80   :  { %6948 = vmatmul.msk.bf16.vlgmr.msra.gmra.mxu3 %vm323_vm0, %v9655_v23  ;;  %v3612_v26 = vsel %vm323_vm0, %v3466_v19, 0 }
 0xd81   :  { %3782 = vmatpush.bf16.msrb.mxu3 %v3773_v17  ;;  %v3390_v36 = vpop.f32.mrf.mxu3  ;;  %3621 = vmatpush.bf16.xpose.msrb.mxu0 %v3612_v26  ;;  %v3868_v14 = vsel %vm584_vm2, %v9666_v55, 0 }
 0xd82   :  { %v3391_v59 = vadd.f32 %v3390_v36, %v7929_v0 }
 0xd84   :  { %v9668_v20 = vpack.c.bf16 %v3391_v59, %v3391_v59  ;;  %v3955_v59 = vunpack.c.l.b16 %v9574_v22 }
 0xd85   :  { %3858 = vmatpush.bf16.msra.mxu3 %v3849_v15 }
 0xd88   :  { %6949 = vmatmul.msk.bf16.vlgmr.msrb.gmra.mxu0 %vm323_vm0, %v9668_v20 }
 0xd89   :  { %3801 = vmatpush.bf16.msra.mxu0 %v3792_v61  ;;  %v3528_v13 = vpop.f32.mrf.mxu3 }
 0xd8a   :  { %v3629_v1 = vmul.f32 0.17677669, %v3528_v13  ;;  %v4071_v13 = vunpack.c.l.b16 %v9641_v62 }
 0xd8b   :  { %v3547_v57 = vpop.f32.mrf.mxu0 }
 0xd8c   :  { %v3630_v16 = vmul.f32 0.17677669, %v3547_v57  ;;  %v3641_v54 = vsel %vm484_vm1, %v3629_v1, -inf  ;;  %v9687_v57 = vpack.c.b16 %v4071_v13, %v4071_v13 }
 0xd8d   :  { %3877 = vmatpush.bf16.msrb.mxu0 %v3868_v14  ;;  %3642 = vmax.xlane.f32.xlu0 %v3641_v54  ;;  %v9682_v14 = vpack.c.b16 %v3955_v59, %v3955_v59 }
 0xd8e   :  { %v3644_v0 = vsel %vm484_vm1, %v3630_v16, -inf }
 0xd8f   :  { %3645 = vmax.xlane.f32.xlu2 %v3644_v0 }
 0xd91   :  { %v3530_v21 = vpop.f32.mrf.mxu3 }
 0xd93   :  { %v3549_v56 = vpop.f32.mrf.mxu0 }
 0xda6   :  { %v9676_v9 = vpop.f32.mrf.mxu1 }
 0xdae   :  { %v3568_v46 = vpop.f32.mrf.mxu1 }
 0xdb4   :  { %v3585_v53 = vpop.f32.mrf.mxu2 }
 0xdb5   :  { %v9696_v46 = vmul.f32 0.17677669, %v3585_v53 }
 0xdbc   :  { %v3587_v51 = vpop.f32.mrf.mxu2 }
 0xdbd   :  { %v3650_v51 = vsel %vm484_vm1, %v9696_v46, -inf }
 0xe00   :  { %v3643_v0 = vpop.xlane.xlu0 %3642 }
 0xe01   :  { %v3661_v22 = vsub.f32 %v3629_v1, %v3643_v0  ;;  %v3926_v1 = vunpack.c.l.b16 %v9550_v42  ;;  %v9725_v0 = vmul.f32 0.17677669, %v9635_v45 }
 0xe02   :  { %v3646_v29 = vpop.xlane.xlu2 %3645 }
 0xe03   :  { %v3662_v17 = vsub.f32 %v3630_v16, %v3646_v29  ;;  %v3604_v3 = vpop.f32.mrf.mxu3  ;;  %v4100_v16 = vunpack.c.l.b16 %v3466_v19  ;;  %v3671_v21 = vmul.f32 1.442695, %v3661_v22  ;;  %v4066_v19 = vunpack.c.l.b16 %v9655_v23 }
 0xe04   :  { %v3633_v5 = vmul.f32 0.17677669, %v3604_v3  ;;  %v9707_v3 = vpack.c.b16 %v3926_v1, %v3926_v1  ;;  %v3897_v23 = vunpack.c.l.b16 %v9541_v8  ;;  %v9731_v22 = vmul.f32 0.17677669, %v9676_v9 }
 0xe05   :  { %v3673_v28 = vmul.f32 1.442695, %v3662_v17  ;;  %v3623_v11 = vpop.f32.mrf.mxu0  ;;  %v9691_v54 = vpack.c.b16 %v4100_v16, %v4100_v16  ;;  %v9701_v29 = vpack.c.b16 %v4066_v19, %v4066_v19  ;;  %v3979_v17 = vunpack.c.l.b16 %v9589_v41 }
 0xe06   :  { %v3634_v30 = vmul.f32 0.17677669, %v3623_v11  ;;  %v3653_v37 = vsel %vm484_vm1, %v3633_v5, -inf  ;;  %v9716_v53 = vpack.c.b16 %v3897_v23, %v3897_v23  ;;  %v3647_v45 = vsel %vm484_vm1, %v9731_v22, -inf }
 0xe07   :  { %7570 = vpow2.f32 %v3673_v28  ;;  %3654 = vmax.xlane.f32.xlu1 %v3653_v37  ;;  %v9709_v28 = vpack.c.b16 %v3979_v17, %v3979_v17  ;;  %v3984_v9 = vunpack.c.l.b16 %v9582_v4  ;;  %v4013_v19 = vunpack.c.l.b16 %v9597_v7 }
 0xe08   :  { %v3656_v15 = vsel %vm484_vm1, %v3634_v30, -inf  ;;  %7572 = vpow2.f32 %v3671_v21 }
 0xe09   :  { %3657 = vmax.xlane.f32.xlu0 %v3656_v15  ;;  %v9753_v17 = vpack.c.b16 %v4013_v19, %v4013_v19 }
 0xe0b   :  { %v3606_v39 = vpop.f32.mrf.mxu3 }
 0xe0d   :  { %v7571_v26 = vpop.eup %7570  ;;  %v3625_v36 = vpop.f32.mrf.mxu0 }
 0xe0e   :  { %v3692_v61 = vsel %vm484_vm1, %v7571_v26, 0.0  ;;  %v7573_v56 = vpop.eup %7572 }
 0xe0f   :  { %v3689_v62 = vsel %vm484_vm1, %v7573_v56, 0.0 }
 0xe11   :  { %3693 = vadd.xlane.f32.xlu0 %v3692_v61 }
 0xe20   :  { %3957 = vrot.lane.b32.xlu1 %v9682_v14, %s7744_s15 }
 0xe25   :  { %4073 = vrot.lane.b32.xlu0 %v9687_v57, %s7744_s15 }
 0xe2d   :  { %4102 = vrot.lane.b32.xlu0 %v9691_v54, %s7744_s15 }
 0xe4a   :  { %3690 = vadd.xlane.f32.xlu1 %v3689_v62 }
 0xe57   :  { %3651 = vmax.xlane.f32.xlu0 %v3650_v51  ;;  %v9745_v51 = vpack.c.b16 %v3984_v9, %v3984_v9 }
 0xe63   :  { %4068 = vrot.lane.b32.xlu1 %v9701_v29, %s7744_s15 }
 0xe6b   :  { %3928 = vrot.lane.b32.xlu0 %v9707_v3, %s7744_s15  ;;  %3981 = vrot.lane.b32.xlu1 %v9709_v28, %s7744_s15 }
 0xe73   :  { %3899 = vrot.lane.b32.xlu0 %v9716_v53, %s7744_s15 }
 0xe7a   :  { %v3655_v42 = vpop.xlane.xlu1 %3654 }
 0xe7b   :  { %v3665_v11 = vsub.f32 %v3633_v5, %v3655_v42  ;;  %v3638_v5 = vsel %vm484_vm1, %v9725_v0, -inf }
 0xe7c   :  { %v3658_v41 = vpop.xlane.xlu0 %3657 }
 0xe7d   :  { %v3679_v37 = vmul.f32 1.442695, %v3665_v11  ;;  %v3666_v8 = vsub.f32 %v3634_v30, %v3658_v41  ;;  %v3950_v30 = vunpack.c.l.b16 %v9580_v38  ;;  %v4095_v38 = vunpack.c.l.b16 %v9668_v20 }
 0xe7f   :  { %7574 = vpow2.f32 %v3679_v37  ;;  %v3681_v16 = vmul.f32 1.442695, %v3666_v8  ;;  %v9740_v62 = vpack.c.b16 %v3950_v30, %v3950_v30  ;;  %v9751_v1 = vpack.c.b16 %v4095_v38, %v4095_v38 }
 0xe80   :  { %v3627_v8 = vmul.f32 0.17677669, %v9633_v40 }
 0xe84   :  { %v3694_v15 = vpop.xlane.xlu0 %3693 }
 0xe85   :  { %v9720_v39 = vpop.eup %7574  ;;  %7576 = vrcp.f32 %v3694_v15 }
 0xe86   :  { %v3701_v36 = vsel %vm484_vm1, %v9720_v39, 0.0  ;;  %7578 = vpow2.f32 %v3681_v16  ;;  %v3921_v16 = vunpack.c.l.b16 %v9558_v48 }
 0xe87   :  { %3702 = vadd.xlane.f32.xlu2 %v3701_v36 }
 0xe8b   :  { %v7577_v61 = vpop.eup %7576 }
 0xe8c   :  { %v3718_v59 = vmul.f32 %v7577_v61, %v7571_v26  ;;  %v9733_v21 = vpop.eup %7578 }
 0xe8d   :  { %v3704_v26 = vsel %vm484_vm1, %v9733_v21, 0.0 }
 0xe8e   :  { %v3726_v13 = vpack.c.bf16 %v3718_v59, %v3718_v59 }
 0xe90   :  { %6953 = vmatmul.msk.bf16.vlgmr.msra.gmra.mxu0 %vm484_vm1, %v3726_v13 }
 0xe92   :  { %v3958_v4 = vpop.permute.xlu1 %3957 }
 0xe93   :  { %v3963_v7 = vsel %vm323_vm0, %v3958_v4, 0 }
 0xe95   :  { %3639 = vmax.xlane.f32.xlu1 %v3638_v5  ;;  %v9769_v5 = vpack.c.b16 %v3921_v16, %v3921_v16 }
 0xe97   :  { %v4074_v23 = vpop.permute.xlu0 %4073 }
 0xe9d   :  { %3705 = vadd.xlane.f32.xlu0 %v3704_v26  ;;  %3648 = vmax.xlane.f32.xlu1 %v3647_v45  ;;  %v4276_v26 = vunpack.c.l.b16 %v9639_v49  ;;  %v4079_v49 = vsel %vm323_vm0, %v4074_v23, 0 }
 0xe9f   :  { %3952 = vrot.lane.b32.xlu2 %v9740_v62, %s7744_s15  ;;  %v4103_v11 = vpop.permute.xlu0 %4102  ;;  %v9779_v9 = vpack.c.b16 %v4276_v26, %v4276_v26 }
 0xea7   :  { %3986 = vrot.lane.b32.xlu2 %v9745_v51, %s7744_s15 }
 0xeaf   :  { %4097 = vrot.lane.b32.xlu2 %v9751_v1, %s7744_s15 }
 0xeb1   :  { %4015 = vrot.lane.b32.xlu0 %v9753_v17, %s7744_s15 }
 0xebd   :  { %v3691_v42 = vpop.xlane.xlu1 %3690 }
 0xebe   :  { %7580 = vrcp.f32 %v3691_v42 }
 0xec4   :  { %v7581_v41 = vpop.eup %7580 }
 0xec5   :  { %v3717_v37 = vmul.f32 %v7581_v41, %v7573_v56  ;;  %v3635_v56 = vsel %vm484_vm1, %v3627_v8, -inf }
 0xec7   :  { %v3725_v20 = vpack.c.bf16 %v3717_v37, %v3717_v37 }
 0xec9   :  { %6952 = vmatmul.msk.bf16.vlgmr.msrb.gmra.mxu3 %vm484_vm1, %v3725_v20 }
 0xeca   :  { %3972 = vmatpush.bf16.xpose.msrb.mxu3 %v3963_v7  ;;  %v3652_v15 = vpop.xlane.xlu0 %3651 }
 0xecb   :  { %v3664_v36 = vsub.f32 %v9696_v46, %v3652_v15  ;;  %v4037_v46 = vunpack.c.l.b16 %v9627_v63  ;;  %v4372_v63 = vunpack.c.l.b16 %v9650_v43 }
 0xecd   :  { %v3677_v61 = vmul.f32 1.442695, %v3664_v36  ;;  %v9774_v30 = vpack.c.b16 %v4037_v46, %v4037_v46  ;;  %v9787_v37 = vpack.c.b16 %v4372_v63, %v4372_v63 }
 0xecf   :  { %7582 = vpow2.f32 %v3677_v61 }
 0xed5   :  { %v9763_v59 = vpop.eup %7582  ;;  %v4069_v40 = vpop.permute.xlu1 %4068 }
 0xed6   :  { %v3698_v13 = vsel %vm484_vm1, %v9763_v59, 0.0 }
 0xed7   :  { %3699 = vadd.xlane.f32.xlu1 %v3698_v13 }
 0xed8   :  { %3636 = vmax.xlane.f32.xlu2 %v3635_v56 }
 0xedd   :  { %v9781_v48 = vpop.permute.xlu0 %3928  ;;  %v3982_v38 = vpop.permute.xlu1 %3981 }
 0xee5   :  { %v9791_v20 = vpop.permute.xlu0 %3899 }
 0xef0   :  { %3923 = vrot.lane.b32.xlu1 %v9769_v5, %s7744_s15 }
 0xef8   :  { %4039 = vrot.lane.b32.xlu1 %v9774_v30, %s7744_s15 }
 0xefa   :  { %v3703_v45 = vpop.xlane.xlu2 %3702 }
 0xefb   :  { %7584 = vrcp.f32 %v3703_v45  ;;  %v4108_v45 = vsel %vm323_vm0, %v4103_v11, 0 }
 0xf00   :  { %4278 = vrot.lane.b32.xlu1 %v9779_v9, %s7744_s15 }
 0xf01   :  { %v7585_v19 = vpop.eup %7584 }
 0xf02   :  { %v3721_v4 = vmul.f32 %v7585_v19, %v9720_v39  ;;  %v3953_v42 = vpop.permute.xlu2 %3952 }
 0xf04   :  { %v3729_v41 = vpack.c.bf16 %v3721_v4, %v3721_v4 }
 0xf06   :  { %6956 = vmatmul.msk.bf16.vlgmr.msra.gmra.mxu3 %vm484_vm1, %v3729_v41 }
 0xf07   :  { %4088 = vmatpush.bf16.xpose.msra.mxu3 %v4079_v49 }
 0xf08   :  { %4374 = vrot.lane.b32.xlu1 %v9787_v37, %s7744_s15  ;;  %v3640_v7 = vpop.xlane.xlu1 %3639 }
 0xf09   :  { %v3660_v15 = vsub.f32 %v9725_v0, %v3640_v7 }
 0xf0a   :  { %v3987_v43 = vpop.permute.xlu2 %3986 }
 0xf0b   :  { %v3669_v36 = vmul.f32 1.442695, %v3660_v15  ;;  %v3992_v39 = vsel %vm323_vm0, %v3987_v43, 0 }
 0xf0c   :  { %4001 = vmatpush.bf16.xpose.msra.mxu0 %v3992_v39 }
 0xf0d   :  { %7586 = vpow2.f32 %v3669_v36  ;;  %v9797_v61 = vpop.f32.mrf.mxu0 }
 0xf10   :  { %v3706_v23 = vpop.xlane.xlu0 %3705  ;;  %v3649_v63 = vpop.xlane.xlu1 %3648 }
 0xf11   :  { %7588 = vrcp.f32 %v3706_v23  ;;  %v3663_v11 = vsub.f32 %v9731_v22, %v3649_v63  ;;  %v4042_v23 = vunpack.c.l.b16 %v9613_v58 }
 0xf12   :  { %v4098_v19 = vpop.permute.xlu2 %4097 }
 0xf13   :  { %v7587_v13 = vpop.eup %7586  ;;  %v3675_v7 = vmul.f32 1.442695, %v3663_v11 }
 0xf14   :  { %v3686_v56 = vsel %vm484_vm1, %v7587_v13, 0.0 }
 0xf15   :  { %v3805_v16 = vpop.f32.mrf.mxu0  ;;  %3687 = vadd.xlane.f32.xlu2 %v3686_v56 }
 0xf16   :  { %6960 = vmatmul.msk.bf16.vlgmr.msrb.gmra.mxu3 %vm323_vm0, %v3953_v42 }
 0xf17   :  { %v7589_v46 = vpop.eup %7588 }
 0xf18   :  { %v3722_v0 = vmul.f32 %v7589_v46, %v9733_v21  ;;  %v9824_v46 = vpack.c.b16 %v4042_v23, %v4042_v23 }
 0xf1a   :  { %v3730_v26 = vpack.c.bf16 %v3722_v0, %v3722_v0  ;;  %v3892_v0 = vunpack.c.l.b16 %v9548_v34  ;;  %v3934_v34 = vsel %vm323_vm0, %v9781_v48, 0 }
 0xf1c   :  { %6957 = vmatmul.msk.bf16.vlgmr.msrb.gmra.mxu0 %vm484_vm1, %v3730_v26 }
 0xf1d   :  { %4117 = vmatpush.bf16.xpose.msrb.mxu0 %v4108_v45 }
 0xf26   :  { %6964 = vmatmul.msk.bf16.vlgmr.msra.gmra.mxu3 %vm323_vm0, %v4069_v40 }
 0xf2c   :  { %6961 = vmatmul.msk.bf16.vlgmr.msra.gmra.mxu0 %vm323_vm0, %v3982_v38 }
 0xf3c   :  { %6965 = vmatmul.msk.bf16.vlgmr.msrb.gmra.mxu0 %vm323_vm0, %v4098_v19  ;;  %v9830_v19 = vpack.c.b16 %v3892_v0, %v3892_v0 }
 0xf4a   :  { %v3700_v43 = vpop.xlane.xlu1 %3699 }
 0xf4b   :  { %v3637_v4 = vpop.xlane.xlu2 %3636 }
 0xf4c   :  { %v3659_v41 = vsub.f32 %v3627_v8, %v3637_v4  ;;  %v9807_v42 = vpop.f32.mrf.mxu3 }
 0xf4e   :  { %v3667_v49 = vmul.f32 1.442695, %v3659_v41 }
 0xf50   :  { %7590 = vpow2.f32 %v3667_v49 }
 0xf51   :  { %7592 = vpow2.f32 %v3675_v7 }
 0xf54   :  { %v3786_v15 = vpop.f32.mrf.mxu3 }
 0xf56   :  { %v9812_v40 = vpop.eup %7590 }
 0xf57   :  { %v3683_v38 = vsel %vm484_vm1, %v9812_v40, 0.0  ;;  %v9816_v8 = vpop.eup %7592 }
 0xf58   :  { %3684 = vadd.xlane.f32.xlu2 %v3683_v38  ;;  %v3695_v36 = vsel %vm484_vm1, %v9816_v8, 0.0 }
 0xf60   :  { %3696 = vadd.xlane.f32.xlu2 %v3695_v36 }
 0xf62   :  { %v3924_v39 = vpop.permute.xlu1 %3923 }
 0xf6a   :  { %v9820_v22 = vpop.permute.xlu1 %4039 }
 0xf72   :  { %v4279_v56 = vpop.permute.xlu1 %4278 }
 0xf73   :  { %v4284_v16 = vsel %vm584_vm2, %v4279_v56, 0 }
 0xf74   :  { %4293 = vmatpush.bf16.msrb.mxu3 %v4284_v16 }
 0xf78   :  { %4044 = vrot.lane.b32.xlu2 %v9824_v46, %s7744_s15 }
 0xf7a   :  { %v4375_v26 = vpop.permute.xlu1 %4374 }
 0xf7b   :  { %v4380_v45 = vsel %vm584_vm2, %v4375_v26, 0 }
 0xf7c   :  { %4389 = vmatpush.bf16.msra.mxu3 %v4380_v45 }
 0xf80   :  { %3894 = vrot.lane.b32.xlu2 %v9830_v19, %s7744_s15 }
 0xf88   :  { %v3688_v58 = vpop.xlane.xlu2 %3687 }
 0xf89   :  { %7594 = vrcp.f32 %v3688_v58  ;;  %v9834_v63 = vpop.f32.mrf.mxu3 }
 0xf8a   :  { %7596 = vrcp.f32 %v3700_v43 }
 0xf8f   :  { %v7595_v4 = vpop.eup %7594 }
 0xf90   :  { %v3716_v41 = vmul.f32 %v7595_v4, %v7587_v13  ;;  %v7597_v23 = vpop.eup %7596 }
 0xf91   :  { %v3862_v11 = vpop.f32.mrf.mxu3  ;;  %v3720_v13 = vmul.f32 %v7597_v23, %v9763_v59  ;;  %v4396_v23 = vunpack.c.l.b16 %v9666_v55 }
 0xf92   :  { %v3724_v49 = vpack.c.bf16 %v3716_v41, %v3716_v41  ;;  %v4008_v11 = vunpack.c.l.b16 %v9611_v2 }
 0xf93   :  { %v3728_v48 = vpack.c.bf16 %v3720_v13, %v3720_v13  ;;  %v9859_v13 = vpack.c.b16 %v4396_v23, %v4396_v23 }
 0xf94   :  { %6951 = vmatmul.msk.bf16.vlgmr.msra.gmra.mxu2 %vm484_vm1, %v3724_v49  ;;  %v9851_v59 = vpack.c.b16 %v4008_v11, %v4008_v11 }
 0xf95   :  { %3943 = vmatpush.bf16.xpose.msra.mxu2 %v3934_v34 }
 0xf99   :  { %v9839_v7 = vpop.f32.mrf.mxu0  ;;  %v3974_v15 = vpop.f32.mrf.mxu3 }
 0xf9a   :  { %v4125_v36 = vmul.f32 0.17677669, %v3974_v15 }
 0xf9c   :  { %v4137_v56 = vsel %vm484_vm1, %v4125_v36, -inf }
 0xf9d   :  { %4138 = vmax.xlane.f32.xlu0 %v4137_v56 }
 0xfa1   :  { %v3881_v16 = vpop.f32.mrf.mxu0  ;;  %v3976_v0 = vpop.f32.mrf.mxu3 }
 0xfa4   :  { %6955 = vmatmul.msk.bf16.vlgmr.msrb.gmra.mxu2 %vm484_vm1, %v3728_v48 }
 0xfa9   :  { %v4003_v43 = vpop.f32.mrf.mxu0  ;;  %v4090_v26 = vpop.f32.mrf.mxu3 }
 0xfaa   :  { %v4126_v45 = vmul.f32 0.17677669, %v4003_v43 }
 0xfac   :  { %v4140_v58 = vsel %vm484_vm1, %v4126_v45, -inf }
 0xfad   :  { %4141 = vmax.xlane.f32.xlu1 %v4140_v58  ;;  %v3905_v58 = vsel %vm323_vm0, %v9791_v20, 0 }
 0xfb1   :  { %v4005_v4 = vpop.f32.mrf.mxu0  ;;  %4535 = vrot.lane.b32.xlu0 %v9716_v53, %s7745_s16  ;;  %v4092_v41 = vpop.f32.mrf.mxu3 }
 0xfb4   :  { %6959 = vmatmul.msk.bf16.vlgmr.msra.gmra.mxu2 %vm323_vm0, %v3924_v39  ;;  %v4300_v39 = vunpack.c.l.b16 %v9653_v47 }
 0xfb6   :  { %v9864_v0 = vpack.c.b16 %v4300_v39, %v4300_v39 }
 0xfb9   :  { %v4119_v49 = vpop.f32.mrf.mxu0  ;;  %4010 = vrot.lane.b32.xlu0 %v9851_v59, %s7744_s15 }
 0xfba   :  { %v4130_v34 = vmul.f32 0.17677669, %v4119_v49 }
 0xfbc   :  { %v4152_v15 = vsel %vm484_vm1, %v4130_v34, -inf }
 0xfbd   :  { %4153 = vmax.xlane.f32.xlu2 %v4152_v15  ;;  %v4129_v15 = vmul.f32 0.17677669, %v4090_v26 }
 0xfbf   :  { %v4149_v20 = vsel %vm484_vm1, %v4129_v15, -inf }
 0xfc1   :  { %v4121_v56 = vpop.f32.mrf.mxu0  ;;  %4533 = vrot.lane.b32.xlu0 %v9830_v19, %s7745_s16 }
 0xfc6   :  { %4398 = vrot.lane.b32.xlu1 %v9859_v13, %s7744_s15 }
 0xfcb   :  { %v3685_v2 = vpop.xlane.xlu2 %3684 }
 0xfcc   :  { %7598 = vrcp.f32 %v3685_v2 }
 0xfd2   :  { %v7599_v16 = vpop.eup %7598 }
 0xfd3   :  { %v3715_v48 = vmul.f32 %v7599_v16, %v9812_v40  ;;  %v3697_v43 = vpop.xlane.xlu2 %3696  ;;  %v4016_v40 = vpop.permute.xlu0 %4015 }
 0xfd4   :  { %7600 = vrcp.f32 %v3697_v43  ;;  %v4021_v23 = vsel %vm323_vm0, %v4016_v40, 0 }
 0xfd5   :  { %v3723_v55 = vpack.c.bf16 %v3715_v48, %v3715_v48  ;;  %4302 = vrot.lane.b32.xlu2 %v9864_v0, %s7744_s15 }
 0xfd7   :  { %6950 = vmatmul.msk.bf16.vlgmr.msra.gmra.mxu1 %vm484_vm1, %v3723_v55 }
 0xfd8   :  { %3914 = vmatpush.bf16.xpose.msra.mxu1 %v3905_v58 }
 0xfda   :  { %v7601_v41 = vpop.eup %7600 }
 0xfdb   :  { %v4045_v4 = vpop.permute.xlu2 %4044  ;;  %v3719_v11 = vmul.f32 %v7601_v41, %v9816_v8 }
 0xfdc   :  { %v4050_v47 = vsel %vm323_vm0, %v4045_v4, 0 }
 0xfdd   :  { %4059 = vmatpush.bf16.xpose.msrb.mxu2 %v4050_v47  ;;  %v3727_v49 = vpack.c.bf16 %v3719_v11, %v3719_v11 }
 0xfe3   :  { %v3895_v56 = vpop.permute.xlu2 %3894 }
 0xfe4   :  { %6963 = vmatmul.msk.bf16.vlgmr.msrb.gmra.mxu2 %vm323_vm0, %v9820_v22 }
 0xfe7   :  { %6954 = vmatmul.msk.bf16.vlgmr.msrb.gmra.mxu1 %vm484_vm1, %v3727_v49 }
 0xfe8   :  { %4030 = vmatpush.bf16.xpose.msrb.mxu1 %v4021_v23 }
 0xfeb   :  { %4150 = vmax.xlane.f32.xlu0 %v4149_v20 }
 0xff7   :  { %6958 = vmatmul.msk.bf16.vlgmr.msra.gmra.mxu1 %vm323_vm0, %v3895_v56 }
0x1010   :  { %v4139_v2 = vpop.xlane.xlu0 %4138 }
0x1011   :  { %v4157_v39 = vsub.f32 %v4125_v36, %v4139_v2 }
0x1013   :  { %v4167_v8 = vmul.f32 1.442695, %v4157_v39 }
0x1015   :  { %7602 = vpow2.f32 %v4167_v8 }
0x1017   :  { %v9880_v16 = vpop.f32.mrf.mxu2 }
0x101b   :  { %v9882_v22 = vpop.eup %7602 }
0x101c   :  { %v4185_v26 = vsel %vm484_vm1, %v9882_v22, 0.0 }
0x101d   :  { %4186 = vadd.xlane.f32.xlu0 %v4185_v26 }
0x101f   :  { %v3767_v48 = vpop.f32.mrf.mxu2 }
0x1020   :  { %v4142_v43 = vpop.xlane.xlu1 %4141 }
0x1021   :  { %v4158_v55 = vsub.f32 %v4126_v45, %v4142_v43 }
0x1023   :  { %v4169_v58 = vmul.f32 1.442695, %v4158_v55  ;;  %v9886_v4 = vpop.permute.xlu0 %4535 }
0x1025   :  { %7604 = vpow2.f32 %v4169_v58 }
0x1027   :  { %v9888_v47 = vpop.f32.mrf.mxu2 }
0x102b   :  { %v9890_v36 = vpop.eup %7604  ;;  %v4011_v41 = vpop.permute.xlu0 %4010 }
0x102c   :  { %6962 = vmatmul.msk.bf16.vlgmr.msrb.gmra.mxu1 %vm323_vm0, %v4011_v41  ;;  %v4188_v11 = vsel %vm484_vm1, %v9890_v36, 0.0 }
0x102d   :  { %4189 = vadd.xlane.f32.xlu1 %v4188_v11 }
0x102f   :  { %v3843_v40 = vpop.f32.mrf.mxu2 }
0x1030   :  { %v4154_v49 = vpop.xlane.xlu2 %4153 }
0x1031   :  { %v4162_v23 = vsub.f32 %v4130_v34, %v4154_v49  ;;  %4579 = vrot.lane.b32.xlu0 %v9740_v62, %s7745_s16 }
0x1033   :  { %v4177_v45 = vmul.f32 1.442695, %v4162_v23  ;;  %v9915_v58 = vpop.permute.xlu0 %4533 }
0x1035   :  { %7606 = vpow2.f32 %v4177_v45 }
0x1037   :  { %v3945_v20 = vpop.f32.mrf.mxu2 }
0x1038   :  { %v4303_v56 = vpop.permute.xlu2 %4302  ;;  %v4399_v2 = vpop.permute.xlu1 %4398 }
0x1039   :  { %v4308_v39 = vsel %vm584_vm2, %v4303_v56, 0  ;;  %v4404_v8 = vsel %vm584_vm2, %v4399_v2, 0  ;;  %4627 = vrot.lane.b32.xlu0 %v9753_v17, %s7745_s16 }
0x103a   :  { %4317 = vmatpush.bf16.msra.mxu0 %v4308_v39 }
0x103b   :  { %v9901_v26 = vpop.eup %7606 }
0x103c   :  { %v4200_v34 = vsel %vm484_vm1, %v9901_v26, 0.0 }
0x103d   :  { %4201 = vadd.xlane.f32.xlu1 %v4200_v34 }
0x103e   :  { %4413 = vmatpush.bf16.msrb.mxu0 %v4404_v8 }
0x103f   :  { %v3947_v48 = vpop.f32.mrf.mxu2 }
0x1041   :  { %4625 = vrot.lane.b32.xlu0 %v9851_v59, %s7745_s16 }
0x1049   :  { %4602 = vrot.lane.b32.xlu0 %v9709_v28, %s7745_s16 }
0x1051   :  { %4648 = vrot.lane.b32.xlu0 %v9774_v30, %s7745_s16 }
0x1054   :  { %v9911_v43 = vpop.f32.mrf.mxu1 }
0x1056   :  { %4604 = vrot.lane.b32.xlu1 %v9745_v51, %s7745_s16 }
0x105c   :  { %v3748_v41 = vpop.f32.mrf.mxu1 }
0x105d   :  { %v9928_v41 = vmul.f32 0.17677669, %v3945_v20 }
0x105e   :  { %4671 = vrot.lane.b32.xlu1 %v9701_v29, %s7745_s16  ;;  %v4151_v11 = vpop.xlane.xlu0 %4150 }
0x105f   :  { %v4161_v40 = vsub.f32 %v4129_v15, %v4151_v11  ;;  %v4134_v15 = vsel %vm484_vm1, %v9928_v41, -inf }
0x1061   :  { %v4175_v49 = vmul.f32 1.442695, %v4161_v40 }
0x1063   :  { %7608 = vpow2.f32 %v4175_v49 }
0x1064   :  { %v9921_v23 = vpop.f32.mrf.mxu1 }
0x1066   :  { %4696 = vrot.lane.b32.xlu1 %v9691_v54, %s7745_s16 }
0x1067   :  { %v4061_v56 = vpop.f32.mrf.mxu2 }
0x1069   :  { %v7609_v2 = vpop.eup %7608 }
0x106a   :  { %v4197_v39 = vsel %vm484_vm1, %v7609_v2, 0.0 }
0x106b   :  { %4198 = vadd.xlane.f32.xlu2 %v4197_v39 }
0x106c   :  { %v3824_v8 = vpop.f32.mrf.mxu1 }
0x106f   :  { %v4063_v34 = vpop.f32.mrf.mxu2 }
0x1074   :  { %v3916_v48 = vpop.f32.mrf.mxu1 }
0x1075   :  { %v9934_v40 = vmul.f32 0.17677669, %v3916_v48  ;;  %v4541_v48 = vsel %vm323_vm0, %v9886_v4, 0 }
0x1077   :  { %v4131_v49 = vsel %vm484_vm1, %v9934_v40, -inf }
0x107b   :  { %4135 = vmax.xlane.f32.xlu0 %v4134_v15 }
0x107c   :  { %v3918_v11 = vpop.f32.mrf.mxu1 }
0x1083   :  { %4581 = vrot.lane.b32.xlu2 %v9682_v14, %s7745_s16 }
0x108b   :  { %4558 = vrot.lane.b32.xlu2 %v9707_v3, %s7745_s16 }
0x1090   :  { %4132 = vmax.xlane.f32.xlu1 %v4131_v49  ;;  %v4187_v39 = vpop.xlane.xlu0 %4186 }
0x1091   :  { %7610 = vrcp.f32 %v4187_v39 }
0x1093   :  { %4556 = vrot.lane.b32.xlu2 %v9769_v5, %s7745_s16 }
0x1097   :  { %v7611_v20 = vpop.eup %7610 }
0x1098   :  { %v4213_v8 = vmul.f32 %v7611_v20, %v9882_v22 }
0x109a   :  { %v4221_v34 = vpack.c.bf16 %v4213_v8, %v4213_v8 }
0x109b   :  { %4673 = vrot.lane.b32.xlu2 %v9687_v57, %s7745_s16 }
0x109c   :  { %6968 = vmatmul.msk.bf16.vlgmr.msrb.gmra.mxu3 %vm484_vm1, %v4221_v34 }
0x109d   :  { %4550 = vmatpush.bf16.xpose.msrb.mxu3 %v4541_v48 }
0x10a0   :  { %v4190_v15 = vpop.xlane.xlu1 %4189 }
0x10a1   :  { %7612 = vrcp.f32 %v4190_v15 }
0x10a3   :  { %4650 = vrot.lane.b32.xlu2 %v9824_v46, %s7745_s16 }
0x10a7   :  { %v7613_v11 = vpop.eup %7612 }
0x10a8   :  { %v4214_v49 = vmul.f32 %v7613_v11, %v9890_v36  ;;  %v4580_v11 = vpop.permute.xlu0 %4579 }
0x10a9   :  { %v4032_v39 = vpop.f32.mrf.mxu1 }
0x10aa   :  { %v4222_v22 = vpack.c.bf16 %v4214_v49, %v4214_v49  ;;  %v9951_v20 = vmul.f32 0.17677669, %v4032_v39  ;;  %v9960_v39 = vmul.f32 0.17677669, %v4061_v56 }
0x10ab   :  { %4694 = vrot.lane.b32.xlu2 %v9751_v1, %s7745_s16 }
0x10ac   :  { %6969 = vmatmul.msk.bf16.vlgmr.msra.gmra.mxu0 %vm484_vm1, %v4222_v22  ;;  %v4143_v4 = vsel %vm484_vm1, %v9951_v20, -inf  ;;  %v4146_v22 = vsel %vm484_vm1, %v9960_v39, -inf }
0x10ad   :  { %4144 = vmax.xlane.f32.xlu0 %v4143_v4 }
0x10b0   :  { %v4202_v8 = vpop.xlane.xlu1 %4201  ;;  %v4628_v49 = vpop.permute.xlu0 %4627 }
0x10b1   :  { %7614 = vrcp.f32 %v4202_v8  ;;  %v4034_v34 = vpop.f32.mrf.mxu1 }
0x10b2   :  { %v4252_v34 = vunpack.c.l.b16 %v9609_v12 }
0x10b4   :  { %v9965_v55 = vpack.c.b16 %v4252_v34, %v4252_v34 }
0x10b7   :  { %v7615_v48 = vpop.eup %7614 }
0x10b8   :  { %v4218_v15 = vmul.f32 %v7615_v48, %v9901_v26  ;;  %v4626_v38 = vpop.permute.xlu0 %4625 }
0x10ba   :  { %v4226_v36 = vpack.c.bf16 %v4218_v15, %v4218_v15 }
0x10bc   :  { %6973 = vmatmul.msk.bf16.vlgmr.msrb.gmra.mxu0 %vm484_vm1, %v4226_v36 }
0x10c0   :  { %v4603_v45 = vpop.permute.xlu0 %4602 }
0x10c8   :  { %v4649_v21 = vpop.permute.xlu0 %4648  ;;  %v4605_v15 = vpop.permute.xlu1 %4604 }
0x10d0   :  { %v4672_v34 = vpop.permute.xlu1 %4671 }
0x10d4   :  { %4147 = vmax.xlane.f32.xlu2 %v4146_v22  ;;  %v4324_v22 = vunpack.c.l.b16 %v9606_v33 }
0x10de   :  { %v4199_v4 = vpop.xlane.xlu2 %4198 }
0x10df   :  { %7616 = vrcp.f32 %v4199_v4 }
0x10e5   :  { %v7617_v8 = vpop.eup %7616 }
0x10e6   :  { %v4217_v26 = vmul.f32 %v7617_v8, %v7609_v2  ;;  %v4582_v48 = vpop.permute.xlu2 %4581  ;;  %v4610_v8 = vsel %vm323_vm0, %v4605_v15, 0 }
0x10e7   :  { %v4587_v56 = vsel %vm323_vm0, %v4582_v48, 0  ;;  %v9975_v48 = vpack.c.b16 %v4324_v22, %v4324_v22 }
0x10e8   :  { %v4225_v36 = vpack.c.bf16 %v4217_v26, %v4217_v26 }
0x10ea   :  { %6972 = vmatmul.msk.bf16.vlgmr.msra.gmra.mxu3 %vm484_vm1, %v4225_v36 }
0x10eb   :  { %4596 = vmatpush.bf16.xpose.msra.mxu3 %v4587_v56  ;;  %v4633_v56 = vsel %vm323_vm0, %v4628_v49, 0 }
0x10ec   :  { %4254 = vrot.lane.b32.xlu2 %v9965_v55, %s7744_s15 }
0x10ee   :  { %v4559_v4 = vpop.permute.xlu2 %4558  ;;  %v4136_v24 = vpop.xlane.xlu0 %4135 }
0x10ef   :  { %v4564_v12 = vsel %vm323_vm0, %v4559_v4, 0  ;;  %v4156_v2 = vsub.f32 %v9928_v41, %v4136_v24  ;;  %v4697_v41 = vpop.permute.xlu1 %4696 }
0x10f0   :  { %4573 = vmatpush.bf16.xpose.msra.mxu0 %v4564_v12 }
0x10f1   :  { %v4165_v26 = vmul.f32 1.442695, %v4156_v2 }
0x10f3   :  { %7618 = vpow2.f32 %v4165_v26 }
0x10f4   :  { %4326 = vrot.lane.b32.xlu2 %v9975_v48, %s7744_s15 }
0x10f6   :  { %v4557_v36 = vpop.permute.xlu2 %4556 }
0x10f7   :  { %6999 = vmatmul.msk.bf16.vlgmr.msra.gmra.mxu0 %vm323_vm0, %v4557_v36 }
0x10f8   :  { %4619 = vmatpush.bf16.xpose.msrb.mxu0 %v4610_v8 }
0x10f9   :  { %v9980_v33 = vpop.eup %7618 }
0x10fa   :  { %6998 = vmatmul.msk.bf16.vlgmr.msrb.gmra.mxu3 %vm323_vm0, %v9915_v58  ;;  %v4182_v24 = vsel %vm484_vm1, %v9980_v33, 0.0  ;;  %v4702_v58 = vsel %vm323_vm0, %v4697_v41, 0 }
0x10fb   :  { %4642 = vmatpush.bf16.xpose.msrb.mxu3 %v4633_v56  ;;  %4183 = vadd.xlane.f32.xlu1 %v4182_v24 }
0x10fc   :  { %4947 = vrot.lane.b32.xlu2 %v9787_v37, %s7745_s16 }
0x10fe   :  { %v4674_v15 = vpop.permute.xlu2 %4673 }
0x10ff   :  { %v4679_v8 = vsel %vm323_vm0, %v4674_v15, 0 }
0x1103   :  { %v4133_v22 = vpop.xlane.xlu1 %4132 }
0x1104   :  { %v4155_v4 = vsub.f32 %v9934_v40, %v4133_v22 }
0x1106   :  { %v4163_v12 = vmul.f32 1.442695, %v4155_v4  ;;  %v4651_v2 = vpop.permute.xlu2 %4650 }
0x1107   :  { %v4656_v49 = vsel %vm323_vm0, %v4651_v2, 0  ;;  %7001 = vmatmul.msk.bf16.vlgmr.msrb.gmra.mxu0 %vm323_vm0, %v4603_v45  ;;  %v4228_v45 = vunpack.c.l.b16 %v9595_v18 }
0x1108   :  { %7620 = vpow2.f32 %v4163_v12  ;;  %4665 = vmatpush.bf16.xpose.msra.mxu0 %v4656_v49 }
0x1109   :  { %v10004_v56 = vpack.c.b16 %v4228_v45, %v4228_v45 }
0x110a   :  { %7000 = vmatmul.msk.bf16.vlgmr.msra.gmra.mxu3 %vm323_vm0, %v4580_v11 }
0x110b   :  { %4688 = vmatpush.bf16.xpose.msra.mxu3 %v4679_v8  ;;  %v4348_v8 = vunpack.c.l.b16 %v9625_v6 }
0x110e   :  { %v9995_v26 = vpop.eup %7620  ;;  %v4695_v11 = vpop.permute.xlu2 %4694 }
0x110f   :  { %v4179_v40 = vsel %vm484_vm1, %v9995_v26, 0.0 }
0x1110   :  { %4711 = vmatpush.bf16.xpose.msrb.mxu0 %v4702_v58  ;;  %4180 = vadd.xlane.f32.xlu0 %v4179_v40  ;;  %v10027_v40 = vpack.c.b16 %v4348_v8, %v4348_v8 }
0x1117   :  { %7003 = vmatmul.msk.bf16.vlgmr.msra.gmra.mxu0 %vm323_vm0, %v4649_v21 }
0x111a   :  { %7002 = vmatmul.msk.bf16.vlgmr.msrb.gmra.mxu3 %vm323_vm0, %v4626_v38 }
0x111f   :  { %v10002_v36 = vpop.f32.mrf.mxu3 }
0x1124   :  { %4230 = vrot.lane.b32.xlu0 %v10004_v56, %s7744_s15 }
0x1127   :  { %v4297_v24 = vpop.f32.mrf.mxu3  ;;  %7005 = vmatmul.msk.bf16.vlgmr.msrb.gmra.mxu0 %vm323_vm0, %v4695_v11 }
0x1129   :  { %v10009_v41 = vpop.f32.mrf.mxu0 }
0x112a   :  { %7004 = vmatmul.msk.bf16.vlgmr.msra.gmra.mxu3 %vm323_vm0, %v4672_v34 }
0x112c   :  { %4842 = vrot.lane.b32.xlu0 %v9965_v55, %s7745_s16 }
0x1131   :  { %v4321_v18 = vpop.f32.mrf.mxu0 }
0x1134   :  { %4884 = vrot.lane.b32.xlu0 %v9864_v0, %s7745_s16 }
0x1139   :  { %v10018_v38 = vpop.f32.mrf.mxu0 }
0x1141   :  { %v4417_v15 = vpop.f32.mrf.mxu0 }
0x1147   :  { %v4148_v22 = vpop.xlane.xlu2 %4147 }
0x1148   :  { %v4160_v4 = vsub.f32 %v9960_v39, %v4148_v22 }
0x114a   :  { %v4173_v12 = vmul.f32 1.442695, %v4160_v4 }
0x114c   :  { %7622 = vpow2.f32 %v4173_v12 }
0x114f   :  { %v4255_v2 = vpop.permute.xlu2 %4254 }
0x1150   :  { %v4260_v49 = vsel %vm584_vm2, %v4255_v2, 0 }
0x1151   :  { %4269 = vmatpush.bf16.msra.mxu2 %v4260_v49 }
0x1152   :  { %v10022_v34 = vpop.eup %7622 }
0x1153   :  { %v4194_v58 = vsel %vm484_vm1, %v10022_v34, 0.0 }
0x1154   :  { %4195 = vadd.xlane.f32.xlu1 %v4194_v58  ;;  %v4145_v58 = vpop.xlane.xlu0 %4144 }
0x116d   :  { %4350 = vrot.lane.b32.xlu1 %v10027_v40, %s7744_s15  ;;  %v10031_v39 = vpop.f32.mrf.mxu3 }
0x116e   :  { %v4184_v11 = vpop.xlane.xlu1 %4183 }
0x116f   :  { %7624 = vrcp.f32 %v4184_v11  ;;  %v4159_v11 = vsub.f32 %v9951_v20, %v4145_v58 }
0x1174   :  { %v4575_v24 = vpop.f32.mrf.mxu0 }
0x1175   :  { %v7625_v18 = vpop.eup %7624  ;;  %v10035_v15 = vmul.f32 0.17677669, %v4575_v24  ;;  %v4393_v22 = vpop.f32.mrf.mxu3  ;;  %v4171_v24 = vmul.f32 1.442695, %v4159_v11 }
0x1176   :  { %v4212_v4 = vmul.f32 %v7625_v18, %v9980_v33 }
0x1177   :  { %v4728_v6 = vsel %vm484_vm1, %v10035_v15, -inf }
0x1178   :  { %v4220_v12 = vpack.c.bf16 %v4212_v4, %v4212_v4  ;;  %4729 = vmax.xlane.f32.xlu0 %v4728_v6 }
0x117a   :  { %6967 = vmatmul.msk.bf16.vlgmr.msra.gmra.mxu2 %vm484_vm1, %v4220_v12 }
0x117c   :  { %v4577_v2 = vpop.f32.mrf.mxu0 }
0x117d   :  { %v10041_v49 = vpop.f32.mrf.mxu3 }
0x1183   :  { %v4181_v21 = vpop.xlane.xlu0 %4180 }
0x1184   :  { %v4621_v8 = vpop.f32.mrf.mxu0  ;;  %7626 = vrcp.f32 %v4181_v21  ;;  %v4327_v21 = vpop.permute.xlu2 %4326 }
0x1185   :  { %v4554_v45 = vpop.f32.mrf.mxu3  ;;  %7628 = vpow2.f32 %v4171_v24  ;;  %v4332_v24 = vsel %vm584_vm2, %v4327_v21, 0 }
0x118a   :  { %v7627_v6 = vpop.eup %7626 }
0x118b   :  { %v10050_v12 = vpop.eup %7628  ;;  %v4211_v45 = vmul.f32 %v7627_v6, %v9995_v26 }
0x118c   :  { %5060 = vrot.lane.b32.xlu0 %v9716_v53, %s7746_s9  ;;  %v4623_v33 = vpop.f32.mrf.mxu0  ;;  %v4191_v58 = vsel %vm484_vm1, %v10050_v12, 0.0 }
0x118d   :  { %v4598_v18 = vpop.f32.mrf.mxu3  ;;  %v4219_v33 = vpack.c.bf16 %v4211_v45, %v4211_v45 }
0x118e   :  { %v10046_v22 = vmul.f32 0.17677669, %v4598_v18 }
0x1190   :  { %v4731_v4 = vsel %vm484_vm1, %v10046_v22, -inf }
0x1191   :  { %4732 = vmax.xlane.f32.xlu2 %v4731_v4 }
0x1194   :  { %5081 = vrot.lane.b32.xlu0 %v9769_v5, %s7746_s9  ;;  %v4667_v20 = vpop.f32.mrf.mxu0 }
0x1195   :  { %v4600_v53 = vpop.f32.mrf.mxu3 }
0x1196   :  { %v4231_v2 = vpop.permute.xlu0 %4230 }
0x1197   :  { %v4236_v11 = vsel %vm584_vm2, %v4231_v2, 0  ;;  %4192 = vadd.xlane.f32.xlu1 %v4191_v58  ;;  %v10073_v58 = vmul.f32 0.17677669, %v4667_v20  ;;  %v7335_v20 = vld [vmem:[%s11051_s2 + $0x38] sm:$0xf0] }
0x1198   :  { %4245 = vmatpush.bf16.msra.mxu1 %v4236_v11 }
0x1199   :  { %v4740_v11 = vsel %vm484_vm1, %v10073_v58, -inf }
0x119b   :  { %6966 = vmatmul.msk.bf16.vlgmr.msra.gmra.mxu1 %vm484_vm1, %v4219_v33 }
0x119c   :  { %4341 = vmatpush.bf16.msrb.mxu1 %v4332_v24  ;;  %5058 = vrot.lane.b32.xlu0 %v9830_v19, %s7746_s9  ;;  %v4669_v5 = vpop.f32.mrf.mxu0 }
0x119d   :  { %v10062_v26 = vpop.f32.mrf.mxu3 }
0x119e   :  { %v4843_v18 = vpop.permute.xlu0 %4842 }
0x11a4   :  { %v10064_v4 = vpop.f32.mrf.mxu0 }
0x11a5   :  { %v4646_v6 = vpop.f32.mrf.mxu3 }
0x11a6   :  { %v4885_v53 = vpop.permute.xlu0 %4884  ;;  %v6992_v6 = vld [vmem:[%s11051_s2 + $0x28] sm:$0xf] }
0x11a7   :  { %v4890_v2 = vsel %vm584_vm2, %v4885_v53, 0  ;;  %v10087_v53 = vmul.f32 0.17677669, %v4621_v8 }
0x11a8   :  { %4899 = vmatpush.bf16.msra.mxu0 %v4890_v2 }
0x11a9   :  { %5083 = vrot.lane.b32.xlu2 %v9707_v3, %s7746_s9 }
0x11ac   :  { %v4715_v21 = vpop.f32.mrf.mxu0 }
0x11ad   :  { %v4690_v45 = vpop.f32.mrf.mxu3  ;;  %v6993_v21 = vor.u32 %v7335_v20, %v6992_v6 }
0x11ae   :  { %v10077_v24 = vmul.f32 0.17677669, %v4690_v45 }
0x11b0   :  { %4863 = vrot.lane.b32.xlu1 %v9779_v9, %s7745_s16  ;;  %v4743_v3 = vsel %vm484_vm1, %v10077_v24, -inf }
0x11b5   :  { %v4692_v19 = vpop.f32.mrf.mxu3 }
0x11b6   :  { %v6988_v19 = vld [vmem:[%s11051_s2] sm:$0xf] }
0x11b8   :  { %4926 = vrot.lane.b32.xlu1 %v10027_v40, %s7745_s16 }
0x11c6   :  { %4741 = vmax.xlane.f32.xlu0 %v4740_v11  ;;  %v7334_v11 = vld [vmem:[%s11051_s2 + $0x10] sm:$0xf0] }
0x11c7   :  { %v4196_v33 = vpop.xlane.xlu1 %4195 }
0x11c8   :  { %7630 = vrcp.f32 %v4196_v33  ;;  %v4734_v33 = vsel %vm484_vm1, %v10087_v53, -inf }
0x11ce   :  { %4744 = vmax.xlane.f32.xlu0 %v4743_v3  ;;  %v7631_v5 = vpop.eup %7630 }
0x11cf   :  { %v4216_v2 = vmul.f32 %v7631_v5, %v10022_v34  ;;  %v6989_v34 = vor.u32 %v7334_v11, %v6988_v19  ;;  %v4848_v5 = vsel %vm584_vm2, %v4843_v18, 0  ;;  %v6980_v18 = vld [vmem:[%s11051_s2 + $0x78] sm:$0xf]  ;;  %v6976_v11 = vld [vmem:[%s11051_s2 + $0x50] sm:$0xf] }
0x11d1   :  { %v4224_v8 = vpack.c.bf16 %v4216_v2, %v4216_v2  ;;  %v11062_v2 = vpack.c.bf16 %v9880_v16, %v9911_v43  ;;  %v4948_v16 = vpop.permute.xlu2 %4947 }
0x11df   :  { %v4351_v45 = vpop.permute.xlu1 %4350 }
0x11e0   :  { %v4356_v3 = vsel %vm584_vm2, %v4351_v45, 0 }
0x11e1   :  { %4365 = vmatpush.bf16.msrb.mxu2 %v4356_v3  ;;  %v7336_v3 = vld [vmem:[%s11051_s2 + $0x60] sm:$0xf0] }
0x11e2   :  { %4735 = vmax.xlane.f32.xlu1 %v4734_v33  ;;  %5129 = vrot.lane.b32.xlu0 %v9745_v51, %s7746_s9  ;;  %v6977_v33 = vor.u32 %v7336_v3, %v6976_v11  ;;  %v10142_v11 = vmul.f32 0.17677669, %v10064_v4 }
0x11e4   :  { %6971 = vmatmul.msk.bf16.vlgmr.msrb.gmra.mxu2 %vm484_vm1, %v4224_v8  ;;  %v11063_v8 = vpack.c.bf16 %v9797_v61, %v9807_v42 }
0x11e5   :  { %4510 = vmatpush.bf16.msra.mxu2 %v6993_v21 }
0x11e9   :  { %4511 = vmatpush.bf16.msra.mxu2 %v6989_v34 }
0x11eb   :  { %v4730_v6 = vpop.xlane.xlu0 %4729 }
0x11ec   :  { %v4750_v20 = vsub.f32 %v10035_v15, %v4730_v6  ;;  %v7337_v15 = vld [vmem:[%s11051_s2 + $0x88] sm:$0xf0] }
0x11ed   :  { %4857 = vmatpush.bf16.msrb.mxu2 %v4848_v5  ;;  %v6981_v19 = vor.u32 %v7337_v15, %v6980_v18  ;;  %v11064_v15 = vpack.c.bf16 %v9888_v47, %v9921_v23  ;;  %v4746_v47 = vsel %vm484_vm1, %v10142_v11, -inf }
0x11ee   :  { %v4759_v45 = vmul.f32 1.442695, %v4750_v20 }
0x11ef   :  { %4457 = vmatpush.bf16.msra.mxu1 %v6981_v19 }
0x11f0   :  { %7632 = vpow2.f32 %v4759_v45 }
0x11f3   :  { %4458 = vmatpush.bf16.msra.mxu1 %v6977_v33 }
0x11f4   :  { %6994 = vmatmul.msk.bf16.vlgmr.msra.gmra.mxu2 %vm323_vm0, %v11062_v2 }
0x11f6   :  { %v10108_v21 = vpop.eup %7632 }
0x11f7   :  { %v4776_v51 = vsel %vm484_vm1, %v10108_v21, 0.0 }
0x11f8   :  { %4777 = vadd.xlane.f32.xlu2 %v4776_v51 }
0x11fb   :  { %4968 = vrot.lane.b32.xlu1 %v9859_v13, %s7745_s16 }
0x11fd   :  { %v4271_v43 = vpop.f32.mrf.mxu2 }
0x11fe   :  { %v5061_v19 = vpop.permute.xlu0 %5060 }
0x1204   :  { %6995 = vmatmul.msk.bf16.gmra.mxu2 %vm323_vm0, %v11063_v8  ;;  %v4733_v34 = vpop.xlane.xlu2 %4732 }
0x1205   :  { %v4751_v5 = vsub.f32 %v10046_v22, %v4733_v34  ;;  %v4273_v6 = vpop.f32.mrf.mxu2  ;;  %v4953_v34 = vsel %vm584_vm2, %v4948_v16, 0 }
0x1206   :  { %v10155_v23 = vpop.permute.xlu0 %5081 }
0x1207   :  { %v4761_v20 = vmul.f32 1.442695, %v4751_v5  ;;  %v11065_v5 = vpack.c.bf16 %v9839_v7, %v9834_v63  ;;  %v11066_v7 = vpack.c.bf16 %v10009_v41, %v10002_v36 }
0x1209   :  { %7634 = vpow2.f32 %v4761_v20 }
0x120a   :  { %v4193_v45 = vpop.xlane.xlu1 %4192 }
0x120b   :  { %7636 = vrcp.f32 %v4193_v45 }
0x120e   :  { %v10158_v63 = vpop.permute.xlu0 %5058 }
0x120f   :  { %v10131_v2 = vpop.eup %7634 }
0x1210   :  { %v4779_v51 = vsel %vm484_vm1, %v10131_v2, 0.0 }
0x1211   :  { %v7637_v18 = vpop.eup %7636  ;;  %4780 = vadd.xlane.f32.xlu0 %v4779_v51 }
0x1212   :  { %v4215_v61 = vmul.f32 %v7637_v18, %v10050_v12 }
0x1214   :  { %v4223_v42 = vpack.c.bf16 %v4215_v61, %v4215_v61  ;;  %6996 = vmatmul.msk.bf16.gmra.mxu2 %vm323_vm0, %v11064_v15 }
0x1216   :  { %6970 = vmatmul.msk.bf16.vlgmr.msrb.gmra.mxu1 %vm484_vm1, %v4223_v42 }
0x1218   :  { %v4247_v22 = vpop.f32.mrf.mxu1 }
0x1219   :  { %v4419_v12 = vpack.c.bf16 %v4271_v43, %v4247_v22 }
0x1220   :  { %v4249_v3 = vpop.f32.mrf.mxu1 }
0x1221   :  { %v5084_v3 = vpop.permute.xlu2 %5083 }
0x1222   :  { %v4864_v33 = vpop.permute.xlu1 %4863 }
0x1223   :  { %v4869_v8 = vsel %vm584_vm2, %v4864_v33, 0 }
0x1224   :  { %6997 = vmatmul.msk.bf16.gmra.mxu2 %vm323_vm0, %v11065_v5  ;;  %4878 = vmatpush.bf16.msrb.mxu3 %v4869_v8 }
0x1225   :  { %4747 = vmax.xlane.f32.xlu1 %v4746_v47  ;;  %5104 = vrot.lane.b32.xlu0 %v9740_v62, %s7746_s9 }
0x1226   :  { %6982 = vmatmul.msk.bf16.vlgmr.msra.gmra.mxu1 %vm323_vm0, %v4419_v12 }
0x1228   :  { %4962 = vmatpush.bf16.msra.mxu3 %v4953_v34 }
0x122a   :  { %v4927_v4 = vpop.permute.xlu1 %4926 }
0x122b   :  { %v4932_v16 = vsel %vm584_vm2, %v4927_v4, 0 }
0x122c   :  { %4941 = vmatpush.bf16.msra.mxu2 %v4932_v16 }
0x1236   :  { %6983 = vmatmul.msk.bf16.gmra.mxu1 %vm323_vm0, %v11066_v7 }
0x1239   :  { %v4742_v43 = vpop.xlane.xlu0 %4741 }
0x123a   :  { %v4754_v6 = vsub.f32 %v10073_v58, %v4742_v43 }
0x123c   :  { %v4767_v20 = vmul.f32 1.442695, %v4754_v6 }
0x123e   :  { %7638 = vpow2.f32 %v4767_v20 }
0x1241   :  { %v4745_v62 = vpop.xlane.xlu0 %4744 }
0x1242   :  { %v4755_v45 = vsub.f32 %v10077_v24, %v4745_v62 }
0x1244   :  { %v10166_v51 = vpop.eup %7638  ;;  %v4769_v18 = vmul.f32 1.442695, %v4755_v45  ;;  %v10201_v45 = vmul.f32 0.17677669, %v10041_v49 }
0x1245   :  { %v4788_v61 = vsel %vm484_vm1, %v10166_v51, 0.0 }
0x1246   :  { %7640 = vpow2.f32 %v4769_v18  ;;  %4789 = vadd.xlane.f32.xlu2 %v4788_v61 }
0x124c   :  { %v10170_v42 = vpop.eup %7640 }
0x124d   :  { %v4791_v36 = vsel %vm484_vm1, %v10170_v42, 0.0 }
0x124f   :  { %4792 = vadd.xlane.f32.xlu0 %v4791_v36 }
0x1255   :  { %v4736_v41 = vpop.xlane.xlu1 %4735 }
0x1256   :  { %v4752_v58 = vsub.f32 %v10087_v53, %v4736_v41  ;;  %v4725_v41 = vsel %vm484_vm1, %v10201_v45, -inf }
0x1258   :  { %v4763_v15 = vmul.f32 1.442695, %v4752_v58 }
0x125a   :  { %7642 = vpow2.f32 %v4763_v15 }
0x125e   :  { %5127 = vrot.lane.b32.xlu2 %v9709_v28, %s7746_s9 }
0x1260   :  { %v10177_v24 = vpop.eup %7642 }
0x1261   :  { %v4782_v22 = vsel %vm484_vm1, %v10177_v24, 0.0 }
0x1262   :  { %4783 = vadd.xlane.f32.xlu1 %v4782_v22 }
0x1263   :  { %5152 = vrot.lane.b32.xlu0 %v9753_v17, %s7746_s9  ;;  %v5066_v17 = vsel %vm323_vm0, %v5061_v19, 0 }
0x1267   :  { %v4367_v33 = vpop.f32.mrf.mxu2 }
0x126b   :  { %v4778_v8 = vpop.xlane.xlu2 %4777  ;;  %5175 = vrot.lane.b32.xlu0 %v9824_v46, %s7746_s9  ;;  %v5130_v46 = vpop.permute.xlu0 %5129 }
0x126c   :  { %7644 = vrcp.f32 %v4778_v8 }
0x126d   :  { %v4969_v53 = vpop.permute.xlu1 %4968 }
0x126e   :  { %v4974_v34 = vsel %vm584_vm2, %v4969_v53, 0 }
0x126f   :  { %v4369_v28 = vpop.f32.mrf.mxu2  ;;  %4983 = vmatpush.bf16.msrb.mxu0 %v4974_v34 }
0x1272   :  { %v7645_v12 = vpop.eup %7644 }
0x1273   :  { %v4806_v5 = vmul.f32 %v7645_v12, %v10108_v21  ;;  %5150 = vrot.lane.b32.xlu0 %v9851_v59, %s7746_s9  ;;  %v5089_v59 = vsel %vm323_vm0, %v5084_v3, 0  ;;  %v5135_v12 = vsel %vm323_vm0, %v5130_v46, 0 }
0x1275   :  { %v4814_v47 = vpack.c.bf16 %v4806_v5, %v4806_v5 }
0x1277   :  { %7007 = vmatmul.msk.bf16.vlgmr.msrb.gmra.mxu2 %vm484_vm1, %v4814_v47  ;;  %v4513_v62 = vpop.f32.mrf.mxu2 }
0x1278   :  { %5075 = vmatpush.bf16.xpose.msrb.mxu2 %v5066_v17 }
0x127b   :  { %5106 = vrot.lane.b32.xlu1 %v9682_v14, %s7746_s9  ;;  %5198 = vrot.lane.b32.xlu0 %v9687_v57, %s7746_s9 }
0x127f   :  { %v10220_v58 = vpop.f32.mrf.mxu2 }
0x1284   :  { %v4781_v4 = vpop.xlane.xlu0 %4780 }
0x1285   :  { %7646 = vrcp.f32 %v4781_v4 }
0x1287   :  { %v4518_v22 = vpop.f32.mrf.mxu2 }
0x128b   :  { %v7647_v16 = vpop.eup %7646 }
0x128c   :  { %v4807_v21 = vmul.f32 %v7647_v16, %v10131_v2  ;;  %v10204_v2 = vmul.f32 0.17677669, %v10062_v26  ;;  %v11067_v26 = vpack.c.bf16 %v10018_v38, %v10031_v39 }
0x128e   :  { %v4815_v7 = vpack.c.bf16 %v4807_v21, %v4807_v21  ;;  %v4737_v49 = vsel %vm484_vm1, %v10204_v2, -inf }
0x128f   :  { %v10241_v5 = vpop.f32.mrf.mxu2 }
0x1290   :  { %7008 = vmatmul.msk.bf16.vlgmr.msrb.gmra.mxu3 %vm484_vm1, %v4815_v7 }
0x1291   :  { %5098 = vmatpush.bf16.xpose.msrb.mxu3 %v5089_v59 }
0x1293   :  { %v4343_v19 = vpop.f32.mrf.mxu1 }
0x1294   :  { %v4421_v43 = vpack.c.bf16 %v4367_v33, %v4343_v19 }
0x1296   :  { %6984 = vmatmul.msk.bf16.gmra.mxu1 %vm323_vm0, %v4421_v43 }
0x1297   :  { %v10228_v53 = vpop.permute.xlu0 %5104  ;;  %v10247_v47 = vpop.f32.mrf.mxu2 }
0x1298   :  { %v4748_v14 = vpop.xlane.xlu1 %4747 }
0x1299   :  { %v4756_v6 = vsub.f32 %v10142_v11, %v4748_v14 }
0x129b   :  { %v4771_v20 = vmul.f32 1.442695, %v4756_v6  ;;  %v4345_v57 = vpop.f32.mrf.mxu1 }
0x129d   :  { %7648 = vpow2.f32 %v4771_v20 }
0x129f   :  { %v10253_v16 = vpop.f32.mrf.mxu2 }
0x12a3   :  { %v10206_v18 = vpop.eup %7648  ;;  %v4460_v61 = vpop.f32.mrf.mxu1 }
0x12a4   :  { %v10208_v36 = vadd.f32 %v4513_v62, %v4460_v61  ;;  %v4794_v11 = vsel %vm484_vm1, %v10206_v18, 0.0 }
0x12a5   :  { %4726 = vmax.xlane.f32.xlu1 %v4725_v41  ;;  %4795 = vadd.xlane.f32.xlu2 %v4794_v11 }
0x12a6   :  { %4738 = vmax.xlane.f32.xlu0 %v4737_v49  ;;  %6985 = vmatmul.msk.bf16.gmra.mxu1 %vm323_vm0, %v11067_v26 }
0x12a7   :  { %v10259_v59 = vpop.f32.mrf.mxu2 }
0x12ab   :  { %v10222_v15 = vpop.f32.mrf.mxu1 }
0x12af   :  { %v10264_v6 = vpop.f32.mrf.mxu2 }
0x12b3   :  { %v4465_v3 = vpop.f32.mrf.mxu1 }
0x12b4   :  { %v10224_v33 = vadd.f32 %v4518_v22, %v4465_v3 }
0x12b9   :  { %v4790_v8 = vpop.xlane.xlu2 %4789 }
0x12ba   :  { %7650 = vrcp.f32 %v4790_v8  ;;  %4905 = vrot.lane.b32.xlu0 %v9975_v48, %s7745_s16 }
0x12bd   :  { %5173 = vrot.lane.b32.xlu2 %v9774_v30, %s7746_s9 }
0x12be   :  { %5196 = vrot.lane.b32.xlu1 %v9701_v29, %s7746_s9 }
0x12c0   :  { %v7651_v38 = vpop.eup %7650 }
0x12c1   :  { %v4810_v39 = vmul.f32 %v7651_v38, %v10166_v51  ;;  %v5128_v7 = vpop.permute.xlu2 %5127 }
0x12c2   :  { %v4793_v28 = vpop.xlane.xlu0 %4792 }
0x12c3   :  { %v4818_v34 = vpack.c.bf16 %v4810_v39, %v4810_v39  ;;  %7652 = vrcp.f32 %v4793_v28 }
0x12c5   :  { %5221 = vrot.lane.b32.xlu2 %v9691_v54, %s7746_s9  ;;  %7011 = vmatmul.msk.bf16.vlgmr.msra.gmra.mxu2 %vm484_vm1, %v4818_v34 }
0x12c6   :  { %5144 = vmatpush.bf16.xpose.msra.mxu2 %v5135_v12  ;;  %4821 = vrot.lane.b32.xlu1 %v10004_v56, %s7745_s16 }
0x12c9   :  { %v7653_v30 = vpop.eup %7652 }
0x12ca   :  { %v4811_v29 = vmul.f32 %v7653_v30, %v10170_v42 }
0x12cc   :  { %v4819_v51 = vpack.c.bf16 %v4811_v29, %v4811_v29 }
0x12cd   :  { %5219 = vrot.lane.b32.xlu2 %v9751_v1, %s7746_s9 }
0x12ce   :  { %7012 = vmatmul.msk.bf16.vlgmr.msra.gmra.mxu3 %vm484_vm1, %v4819_v51 }
0x12d5   :  { %v4784_v54 = vpop.xlane.xlu1 %4783  ;;  %7026 = vmatmul.msk.bf16.vlgmr.msrb.gmra.mxu2 %vm323_vm0, %v10158_v63  ;;  %v5153_v17 = vpop.permute.xlu0 %5152 }
0x12d6   :  { %7654 = vrcp.f32 %v4784_v54  ;;  %v5158_v46 = vsel %vm323_vm0, %v5153_v17, 0 }
0x12d7   :  { %5167 = vmatpush.bf16.xpose.msra.mxu3 %v5158_v46 }
0x12dc   :  { %v7655_v4 = vpop.eup %7654 }
0x12dd   :  { %v4808_v42 = vmul.f32 %v7655_v4, %v10177_v24  ;;  %v5176_v21 = vpop.permute.xlu0 %5175 }
0x12de   :  { %7027 = vmatmul.msk.bf16.vlgmr.msrb.gmra.mxu3 %vm323_vm0, %v10155_v23  ;;  %v5181_v30 = vsel %vm323_vm0, %v5176_v21, 0 }
0x12df   :  { %v4816_v1 = vpack.c.bf16 %v4808_v42, %v4808_v42 }
0x12e1   :  { %7009 = vmatmul.msk.bf16.vlgmr.msra.gmra.mxu0 %vm484_vm1, %v4816_v1 }
0x12e5   :  { %7029 = vmatmul.msk.bf16.vlgmr.msra.gmra.mxu2 %vm323_vm0, %v5128_v7  ;;  %v5151_v63 = vpop.permute.xlu0 %5150 }
0x12ed   :  { %v5107_v19 = vpop.permute.xlu1 %5106  ;;  %v5199_v14 = vpop.permute.xlu0 %5198 }
0x12ee   :  { %v5112_v43 = vsel %vm323_vm0, %v5107_v19, 0  ;;  %v5204_v24 = vsel %vm323_vm0, %v5199_v14, 0  ;;  %7030 = vmatmul.msk.bf16.vlgmr.msra.gmra.mxu3 %vm323_vm0, %v5151_v63 }
0x12ef   :  { %5121 = vmatpush.bf16.xpose.msra.mxu0 %v5112_v43  ;;  %5213 = vmatpush.bf16.xpose.msrb.mxu2 %v5204_v24 }
0x12fa   :  { %v10266_v23 = vpop.f32.mrf.mxu2 }
0x1302   :  { %v4861_v20 = vpop.f32.mrf.mxu2 }
0x1313   :  { %v10268_v57 = vpop.f32.mrf.mxu3 }
0x1318   :  { %v4727_v62 = vpop.xlane.xlu1 %4726  ;;  %v4796_v61 = vpop.xlane.xlu2 %4795 }
0x1319   :  { %v4749_v41 = vsub.f32 %v10201_v45, %v4727_v62  ;;  %7656 = vrcp.f32 %v4796_v61  ;;  %v4739_v11 = vpop.xlane.xlu0 %4738 }
0x131a   :  { %v4753_v49 = vsub.f32 %v10204_v2, %v4739_v11 }
0x131b   :  { %v4757_v26 = vmul.f32 1.442695, %v4749_v41  ;;  %v4882_v22 = vpop.f32.mrf.mxu3 }
0x131c   :  { %v4765_v3 = vmul.f32 1.442695, %v4753_v49 }
0x131d   :  { %7658 = vpow2.f32 %v4757_v26 }
0x131e   :  { %7660 = vpow2.f32 %v4765_v3 }
0x131f   :  { %v7657_v8 = vpop.eup %7656 }
0x1320   :  { %v4812_v38 = vmul.f32 %v7657_v8, %v10206_v18  ;;  %v5174_v39 = vpop.permute.xlu2 %5173 }
0x1322   :  { %v4820_v34 = vpack.c.bf16 %v4812_v38, %v4812_v38 }
0x1323   :  { %v7659_v28 = vpop.eup %7658 }
0x1324   :  { %v7661_v12 = vpop.eup %7660  ;;  %7013 = vmatmul.msk.bf16.vlgmr.msrb.gmra.mxu0 %vm484_vm1, %v4820_v34  ;;  %v4773_v45 = vsel %vm484_vm1, %v7659_v28, 0.0 }
0x1325   :  { %5190 = vmatpush.bf16.xpose.msrb.mxu0 %v5181_v30  ;;  %4774 = vadd.xlane.f32.xlu2 %v4773_v45  ;;  %v4785_v2 = vsel %vm484_vm1, %v7661_v12, 0.0 }
0x1326   :  { %4786 = vadd.xlane.f32.xlu1 %v4785_v2 }
0x1328   :  { %v5222_v29 = vpop.permute.xlu2 %5221 }
0x1329   :  { %v5227_v51 = vsel %vm323_vm0, %v5222_v29, 0 }
0x132a   :  { %5236 = vmatpush.bf16.xpose.msrb.mxu3 %v5227_v51 }
0x132c   :  { %v4906_v17 = vpop.permute.xlu0 %4905 }
0x132d   :  { %v4911_v42 = vsel %vm584_vm2, %v4906_v17, 0 }
0x1330   :  { %v5197_v18 = vpop.permute.xlu1 %5196  ;;  %v5220_v54 = vpop.permute.xlu2 %5219 }
0x1331   :  { %7032 = vmatmul.msk.bf16.vlgmr.msrb.gmra.mxu2 %vm323_vm0, %v5197_v18  ;;  %7033 = vmatmul.msk.bf16.vlgmr.msrb.gmra.mxu3 %vm323_vm0, %v5220_v54 }
0x1334   :  { %7028 = vmatmul.msk.bf16.vlgmr.msra.gmra.mxu0 %vm323_vm0, %v10228_v53 }
0x1338   :  { %v4822_v46 = vpop.permute.xlu1 %4821 }
0x1339   :  { %v4827_v4 = vsel %vm584_vm2, %v4822_v46, 0 }
0x133a   :  { %4836 = vmatpush.bf16.msrb.mxu1 %v4827_v4 }
0x133e   :  { %4920 = vmatpush.bf16.msra.mxu1 %v4911_v42 }
0x133f   :  { %5367 = vrot.lane.b32.xlu1 %v9965_v55, %s7746_s9 }
0x1344   :  { %7031 = vmatmul.msk.bf16.vlgmr.msrb.gmra.mxu0 %vm323_vm0, %v5174_v39 }
0x1348   :  { %v10287_v21 = vpop.f32.mrf.mxu2 }
0x1350   :  { %v4945_v1 = vpop.f32.mrf.mxu2 }
0x1351   :  { %v10289_v7 = vpop.f32.mrf.mxu3 }
0x1358   :  { %v5077_v63 = vpop.f32.mrf.mxu2 }
0x1359   :  { %v5242_v53 = vmul.f32 0.17677669, %v5077_v63  ;;  %v4966_v19 = vpop.f32.mrf.mxu3 }
0x135b   :  { %v5250_v43 = vsel %vm484_vm1, %v5242_v53, -inf }
0x135c   :  { %5251 = vmax.xlane.f32.xlu2 %v5250_v43 }
0x135e   :  { %v10292_v14 = vpop.f32.mrf.mxu0 }
0x1360   :  { %v5079_v24 = vpop.f32.mrf.mxu2 }
0x1361   :  { %v5100_v20 = vpop.f32.mrf.mxu3 }
0x1362   :  { %v5243_v49 = vmul.f32 0.17677669, %v5100_v20 }
0x1364   :  { %v5253_v3 = vsel %vm484_vm1, %v5243_v49, -inf }
0x1366   :  { %v4903_v62 = vpop.f32.mrf.mxu0 }
0x1368   :  { %v5146_v61 = vpop.f32.mrf.mxu2 }
0x1369   :  { %v10294_v55 = vmul.f32 0.17677669, %v5146_v61  ;;  %v5102_v41 = vpop.f32.mrf.mxu3 }
0x136b   :  { %v5259_v11 = vsel %vm484_vm1, %v10294_v55, -inf }
0x136c   :  { %5260 = vmax.xlane.f32.xlu2 %v5259_v11 }
0x1370   :  { %v5148_v26 = vpop.f32.mrf.mxu2 }
0x1371   :  { %v5169_v22 = vpop.f32.mrf.mxu3 }
0x1372   :  { %v10299_v8 = vmul.f32 0.17677669, %v5169_v22 }
0x1374   :  { %5254 = vmax.xlane.f32.xlu2 %v5253_v3  ;;  %v5262_v39 = vsel %vm484_vm1, %v10299_v8, -inf }
0x1379   :  { %v5171_v38 = vpop.f32.mrf.mxu3 }
0x137c   :  { %5263 = vmax.xlane.f32.xlu2 %v5262_v39 }
0x1398   :  { %v4775_v34 = vpop.xlane.xlu2 %4774 }
0x1399   :  { %7662 = vrcp.f32 %v4775_v34  ;;  %v4787_v51 = vpop.xlane.xlu1 %4786 }
0x139a   :  { %7664 = vrcp.f32 %v4787_v51 }
0x139f   :  { %v7663_v30 = vpop.eup %7662 }
0x13a0   :  { %v4805_v45 = vmul.f32 %v7663_v30, %v7659_v28  ;;  %v7665_v54 = vpop.eup %7664 }
0x13a1   :  { %v10303_v2 = vpop.f32.mrf.mxu0  ;;  %v4809_v17 = vmul.f32 %v7665_v54, %v7661_v12 }
0x13a2   :  { %v4813_v29 = vpack.c.bf16 %v4805_v45, %v4805_v45 }
0x13a3   :  { %v4817_v42 = vpack.c.bf16 %v4809_v17, %v4809_v17 }
0x13a4   :  { %7006 = vmatmul.msk.bf16.vlgmr.msrb.gmra.mxu1 %vm484_vm1, %v4813_v29 }
0x13a9   :  { %v4987_v18 = vpop.f32.mrf.mxu0 }
0x13b1   :  { %v5368_v46 = vpop.permute.xlu1 %5367  ;;  %v5123_v4 = vpop.f32.mrf.mxu0 }
0x13b2   :  { %v5373_v1 = vsel %vm584_vm2, %v5368_v46, 0  ;;  %v10307_v63 = vmul.f32 0.17677669, %v5123_v4  ;;  %v10332_v46 = vpop.f32.mrf.mxu1 }
0x13b3   :  { %5382 = vmatpush.bf16.msra.mxu2 %v5373_v1 }
0x13b4   :  { %7010 = vmatmul.msk.bf16.vlgmr.msra.gmra.mxu1 %vm484_vm1, %v4817_v42  ;;  %v5215_v28 = vpop.f32.mrf.mxu2  ;;  %v5238_v19 = vpop.f32.mrf.mxu3  ;;  %v5256_v43 = vsel %vm484_vm1, %v10307_v63, -inf  ;;  %v7020_v42 = vld [vmem:[%s11051_s2 + $0xc8] sm:$0xf] }
0x13b5   :  { %5257 = vmax.xlane.f32.xlu0 %v5256_v43  ;;  %v10316_v11 = vmul.f32 0.17677669, %v5215_v28  ;;  %v10320_v38 = vmul.f32 0.17677669, %v5238_v19  ;;  %v7338_v19 = vld [vmem:[%s11051_s2 + $0xb0] sm:$0xf0] }
0x13b7   :  { %v5268_v22 = vsel %vm484_vm1, %v10316_v11, -inf  ;;  %v5271_v30 = vsel %vm484_vm1, %v10320_v38, -inf }
0x13b9   :  { %v5125_v24 = vpop.f32.mrf.mxu0 }
0x13ba   :  { %v10342_v28 = vpop.f32.mrf.mxu1 }
0x13bc   :  { %v5217_v20 = vpop.f32.mrf.mxu2  ;;  %v5240_v62 = vpop.f32.mrf.mxu3 }
0x13c1   :  { %v5192_v12 = vpop.f32.mrf.mxu0 }
0x13c2   :  { %v10312_v61 = vmul.f32 0.17677669, %v5192_v12  ;;  %v10350_v20 = vpop.f32.mrf.mxu1 }
0x13c4   :  { %v5265_v41 = vsel %vm484_vm1, %v10312_v61, -inf }
0x13c5   :  { %5266 = vmax.xlane.f32.xlu1 %v5265_v41 }
0x13c9   :  { %v5194_v26 = vpop.f32.mrf.mxu0 }
0x13ca   :  { %v10355_v41 = vpop.f32.mrf.mxu1 }
0x13cd   :  { %5269 = vmax.xlane.f32.xlu1 %v5268_v22 }
0x13cf   :  { %v5252_v3 = vpop.xlane.xlu2 %5251 }
0x13d0   :  { %v5274_v39 = vsub.f32 %v5242_v53, %v5252_v3 }
0x13d2   :  { %v5282_v34 = vmul.f32 1.442695, %v5274_v39  ;;  %v10361_v3 = vpop.f32.mrf.mxu1 }
0x13d4   :  { %7666 = vpow2.f32 %v5282_v34 }
0x13d5   :  { %5272 = vmax.xlane.f32.xlu1 %v5271_v30 }
0x13da   :  { %v10324_v45 = vpop.eup %7666 }
0x13db   :  { %v5298_v29 = vsel %vm484_vm1, %v10324_v45, 0.0 }
0x13dc   :  { %5299 = vadd.xlane.f32.xlu2 %v5298_v29 }
0x13df   :  { %v5261_v51 = vpop.xlane.xlu2 %5260 }
0x13e0   :  { %v5277_v29 = vsub.f32 %v10294_v55, %v5261_v51 }
0x13e7   :  { %v5255_v18 = vpop.xlane.xlu2 %5254 }
0x13e8   :  { %v5275_v54 = vsub.f32 %v5243_v49, %v5255_v18  ;;  %v7339_v49 = vld [vmem:[%s11051_s2 + $0xd8] sm:$0xf0] }
0x13e9   :  { %v7021_v1 = vor.u32 %v7339_v49, %v7020_v42 }
0x13ea   :  { %v5284_v17 = vmul.f32 1.442695, %v5275_v54  ;;  %v5288_v54 = vmul.f32 1.442695, %v5277_v29 }
0x13eb   :  { %5027 = vmatpush.bf16.msrb.mxu1 %v7021_v1 }
0x13ec   :  { %7668 = vpow2.f32 %v5284_v17 }
0x13ee   :  { %5388 = vrot.lane.b32.xlu1 %v9779_v9, %s7746_s9  ;;  %v7016_v9 = vld [vmem:[%s11051_s2 + $0xa0] sm:$0xf] }
0x13ef   :  { %v7017_v43 = vor.u32 %v7338_v19, %v7016_v9  ;;  %v5264_v24 = vpop.xlane.xlu2 %5263 }
0x13f0   :  { %v5278_v62 = vsub.f32 %v10299_v8, %v5264_v24 }
0x13f1   :  { %5028 = vmatpush.bf16.msrb.mxu1 %v7017_v43 }
0x13f2   :  { %v10330_v53 = vpop.eup %7668  ;;  %v5290_v12 = vmul.f32 1.442695, %v5278_v62  ;;  %v4992_v62 = vpack.c.bf16 %v10303_v2, %v10289_v7 }
0x13f3   :  { %v5301_v4 = vsel %vm484_vm1, %v10330_v53, 0.0 }
0x13f4   :  { %5302 = vadd.xlane.f32.xlu2 %v5301_v4  ;;  %7670 = vpow2.f32 %v5290_v12  ;;  %v4990_v4 = vpack.c.bf16 %v10292_v14, %v10268_v57 }
0x13fa   :  { %v10357_v26 = vpop.eup %7670 }
0x13fb   :  { %v5310_v22 = vsel %vm484_vm1, %v10357_v26, 0.0 }
0x140c   :  { %5346 = vrot.lane.b32.xlu2 %v10004_v56, %s7746_s9 }
0x1418   :  { %5311 = vadd.xlane.f32.xlu1 %v5310_v22 }
0x1421   :  { %v4838_v39 = vpop.f32.mrf.mxu1 }
0x1422   :  { %v4989_v34 = vpack.c.bf16 %v10266_v23, %v4838_v39 }
0x1424   :  { %7022 = vmatmul.msk.bf16.vlgmr.msrb.gmra.mxu1 %vm323_vm0, %v4989_v34 }
0x1428   :  { %v5258_v8 = vpop.xlane.xlu0 %5257 }
0x1429   :  { %v5276_v30 = vsub.f32 %v10307_v63, %v5258_v8  ;;  %v4840_v56 = vpop.f32.mrf.mxu1 }
0x142b   :  { %v5286_v18 = vmul.f32 1.442695, %v5276_v30 }
0x142d   :  { %7672 = vpow2.f32 %v5286_v18 }
0x142e   :  { %7674 = vpow2.f32 %v5288_v54 }
0x1431   :  { %v4922_v17 = vpop.f32.mrf.mxu1  ;;  %5472 = vrot.lane.b32.xlu1 %v9787_v37, %s7746_s9 }
0x1432   :  { %v4991_v14 = vpack.c.bf16 %v10287_v21, %v4922_v17 }
0x1433   :  { %v10371_v42 = vpop.eup %7672 }
0x1434   :  { %7023 = vmatmul.msk.bf16.gmra.mxu1 %vm323_vm0, %v4990_v4  ;;  %v5304_v23 = vsel %vm484_vm1, %v10371_v42, 0.0  ;;  %v10376_v63 = vpop.eup %7674 }
0x1435   :  { %5305 = vadd.xlane.f32.xlu0 %v5304_v23  ;;  %v5307_v37 = vsel %vm484_vm1, %v10376_v63, 0.0 }
0x1438   :  { %v5267_v55 = vpop.xlane.xlu1 %5266 }
0x1439   :  { %v5279_v51 = vsub.f32 %v10312_v61, %v5267_v55  ;;  %v4924_v49 = vpop.f32.mrf.mxu1 }
0x143b   :  { %v5292_v1 = vmul.f32 1.442695, %v5279_v51 }
0x143d   :  { %7676 = vpow2.f32 %v5292_v1  ;;  %5308 = vadd.xlane.f32.xlu0 %v5307_v37 }
0x1440   :  { %v5270_v57 = vpop.xlane.xlu1 %5269 }
0x1443   :  { %v10382_v9 = vpop.eup %7676 }
0x1444   :  { %7024 = vmatmul.msk.bf16.gmra.mxu1 %vm323_vm0, %v4991_v14  ;;  %v5313_v19 = vsel %vm484_vm1, %v10382_v9, 0.0 }
0x1445   :  { %5314 = vadd.xlane.f32.xlu2 %v5313_v19 }
0x1448   :  { %v5273_v43 = vpop.xlane.xlu1 %5272 }
0x1449   :  { %v5281_v61 = vsub.f32 %v10320_v38, %v5273_v43 }
0x144b   :  { %v5296_v24 = vmul.f32 1.442695, %v5281_v61  ;;  %v4524_v61 = vadd.f32 %v10247_v47, %v10342_v28 }
0x144d   :  { %7678 = vpow2.f32 %v5296_v24 }
0x144f   :  { %v5300_v38 = vpop.xlane.xlu2 %5299 }
0x1450   :  { %7680 = vrcp.f32 %v5300_v38 }
0x1451   :  { %5409 = vrot.lane.b32.xlu0 %v9864_v0, %s7746_s9 }
0x1453   :  { %v10392_v21 = vpop.eup %7678 }
0x1454   :  { %7025 = vmatmul.msk.bf16.gmra.mxu1 %vm323_vm0, %v4992_v62  ;;  %v5319_v12 = vsel %vm484_vm1, %v10392_v21, 0.0 }
0x1455   :  { %5320 = vadd.xlane.f32.xlu2 %v5319_v12 }
0x1456   :  { %v7681_v7 = vpop.eup %7680 }
0x1457   :  { %v5330_v34 = vmul.f32 %v7681_v7, %v10324_v45 }
0x1459   :  { %5451 = vrot.lane.b32.xlu0 %v10027_v40, %s7746_s9  ;;  %v5338_v29 = vpack.c.bf16 %v5330_v34, %v5330_v34 }
0x1460   :  { %v5389_v22 = vpop.permute.xlu1 %5388 }
0x1461   :  { %v5394_v39 = vsel %vm584_vm2, %v5389_v22, 0  ;;  %5430 = vrot.lane.b32.xlu0 %v9975_v48, %s7746_s9  ;;  %v5280_v48 = vsub.f32 %v10316_v11, %v5270_v57 }
0x1462   :  { %5403 = vmatpush.bf16.msra.mxu3 %v5394_v39 }
0x1463   :  { %v5294_v18 = vmul.f32 1.442695, %v5280_v48 }
0x1467   :  { %v5303_v0 = vpop.xlane.xlu2 %5302 }
0x1468   :  { %7682 = vrcp.f32 %v5303_v0 }
0x1469   :  { %7684 = vpow2.f32 %v5294_v18 }
0x146d   :  { %5493 = vrot.lane.b32.xlu2 %v9859_v13, %s7746_s9 }
0x146e   :  { %v7683_v2 = vpop.eup %7682 }
0x146f   :  { %v5331_v40 = vmul.f32 %v7683_v2, %v10330_v53  ;;  %v5347_v8 = vpop.permute.xlu2 %5346  ;;  %v10410_v13 = vpop.eup %7684 }
0x1470   :  { %v5352_v30 = vsel %vm584_vm2, %v5347_v8, 0  ;;  %v5316_v45 = vsel %vm484_vm1, %v10410_v13, 0.0 }
0x1471   :  { %v5339_v56 = vpack.c.bf16 %v5331_v40, %v5331_v40  ;;  %5361 = vmatpush.bf16.msra.mxu0 %v5352_v30  ;;  %v4529_v40 = vadd.f32 %v10259_v59, %v10355_v41 }
0x1473   :  { %7035 = vmatmul.msk.bf16.vlgmr.msra.gmra.mxu2 %vm484_vm1, %v5339_v56 }
0x1474   :  { %7034 = vmatmul.msk.bf16.vlgmr.msra.gmra.mxu0 %vm484_vm1, %v5338_v29  ;;  %v7341_v29 = vld [vmem:[%s11051_s2 + $0x128] sm:$0xf0] }
0x148b   :  { %5317 = vadd.xlane.f32.xlu0 %v5316_v45  ;;  %v5312_v53 = vpop.xlane.xlu1 %5311 }
0x14a1   :  { %v5030_v54 = vpop.f32.mrf.mxu1 }
0x14a2   :  { %v10415_v17 = vadd.f32 %v5030_v54, %v10208_v36  ;;  %v7044_v54 = vld [vmem:[%s11051_s2 + $0xf0] sm:$0xf] }
0x14a3   :  { %v5473_v4 = vpop.permute.xlu1 %5472 }
0x14a4   :  { %v5478_v23 = vsel %vm584_vm2, %v5473_v4, 0  ;;  %v7340_v4 = vld [vmem:[%s11051_s2 + $0x100] sm:$0xf0] }
0x14a5   :  { %5487 = vmatpush.bf16.msrb.mxu3 %v5478_v23 }
0x14a8   :  { %v5306_v55 = vpop.xlane.xlu0 %5305 }
0x14a9   :  { %7686 = vrcp.f32 %v5306_v55  ;;  %v10418_v11 = vpop.f32.mrf.mxu1 }
0x14af   :  { %v7687_v51 = vpop.eup %7686 }
0x14b0   :  { %v5332_v49 = vmul.f32 %v7687_v51, %v10371_v42  ;;  %v5309_v36 = vpop.xlane.xlu0 %5308 }
0x14b1   :  { %v5035_v1 = vpop.f32.mrf.mxu1  ;;  %7688 = vrcp.f32 %v5309_v36 }
0x14b2   :  { %v5340_v37 = vpack.c.bf16 %v5332_v49, %v5332_v49  ;;  %v10422_v57 = vadd.f32 %v5035_v1, %v10224_v33 }
0x14b4   :  { %7036 = vmatmul.msk.bf16.vlgmr.msra.gmra.mxu3 %vm484_vm1, %v5340_v37 }
0x14b7   :  { %v7689_v43 = vpop.eup %7688 }
0x14b8   :  { %v5315_v19 = vpop.xlane.xlu2 %5314  ;;  %v5333_v42 = vmul.f32 %v7689_v43, %v10376_v63 }
0x14b9   :  { %v10425_v14 = vpop.f32.mrf.mxu1  ;;  %7690 = vrcp.f32 %v5315_v19 }
0x14ba   :  { %v5341_v38 = vpack.c.bf16 %v5333_v42, %v5333_v42  ;;  %7692 = vrcp.f32 %v5312_v53 }
0x14bf   :  { %v7691_v22 = vpop.eup %7690 }
0x14c0   :  { %v5335_v47 = vmul.f32 %v7691_v22, %v10382_v9  ;;  %v7693_v7 = vpop.eup %7692  ;;  %v7048_v9 = vld [vmem:[%s11051_s2 + $0x118] sm:$0xf] }
0x14c1   :  { %v5040_v24 = vpop.f32.mrf.mxu1  ;;  %v5334_v48 = vmul.f32 %v7693_v7, %v10357_v26  ;;  %v7049_v59 = vor.u32 %v7341_v29, %v7048_v9 }
0x14c2   :  { %v10430_v62 = vadd.f32 %v5040_v24, %v4524_v61  ;;  %v5343_v2 = vpack.c.bf16 %v5335_v47, %v5335_v47 }
0x14c3   :  { %v5410_v12 = vpop.permute.xlu0 %5409  ;;  %v5342_v23 = vpack.c.bf16 %v5334_v48, %v5334_v48 }
0x14c4   :  { %v5415_v33 = vsel %vm584_vm2, %v5410_v12, 0 }
0x14c5   :  { %5424 = vmatpush.bf16.msrb.mxu0 %v5415_v33 }
0x14c8   :  { %7037 = vmatmul.msk.bf16.vlgmr.msrb.gmra.mxu0 %vm484_vm1, %v5341_v38  ;;  %v5321_v39 = vpop.xlane.xlu2 %5320 }
0x14c9   :  { %7694 = vrcp.f32 %v5321_v39  ;;  %v10434_v0 = vpop.f32.mrf.mxu1 }
0x14cb   :  { %v5452_v28 = vpop.permute.xlu0 %5451 }
0x14cc   :  { %v5457_v63 = vsel %vm584_vm2, %v5452_v28, 0 }
0x14cd   :  { %5466 = vmatpush.bf16.msrb.mxu2 %v5457_v63 }
0x14cf   :  { %v7695_v34 = vpop.eup %7694 }
0x14d0   :  { %7039 = vmatmul.msk.bf16.vlgmr.msrb.gmra.mxu2 %vm484_vm1, %v5343_v2  ;;  %v5494_v8 = vpop.permute.xlu2 %5493  ;;  %v5337_v18 = vmul.f32 %v7695_v34, %v10392_v21  ;;  %v7045_v21 = vor.u32 %v7340_v4, %v7044_v54 }
0x14d1   :  { %v5499_v30 = vsel %vm584_vm2, %v5494_v8, 0  ;;  %v5045_v56 = vpop.f32.mrf.mxu1  ;;  %v7738_v8 = vld [vmem:[%s11049_s4 + $0x3] ss:$0 sm:$0xff] }
0x14d2   :  { %v10450_v45 = vadd.f32 %v5045_v56, %v4529_v40  ;;  %5508 = vmatpush.bf16.msra.mxu0 %v5499_v30  ;;  %v5345_v26 = vpack.c.bf16 %v5337_v18, %v5337_v18  ;;  %v4516_v56 = vadd.f32 %v10220_v58, %v10222_v15 }
0x14d3   :  { %v5431_v41 = vpop.permute.xlu0 %5430 }
0x14d4   :  { %v5436_v53 = vsel %vm584_vm2, %v5431_v41, 0  ;;  %v5051_v29 = vadd.f32 %v10418_v11, %v4516_v56 }
0x14d5   :  { %5445 = vmatpush.bf16.msra.mxu1 %v5436_v53 }
0x14d8   :  { %7038 = vmatmul.msk.bf16.vlgmr.msra.gmra.mxu1 %vm484_vm1, %v5342_v23  ;;  %7041 = vmatmul.msk.bf16.vlgmr.msra.gmra.mxu0 %vm484_vm1, %v5345_v26 }
0x14d9   :  { %5552 = vmatpush.bf16.msrb.mxu1 %v7049_v59  ;;  %v10465_v38 = vpop.f32.mrf.mxu1 }
0x14dd   :  { %5553 = vmatpush.bf16.msrb.mxu1 %v7045_v21 }
0x14f1   :  { %v5363_v55 = vpop.f32.mrf.mxu0 }
0x14f6   :  { %v5384_v51 = vpop.f32.mrf.mxu2 }
0x14f7   :  { %v5514_v49 = vpack.c.bf16 %v5384_v51, %v5363_v55 }
0x14f9   :  { %v5365_v1 = vpop.f32.mrf.mxu0  ;;  %7050 = vmatmul.msk.bf16.vlgmr.msrb.gmra.mxu1 %vm323_vm0, %v5514_v49 }
0x14fe   :  { %v5318_v37 = vpop.xlane.xlu0 %5317  ;;  %v5386_v36 = vpop.f32.mrf.mxu2 }
0x14ff   :  { %7696 = vrcp.f32 %v5318_v37 }
0x1505   :  { %v7697_v19 = vpop.eup %7696 }
0x1506   :  { %v5336_v43 = vmul.f32 %v7697_v19, %v10410_v13 }
0x1508   :  { %v5344_v61 = vpack.c.bf16 %v5336_v43, %v5336_v43 }
0x150a   :  { %7040 = vmatmul.msk.bf16.vlgmr.msrb.gmra.mxu3 %vm484_vm1, %v5344_v61 }
0x1537   :  { %v5405_v24 = vpop.f32.mrf.mxu3 }
0x153f   :  { %v5407_v42 = vpop.f32.mrf.mxu3 }
0x1540   :  { %v4531_v42 = vadd.f32 %v10264_v6, %v10361_v3 }
0x1545   :  { %v5426_v12 = vpop.f32.mrf.mxu0 }
0x1546   :  { %v5515_v33 = vpack.c.bf16 %v5426_v12, %v5405_v24 }
0x1548   :  { %7051 = vmatmul.msk.bf16.gmra.mxu1 %vm323_vm0, %v5515_v33  ;;  %v5057_v33 = vadd.f32 %v10465_v38, %v4531_v42  ;;  %v7345_v42 = vld [vmem:[%s11051_s2 + $0x3c] sm:$0xf0] }
0x154d   :  { %v5428_v22 = vpop.f32.mrf.mxu0 }
0x1553   :  { %v5468_v39 = vpop.f32.mrf.mxu2 }
0x1555   :  { %v5447_v47 = vpop.f32.mrf.mxu1  ;;  %v5510_v28 = vpop.f32.mrf.mxu0 }
0x1556   :  { %v5516_v63 = vpack.c.bf16 %v5468_v39, %v5447_v47 }
0x1558   :  { %7052 = vmatmul.msk.bf16.gmra.mxu1 %vm323_vm0, %v5516_v63 }
0x155b   :  { %v5470_v7 = vpop.f32.mrf.mxu2 }
0x155d   :  { %v5449_v13 = vpop.f32.mrf.mxu1  ;;  %v5512_v2 = vpop.f32.mrf.mxu0 }
0x1576   :  { %v5555_v34 = vpop.f32.mrf.mxu1 }
0x1577   :  { %v5575_v40 = vadd.f32 %v5555_v34, %v10415_v17  ;;  %v7112_v34 = vld [vmem:[%s11051_s2 + $0x11c] sm:$0xf] }
0x1579   :  { %v5583_v30 = vadd.f32 %v7738_v8, %v5575_v40  ;;  %v7357_v40 = vld [vmem:[%s11051_s2 + $0x12c] sm:$0xf0] }
0x157a   :  { %v7113_v56 = vor.u32 %v7357_v40, %v7112_v34 }
0x157b   :  { %v5591_v9 = vadd.f32 %v5583_v30, %v9493_v25  ;;  %v4521_v25 = vadd.f32 %v10241_v5, %v10332_v46 }
0x157c   :  { %5875 = vmatpush.bf16.msra.mxu2 %v7113_v56 }
0x157d   :  { %5599 = vadd.xlane.f32.xlu1 %v5591_v9  ;;  %v5053_v11 = vadd.f32 %v10425_v14, %v4521_v25  ;;  %v7353_v25 = vld [vmem:[%s11051_s2 + $0xdc] sm:$0xf0] }
0x157e   :  { %v5557_v48 = vpop.f32.mrf.mxu1 }
0x157f   :  { %v5576_v18 = vadd.f32 %v5557_v48, %v5051_v29 }
0x1581   :  { %v5584_v59 = vadd.f32 %v7738_v8, %v5576_v18  ;;  %v7104_v18 = vld [vmem:[%s11051_s2 + $0xf4] sm:$0xf] }
0x1583   :  { %v5592_v41 = vadd.f32 %v5584_v59, %v9496_v52  ;;  %v7355_v59 = vld [vmem:[%s11051_s2 + $0x104] sm:$0xf0] }
0x1585   :  { %5601 = vadd.xlane.f32.xlu2 %v5592_v41 }
0x158d   :  { %v5489_v17 = vpop.f32.mrf.mxu3 }
0x158e   :  { %v5517_v53 = vpack.c.bf16 %v5510_v28, %v5489_v17  ;;  %v7105_v17 = vor.u32 %v7355_v59, %v7104_v18 }
0x1590   :  { %7053 = vmatmul.msk.bf16.gmra.mxu1 %vm323_vm0, %v5517_v53  ;;  %v7106_v53 = vld [vmem:[%s11051_s2 + $0x108] sm:$0xf0]  ;;  %5876 = vmatpush.bf16.msra.mxu2 %v7105_v17 }
0x1595   :  { %v5491_v54 = vpop.f32.mrf.mxu3 }
0x15c5   :  { %v5560_v4 = vpop.f32.mrf.mxu1 }
0x15c6   :  { %v5577_v23 = vadd.f32 %v5560_v4, %v10422_v57  ;;  %v4526_v57 = vadd.f32 %v10253_v16, %v10350_v20 }
0x15c8   :  { %v5585_v58 = vadd.f32 %v7738_v8, %v5577_v23 }
0x15ca   :  { %v5593_v15 = vadd.f32 %v5585_v58, %v9518_v44  ;;  %v5055_v44 = vadd.f32 %v10434_v0, %v4526_v57  ;;  %v7096_v58 = vld [vmem:[%s11051_s2 + $0xcc] sm:$0xf] }
0x15cc   :  { %5603 = vadd.xlane.f32.xlu0 %v5593_v15 }
0x15cd   :  { %v5562_v26 = vpop.f32.mrf.mxu1 }
0x15ce   :  { %v5578_v52 = vadd.f32 %v5562_v26, %v5053_v11  ;;  %v7097_v26 = vor.u32 %v7353_v25, %v7096_v58 }
0x15d0   :  { %v5586_v21 = vadd.f32 %v7738_v8, %v5578_v52  ;;  %v7098_v52 = vld [vmem:[%s11051_s2 + $0xe0] sm:$0xf0]  ;;  %5877 = vmatpush.bf16.msra.mxu2 %v7097_v26 }
0x15d2   :  { %v5594_v55 = vadd.f32 %v5586_v21, %v9521_v31 }
0x15d4   :  { %5605 = vadd.xlane.f32.xlu0 %v5594_v55 }
0x15d5   :  { %v5565_v51 = vpop.f32.mrf.mxu1 }
0x15d6   :  { %v5579_v49 = vadd.f32 %v5565_v51, %v10430_v62  ;;  %v7088_v51 = vld [vmem:[%s11051_s2 + $0xa4] sm:$0xf] }
0x15d8   :  { %v5587_v1 = vadd.f32 %v7738_v8, %v5579_v49  ;;  %v7351_v49 = vld [vmem:[%s11051_s2 + $0xb4] sm:$0xf0] }
0x15d9   :  { %v7089_v57 = vor.u32 %v7351_v49, %v7088_v51 }
0x15da   :  { %v5595_v5 = vadd.f32 %v5587_v1, %v9532_v35  ;;  %v7350_v1 = vld [vmem:[%s11051_s2 + $0xa8] sm:$0xf] }
0x15db   :  { %5878 = vmatpush.bf16.msra.mxu2 %v7089_v57 }
0x15dc   :  { %5607 = vadd.xlane.f32.xlu0 %v5595_v5 }
0x15dd   :  { %v5567_v46 = vpop.f32.mrf.mxu1 }
0x15de   :  { %v5580_v14 = vadd.f32 %v5567_v46, %v5055_v44  ;;  %v7080_v46 = vld [vmem:[%s11051_s2 + $0x7c] sm:$0xf] }
0x15e0   :  { %v5588_v37 = vadd.f32 %v7738_v8, %v5580_v14  ;;  %v7349_v14 = vld [vmem:[%s11051_s2 + $0x8c] sm:$0xf0] }
0x15e2   :  { %v5596_v36 = vadd.f32 %v5588_v37, %v9535_v32  ;;  %v7348_v37 = vld [vmem:[%s11051_s2 + $0x80] sm:$0xf] }
0x15e4   :  { %5609 = vadd.xlane.f32.xlu0 %v5596_v36 }
0x15f0   :  { %v5600_v31 = vpop.xlane.xlu1 %5599 }
0x15f1   :  { %v5615_v19 = vmul.f32 %v5600_v31, %v8955_v50  ;;  %v7082_v31 = vld [vmem:[%s11051_s2 + $0x90] sm:$0xf0] }
0x15f3   :  { %v10491_v43 = vsub.f32 %v5591_v9, %v5615_v19  ;;  %v7114_v9 = vld [vmem:[%s11051_s2 + $0x130] sm:$0xf0]  ;;  %v7085_v19 = vor.u32 %v7348_v37, %v7082_v31 }
0x15f5   :  { %v5631_v62 = vmul.f32 %v10491_v43, %v10491_v43 }
0x15f7   :  { %5639 = vadd.xlane.f32.xlu0 %v5631_v62  ;;  %v7072_v62 = vld [vmem:[%s11051_s2 + $0x54] sm:$0xf] }
0x15f8   :  { %v5602_v16 = vpop.xlane.xlu2 %5601 }
0x15f9   :  { %v5616_v35 = vmul.f32 %v5602_v16, %v8955_v50  ;;  %v7347_v16 = vld [vmem:[%s11051_s2 + $0x64] sm:$0xf0] }
0x15fb   :  { %v10496_v20 = vsub.f32 %v5592_v41, %v5616_v35  ;;  %v7354_v41 = vld [vmem:[%s11051_s2 + $0xf8] sm:$0xf] }
0x15fc   :  { %v7109_v4 = vor.u32 %v7354_v41, %v7106_v53  ;;  %v7346_v35 = vld [vmem:[%s11051_s2 + $0x58] sm:$0xf] }
0x15fd   :  { %v5632_v0 = vmul.f32 %v10496_v20, %v10496_v20 }
0x15ff   :  { %5641 = vadd.xlane.f32.xlu1 %v5632_v0  ;;  %v7073_v0 = vor.u32 %v7347_v16, %v7072_v62 }
0x160d   :  { %v5570_v32 = vpop.f32.mrf.mxu1 }
0x160e   :  { %v5581_v61 = vadd.f32 %v5570_v32, %v10450_v45  ;;  %v7074_v32 = vld [vmem:[%s11051_s2 + $0x68] sm:$0xf0] }
0x1610   :  { %v5589_v24 = vadd.f32 %v7738_v8, %v5581_v61  ;;  %v7077_v61 = vor.u32 %v7346_v35, %v7074_v32 }
0x1612   :  { %v10504_v12 = vadd.f32 %v5589_v24, %v9566_v10  ;;  %v7064_v24 = vld [vmem:[%s11051_s2 + $0x2c] sm:$0xf] }
0x1614   :  { %5611 = vadd.xlane.f32.xlu2 %v10504_v12 }
0x1615   :  { %v5572_v22 = vpop.f32.mrf.mxu1 }
0x1616   :  { %v5582_v39 = vadd.f32 %v5572_v22, %v5057_v33  ;;  %v7344_v33 = vld [vmem:[%s11051_s2 + $0x30] sm:$0xf] }
0x1618   :  { %v5590_v47 = vadd.f32 %v7738_v8, %v5582_v39  ;;  %v7356_v8 = vld [vmem:[%s11051_s2 + $0x120] sm:$0xf]  ;;  %v7065_v39 = vor.u32 %v7345_v42, %v7064_v24 }
0x1619   :  { %v7117_v29 = vor.u32 %v7356_v8, %v7114_v9 }
0x161a   :  { %v10509_v28 = vadd.f32 %v5590_v47, %v9569_v27  ;;  %v7066_v47 = vld [vmem:[%s11051_s2 + $0x40] sm:$0xf0] }
0x161b   :  { %5904 = vmatpush.bf16.msra.mxu3 %v7117_v29 }
0x161c   :  { %5613 = vadd.xlane.f32.xlu0 %v10509_v28 }
0x161f   :  { %5905 = vmatpush.bf16.msra.mxu3 %v7109_v4 }
0x163f   :  { %v5604_v45 = vpop.xlane.xlu0 %5603 }
0x1640   :  { %v5617_v63 = vmul.f32 %v5604_v45, %v8955_v50 }
0x1642   :  { %v10513_v7 = vsub.f32 %v5593_v15, %v5617_v63  ;;  %v7352_v15 = vld [vmem:[%s11051_s2 + $0xd0] sm:$0xf]  ;;  %v7069_v63 = vor.u32 %v7344_v33, %v7066_v47 }
0x1643   :  { %v7101_v21 = vor.u32 %v7352_v15, %v7098_v52 }
0x1644   :  { %v5633_v10 = vmul.f32 %v10513_v7, %v10513_v7 }
0x1645   :  { %5906 = vmatpush.bf16.msra.mxu3 %v7101_v21 }
0x1646   :  { %5643 = vadd.xlane.f32.xlu1 %v5633_v10 }
0x1647   :  { %v5606_v6 = vpop.xlane.xlu0 %5605 }
0x1648   :  { %v5618_v3 = vmul.f32 %v5606_v6, %v8955_v50  ;;  %v7056_v6 = vld [vmem:[%s11051_s2 + $0x4] sm:$0xf] }
0x164a   :  { %v10518_v38 = vsub.f32 %v5594_v55, %v5618_v3  ;;  %v7343_v3 = vld [vmem:[%s11051_s2 + $0x14] sm:$0xf0] }
0x164c   :  { %v5634_v27 = vmul.f32 %v10518_v38, %v10518_v38 }
0x164e   :  { %5645 = vadd.xlane.f32.xlu2 %v5634_v27  ;;  %v7057_v27 = vor.u32 %v7343_v3, %v7056_v6 }
0x164f   :  { %v5608_v13 = vpop.xlane.xlu0 %5607 }
0x1650   :  { %v5619_v2 = vmul.f32 %v5608_v13, %v8955_v50  ;;  %v7342_v13 = vld [vmem:[%s11051_s2 + $0x8] sm:$0xf] }
0x1652   :  { %v10532_v30 = vsub.f32 %v5595_v5, %v5619_v2  ;;  %v7090_v5 = vld [vmem:[%s11051_s2 + $0xb8] sm:$0xf0] }
0x1653   :  { %v7093_v44 = vor.u32 %v7350_v1, %v7090_v5  ;;  %v7058_v2 = vld [vmem:[%s11051_s2 + $0x18] sm:$0xf0]  ;;  %v10648_v5 = vld [vmem:[%s11052_s5 + $0x1] ss:$0 sm:$0xff] }
0x1654   :  { %v5635_v48 = vmul.f32 %v10532_v30, %v10532_v30  ;;  %v7061_v34 = vor.u32 %v7342_v13, %v7058_v2 }
0x1655   :  { %5907 = vmatpush.bf16.msra.mxu3 %v7093_v44 }
0x1656   :  { %5647 = vadd.xlane.f32.xlu0 %v5635_v48 }
0x1657   :  { %v5610_v54 = vpop.xlane.xlu0 %5609 }
0x1658   :  { %v5620_v23 = vmul.f32 %v5610_v54, %v8955_v50 }
0x1659   :  { %5908 = vmatpush.bf16.msra.mxu3 %v7085_v19 }
0x165a   :  { %v10561_v11 = vsub.f32 %v5596_v36, %v5620_v23  ;;  %v7081_v36 = vor.u32 %v7349_v14, %v7080_v46 }
0x165c   :  { %v5636_v55 = vmul.f32 %v10561_v11, %v10561_v11  ;;  %5879 = vmatpush.bf16.msra.mxu2 %v7081_v36 }
0x165d   :  { %5909 = vmatpush.bf16.msra.mxu3 %v7077_v61 }
0x165e   :  { %5649 = vadd.xlane.f32.xlu1 %v5636_v55  ;;  %v10635_v55 = vld [vmem:[%s11052_s5] ss:$0 sm:$0xff] }
0x1660   :  { %5880 = vmatpush.bf16.msra.mxu2 %v7073_v0 }
0x1661   :  { %5910 = vmatpush.bf16.msra.mxu3 %v7069_v63 }
0x1664   :  { %5881 = vmatpush.bf16.msra.mxu2 %v7065_v39 }
0x1665   :  { %5911 = vmatpush.bf16.msra.mxu3 %v7061_v34 }
0x1668   :  { %5882 = vmatpush.bf16.msra.mxu2 %v7057_v27 }
0x166a   :  { %v5640_v22 = vpop.xlane.xlu0 %5639 }
0x166b   :  { %v5655_v45 = vmul.f32 %v5640_v22, %v8955_v50 }
0x166d   :  { %v5663_v10 = vadd.f32 1e-05, %v5655_v45 }
0x166f   :  { %7698 = vrsqrt.f32 %v5663_v10  ;;  %vm5677_vm1 = vweird.f32 %v5663_v10 }
0x1672   :  { %v5642_v40 = vpop.xlane.xlu1 %5641 }
0x1673   :  { %v5656_v8 = vmul.f32 %v5642_v40, %v8955_v50 }
0x1675   :  { %v7699_v56 = vpop.eup %7698  ;;  %v5664_v9 = vadd.f32 1e-05, %v5656_v8 }
0x1676   :  { %v5672_v29 = vmul.f32 %v7699_v56, %v5663_v10  ;;  %vm5678_vm0 = vweird.f32 %v7699_v56 }
0x1677   :  { %7700 = vrsqrt.f32 %v5664_v9  ;;  %vm5679_vm2 = vmor %vm5677_vm1, %vm5678_vm0  ;;  %vm5687_vm14 = vweird.f32 %v5664_v9 }
0x1678   :  { %v5673_v48 = vmul.f32 %v7699_v56, %v5672_v29 }
0x167a   :  { %v5674_v18 = vmul.f32 0.5, %v5673_v48 }
0x167c   :  { %v5675_v59 = vsub.f32 1.5, %v5674_v18 }
0x167d   :  { %v7701_v41 = vpop.eup %7700 }
0x167e   :  { %v5676_v17 = vmul.f32 %v7699_v56, %v5675_v59  ;;  %v5682_v53 = vmul.f32 %v7701_v41, %v5664_v9  ;;  %vm5688_vm13 = vweird.f32 %v7701_v41 }
0x167f   :  { %vm5689_vm15 = vmor %vm5687_vm14, %vm5688_vm13 }
0x1680   :  { %v5683_v54 = vmul.f32 %v7701_v41, %v5682_v53  ;;  %v5680_v4 = vsel %vm5679_vm2, %v7699_v56, %v5676_v17 }
0x1681   :  { %v5751_v25 = vmul.f32 %v5680_v4, %v10491_v43 }
0x1682   :  { %v5684_v23 = vmul.f32 0.5, %v5683_v54 }
0x1683   :  { %v5759_v51 = vmul.f32 %v10635_v55, %v5751_v25 }
0x1684   :  { %v5685_v58 = vsub.f32 1.5, %v5684_v23 }
0x1685   :  { %v10651_v44 = vadd.f32 %v10648_v5, %v5759_v51  ;;  %v7365_v51 = vld [vmem:[%s11053_s3 + $0x38] sm:$0xff] }
0x1686   :  { %v5686_v15 = vmul.f32 %v7701_v41, %v5685_v58  ;;  %6085 = vmatpush.bf16.msrb.mxu0 %v7365_v51 }
0x1687   :  { %v5612_v26 = vpop.xlane.xlu2 %5611 }
0x1688   :  { %v5690_v52 = vsel %vm5689_vm15, %v7701_v41, %v5686_v15  ;;  %v5621_v21 = vmul.f32 %v5612_v26, %v8955_v50 }
0x1689   :  { %v5752_v49 = vmul.f32 %v5690_v52, %v10496_v20 }
0x168a   :  { %v10640_v1 = vsub.f32 %v10504_v12, %v5621_v21 }
0x168b   :  { %v5760_v43 = vmul.f32 %v10635_v55, %v5752_v49  ;;  %v7373_v49 = vld [vmem:[%s11053_s3 + $0x78] sm:$0xff] }
0x168c   :  { %v5637_v57 = vmul.f32 %v10640_v1, %v10640_v1  ;;  %6114 = vmatpush.bf16.msra.mxu1 %v7373_v49 }
0x168d   :  { %v10654_v46 = vadd.f32 %v10648_v5, %v5760_v43 }
0x168e   :  { %5651 = vadd.xlane.f32.xlu2 %v5637_v57 }
0x168f   :  { %v5614_v20 = vpop.xlane.xlu0 %5613  ;;  %v5775_v12 = vpack.c.bf16 %v10654_v46, %v10651_v44 }
0x1690   :  { %v5622_v14 = vmul.f32 %v5614_v20, %v8955_v50 }
0x1691   :  { %5883 = vmatmul.bf16.vlgmr.msra.gmra.mxu2 %v5775_v12  ;;  %5912 = vmatmul.bf16.vlgmr.msra.gmra.mxu3 %v5775_v12 }
0x1692   :  { %v10660_v37 = vsub.f32 %v10509_v28, %v5622_v14  ;;  %v7372_v14 = vld [vmem:[%s11053_s3 + $0x70] sm:$0xff] }
0x1693   :  { %6115 = vmatpush.bf16.msra.mxu1 %v7372_v14 }
0x1694   :  { %v5638_v36 = vmul.f32 %v10660_v37, %v10660_v37 }
0x1696   :  { %5653 = vadd.xlane.f32.xlu0 %v5638_v36 }
0x16b9   :  { %v5644_v31 = vpop.xlane.xlu1 %5643 }
0x16ba   :  { %v5657_v19 = vmul.f32 %v5644_v31, %v8955_v50 }
0x16bc   :  { %v5665_v62 = vadd.f32 1e-05, %v5657_v19 }
0x16be   :  { %7702 = vrsqrt.f32 %v5665_v62  ;;  %vm5697_vm4 = vweird.f32 %v5665_v62 }
0x16c1   :  { %v5646_v16 = vpop.xlane.xlu2 %5645 }
0x16c2   :  { %v5658_v35 = vmul.f32 %v5646_v16, %v8955_v50 }
0x16c4   :  { %v7703_v0 = vpop.eup %7702  ;;  %v5666_v32 = vadd.f32 1e-05, %v5658_v35  ;;  %v7362_v35 = vld [vmem:[%s11053_s3 + $0x20] sm:$0xff] }
0x16c5   :  { %v5692_v61 = vmul.f32 %v7703_v0, %v5665_v62  ;;  %vm5698_vm3 = vweird.f32 %v7703_v0  ;;  %v7371_v62 = vld [vmem:[%s11053_s3 + $0x68] sm:$0xff] }
0x16c6   :  { %7704 = vrsqrt.f32 %v5666_v32  ;;  %vm5699_vm5 = vmor %vm5697_vm4, %vm5698_vm3  ;;  %vm5707_vm7 = vweird.f32 %v5666_v32  ;;  %6116 = vmatpush.bf16.msra.mxu1 %v7371_v62 }
0x16c7   :  { %v5693_v24 = vmul.f32 %v7703_v0, %v5692_v61  ;;  %v7369_v61 = vld [vmem:[%s11053_s3 + $0x58] sm:$0xff] }
0x16c9   :  { %v5694_v42 = vmul.f32 0.5, %v5693_v24  ;;  %v5648_v28 = vpop.xlane.xlu0 %5647  ;;  %v7360_v24 = vld [vmem:[%s11053_s3 + $0x10] sm:$0xff] }
0x16ca   :  { %v5659_v33 = vmul.f32 %v5648_v28, %v8955_v50  ;;  %v7359_v28 = vld [vmem:[%s11053_s3 + $0x8] sm:$0xff] }
0x16cb   :  { %v5695_v22 = vsub.f32 1.5, %v5694_v42  ;;  %v7368_v42 = vld [vmem:[%s11053_s3 + $0x50] sm:$0xff] }
0x16cc   :  { %v7705_v39 = vpop.eup %7704  ;;  %v5667_v47 = vadd.f32 1e-05, %v5659_v33  ;;  %v7367_v33 = vld [vmem:[%s11053_s3 + $0x48] sm:$0xff] }
0x16cd   :  { %v5696_v45 = vmul.f32 %v7703_v0, %v5695_v22  ;;  %v5702_v63 = vmul.f32 %v7705_v39, %v5666_v32  ;;  %vm5708_vm6 = vweird.f32 %v7705_v39  ;;  %v7361_v32 = vld [vmem:[%s11053_s3 + $0x18] sm:$0xff]  ;;  %v7358_v22 = vld [vmem:[%s11053_s3] sm:$0xff] }
0x16ce   :  { %7706 = vrsqrt.f32 %v5667_v47  ;;  %vm5709_vm8 = vmor %vm5707_vm7, %vm5708_vm6  ;;  %vm5717_vm10 = vweird.f32 %v5667_v47 }
0x16cf   :  { %v5703_v10 = vmul.f32 %v7705_v39, %v5702_v63  ;;  %v5700_v6 = vsel %vm5699_vm5, %v7703_v0, %v5696_v45  ;;  %v7370_v0 = vld [vmem:[%s11053_s3 + $0x60] sm:$0xff] }
0x16d0   :  { %v5753_v40 = vmul.f32 %v5700_v6, %v10513_v7  ;;  %6117 = vmatpush.bf16.msra.mxu1 %v7370_v0 }
0x16d1   :  { %v5704_v3 = vmul.f32 0.5, %v5703_v10  ;;  %v5650_v27 = vpop.xlane.xlu1 %5649 }
0x16d2   :  { %v5660_v13 = vmul.f32 %v5650_v27, %v8955_v50  ;;  %v5761_v59 = vmul.f32 %v10635_v55, %v5753_v40 }
0x16d3   :  { %v5705_v2 = vsub.f32 1.5, %v5704_v3 }
0x16d4   :  { %v7707_v34 = vpop.eup %7706  ;;  %v5668_v8 = vadd.f32 1e-05, %v5660_v13  ;;  %v10673_v4 = vadd.f32 %v10648_v5, %v5761_v59  ;;  %6118 = vmatpush.bf16.msra.mxu1 %v7369_v61 }
0x16d5   :  { %v5706_v56 = vmul.f32 %v7705_v39, %v5705_v2  ;;  %v5712_v9 = vmul.f32 %v7707_v34, %v5667_v47  ;;  %vm5718_vm9 = vweird.f32 %v7707_v34 }
0x16d6   :  { %7708 = vrsqrt.f32 %v5668_v8  ;;  %vm5719_vm11 = vmor %vm5717_vm10, %vm5718_vm9  ;;  %vm5727_vm0 = vweird.f32 %v5668_v8 }
0x16d7   :  { %v5710_v29 = vsel %vm5709_vm8, %v7705_v39, %v5706_v56  ;;  %v5713_v48 = vmul.f32 %v7707_v34, %v5712_v9  ;;  %v7366_v39 = vld [vmem:[%s11053_s3 + $0x40] sm:$0xff] }
0x16d8   :  { %v5754_v18 = vmul.f32 %v5710_v29, %v10518_v38  ;;  %6119 = vmatpush.bf16.msra.mxu1 %v7368_v42 }
0x16d9   :  { %v5714_v41 = vmul.f32 0.5, %v5713_v48 }
0x16da   :  { %v5762_v17 = vmul.f32 %v10635_v55, %v5754_v18 }
0x16db   :  { %v5715_v53 = vsub.f32 1.5, %v5714_v41 }
0x16dc   :  { %v7709_v54 = vpop.eup %7708  ;;  %v10676_v7 = vadd.f32 %v10648_v5, %v5762_v17  ;;  %6120 = vmatpush.bf16.msra.mxu1 %v7367_v33 }
0x16dd   :  { %v5716_v23 = vmul.f32 %v7707_v34, %v5715_v53  ;;  %v5722_v58 = vmul.f32 %v7709_v54, %v5668_v8  ;;  %vm5728_vm12 = vweird.f32 %v7709_v54 }
0x16de   :  { %v5776_v25 = vpack.c.bf16 %v10676_v7, %v10673_v4  ;;  %vm5729_vm1 = vmor %vm5727_vm0, %vm5728_vm12 }
0x16df   :  { %v5723_v38 = vmul.f32 %v7709_v54, %v5722_v58  ;;  %v5720_v15 = vsel %vm5719_vm11, %v7707_v34, %v5716_v23 }
0x16e0   :  { %5888 = vmatmul.bf16.gmra.mxu2 %v5776_v25  ;;  %5917 = vmatmul.bf16.gmra.mxu3 %v5776_v25  ;;  %v5755_v21 = vmul.f32 %v5720_v15, %v10532_v30  ;;  %v7364_v30 = vld [vmem:[%s11053_s3 + $0x30] sm:$0xff] }
0x16e1   :  { %v5724_v26 = vmul.f32 0.5, %v5723_v38  ;;  %6086 = vmatpush.bf16.msrb.mxu0 %v7364_v30  ;;  %6121 = vmatpush.bf16.msra.mxu1 %v7366_v39 }
0x16e2   :  { %v5763_v12 = vmul.f32 %v10635_v55, %v5755_v21 }
0x16e3   :  { %v5725_v52 = vsub.f32 1.5, %v5724_v26 }
0x16e4   :  { %v10697_v31 = vadd.f32 %v10648_v5, %v5763_v12 }
0x16e5   :  { %v5726_v43 = vmul.f32 %v7709_v54, %v5725_v52 }
0x16e7   :  { %v5730_v57 = vsel %vm5729_vm1, %v7709_v54, %v5726_v43  ;;  %v11068_v54 = vld [vmem:[#allocation2_spill] sm:$0xff] }
0x16e8   :  { %v5756_v20 = vmul.f32 %v5730_v57, %v10561_v11  ;;  %v7363_v11 = vld [vmem:[%s11053_s3 + $0x28] sm:$0xff] }
0x16e9   :  { %6087 = vmatpush.bf16.msrb.mxu0 %v7363_v11 }
0x16ea   :  { %v5764_v36 = vmul.f32 %v10635_v55, %v5756_v20 }
0x16ec   :  { %v10700_v19 = vadd.f32 %v10648_v5, %v5764_v36 }
0x16ed   :  { %6088 = vmatpush.bf16.msrb.mxu0 %v7362_v35 }
0x16ee   :  { %v5777_v16 = vpack.c.bf16 %v10700_v19, %v10697_v31 }
0x16f0   :  { %5893 = vmatmul.bf16.gmra.mxu2 %v5777_v16  ;;  %5922 = vmatmul.bf16.gmra.mxu3 %v5777_v16 }
0x16f1   :  { %6089 = vmatpush.bf16.msrb.mxu0 %v7361_v32 }
0x16f5   :  { %6090 = vmatpush.bf16.msrb.mxu0 %v7360_v24 }
0x16f9   :  { %6091 = vmatpush.bf16.msrb.mxu0 %v7359_v28 }
0x16fd   :  { %6092 = vmatpush.bf16.msrb.mxu0 %v7358_v22 }
0x1701   :  { %v5652_v47 = vpop.xlane.xlu2 %5651 }
0x1702   :  { %v5661_v45 = vmul.f32 %v5652_v47, %v8955_v50 }
0x1704   :  { %v5669_v63 = vadd.f32 1e-05, %v5661_v45 }
0x1706   :  { %7710 = vrsqrt.f32 %v5669_v63  ;;  %vm5737_vm13 = vweird.f32 %v5669_v63 }
0x1709   :  { %v5654_v10 = vpop.xlane.xlu0 %5653 }
0x170a   :  { %v5662_v6 = vmul.f32 %v5654_v10, %v8955_v50 }
0x170c   :  { %v7711_v3 = vpop.eup %7710  ;;  %v5670_v27 = vadd.f32 1e-05, %v5662_v6 }
0x170d   :  { %v5732_v13 = vmul.f32 %v7711_v3, %v5669_v63  ;;  %vm5738_vm2 = vweird.f32 %v7711_v3 }
0x170e   :  { %7712 = vrsqrt.f32 %v5670_v27  ;;  %vm5739_vm14 = vmor %vm5737_vm13, %vm5738_vm2  ;;  %vm5747_vm3 = vweird.f32 %v5670_v27 }
0x170f   :  { %v5733_v2 = vmul.f32 %v7711_v3, %v5732_v13 }
0x1711   :  { %v5734_v34 = vmul.f32 0.5, %v5733_v2 }
0x1713   :  { %v5735_v40 = vsub.f32 1.5, %v5734_v34 }
0x1714   :  { %v7713_v8 = vpop.eup %7712  ;;  %v5884_v56 = vpop.f32.mrf.mxu2 }
0x1715   :  { %v5913_v9 = vpop.f32.mrf.mxu3  ;;  %v5736_v29 = vmul.f32 %v7711_v3, %v5735_v40  ;;  %v5742_v48 = vmul.f32 %v7713_v8, %v5670_v27  ;;  %v5885_v17 = vadd.f32 %v5884_v56, %v9205_v60  ;;  %vm5748_vm15 = vweird.f32 %v7713_v8 }
0x1716   :  { %v5914_v23 = vadd.f32 %v5913_v9, %v11068_v54  ;;  %vm5749_vm4 = vmor %vm5747_vm3, %vm5748_vm15 }
0x1717   :  { %v5743_v18 = vmul.f32 %v7713_v8, %v5742_v48  ;;  %v5740_v59 = vsel %vm5739_vm14, %v7711_v3, %v5736_v29  ;;  %v5933_v21 = vmax.f32 %v5885_v17, 0.0 }
0x1718   :  { %v5757_v58 = vmul.f32 %v5740_v59, %v10640_v1  ;;  %v5934_v49 = vmax.f32 %v5914_v23, 0.0 }
0x1719   :  { %v5744_v41 = vmul.f32 0.5, %v5743_v18  ;;  %v10769_v18 = vld [vmem:[%s11049_s4 + $0x6] ss:$0 sm:$0xff] }
0x171a   :  { %v5765_v12 = vmul.f32 %v10635_v55, %v5757_v58 }
0x171b   :  { %v5745_v53 = vsub.f32 1.5, %v5744_v41 }
0x171c   :  { %v5886_v25 = vpop.f32.mrf.mxu2  ;;  %v10751_v36 = vadd.f32 %v10648_v5, %v5765_v12 }
0x171d   :  { %v5915_v38 = vpop.f32.mrf.mxu3  ;;  %v5746_v15 = vmul.f32 %v7713_v8, %v5745_v53  ;;  %v5887_v26 = vadd.f32 %v5886_v25, %v9205_v60 }
0x171e   :  { %v5916_v52 = vadd.f32 %v5915_v38, %v11068_v54 }
0x171f   :  { %v5750_v51 = vsel %vm5749_vm4, %v7713_v8, %v5746_v15  ;;  %v5935_v43 = vmax.f32 %v5887_v26, 0.0 }
0x1720   :  { %v5936_v57 = vmax.f32 %v5916_v52, 0.0  ;;  %v5758_v20 = vmul.f32 %v5750_v51, %v10660_v37 }
0x1721   :  { %v5949_v30 = vpack.c.bf16 %v5935_v43, %v5933_v21 }
0x1722   :  { %v5950_v1 = vpack.c.bf16 %v5936_v57, %v5934_v49  ;;  %v5766_v14 = vmul.f32 %v10635_v55, %v5758_v20 }
0x1723   :  { %6093 = vmatmul.bf16.vlgmr.msrb.gmra.mxu0 %v5949_v30 }
0x1724   :  { %6122 = vmatmul.bf16.vlgmr.msra.gmra.mxu1 %v5950_v1  ;;  %v10754_v11 = vadd.f32 %v10648_v5, %v5766_v14 }
0x1726   :  { %v5778_v62 = vpack.c.bf16 %v10754_v11, %v10751_v36 }
0x1728   :  { %5898 = vmatmul.bf16.gmra.mxu2 %v5778_v62  ;;  %5927 = vmatmul.bf16.gmra.mxu3 %v5778_v62 }
0x1763   :  { %v5889_v37 = vpop.f32.mrf.mxu2  ;;  %v5918_v16 = vpop.f32.mrf.mxu3 }
0x1764   :  { %v5890_v35 = vadd.f32 %v5889_v37, %v9205_v60  ;;  %v5919_v0 = vadd.f32 %v5918_v16, %v11068_v54 }
0x1766   :  { %v5937_v42 = vmax.f32 %v5890_v35, 0.0  ;;  %v5938_v5 = vmax.f32 %v5919_v0, 0.0 }
0x176b   :  { %v5891_v55 = vpop.f32.mrf.mxu2  ;;  %v5920_v32 = vpop.f32.mrf.mxu3 }
0x176c   :  { %v5892_v61 = vadd.f32 %v5891_v55, %v9205_v60  ;;  %v5921_v24 = vadd.f32 %v5920_v32, %v11068_v54 }
0x176e   :  { %v5939_v28 = vmax.f32 %v5892_v61, 0.0  ;;  %v5940_v33 = vmax.f32 %v5921_v24, 0.0 }
0x1770   :  { %v5951_v22 = vpack.c.bf16 %v5939_v28, %v5937_v42  ;;  %v5952_v39 = vpack.c.bf16 %v5940_v33, %v5938_v5 }
0x1772   :  { %6098 = vmatmul.bf16.gmra.mxu0 %v5951_v22  ;;  %6127 = vmatmul.bf16.gmra.mxu1 %v5952_v39 }
0x1773   :  { %v5894_v47 = vpop.f32.mrf.mxu2  ;;  %v5923_v45 = vpop.f32.mrf.mxu3 }
0x1774   :  { %v5895_v63 = vadd.f32 %v5894_v47, %v9205_v60  ;;  %v5924_v10 = vadd.f32 %v5923_v45, %v11068_v54 }
0x1776   :  { %v5941_v2 = vmax.f32 %v5895_v63, 0.0  ;;  %v5942_v34 = vmax.f32 %v5924_v10, 0.0 }
0x177b   :  { %v5896_v6 = vpop.f32.mrf.mxu2  ;;  %v5925_v3 = vpop.f32.mrf.mxu3 }
0x177c   :  { %v5897_v27 = vadd.f32 %v5896_v6, %v9205_v60  ;;  %v5926_v13 = vadd.f32 %v5925_v3, %v11068_v54 }
0x177e   :  { %v5943_v40 = vmax.f32 %v5897_v27, 0.0  ;;  %v5944_v8 = vmax.f32 %v5926_v13, 0.0 }
0x1780   :  { %v5953_v56 = vpack.c.bf16 %v5943_v40, %v5941_v2  ;;  %v5954_v9 = vpack.c.bf16 %v5944_v8, %v5942_v34 }
0x1782   :  { %6103 = vmatmul.bf16.gmra.mxu0 %v5953_v56  ;;  %6132 = vmatmul.bf16.gmra.mxu1 %v5954_v9 }
0x17a0   :  { %v6094_v29 = vpop.f32.mrf.mxu0 }
0x17a1   :  { %v6123_v48 = vpop.f32.mrf.mxu1  ;;  %v6095_v59 = vadd.f32 %v10769_v18, %v6094_v29 }
0x17a3   :  { %v6124_v41 = vadd.f32 %v6123_v48, %v6095_v59 }
0x17a5   :  { %v6143_v17 = vadd.f32 %v6124_v41, %v10651_v44 }
0x17a7   :  { %6151 = vadd.xlane.f32.xlu1 %v6143_v17 }
0x17a8   :  { %v6096_v53 = vpop.f32.mrf.mxu0 }
0x17a9   :  { %v6097_v23 = vadd.f32 %v10769_v18, %v6096_v53  ;;  %v6125_v58 = vpop.f32.mrf.mxu1 }
0x17ab   :  { %v6126_v25 = vadd.f32 %v6125_v58, %v6097_v23  ;;  %v5899_v38 = vpop.f32.mrf.mxu2  ;;  %v5928_v15 = vpop.f32.mrf.mxu3 }
0x17ac   :  { %v5900_v52 = vadd.f32 %v5899_v38, %v9205_v60  ;;  %v5929_v21 = vadd.f32 %v5928_v15, %v11068_v54  ;;  %v7240_v38 = vld [vmem:[%s11051_s2 + $0x124] sm:$0xf]  ;;  %v7389_v15 = vld [vmem:[%s11051_s2 + $0x134] sm:$0xf0] }
0x17ad   :  { %v6144_v26 = vadd.f32 %v6126_v25, %v10654_v46 }
0x17ae   :  { %v5945_v57 = vmax.f32 %v5900_v52, 0.0  ;;  %v5946_v20 = vmax.f32 %v5929_v21, 0.0  ;;  %v7241_v21 = vor.u32 %v7389_v15, %v7240_v38 }
0x17af   :  { %6153 = vadd.xlane.f32.xlu2 %v6144_v26 }
0x17b0   :  { %6432 = vmatpush.bf16.msrb.mxu2 %v7241_v21 }
0x17b3   :  { %v5901_v51 = vpop.f32.mrf.mxu2  ;;  %v5930_v49 = vpop.f32.mrf.mxu3 }
0x17b4   :  { %v5902_v43 = vadd.f32 %v5901_v51, %v9205_v60  ;;  %v5931_v44 = vadd.f32 %v5930_v49, %v11068_v54  ;;  %v7242_v51 = vld [vmem:[%s11051_s2 + $0x138] sm:$0xf0] }
0x17b6   :  { %v5947_v12 = vmax.f32 %v5902_v43, 0.0  ;;  %v5948_v30 = vmax.f32 %v5931_v44, 0.0  ;;  %v7232_v44 = vld [vmem:[%s11051_s2 + $0xfc] sm:$0xf] }
0x17b8   :  { %v5955_v1 = vpack.c.bf16 %v5947_v12, %v5945_v57  ;;  %v5956_v14 = vpack.c.bf16 %v5948_v30, %v5946_v20  ;;  %v7387_v57 = vld [vmem:[%s11051_s2 + $0x10c] sm:$0xf0]  ;;  %v7386_v20 = vld [vmem:[%s11051_s2 + $0x100] sm:$0xf]  ;;  %v7234_v30 = vld [vmem:[%s11051_s2 + $0x110] sm:$0xf0] }
0x17b9   :  { %v7233_v12 = vor.u32 %v7387_v57, %v7232_v44 }
0x17ba   :  { %6108 = vmatmul.bf16.gmra.mxu0 %v5955_v1  ;;  %6137 = vmatmul.bf16.gmra.mxu1 %v5956_v14  ;;  %v7237_v14 = vor.u32 %v7386_v20, %v7234_v30 }
0x17bb   :  { %6433 = vmatpush.bf16.msrb.mxu2 %v7233_v12 }
0x17ef   :  { %v6099_v46 = vpop.f32.mrf.mxu0  ;;  %v6128_v62 = vpop.f32.mrf.mxu1 }
0x17f0   :  { %v6100_v37 = vadd.f32 %v10769_v18, %v6099_v46 }
0x17f2   :  { %v6129_v16 = vadd.f32 %v6128_v62, %v6100_v37  ;;  %v7224_v62 = vld [vmem:[%s11051_s2 + $0xd4] sm:$0xf]  ;;  %v7385_v37 = vld [vmem:[%s11051_s2 + $0xe4] sm:$0xf0] }
0x17f4   :  { %v6145_v35 = vadd.f32 %v6129_v16, %v10673_v4  ;;  %v7384_v16 = vld [vmem:[%s11051_s2 + $0xd8] sm:$0xf] }
0x17f6   :  { %6155 = vadd.xlane.f32.xlu0 %v6145_v35 }
0x17f7   :  { %v6101_v0 = vpop.f32.mrf.mxu0  ;;  %v6130_v60 = vpop.f32.mrf.mxu1 }
0x17f8   :  { %v6102_v54 = vadd.f32 %v10769_v18, %v6101_v0  ;;  %v7225_v0 = vor.u32 %v7385_v37, %v7224_v62 }
0x17fa   :  { %v6131_v55 = vadd.f32 %v6130_v60, %v6102_v54  ;;  %v7226_v60 = vld [vmem:[%s11051_s2 + $0xe8] sm:$0xf0]  ;;  %6434 = vmatpush.bf16.msrb.mxu2 %v7225_v0 }
0x17fb   :  { %v7229_v54 = vor.u32 %v7384_v16, %v7226_v60 }
0x17fc   :  { %v6146_v32 = vadd.f32 %v6131_v55, %v10676_v7 }
0x17fe   :  { %6157 = vadd.xlane.f32.xlu1 %v6146_v32 }
0x17ff   :  { %v6104_v61 = vpop.f32.mrf.mxu0  ;;  %v6133_v24 = vpop.f32.mrf.mxu1 }
0x1800   :  { %v6105_v42 = vadd.f32 %v10769_v18, %v6104_v61  ;;  %v7383_v61 = vld [vmem:[%s11051_s2 + $0xbc] sm:$0xf0] }
0x1802   :  { %v6134_v5 = vadd.f32 %v6133_v24, %v6105_v42  ;;  %v7382_v24 = vld [vmem:[%s11051_s2 + $0xb0] sm:$0xf] }
0x1804   :  { %v6147_v28 = vadd.f32 %v6134_v5, %v10697_v31  ;;  %v7218_v5 = vld [vmem:[%s11051_s2 + $0xc0] sm:$0xf0] }
0x1806   :  { %6159 = vadd.xlane.f32.xlu2 %v6147_v28 }
0x1807   :  { %v6106_v33 = vpop.f32.mrf.mxu0  ;;  %v6135_v22 = vpop.f32.mrf.mxu1 }
0x1808   :  { %v6107_v4 = vadd.f32 %v10769_v18, %v6106_v33  ;;  %v7208_v33 = vld [vmem:[%s11051_s2 + $0x84] sm:$0xf] }
0x180a   :  { %v6136_v39 = vadd.f32 %v6135_v22, %v6107_v4  ;;  %v7381_v4 = vld [vmem:[%s11051_s2 + $0x94] sm:$0xf0]  ;;  %v7380_v22 = vld [vmem:[%s11051_s2 + $0x88] sm:$0xf] }
0x180c   :  { %v6148_v47 = vadd.f32 %v6136_v39, %v10700_v19  ;;  %v7209_v39 = vor.u32 %v7381_v4, %v7208_v33 }
0x180e   :  { %6161 = vadd.xlane.f32.xlu0 %v6148_v47 }
0x181a   :  { %v6152_v45 = vpop.xlane.xlu1 %6151 }
0x181b   :  { %v6167_v7 = vmul.f32 %v6152_v45, %v8955_v50 }
0x181d   :  { %v10788_v63 = vsub.f32 %v6143_v17, %v6167_v7  ;;  %v7200_v7 = vld [vmem:[%s11051_s2 + $0x5c] sm:$0xf] }
0x181f   :  { %v6183_v10 = vmul.f32 %v10788_v63, %v10788_v63 }
0x1821   :  { %6191 = vadd.xlane.f32.xlu1 %v6183_v10  ;;  %v7379_v10 = vld [vmem:[%s11051_s2 + $0x6c] sm:$0xf0] }
0x1822   :  { %v6154_v6 = vpop.xlane.xlu2 %6153 }
0x1823   :  { %v6168_v31 = vmul.f32 %v6154_v6, %v8955_v50  ;;  %v7378_v6 = vld [vmem:[%s11051_s2 + $0x60] sm:$0xf] }
0x1825   :  { %v10793_v3 = vsub.f32 %v6144_v26, %v6168_v31  ;;  %v7388_v26 = vld [vmem:[%s11051_s2 + $0x128] sm:$0xf]  ;;  %v7201_v31 = vor.u32 %v7379_v10, %v7200_v7 }
0x1826   :  { %v7245_v49 = vor.u32 %v7388_v26, %v7242_v51 }
0x1827   :  { %v6184_v27 = vmul.f32 %v10793_v3, %v10793_v3 }
0x1828   :  { %6461 = vmatpush.bf16.msrb.mxu3 %v7245_v49 }
0x1829   :  { %6193 = vadd.xlane.f32.xlu2 %v6184_v27  ;;  %v7202_v27 = vld [vmem:[%s11051_s2 + $0x70] sm:$0xf0] }
0x182c   :  { %6462 = vmatpush.bf16.msrb.mxu3 %v7237_v14 }
0x1830   :  { %6463 = vmatpush.bf16.msrb.mxu3 %v7229_v54  ;;  %v10930_v54 = vld [vmem:[%s11052_s5 + $0x2] ss:$0 sm:$0xff] }
0x1837   :  { %v6109_v19 = vpop.f32.mrf.mxu0  ;;  %v6138_v13 = vpop.f32.mrf.mxu1 }
0x1838   :  { %v6110_v2 = vadd.f32 %v10769_v18, %v6109_v19  ;;  %v7205_v19 = vor.u32 %v7378_v6, %v7202_v27 }
0x183a   :  { %v6139_v34 = vadd.f32 %v6138_v13, %v6110_v2  ;;  %v7192_v13 = vld [vmem:[%s11051_s2 + $0x34] sm:$0xf]  ;;  %v7377_v2 = vld [vmem:[%s11051_s2 + $0x44] sm:$0xf0] }
0x183c   :  { %v10799_v40 = vadd.f32 %v6139_v34, %v10751_v36  ;;  %v7376_v34 = vld [vmem:[%s11051_s2 + $0x38] sm:$0xf] }
0x183e   :  { %6163 = vadd.xlane.f32.xlu0 %v10799_v40 }
0x183f   :  { %v6111_v8 = vpop.f32.mrf.mxu0  ;;  %v6140_v9 = vpop.f32.mrf.mxu1 }
0x1840   :  { %v6112_v56 = vadd.f32 %v10769_v18, %v6111_v8 }
0x1842   :  { %v6141_v29 = vadd.f32 %v6140_v9, %v6112_v56  ;;  %v7193_v56 = vor.u32 %v7377_v2, %v7192_v13  ;;  %v7194_v9 = vld [vmem:[%s11051_s2 + $0x48] sm:$0xf0] }
0x1844   :  { %v10804_v48 = vadd.f32 %v6141_v29, %v10754_v11 }
0x1846   :  { %6165 = vadd.xlane.f32.xlu1 %v10804_v48 }
0x1869   :  { %v6156_v59 = vpop.xlane.xlu0 %6155 }
0x186a   :  { %v6169_v41 = vmul.f32 %v6156_v59, %v8955_v50  ;;  %v7197_v59 = vor.u32 %v7376_v34, %v7194_v9 }
0x186c   :  { %v10808_v17 = vsub.f32 %v6145_v35, %v6169_v41 }
0x186e   :  { %v6185_v36 = vmul.f32 %v10808_v17, %v10808_v17 }
0x1870   :  { %6195 = vadd.xlane.f32.xlu2 %v6185_v36  ;;  %v7184_v36 = vld [vmem:[%s11051_s2 + $0xc] sm:$0xf] }
0x1871   :  { %v6158_v53 = vpop.xlane.xlu1 %6157 }
0x1872   :  { %v6170_v23 = vmul.f32 %v6158_v53, %v8955_v50  ;;  %v7375_v53 = vld [vmem:[%s11051_s2 + $0x1c] sm:$0xf0] }
0x1874   :  { %v10813_v18 = vsub.f32 %v6146_v32, %v6170_v23  ;;  %v7216_v32 = vld [vmem:[%s11051_s2 + $0xac] sm:$0xf]  ;;  %v7185_v23 = vor.u32 %v7375_v53, %v7184_v36 }
0x1875   :  { %v7217_v42 = vor.u32 %v7383_v61, %v7216_v32 }
0x1876   :  { %v6186_v11 = vmul.f32 %v10813_v18, %v10813_v18 }
0x1877   :  { %6435 = vmatpush.bf16.msrb.mxu2 %v7217_v42  ;;  %v10943_v42 = vld [vmem:[%s11052_s5 + $0x3] ss:$0 sm:$0xff] }
0x1878   :  { %6197 = vadd.xlane.f32.xlu0 %v6186_v11  ;;  %v7374_v11 = vld [vmem:[%s11051_s2 + $0x10] sm:$0xf] }
0x1879   :  { %v6160_v58 = vpop.xlane.xlu2 %6159 }
0x187a   :  { %v6171_v25 = vmul.f32 %v6160_v58, %v8955_v50  ;;  %v7186_v58 = vld [vmem:[%s11051_s2 + $0x20] sm:$0xf0] }
0x187b   :  { %6436 = vmatpush.bf16.msrb.mxu2 %v7209_v39 }
0x187c   :  { %v10827_v52 = vsub.f32 %v6147_v28, %v6171_v25  ;;  %v7221_v28 = vor.u32 %v7382_v24, %v7218_v5  ;;  %v7189_v25 = vor.u32 %v7374_v11, %v7186_v58 }
0x187e   :  { %v6187_v43 = vmul.f32 %v10827_v52, %v10827_v52  ;;  %6464 = vmatpush.bf16.msrb.mxu3 %v7221_v28 }
0x187f   :  { %6437 = vmatpush.bf16.msrb.mxu2 %v7201_v31 }
0x1880   :  { %6199 = vadd.xlane.f32.xlu1 %v6187_v43 }
0x1881   :  { %v6162_v1 = vpop.xlane.xlu0 %6161 }
0x1882   :  { %v6172_v46 = vmul.f32 %v6162_v1, %v8955_v50 }
0x1883   :  { %6438 = vmatpush.bf16.msrb.mxu2 %v7193_v56 }
0x1884   :  { %v10856_v35 = vsub.f32 %v6148_v47, %v6172_v46  ;;  %v7210_v47 = vld [vmem:[%s11051_s2 + $0x98] sm:$0xf0] }
0x1885   :  { %v7213_v45 = vor.u32 %v7380_v22, %v7210_v47 }
0x1886   :  { %v6188_v55 = vmul.f32 %v10856_v35, %v10856_v35 }
0x1887   :  { %6465 = vmatpush.bf16.msrb.mxu3 %v7213_v45  ;;  %6439 = vmatpush.bf16.msrb.mxu2 %v7185_v23 }
0x1888   :  { %6201 = vadd.xlane.f32.xlu2 %v6188_v55 }
0x188b   :  { %6466 = vmatpush.bf16.msrb.mxu3 %v7205_v19 }
0x188f   :  { %6467 = vmatpush.bf16.msrb.mxu3 %v7197_v59 }
0x1893   :  { %6468 = vmatpush.bf16.msrb.mxu3 %v7189_v25 }
0x1894   :  { %v6192_v8 = vpop.xlane.xlu1 %6191 }
0x1895   :  { %v6207_v29 = vmul.f32 %v6192_v8, %v8955_v50 }
0x1897   :  { %v6215_v41 = vadd.f32 1e-05, %v6207_v29 }
0x1899   :  { %7714 = vrsqrt.f32 %v6215_v41  ;;  %vm6229_vm6 = vweird.f32 %v6215_v41 }
0x189c   :  { %v6194_v38 = vpop.xlane.xlu2 %6193 }
0x189d   :  { %v6208_v15 = vmul.f32 %v6194_v38, %v8955_v50 }
0x189f   :  { %v7715_v26 = vpop.eup %7714  ;;  %v6216_v21 = vadd.f32 1e-05, %v6208_v15 }
0x18a0   :  { %v6224_v51 = vmul.f32 %v7715_v26, %v6215_v41  ;;  %vm6230_vm5 = vweird.f32 %v7715_v26 }
0x18a1   :  { %7716 = vrsqrt.f32 %v6216_v21  ;;  %vm6231_vm7 = vmor %vm6229_vm6, %vm6230_vm5  ;;  %vm6239_vm9 = vweird.f32 %v6216_v21 }
0x18a2   :  { %v6225_v49 = vmul.f32 %v7715_v26, %v6224_v51 }
0x18a4   :  { %v6226_v43 = vmul.f32 0.5, %v6225_v49 }
0x18a6   :  { %v6227_v44 = vsub.f32 1.5, %v6226_v43 }
0x18a7   :  { %v7717_v57 = vpop.eup %7716 }
0x18a8   :  { %v6228_v20 = vmul.f32 %v7715_v26, %v6227_v44  ;;  %v6234_v12 = vmul.f32 %v7717_v57, %v6216_v21  ;;  %vm6240_vm8 = vweird.f32 %v7717_v57 }
0x18a9   :  { %vm6241_vm10 = vmor %vm6239_vm9, %vm6240_vm8 }
0x18aa   :  { %v6235_v30 = vmul.f32 %v7717_v57, %v6234_v12  ;;  %v6232_v1 = vsel %vm6231_vm7, %v7715_v26, %v6228_v20 }
0x18ab   :  { %v6303_v62 = vmul.f32 %v6232_v1, %v10788_v63 }
0x18ac   :  { %v6236_v14 = vmul.f32 0.5, %v6235_v30 }
0x18ad   :  { %v6311_v55 = vmul.f32 %v10930_v54, %v6303_v62 }
0x18ae   :  { %v6237_v46 = vsub.f32 1.5, %v6236_v14 }
0x18af   :  { %v6319_v5 = vadd.f32 %v10943_v42, %v6311_v55 }
0x18b0   :  { %v6238_v37 = vmul.f32 %v7717_v57, %v6237_v46 }
0x18b1   :  { %v6164_v16 = vpop.xlane.xlu0 %6163 }
0x18b2   :  { %v6242_v0 = vsel %vm6241_vm10, %v7717_v57, %v6238_v37  ;;  %v6173_v60 = vmul.f32 %v6164_v16, %v8955_v50 }
0x18b3   :  { %v6304_v32 = vmul.f32 %v6242_v0, %v10793_v3 }
0x18b4   :  { %v10935_v61 = vsub.f32 %v10799_v40, %v6173_v60 }
0x18b5   :  { %v6312_v63 = vmul.f32 %v10930_v54, %v6304_v32 }
0x18b6   :  { %v6189_v24 = vmul.f32 %v10935_v61, %v10935_v61 }
0x18b7   :  { %v6320_v28 = vadd.f32 %v10943_v42, %v6312_v63 }
0x18b8   :  { %6203 = vadd.xlane.f32.xlu0 %v6189_v24 }
0x18b9   :  { %v6166_v33 = vpop.xlane.xlu1 %6165  ;;  %v6327_v3 = vpack.c.bf16 %v6320_v28, %v6319_v5 }
0x18ba   :  { %v6174_v40 = vmul.f32 %v6166_v33, %v8955_v50 }
0x18bb   :  { %6440 = vmatmul.bf16.vlgmr.msrb.gmra.mxu2 %v6327_v3  ;;  %6469 = vmatmul.bf16.vlgmr.msrb.gmra.mxu3 %v6327_v3 }
0x18bc   :  { %v10949_v4 = vsub.f32 %v10804_v48, %v6174_v40 }
0x18be   :  { %v6190_v22 = vmul.f32 %v10949_v4, %v10949_v4 }
0x18c0   :  { %6205 = vadd.xlane.f32.xlu1 %v6190_v22 }
0x18e3   :  { %v6196_v39 = vpop.xlane.xlu2 %6195 }
0x18e4   :  { %v6209_v47 = vmul.f32 %v6196_v39, %v8955_v50 }
0x18e6   :  { %v6217_v45 = vadd.f32 1e-05, %v6209_v47 }
0x18e8   :  { %7718 = vrsqrt.f32 %v6217_v45  ;;  %vm6249_vm12 = vweird.f32 %v6217_v45 }
0x18eb   :  { %v6198_v7 = vpop.xlane.xlu0 %6197 }
0x18ec   :  { %v6210_v10 = vmul.f32 %v6198_v7, %v8955_v50  ;;  %v28_v7 = vld [vmem:[%s11049_s4 + $0x7] sm:$0x3] }
0x18ee   :  { %v7719_v6 = vpop.eup %7718  ;;  %v6218_v31 = vadd.f32 1e-05, %v6210_v10 }
0x18ef   :  { %v6244_v27 = vmul.f32 %v7719_v6, %v6217_v45  ;;  %vm6250_vm11 = vweird.f32 %v7719_v6 }
0x18f0   :  { %7720 = vrsqrt.f32 %v6218_v31  ;;  %vm6251_vm0 = vmor %vm6249_vm12, %vm6250_vm11  ;;  %vm6259_vm2 = vweird.f32 %v6218_v31 }
0x18f1   :  { %v6245_v19 = vmul.f32 %v7719_v6, %v6244_v27  ;;  %v10976_v27 = vperm.slane %v28_v7, 1 }
0x18f3   :  { %v6246_v13 = vmul.f32 0.5, %v6245_v19  ;;  %v6200_v48 = vpop.xlane.xlu1 %6199 }
0x18f4   :  { %v6211_v2 = vmul.f32 %v6200_v48, %v8955_v50 }
0x18f5   :  { %v6247_v34 = vsub.f32 1.5, %v6246_v13 }
0x18f6   :  { %v7721_v8 = vpop.eup %7720  ;;  %v6219_v56 = vadd.f32 1e-05, %v6211_v2 }
0x18f7   :  { %v6248_v9 = vmul.f32 %v7719_v6, %v6247_v34  ;;  %v6254_v29 = vmul.f32 %v7721_v8, %v6218_v31  ;;  %vm6260_vm1 = vweird.f32 %v7721_v8  ;;  %v10974_v31 = vperm.slane %v28_v7, 0 }
0x18f8   :  { %7722 = vrsqrt.f32 %v6219_v56  ;;  %vm6261_vm13 = vmor %vm6259_vm2, %vm6260_vm1  ;;  %vm6269_vm15 = vweird.f32 %v6219_v56 }
0x18f9   :  { %v6255_v59 = vmul.f32 %v7721_v8, %v6254_v29  ;;  %v6252_v41 = vsel %vm6251_vm0, %v7719_v6, %v6248_v9 }
0x18fa   :  { %v6305_v25 = vmul.f32 %v6252_v41, %v10808_v17 }
0x18fb   :  { %v6256_v36 = vmul.f32 0.5, %v6255_v59  ;;  %v6202_v53 = vpop.xlane.xlu2 %6201 }
0x18fc   :  { %v6212_v23 = vmul.f32 %v6202_v53, %v8955_v50  ;;  %v6313_v43 = vmul.f32 %v10930_v54, %v6305_v25 }
0x18fd   :  { %v6257_v11 = vsub.f32 1.5, %v6256_v36 }
0x18fe   :  { %v7723_v58 = vpop.eup %7722  ;;  %v6220_v38 = vadd.f32 1e-05, %v6212_v23  ;;  %v6321_v30 = vadd.f32 %v10943_v42, %v6313_v43 }
0x18ff   :  { %v6258_v15 = vmul.f32 %v7721_v8, %v6257_v11  ;;  %v6264_v26 = vmul.f32 %v7723_v58, %v6219_v56  ;;  %vm6270_vm14 = vweird.f32 %v7723_v58 }
0x1900   :  { %7724 = vrsqrt.f32 %v6220_v38  ;;  %vm6271_vm3 = vmor %vm6269_vm15, %vm6270_vm14  ;;  %vm6279_vm5 = vweird.f32 %v6220_v38 }
0x1901   :  { %v6262_v21 = vsel %vm6261_vm13, %v7721_v8, %v6258_v15  ;;  %v6265_v51 = vmul.f32 %v7723_v58, %v6264_v26 }
0x1902   :  { %v6306_v49 = vmul.f32 %v6262_v21, %v10813_v18 }
0x1903   :  { %v6266_v44 = vmul.f32 0.5, %v6265_v51 }
0x1904   :  { %v6314_v57 = vmul.f32 %v10930_v54, %v6306_v49 }
0x1905   :  { %v6267_v20 = vsub.f32 1.5, %v6266_v44 }
0x1906   :  { %v7725_v12 = vpop.eup %7724  ;;  %v6322_v17 = vadd.f32 %v10943_v42, %v6314_v57 }
0x1907   :  { %v6268_v1 = vmul.f32 %v7723_v58, %v6267_v20  ;;  %v6274_v14 = vmul.f32 %v7725_v12, %v6220_v38  ;;  %vm6280_vm4 = vweird.f32 %v7725_v12 }
0x1908   :  { %v6328_v46 = vpack.c.bf16 %v6322_v17, %v6321_v30  ;;  %vm6281_vm6 = vmor %vm6279_vm5, %vm6280_vm4 }
0x1909   :  { %v6275_v62 = vmul.f32 %v7725_v12, %v6274_v14  ;;  %v6272_v18 = vsel %vm6271_vm3, %v7723_v58, %v6268_v1 }
0x190a   :  { %6445 = vmatmul.bf16.gmra.mxu2 %v6328_v46  ;;  %6474 = vmatmul.bf16.gmra.mxu3 %v6328_v46  ;;  %v6307_v0 = vmul.f32 %v6272_v18, %v10827_v52 }
0x190b   :  { %v6276_v37 = vmul.f32 0.5, %v6275_v62 }
0x190c   :  { %v6315_v63 = vmul.f32 %v10930_v54, %v6307_v0 }
0x190d   :  { %v6277_v16 = vsub.f32 1.5, %v6276_v37 }
0x190e   :  { %v6323_v5 = vadd.f32 %v10943_v42, %v6315_v63 }
0x190f   :  { %v6278_v60 = vmul.f32 %v7725_v12, %v6277_v16 }
0x1911   :  { %v6282_v55 = vsel %vm6281_vm6, %v7725_v12, %v6278_v60 }
0x1912   :  { %v6308_v32 = vmul.f32 %v6282_v55, %v10856_v35 }
0x1914   :  { %v6316_v24 = vmul.f32 %v10930_v54, %v6308_v32 }
0x1916   :  { %v6324_v28 = vadd.f32 %v10943_v42, %v6316_v24 }
0x1918   :  { %v6329_v33 = vpack.c.bf16 %v6324_v28, %v6323_v5 }
0x191a   :  { %6450 = vmatmul.bf16.gmra.mxu2 %v6329_v33  ;;  %6479 = vmatmul.bf16.gmra.mxu3 %v6329_v33 }
0x192b   :  { %v6204_v3 = vpop.xlane.xlu0 %6203 }
0x192c   :  { %v6213_v52 = vmul.f32 %v6204_v3, %v8955_v50 }
0x192e   :  { %v6221_v40 = vadd.f32 1e-05, %v6213_v52 }
0x1930   :  { %7726 = vrsqrt.f32 %v6221_v40  ;;  %vm6289_vm8 = vweird.f32 %v6221_v40 }
0x1933   :  { %v6206_v22 = vpop.xlane.xlu1 %6205 }
0x1934   :  { %v6214_v39 = vmul.f32 %v6206_v22, %v8955_v50 }
0x1936   :  { %v7727_v35 = vpop.eup %7726  ;;  %v6222_v47 = vadd.f32 1e-05, %v6214_v39 }
0x1937   :  { %v6284_v45 = vmul.f32 %v7727_v35, %v6221_v40  ;;  %vm6290_vm7 = vweird.f32 %v7727_v35 }
0x1938   :  { %7728 = vrsqrt.f32 %v6222_v47  ;;  %vm6291_vm9 = vmor %vm6289_vm8, %vm6290_vm7  ;;  %vm6299_vm11 = vweird.f32 %v6222_v47 }
0x1939   :  { %v6285_v10 = vmul.f32 %v7727_v35, %v6284_v45 }
0x193b   :  { %v6286_v6 = vmul.f32 0.5, %v6285_v10 }
0x193d   :  { %v6287_v19 = vsub.f32 1.5, %v6286_v6 }
0x193e   :  { %v7729_v13 = vpop.eup %7728  ;;  %v6441_v48 = vpop.f32.mrf.mxu2 }
0x193f   :  { %v6470_v2 = vpop.f32.mrf.mxu3  ;;  %v6288_v34 = vmul.f32 %v7727_v35, %v6287_v19  ;;  %v6294_v50 = vmul.f32 %v7729_v13, %v6222_v47  ;;  %v6442_v8 = vadd.f32 %v6441_v48, %v10974_v31  ;;  %vm6300_vm10 = vweird.f32 %v7729_v13 }
0x1940   :  { %v6471_v56 = vadd.f32 %v6470_v2, %v10976_v27  ;;  %vm6301_vm12 = vmor %vm6299_vm11, %vm6300_vm10 }
0x1941   :  { %v6295_v9 = vmul.f32 %v7729_v13, %v6294_v50  ;;  %6490 = vst [vmem:[%s11054_s6] sm:$0xff] %v6442_v8  ;;  %v6292_v29 = vsel %vm6291_vm9, %v7727_v35, %v6288_v34 }
0x1942   :  { %6491 = vst [vmem:[%s11054_s6 + $0x8] sm:$0xff] %v6471_v56  ;;  %v6309_v36 = vmul.f32 %v6292_v29, %v10935_v61 }
0x1943   :  { %v6296_v59 = vmul.f32 0.5, %v6295_v9 }
0x1944   :  { %v6317_v61 = vmul.f32 %v10930_v54, %v6309_v36 }
0x1945   :  { %v6297_v41 = vsub.f32 1.5, %v6296_v59 }
0x1946   :  { %v6443_v53 = vpop.f32.mrf.mxu2  ;;  %v6325_v21 = vadd.f32 %v10943_v42, %v6317_v61 }
0x1947   :  { %v6472_v23 = vpop.f32.mrf.mxu3  ;;  %v6298_v11 = vmul.f32 %v7729_v13, %v6297_v41  ;;  %v6444_v58 = vadd.f32 %v6443_v53, %v10974_v31 }
0x1948   :  { %v6473_v25 = vadd.f32 %v6472_v23, %v10976_v27 }
0x1949   :  { %v6302_v38 = vsel %vm6301_vm12, %v7729_v13, %v6298_v11  ;;  %6492 = vst [vmem:[%s11054_s6 + $0x10] sm:$0xff] %v6444_v58 }
0x194a   :  { %v6310_v15 = vmul.f32 %v6302_v38, %v10949_v4  ;;  %6493 = vst [vmem:[%s11054_s6 + $0x18] sm:$0xff] %v6473_v25 }
0x194c   :  { %v6318_v26 = vmul.f32 %v10930_v54, %v6310_v15 }
0x194e   :  { %v6326_v51 = vadd.f32 %v10943_v42, %v6318_v26 }
0x1950   :  { %v6330_v49 = vpack.c.bf16 %v6326_v51, %v6325_v21 }
0x1952   :  { %6455 = vmatmul.bf16.gmra.mxu2 %v6330_v49  ;;  %6484 = vmatmul.bf16.gmra.mxu3 %v6330_v49 }
0x198d   :  { %v6446_v43 = vpop.f32.mrf.mxu2  ;;  %v6475_v44 = vpop.f32.mrf.mxu3 }
0x198e   :  { %v6447_v57 = vadd.f32 %v6446_v43, %v10974_v31  ;;  %v6476_v4 = vadd.f32 %v6475_v44, %v10976_v27 }
0x1990   :  { %6494 = vst [vmem:[%s11054_s6 + $0x20] sm:$0xff] %v6447_v57 }
0x1991   :  { %6495 = vst [vmem:[%s11054_s6 + $0x28] sm:$0xff] %v6476_v4 }
0x1995   :  { %v6448_v54 = vpop.f32.mrf.mxu2  ;;  %v6477_v20 = vpop.f32.mrf.mxu3 }
0x1996   :  { %v6449_v42 = vadd.f32 %v6448_v54, %v10974_v31  ;;  %v6478_v12 = vadd.f32 %v6477_v20, %v10976_v27 }
0x1998   :  { %6496 = vst [vmem:[%s11054_s6 + $0x30] sm:$0xff] %v6449_v42 }
0x1999   :  { %6497 = vst [vmem:[%s11054_s6 + $0x38] sm:$0xff] %v6478_v12 }
0x199d   :  { %v6451_v30 = vpop.f32.mrf.mxu2  ;;  %v6480_v17 = vpop.f32.mrf.mxu3 }
0x199e   :  { %v6452_v1 = vadd.f32 %v6451_v30, %v10974_v31  ;;  %v6481_v14 = vadd.f32 %v6480_v17, %v10976_v27 }
0x19a0   :  { %6498 = vst [vmem:[%s11054_s6 + $0x40] sm:$0xff] %v6452_v1 }
0x19a1   :  { %6499 = vst [vmem:[%s11054_s6 + $0x48] sm:$0xff] %v6481_v14 }
0x19a5   :  { %v6453_v46 = vpop.f32.mrf.mxu2  ;;  %v6482_v62 = vpop.f32.mrf.mxu3 }
0x19a6   :  { %v6454_v18 = vadd.f32 %v6453_v46, %v10974_v31  ;;  %v6483_v37 = vadd.f32 %v6482_v62, %v10976_v27 }
0x19a8   :  { %6500 = vst [vmem:[%s11054_s6 + $0x50] sm:$0xff] %v6454_v18 }
0x19a9   :  { %6501 = vst [vmem:[%s11054_s6 + $0x58] sm:$0xff] %v6483_v37 }
0x19d5   :  { %v6456_v16 = vpop.f32.mrf.mxu2  ;;  %v6485_v0 = vpop.f32.mrf.mxu3 }
0x19d6   :  { %v6457_v60 = vadd.f32 %v6456_v16, %v10974_v31  ;;  %v6486_v55 = vadd.f32 %v6485_v0, %v10976_v27 }
0x19d8   :  { %6502 = vst [vmem:[%s11054_s6 + $0x60] sm:$0xff] %v6457_v60 }
0x19d9   :  { %6503 = vst [vmem:[%s11054_s6 + $0x68] sm:$0xff] %v6486_v55 }
0x19dd   :  { %v6458_v32 = vpop.f32.mrf.mxu2  ;;  %v6487_v63 = vpop.f32.mrf.mxu3 }
0x19de   :  { %v6459_v24 = vadd.f32 %v6458_v32, %v10974_v31  ;;  %v6488_v5 = vadd.f32 %v6487_v63, %v10976_v27 }
0x19e0   :  { %6504 = vst [vmem:[%s11054_s6 + $0x70] sm:$0xff] %v6459_v24 }
0x19e1   :  { %6505 = vst [vmem:[%s11054_s6 + $0x78] sm:$0xff] %v6488_v5 }

</bundles_post_ra>
